<compile_context>
chip_gen: v7x
topology: tpu7x:2x2x1
jax: 0.10.0
libtpu: 0.0.40
codegen_flags: <defaults>
</compile_context>

<pallas_src>
import numpy as np
import jax
import jax.numpy as jnp
from jax import lax
from jax.experimental import pallas as pl
from jax.experimental.pallas import tpu as pltpu

INPUT_SIZE = 7        # len(features)
HIDDEN = 32           # small stand-in for the module's hidden_size=100
                      # TODO(synk): for the real hidden_size=100, pad H to 128 (lane-dense).
NUM_LAYERS = 8
OUTPUT_SIZE = 7
B_PAD = 8             # pad batch to a sublane multiple
FC_PAD = 128          # pad fc output to a full lane width


def lstm_wavefront_kernel(x_ref, w_ih0_ref, w_comb_ref, b_ref, w_fc_ref, b_fc_ref,
                          out_ref, gx_buf):
    """Whole stacked-LSTM forward (wavefront over layer/time diagonals).

    x_ref     : ((T+L-1)*B_PAD, H)   time-major flattened, feature-padded input;
                                     the trailing L-1 time steps are zero padding.
    w_ih0_ref : (H, L*4H)            layer-0 input weights scattered into the
                                     gate-grouped lane layout (g-quarter prescaled by 2)
    w_comb_ref: (L*H, L*4H)          block-bidiagonal combined W_hh (diag) + W_ih (super-diag)
    b_ref     : (1, L*4H)            all biases (b_ih + b_hh), gate-grouped, g prescaled
    w_fc_ref  : (L*H, FC_PAD)        fc weights, zero outside the last layer's rows
    b_fc_ref  : (1, FC_PAD)
    out_ref   : (B_PAD, FC_PAD)
    gx_buf    : ((T+L-1)*B_PAD, L*4H) scratch: hoisted layer-0 projection + bias
    """
    H, L = HIDDEN, NUM_LAYERS
    LH = L * H
    D = x_ref.shape[0] // B_PAD          # number of wavefront diagonals = T + L - 1
    T = D - (L - 1)

    # Hoisted input projection + bias for the whole (padded) sequence: one matmul,
    # entirely off the recurrent critical path.  Padded tail rows reduce to bias.
    gx_buf[...] = (jnp.dot(x_ref[...], w_ih0_ref[...],
                           preferred_element_type=jnp.float32) + b_ref[...])

    w_comb = w_comb_ref[...]             # (LH, 4*LH); streamed from VMEM by the MXU

    # Hoisted lane-index iota for the static live-layer masks.
    lane = lax.broadcasted_iota(jnp.int32, (B_PAD, LH), 1)

    h_all = jnp.zeros((B_PAD, LH), jnp.float32)   # h of all 8 layers, packed by layer
    c_all = jnp.zeros((B_PAD, LH), jnp.float32)

    for d in range(D):                   # static unrolled wavefront loop (15 diagonals)
        # TODO(synk): for long real sequences use lax.fori_loop(unroll=4..8) with a
        # dynamic live mask instead of a fully unrolled static loop.
        gates = (jnp.dot(h_all, w_comb, preferred_element_type=jnp.float32)
                 + gx_buf[pl.ds(d * B_PAD, B_PAD), :])          # (B_PAD, 4*LH)
        # Single sigmoid over the whole gates slab; tanh via 2*sigmoid(2x)-1
        # (g-gate columns were prescaled by 2 at pack time).
        sig = jax.nn.sigmoid(gates)
        i_all = sig[:, 0 * LH:1 * LH]
        f_all = sig[:, 1 * LH:2 * LH]
        g_all = 2.0 * sig[:, 2 * LH:3 * LH] - 1.0
        o_all = sig[:, 3 * LH:4 * LH]
        c_new = f_all * c_all + i_all * g_all
        h_new = o_all * jnp.tanh(c_new)

        # Freeze layers that have not started (l > d) or already finished (d - l >= T);
        # a finished layer's h must stay at its t = T-1 value (it feeds the layer above
        # and, for the last layer, the fc head).  Live range is static per diagonal.
        lo = max(0, d - T + 1)
        hi = min(d, L - 1)
        if lo == 0 and hi == L - 1:
            c_all, h_all = c_new, h_new
        else:
            live = (lane >= lo * H) & (lane < (hi + 1) * H)
            c_all = jnp.where(live, c_new, c_all)
            h_all = jnp.where(live, h_new, h_all)

    # fc on the last layer's final hidden state; w_fc is zero outside that layer's
    # rows so the full-width matmul needs no lane extraction.  Lane-dense store.
    out_ref[...] = (jnp.dot(h_all, w_fc_ref[...],
                            preferred_element_type=jnp.float32) + b_fc_ref[...])


def make_raw_params(key):
    """Raw torch-layout params, U(-1/sqrt(H), 1/sqrt(H)) like nn.LSTM / nn.Linear."""
    H, I, L, O = HIDDEN, INPUT_SIZE, NUM_LAYERS, OUTPUT_SIZE
    bound = 1.0 / (H ** 0.5)
    keys = jax.random.split(key, 4 * L + 2)
    layers = []
    k = 0
    for layer in range(L):
        in_dim = I if layer == 0 else H
        w_ih = jax.random.uniform(keys[k], (4 * H, in_dim), minval=-bound, maxval=bound); k += 1
        w_hh = jax.random.uniform(keys[k], (4 * H, H), minval=-bound, maxval=bound); k += 1
        b_ih = jax.random.uniform(keys[k], (4 * H,), minval=-bound, maxval=bound); k += 1
        b_hh = jax.random.uniform(keys[k], (4 * H,), minval=-bound, maxval=bound); k += 1
        layers.append((w_ih, w_hh, b_ih, b_hh))
    w_fc = jax.random.uniform(keys[k], (O, H), minval=-bound, maxval=bound); k += 1
    b_fc = jax.random.uniform(keys[k], (O,), minval=-bound, maxval=bound)
    return layers, w_fc, b_fc


def pack_params(raw):
    """Pack raw params into the wavefront / gate-grouped kernel layout."""
    layers, w_fc, b_fc = raw
    H, I, L, O = HIDDEN, INPUT_SIZE, NUM_LAYERS, OUTPUT_SIZE
    LH, G = L * H, 4 * L * H
    w_ih0 = np.zeros((H, G), np.float32)     # x -> layer-0 gates (scattered)
    w_comb = np.zeros((LH, G), np.float32)   # h_l -> layer l gates (W_hh) and layer l+1 gates (W_ih)
    b_all = np.zeros((1, G), np.float32)
    for l, (w_ih, w_hh, b_ih, b_hh) in enumerate(layers):
        w_ih = np.asarray(w_ih, np.float32)
        w_hh = np.asarray(w_hh, np.float32)
        bias = np.asarray(b_ih, np.float32) + np.asarray(b_hh, np.float32)
        for g in range(4):                   # torch gate order [i, f, g, o]
            col = g * LH + l * H
            w_comb[l * H:(l + 1) * H, col:col + H] = w_hh[g * H:(g + 1) * H, :].T
            b_all[0, col:col + H] = bias[g * H:(g + 1) * H]
            w_ih_g = w_ih[g * H:(g + 1) * H, :].T          # (in_dim, H)
            if l == 0:
                w_ih0[:I, col:col + H] = w_ih_g            # features zero-padded to H
            else:
                w_comb[(l - 1) * H:l * H, col:col + H] = w_ih_g
    # tanh(x) = 2*sigmoid(2x) - 1: prescale g-gate columns by 2 so the kernel only
    # needs one sigmoid over the full gates slab.
    w_ih0[:, 2 * LH:3 * LH] *= 2.0
    w_comb[:, 2 * LH:3 * LH] *= 2.0
    b_all[:, 2 * LH:3 * LH] *= 2.0
    # fc padded to (LH, FC_PAD): only the last layer's rows are nonzero.
    w_fc_p = np.zeros((LH, FC_PAD), np.float32)
    w_fc_p[(L - 1) * H:, :O] = np.asarray(w_fc, np.float32).T
    b_fc_p = np.zeros((1, FC_PAD), np.float32)
    b_fc_p[0, :O] = np.asarray(b_fc, np.float32)
    return (jnp.asarray(w_ih0), jnp.asarray(w_comb), jnp.asarray(b_all),
            jnp.asarray(w_fc_p), jnp.asarray(b_fc_p))


@jax.jit
def lstm_forward(x, kparams):
    w_ih0, w_comb, b_all, w_fc, b_fc = kparams
    B, T, I = x.shape
    L, H = NUM_LAYERS, HIDDEN
    D = T + L - 1
    LH, G = L * H, 4 * L * H
    # glue: time-major, pad batch->B_PAD and features->H, append L-1 zero time steps
    # (their hoisted projection reduces to the bias), flatten to 2-D tiles.
    x_tm = jnp.transpose(x, (1, 0, 2))
    x_pad = jnp.zeros((D, B_PAD, H), jnp.float32).at[:T, :B, :I].set(x_tm)
    x_flat = x_pad.reshape(D * B_PAD, H)

    out = pl.pallas_call(
        lstm_wavefront_kernel,
        out_shape=jax.ShapeDtypeStruct((B_PAD, FC_PAD), jnp.float32),
        grid=(1,),
        # TODO(synk): for batch > B_PAD add a parallel batch grid axis (uses both
        # v7x TensorCores); at B=2 a single tile is correct and sufficient.
        in_specs=[
            pl.BlockSpec((D * B_PAD, H), lambda i: (0, 0)),
            pl.BlockSpec((H, G), lambda i: (0, 0)),
            pl.BlockSpec((LH, G), lambda i: (0, 0)),
            pl.BlockSpec((1, G), lambda i: (0, 0)),
            pl.BlockSpec((LH, FC_PAD), lambda i: (0, 0)),
            pl.BlockSpec((1, FC_PAD), lambda i: (0, 0)),
        ],
        out_specs=pl.BlockSpec((B_PAD, FC_PAD), lambda i: (0, 0)),
        scratch_shapes=[
            pltpu.VMEM((D * B_PAD, G), jnp.float32),   # gx_buf (~480 KiB at toy sizes)
        ],
        compiler_params=pltpu.CompilerParams(
            dimension_semantics=("arbitrary",),
            # Tiny at these toy sizes; explicit guard when scaling T / hidden
            # (re-derive for v7x's 64 MiB physical VMEM; tile gx over time there).
            vmem_limit_bytes=32 * 1024 * 1024,
        ),
    )(x_flat, w_ih0, w_comb, b_all, w_fc, b_fc)
    return out[:B, :OUTPUT_SIZE]


def lstm_ref(x, raw):
    """Pure-JAX reference with torch.nn.LSTM semantics on the RAW params."""
    layers, w_fc, b_fc = raw
    B, T, I = x.shape
    H = HIDDEN
    inp = x
    h = jnp.zeros((B, H), jnp.float32)
    for (w_ih, w_hh, b_ih, b_hh) in layers:
        h = jnp.zeros((B, H), jnp.float32)
        c = jnp.zeros((B, H), jnp.float32)
        outs = []
        for t in range(T):
            gates = inp[:, t, :] @ w_ih.T + h @ w_hh.T + b_ih + b_hh
            i_g = jax.nn.sigmoid(gates[:, :H])
            f_g = jax.nn.sigmoid(gates[:, H:2 * H])
            g_g = jnp.tanh(gates[:, 2 * H:3 * H])
            o_g = jax.nn.sigmoid(gates[:, 3 * H:])
            c = f_g * c + i_g * g_g
            h = o_g * jnp.tanh(c)
            outs.append(h)
        inp = jnp.stack(outs, axis=1)
    return h @ w_fc.T + b_fc


if __name__ == "__main__":
    key = jax.random.PRNGKey(0)
    pkey, xkey = jax.random.split(key)
    raw = make_raw_params(pkey)
    kparams = pack_params(raw)
    x = jax.random.normal(xkey, (2, 8, INPUT_SIZE), dtype=jnp.float32)  # (B, T, I)

    out = jax.block_until_ready(lstm_forward(x, kparams))

    ref = lstm_ref(x, raw)
    assert out.shape == (2, OUTPUT_SIZE), out.shape
    assert jnp.allclose(out, ref, atol=2e-3, rtol=2e-3), (out, ref)
    print("KERNEL_OK")
</pallas_src>

<mosaic_0001>
module attributes {stable_mosaic.version = 11 : i64} {
  func.func @lstm_wavefront_kernel(%arg0: i32, %arg1: memref<120x32xf32, #tpu.memory_space<vmem>>, %arg2: memref<32x1024xf32, #tpu.memory_space<vmem>>, %arg3: memref<256x1024xf32, #tpu.memory_space<vmem>>, %arg4: memref<1x1024xf32, #tpu.memory_space<vmem>>, %arg5: memref<256x128xf32, #tpu.memory_space<vmem>>, %arg6: memref<1x128xf32, #tpu.memory_space<vmem>>, %arg7: memref<8x128xf32, #tpu.memory_space<vmem>>, %arg8: memref<120x1024xf32, #tpu.memory_space<vmem>>) attributes {dimension_semantics = [#tpu.dimension_semantics<arbitrary>], iteration_bounds = array<i64: 1>, scalar_prefetch = 0 : i64, scratch_operands = 1 : i64, tpu.core_type = #tpu.core_type<tc>, window_params = [{pipeline_mode = #tpu.pipeline_mode<synchronous>, transform_indices = @transform_0, window_bounds = array<i64: 120, 32>}, {pipeline_mode = #tpu.pipeline_mode<synchronous>, transform_indices = @transform_1, window_bounds = array<i64: 32, 1024>}, {pipeline_mode = #tpu.pipeline_mode<synchronous>, transform_indices = @transform_2, window_bounds = array<i64: 256, 1024>}, {pipeline_mode = #tpu.pipeline_mode<synchronous>, transform_indices = @transform_3, window_bounds = array<i64: 1, 1024>}, {pipeline_mode = #tpu.pipeline_mode<synchronous>, transform_indices = @transform_4, window_bounds = array<i64: 256, 128>}, {pipeline_mode = #tpu.pipeline_mode<synchronous>, transform_indices = @transform_5, window_bounds = array<i64: 1, 128>}, {pipeline_mode = #tpu.pipeline_mode<synchronous>, transform_indices = @transform_6, window_bounds = array<i64: 8, 128>}]} {
    %c0 = arith.constant 0 : index
    %c0_0 = arith.constant 0 : index
    %0 = vector.load %arg1[%c0, %c0_0] : memref<120x32xf32, #tpu.memory_space<vmem>>, vector<120x32xf32>
    %c0_1 = arith.constant 0 : index
    %c0_2 = arith.constant 0 : index
    %1 = vector.load %arg2[%c0_1, %c0_2] : memref<32x1024xf32, #tpu.memory_space<vmem>>, vector<32x1024xf32>
    %cst = arith.constant dense<0.000000e+00> : vector<120x1024xf32>
    %2 = tpu.matmul %0, %1, %cst {dimension_numbers = #tpu.dot_dimension_numbers<[1], [0], [0], [1], [0, 0, 1, 1], [], []>} : vector<120x32xf32>, vector<32x1024xf32>, vector<120x1024xf32> -> vector<120x1024xf32>
    %c0_3 = arith.constant 0 : index
    %c0_4 = arith.constant 0 : index
    %3 = vector.load %arg4[%c0_3, %c0_4] : memref<1x1024xf32, #tpu.memory_space<vmem>>, vector<1x1024xf32>
    %4 = vector.broadcast %3 : vector<1x1024xf32> to vector<120x1024xf32>
    %5 = arith.addf %2, %4 : vector<120x1024xf32>
    %c0_5 = arith.constant 0 : index
    %c0_6 = arith.constant 0 : index
    %6 = vector.load %arg8[%c0_5, %c0_6] : memref<120x1024xf32, #tpu.memory_space<vmem>>, vector<120x1024xf32>
    tpu.vector_store %arg8[%c0_5, %c0_6], %5 {strides = array<i32>} : memref<120x1024xf32, #tpu.memory_space<vmem>>, vector<120x1024xf32>,
    %c0_7 = arith.constant 0 : index
    %c0_8 = arith.constant 0 : index
    %7 = vector.load %arg3[%c0_7, %c0_8] : memref<256x1024xf32, #tpu.memory_space<vmem>>, vector<256x1024xf32>
    %8 = tpu.iota {dimensions = array<i32: 1>} : vector<8x256xi32>
    %cst_9 = arith.constant 0.000000e+00 : f32
    %9 = vector.broadcast %cst_9 : f32 to vector<8x256xf32>
    %cst_10 = arith.constant 0.000000e+00 : f32
    %10 = vector.broadcast %cst_10 : f32 to vector<8x256xf32>
    %cst_11 = arith.constant dense<0.000000e+00> : vector<8x1024xf32>
    %11 = tpu.matmul %9, %7, %cst_11 {dimension_numbers = #tpu.dot_dimension_numbers<[1], [0], [0], [1], [0, 0, 1, 1], [], []>} : vector<8x256xf32>, vector<256x1024xf32>, vector<8x1024xf32> -> vector<8x1024xf32>
    %c0_12 = arith.constant 0 : index
    %c0_13 = arith.constant 0 : index
    %12 = vector.load %arg8[%c0_12, %c0_13] : memref<120x1024xf32, #tpu.memory_space<vmem>>, vector<8x1024xf32>
    %13 = arith.addf %11, %12 : vector<8x1024xf32>
    %14 = arith.negf %13 : vector<8x1024xf32>
    %15 = math.exp %14 : vector<8x1024xf32>
    %cst_14 = arith.constant 1.000000e+00 : f32
    %16 = vector.broadcast %cst_14 : f32 to vector<8x1024xf32>
    %17 = arith.addf %16, %15 : vector<8x1024xf32>
    %18 = arith.divf %16, %17 : vector<8x1024xf32>
    %19 = vector.extract_strided_slice %18 {offsets = [0, 0], sizes = [8, 256], strides = [1, 1]} : vector<8x1024xf32> to vector<8x256xf32>
    %20 = vector.extract_strided_slice %18 {offsets = [0, 256], sizes = [8, 256], strides = [1, 1]} : vector<8x1024xf32> to vector<8x256xf32>
    %21 = vector.extract_strided_slice %18 {offsets = [0, 512], sizes = [8, 256], strides = [1, 1]} : vector<8x1024xf32> to vector<8x256xf32>
    %cst_15 = arith.constant 2.000000e+00 : f32
    %22 = vector.broadcast %cst_15 : f32 to vector<8x256xf32>
    %23 = arith.mulf %22, %21 : vector<8x256xf32>
    %cst_16 = arith.constant 1.000000e+00 : f32
    %24 = vector.broadcast %cst_16 : f32 to vector<8x256xf32>
    %25 = arith.subf %23, %24 : vector<8x256xf32>
    %26 = vector.extract_strided_slice %18 {offsets = [0, 768], sizes = [8, 256], strides = [1, 1]} : vector<8x1024xf32> to vector<8x256xf32>
    %27 = arith.mulf %20, %10 : vector<8x256xf32>
    %28 = arith.mulf %19, %25 : vector<8x256xf32>
    %29 = arith.addf %27, %28 : vector<8x256xf32>
    %30 = math.tanh %29 : vector<8x256xf32>
    %31 = arith.mulf %26, %30 : vector<8x256xf32>
    %c0_i32 = arith.constant 0 : i32
    %32 = vector.broadcast %c0_i32 : i32 to vector<8x256xi32>
    %33 = arith.cmpi sge, %8, %32 : vector<8x256xi32>
    %c32_i32 = arith.constant 32 : i32
    %34 = vector.broadcast %c32_i32 : i32 to vector<8x256xi32>
    %35 = arith.cmpi slt, %8, %34 : vector<8x256xi32>
    %36 = arith.andi %33, %35 : vector<8x256xi1>
    %37 = arith.select %36, %29, %10 : vector<8x256xi1>, vector<8x256xf32>
    %38 = arith.select %36, %31, %9 : vector<8x256xi1>, vector<8x256xf32>
    %cst_17 = arith.constant dense<0.000000e+00> : vector<8x1024xf32>
    %39 = tpu.matmul %38, %7, %cst_17 {dimension_numbers = #tpu.dot_dimension_numbers<[1], [0], [0], [1], [0, 0, 1, 1], [], []>} : vector<8x256xf32>, vector<256x1024xf32>, vector<8x1024xf32> -> vector<8x1024xf32>
    %c8 = arith.constant 8 : index
    %c0_18 = arith.constant 0 : index
    %40 = vector.load %arg8[%c8, %c0_18] : memref<120x1024xf32, #tpu.memory_space<vmem>>, vector<8x1024xf32>
    %41 = arith.addf %39, %40 : vector<8x1024xf32>
    %42 = arith.negf %41 : vector<8x1024xf32>
    %43 = math.exp %42 : vector<8x1024xf32>
    %cst_19 = arith.constant 1.000000e+00 : f32
    %44 = vector.broadcast %cst_19 : f32 to vector<8x1024xf32>
    %45 = arith.addf %44, %43 : vector<8x1024xf32>
    %46 = arith.divf %44, %45 : vector<8x1024xf32>
    %47 = vector.extract_strided_slice %46 {offsets = [0, 0], sizes = [8, 256], strides = [1, 1]} : vector<8x1024xf32> to vector<8x256xf32>
    %48 = vector.extract_strided_slice %46 {offsets = [0, 256], sizes = [8, 256], strides = [1, 1]} : vector<8x1024xf32> to vector<8x256xf32>
    %49 = vector.extract_strided_slice %46 {offsets = [0, 512], sizes = [8, 256], strides = [1, 1]} : vector<8x1024xf32> to vector<8x256xf32>
    %cst_20 = arith.constant 2.000000e+00 : f32
    %50 = vector.broadcast %cst_20 : f32 to vector<8x256xf32>
    %51 = arith.mulf %50, %49 : vector<8x256xf32>
    %cst_21 = arith.constant 1.000000e+00 : f32
    %52 = vector.broadcast %cst_21 : f32 to vector<8x256xf32>
    %53 = arith.subf %51, %52 : vector<8x256xf32>
    %54 = vector.extract_strided_slice %46 {offsets = [0, 768], sizes = [8, 256], strides = [1, 1]} : vector<8x1024xf32> to vector<8x256xf32>
    %55 = arith.mulf %48, %37 : vector<8x256xf32>
    %56 = arith.mulf %47, %53 : vector<8x256xf32>
    %57 = arith.addf %55, %56 : vector<8x256xf32>
    %58 = math.tanh %57 : vector<8x256xf32>
    %59 = arith.mulf %54, %58 : vector<8x256xf32>
    %c0_i32_22 = arith.constant 0 : i32
    %60 = vector.broadcast %c0_i32_22 : i32 to vector<8x256xi32>
    %61 = arith.cmpi sge, %8, %60 : vector<8x256xi32>
    %c64_i32 = arith.constant 64 : i32
    %62 = vector.broadcast %c64_i32 : i32 to vector<8x256xi32>
    %63 = arith.cmpi slt, %8, %62 : vector<8x256xi32>
    %64 = arith.andi %61, %63 : vector<8x256xi1>
    %65 = arith.select %64, %57, %37 : vector<8x256xi1>, vector<8x256xf32>
    %66 = arith.select %64, %59, %38 : vector<8x256xi1>, vector<8x256xf32>
    %cst_23 = arith.constant dense<0.000000e+00> : vector<8x1024xf32>
    %67 = tpu.matmul %66, %7, %cst_23 {dimension_numbers = #tpu.dot_dimension_numbers<[1], [0], [0], [1], [0, 0, 1, 1], [], []>} : vector<8x256xf32>, vector<256x1024xf32>, vector<8x1024xf32> -> vector<8x1024xf32>
    %c16 = arith.constant 16 : index
    %c0_24 = arith.constant 0 : index
    %68 = vector.load %arg8[%c16, %c0_24] : memref<120x1024xf32, #tpu.memory_space<vmem>>, vector<8x1024xf32>
    %69 = arith.addf %67, %68 : vector<8x1024xf32>
    %70 = arith.negf %69 : vector<8x1024xf32>
    %71 = math.exp %70 : vector<8x1024xf32>
    %cst_25 = arith.constant 1.000000e+00 : f32
    %72 = vector.broadcast %cst_25 : f32 to vector<8x1024xf32>
    %73 = arith.addf %72, %71 : vector<8x1024xf32>
    %74 = arith.divf %72, %73 : vector<8x1024xf32>
    %75 = vector.extract_strided_slice %74 {offsets = [0, 0], sizes = [8, 256], strides = [1, 1]} : vector<8x1024xf32> to vector<8x256xf32>
    %76 = vector.extract_strided_slice %74 {offsets = [0, 256], sizes = [8, 256], strides = [1, 1]} : vector<8x1024xf32> to vector<8x256xf32>
    %77 = vector.extract_strided_slice %74 {offsets = [0, 512], sizes = [8, 256], strides = [1, 1]} : vector<8x1024xf32> to vector<8x256xf32>
    %cst_26 = arith.constant 2.000000e+00 : f32
    %78 = vector.broadcast %cst_26 : f32 to vector<8x256xf32>
    %79 = arith.mulf %78, %77 : vector<8x256xf32>
    %cst_27 = arith.constant 1.000000e+00 : f32
    %80 = vector.broadcast %cst_27 : f32 to vector<8x256xf32>
    %81 = arith.subf %79, %80 : vector<8x256xf32>
    %82 = vector.extract_strided_slice %74 {offsets = [0, 768], sizes = [8, 256], strides = [1, 1]} : vector<8x1024xf32> to vector<8x256xf32>
    %83 = arith.mulf %76, %65 : vector<8x256xf32>
    %84 = arith.mulf %75, %81 : vector<8x256xf32>
    %85 = arith.addf %83, %84 : vector<8x256xf32>
    %86 = math.tanh %85 : vector<8x256xf32>
    %87 = arith.mulf %82, %86 : vector<8x256xf32>
    %c0_i32_28 = arith.constant 0 : i32
    %88 = vector.broadcast %c0_i32_28 : i32 to vector<8x256xi32>
    %89 = arith.cmpi sge, %8, %88 : vector<8x256xi32>
    %c96_i32 = arith.constant 96 : i32
    %90 = vector.broadcast %c96_i32 : i32 to vector<8x256xi32>
    %91 = arith.cmpi slt, %8, %90 : vector<8x256xi32>
    %92 = arith.andi %89, %91 : vector<8x256xi1>
    %93 = arith.select %92, %85, %65 : vector<8x256xi1>, vector<8x256xf32>
    %94 = arith.select %92, %87, %66 : vector<8x256xi1>, vector<8x256xf32>
    %cst_29 = arith.constant dense<0.000000e+00> : vector<8x1024xf32>
    %95 = tpu.matmul %94, %7, %cst_29 {dimension_numbers = #tpu.dot_dimension_numbers<[1], [0], [0], [1], [0, 0, 1, 1], [], []>} : vector<8x256xf32>, vector<256x1024xf32>, vector<8x1024xf32> -> vector<8x1024xf32>
    %c24 = arith.constant 24 : index
    %c0_30 = arith.constant 0 : index
    %96 = vector.load %arg8[%c24, %c0_30] : memref<120x1024xf32, #tpu.memory_space<vmem>>, vector<8x1024xf32>
    %97 = arith.addf %95, %96 : vector<8x1024xf32>
    %98 = arith.negf %97 : vector<8x1024xf32>
    %99 = math.exp %98 : vector<8x1024xf32>
    %cst_31 = arith.constant 1.000000e+00 : f32
    %100 = vector.broadcast %cst_31 : f32 to vector<8x1024xf32>
    %101 = arith.addf %100, %99 : vector<8x1024xf32>
    %102 = arith.divf %100, %101 : vector<8x1024xf32>
    %103 = vector.extract_strided_slice %102 {offsets = [0, 0], sizes = [8, 256], strides = [1, 1]} : vector<8x1024xf32> to vector<8x256xf32>
    %104 = vector.extract_strided_slice %102 {offsets = [0, 256], sizes = [8, 256], strides = [1, 1]} : vector<8x1024xf32> to vector<8x256xf32>
    %105 = vector.extract_strided_slice %102 {offsets = [0, 512], sizes = [8, 256], strides = [1, 1]} : vector<8x1024xf32> to vector<8x256xf32>
    %cst_32 = arith.constant 2.000000e+00 : f32
    %106 = vector.broadcast %cst_32 : f32 to vector<8x256xf32>
    %107 = arith.mulf %106, %105 : vector<8x256xf32>
    %cst_33 = arith.constant 1.000000e+00 : f32
    %108 = vector.broadcast %cst_33 : f32 to vector<8x256xf32>
    %109 = arith.subf %107, %108 : vector<8x256xf32>
    %110 = vector.extract_strided_slice %102 {offsets = [0, 768], sizes = [8, 256], strides = [1, 1]} : vector<8x1024xf32> to vector<8x256xf32>
    %111 = arith.mulf %104, %93 : vector<8x256xf32>
    %112 = arith.mulf %103, %109 : vector<8x256xf32>
    %113 = arith.addf %111, %112 : vector<8x256xf32>
    %114 = math.tanh %113 : vector<8x256xf32>
    %115 = arith.mulf %110, %114 : vector<8x256xf32>
    %c0_i32_34 = arith.constant 0 : i32
    %116 = vector.broadcast %c0_i32_34 : i32 to vector<8x256xi32>
    %117 = arith.cmpi sge, %8, %116 : vector<8x256xi32>
    %c128_i32 = arith.constant 128 : i32
    %118 = vector.broadcast %c128_i32 : i32 to vector<8x256xi32>
    %119 = arith.cmpi slt, %8, %118 : vector<8x256xi32>
    %120 = arith.andi %117, %119 : vector<8x256xi1>
    %121 = arith.select %120, %113, %93 : vector<8x256xi1>, vector<8x256xf32>
    %122 = arith.select %120, %115, %94 : vector<8x256xi1>, vector<8x256xf32>
    %cst_35 = arith.constant dense<0.000000e+00> : vector<8x1024xf32>
    %123 = tpu.matmul %122, %7, %cst_35 {dimension_numbers = #tpu.dot_dimension_numbers<[1], [0], [0], [1], [0, 0, 1, 1], [], []>} : vector<8x256xf32>, vector<256x1024xf32>, vector<8x1024xf32> -> vector<8x1024xf32>
    %c32 = arith.constant 32 : index
    %c0_36 = arith.constant 0 : index
    %124 = vector.load %arg8[%c32, %c0_36] : memref<120x1024xf32, #tpu.memory_space<vmem>>, vector<8x1024xf32>
    %125 = arith.addf %123, %124 : vector<8x1024xf32>
    %126 = arith.negf %125 : vector<8x1024xf32>
    %127 = math.exp %126 : vector<8x1024xf32>
    %cst_37 = arith.constant 1.000000e+00 : f32
    %128 = vector.broadcast %cst_37 : f32 to vector<8x1024xf32>
    %129 = arith.addf %128, %127 : vector<8x1024xf32>
    %130 = arith.divf %128, %129 : vector<8x1024xf32>
    %131 = vector.extract_strided_slice %130 {offsets = [0, 0], sizes = [8, 256], strides = [1, 1]} : vector<8x1024xf32> to vector<8x256xf32>
    %132 = vector.extract_strided_slice %130 {offsets = [0, 256], sizes = [8, 256], strides = [1, 1]} : vector<8x1024xf32> to vector<8x256xf32>
    %133 = vector.extract_strided_slice %130 {offsets = [0, 512], sizes = [8, 256], strides = [1, 1]} : vector<8x1024xf32> to vector<8x256xf32>
    %cst_38 = arith.constant 2.000000e+00 : f32
    %134 = vector.broadcast %cst_38 : f32 to vector<8x256xf32>
    %135 = arith.mulf %134, %133 : vector<8x256xf32>
    %cst_39 = arith.constant 1.000000e+00 : f32
    %136 = vector.broadcast %cst_39 : f32 to vector<8x256xf32>
    %137 = arith.subf %135, %136 : vector<8x256xf32>
    %138 = vector.extract_strided_slice %130 {offsets = [0, 768], sizes = [8, 256], strides = [1, 1]} : vector<8x1024xf32> to vector<8x256xf32>
    %139 = arith.mulf %132, %121 : vector<8x256xf32>
    %140 = arith.mulf %131, %137 : vector<8x256xf32>
    %141 = arith.addf %139, %140 : vector<8x256xf32>
    %142 = math.tanh %141 : vector<8x256xf32>
    %143 = arith.mulf %138, %142 : vector<8x256xf32>
    %c0_i32_40 = arith.constant 0 : i32
    %144 = vector.broadcast %c0_i32_40 : i32 to vector<8x256xi32>
    %145 = arith.cmpi sge, %8, %144 : vector<8x256xi32>
    %c160_i32 = arith.constant 160 : i32
    %146 = vector.broadcast %c160_i32 : i32 to vector<8x256xi32>
    %147 = arith.cmpi slt, %8, %146 : vector<8x256xi32>
    %148 = arith.andi %145, %147 : vector<8x256xi1>
    %149 = arith.select %148, %141, %121 : vector<8x256xi1>, vector<8x256xf32>
    %150 = arith.select %148, %143, %122 : vector<8x256xi1>, vector<8x256xf32>
    %cst_41 = arith.constant dense<0.000000e+00> : vector<8x1024xf32>
    %151 = tpu.matmul %150, %7, %cst_41 {dimension_numbers = #tpu.dot_dimension_numbers<[1], [0], [0], [1], [0, 0, 1, 1], [], []>} : vector<8x256xf32>, vector<256x1024xf32>, vector<8x1024xf32> -> vector<8x1024xf32>
    %c40 = arith.constant 40 : index
    %c0_42 = arith.constant 0 : index
    %152 = vector.load %arg8[%c40, %c0_42] : memref<120x1024xf32, #tpu.memory_space<vmem>>, vector<8x1024xf32>
    %153 = arith.addf %151, %152 : vector<8x1024xf32>
    %154 = arith.negf %153 : vector<8x1024xf32>
    %155 = math.exp %154 : vector<8x1024xf32>
    %cst_43 = arith.constant 1.000000e+00 : f32
    %156 = vector.broadcast %cst_43 : f32 to vector<8x1024xf32>
    %157 = arith.addf %156, %155 : vector<8x1024xf32>
    %158 = arith.divf %156, %157 : vector<8x1024xf32>
    %159 = vector.extract_strided_slice %158 {offsets = [0, 0], sizes = [8, 256], strides = [1, 1]} : vector<8x1024xf32> to vector<8x256xf32>
    %160 = vector.extract_strided_slice %158 {offsets = [0, 256], sizes = [8, 256], strides = [1, 1]} : vector<8x1024xf32> to vector<8x256xf32>
    %161 = vector.extract_strided_slice %158 {offsets = [0, 512], sizes = [8, 256], strides = [1, 1]} : vector<8x1024xf32> to vector<8x256xf32>
    %cst_44 = arith.constant 2.000000e+00 : f32
    %162 = vector.broadcast %cst_44 : f32 to vector<8x256xf32>
    %163 = arith.mulf %162, %161 : vector<8x256xf32>
    %cst_45 = arith.constant 1.000000e+00 : f32
    %164 = vector.broadcast %cst_45 : f32 to vector<8x256xf32>
    %165 = arith.subf %163, %164 : vector<8x256xf32>
    %166 = vector.extract_strided_slice %158 {offsets = [0, 768], sizes = [8, 256], strides = [1, 1]} : vector<8x1024xf32> to vector<8x256xf32>
    %167 = arith.mulf %160, %149 : vector<8x256xf32>
    %168 = arith.mulf %159, %165 : vector<8x256xf32>
    %169 = arith.addf %167, %168 : vector<8x256xf32>
    %170 = math.tanh %169 : vector<8x256xf32>
    %171 = arith.mulf %166, %170 : vector<8x256xf32>
    %c0_i32_46 = arith.constant 0 : i32
    %172 = vector.broadcast %c0_i32_46 : i32 to vector<8x256xi32>
    %173 = arith.cmpi sge, %8, %172 : vector<8x256xi32>
    %c192_i32 = arith.constant 192 : i32
    %174 = vector.broadcast %c192_i32 : i32 to vector<8x256xi32>
    %175 = arith.cmpi slt, %8, %174 : vector<8x256xi32>
    %176 = arith.andi %173, %175 : vector<8x256xi1>
    %177 = arith.select %176, %169, %149 : vector<8x256xi1>, vector<8x256xf32>
    %178 = arith.select %176, %171, %150 : vector<8x256xi1>, vector<8x256xf32>
    %cst_47 = arith.constant dense<0.000000e+00> : vector<8x1024xf32>
    %179 = tpu.matmul %178, %7, %cst_47 {dimension_numbers = #tpu.dot_dimension_numbers<[1], [0], [0], [1], [0, 0, 1, 1], [], []>} : vector<8x256xf32>, vector<256x1024xf32>, vector<8x1024xf32> -> vector<8x1024xf32>
    %c48 = arith.constant 48 : index
    %c0_48 = arith.constant 0 : index
    %180 = vector.load %arg8[%c48, %c0_48] : memref<120x1024xf32, #tpu.memory_space<vmem>>, vector<8x1024xf32>
    %181 = arith.addf %179, %180 : vector<8x1024xf32>
    %182 = arith.negf %181 : vector<8x1024xf32>
    %183 = math.exp %182 : vector<8x1024xf32>
    %cst_49 = arith.constant 1.000000e+00 : f32
    %184 = vector.broadcast %cst_49 : f32 to vector<8x1024xf32>
    %185 = arith.addf %184, %183 : vector<8x1024xf32>
    %186 = arith.divf %184, %185 : vector<8x1024xf32>
    %187 = vector.extract_strided_slice %186 {offsets = [0, 0], sizes = [8, 256], strides = [1, 1]} : vector<8x1024xf32> to vector<8x256xf32>
    %188 = vector.extract_strided_slice %186 {offsets = [0, 256], sizes = [8, 256], strides = [1, 1]} : vector<8x1024xf32> to vector<8x256xf32>
    %189 = vector.extract_strided_slice %186 {offsets = [0, 512], sizes = [8, 256], strides = [1, 1]} : vector<8x1024xf32> to vector<8x256xf32>
    %cst_50 = arith.constant 2.000000e+00 : f32
    %190 = vector.broadcast %cst_50 : f32 to vector<8x256xf32>
    %191 = arith.mulf %190, %189 : vector<8x256xf32>
    %cst_51 = arith.constant 1.000000e+00 : f32
    %192 = vector.broadcast %cst_51 : f32 to vector<8x256xf32>
    %193 = arith.subf %191, %192 : vector<8x256xf32>
    %194 = vector.extract_strided_slice %186 {offsets = [0, 768], sizes = [8, 256], strides = [1, 1]} : vector<8x1024xf32> to vector<8x256xf32>
    %195 = arith.mulf %188, %177 : vector<8x256xf32>
    %196 = arith.mulf %187, %193 : vector<8x256xf32>
    %197 = arith.addf %195, %196 : vector<8x256xf32>
    %198 = math.tanh %197 : vector<8x256xf32>
    %199 = arith.mulf %194, %198 : vector<8x256xf32>
    %c0_i32_52 = arith.constant 0 : i32
    %200 = vector.broadcast %c0_i32_52 : i32 to vector<8x256xi32>
    %201 = arith.cmpi sge, %8, %200 : vector<8x256xi32>
    %c224_i32 = arith.constant 224 : i32
    %202 = vector.broadcast %c224_i32 : i32 to vector<8x256xi32>
    %203 = arith.cmpi slt, %8, %202 : vector<8x256xi32>
    %204 = arith.andi %201, %203 : vector<8x256xi1>
    %205 = arith.select %204, %197, %177 : vector<8x256xi1>, vector<8x256xf32>
    %206 = arith.select %204, %199, %178 : vector<8x256xi1>, vector<8x256xf32>
    %cst_53 = arith.constant dense<0.000000e+00> : vector<8x1024xf32>
    %207 = tpu.matmul %206, %7, %cst_53 {dimension_numbers = #tpu.dot_dimension_numbers<[1], [0], [0], [1], [0, 0, 1, 1], [], []>} : vector<8x256xf32>, vector<256x1024xf32>, vector<8x1024xf32> -> vector<8x1024xf32>
    %c56 = arith.constant 56 : index
    %c0_54 = arith.constant 0 : index
    %208 = vector.load %arg8[%c56, %c0_54] : memref<120x1024xf32, #tpu.memory_space<vmem>>, vector<8x1024xf32>
    %209 = arith.addf %207, %208 : vector<8x1024xf32>
    %210 = arith.negf %209 : vector<8x1024xf32>
    %211 = math.exp %210 : vector<8x1024xf32>
    %cst_55 = arith.constant 1.000000e+00 : f32
    %212 = vector.broadcast %cst_55 : f32 to vector<8x1024xf32>
    %213 = arith.addf %212, %211 : vector<8x1024xf32>
    %214 = arith.divf %212, %213 : vector<8x1024xf32>
    %215 = vector.extract_strided_slice %214 {offsets = [0, 0], sizes = [8, 256], strides = [1, 1]} : vector<8x1024xf32> to vector<8x256xf32>
    %216 = vector.extract_strided_slice %214 {offsets = [0, 256], sizes = [8, 256], strides = [1, 1]} : vector<8x1024xf32> to vector<8x256xf32>
    %217 = vector.extract_strided_slice %214 {offsets = [0, 512], sizes = [8, 256], strides = [1, 1]} : vector<8x1024xf32> to vector<8x256xf32>
    %cst_56 = arith.constant 2.000000e+00 : f32
    %218 = vector.broadcast %cst_56 : f32 to vector<8x256xf32>
    %219 = arith.mulf %218, %217 : vector<8x256xf32>
    %cst_57 = arith.constant 1.000000e+00 : f32
    %220 = vector.broadcast %cst_57 : f32 to vector<8x256xf32>
    %221 = arith.subf %219, %220 : vector<8x256xf32>
    %222 = vector.extract_strided_slice %214 {offsets = [0, 768], sizes = [8, 256], strides = [1, 1]} : vector<8x1024xf32> to vector<8x256xf32>
    %223 = arith.mulf %216, %205 : vector<8x256xf32>
    %224 = arith.mulf %215, %221 : vector<8x256xf32>
    %225 = arith.addf %223, %224 : vector<8x256xf32>
    %226 = math.tanh %225 : vector<8x256xf32>
    %227 = arith.mulf %222, %226 : vector<8x256xf32>
    %cst_58 = arith.constant dense<0.000000e+00> : vector<8x1024xf32>
    %228 = tpu.matmul %227, %7, %cst_58 {dimension_numbers = #tpu.dot_dimension_numbers<[1], [0], [0], [1], [0, 0, 1, 1], [], []>} : vector<8x256xf32>, vector<256x1024xf32>, vector<8x1024xf32> -> vector<8x1024xf32>
    %c64 = arith.constant 64 : index
    %c0_59 = arith.constant 0 : index
    %229 = vector.load %arg8[%c64, %c0_59] : memref<120x1024xf32, #tpu.memory_space<vmem>>, vector<8x1024xf32>
    %230 = arith.addf %228, %229 : vector<8x1024xf32>
    %231 = arith.negf %230 : vector<8x1024xf32>
    %232 = math.exp %231 : vector<8x1024xf32>
    %cst_60 = arith.constant 1.000000e+00 : f32
    %233 = vector.broadcast %cst_60 : f32 to vector<8x1024xf32>
    %234 = arith.addf %233, %232 : vector<8x1024xf32>
    %235 = arith.divf %233, %234 : vector<8x1024xf32>
    %236 = vector.extract_strided_slice %235 {offsets = [0, 0], sizes = [8, 256], strides = [1, 1]} : vector<8x1024xf32> to vector<8x256xf32>
    %237 = vector.extract_strided_slice %235 {offsets = [0, 256], sizes = [8, 256], strides = [1, 1]} : vector<8x1024xf32> to vector<8x256xf32>
    %238 = vector.extract_strided_slice %235 {offsets = [0, 512], sizes = [8, 256], strides = [1, 1]} : vector<8x1024xf32> to vector<8x256xf32>
    %cst_61 = arith.constant 2.000000e+00 : f32
    %239 = vector.broadcast %cst_61 : f32 to vector<8x256xf32>
    %240 = arith.mulf %239, %238 : vector<8x256xf32>
    %cst_62 = arith.constant 1.000000e+00 : f32
    %241 = vector.broadcast %cst_62 : f32 to vector<8x256xf32>
    %242 = arith.subf %240, %241 : vector<8x256xf32>
    %243 = vector.extract_strided_slice %235 {offsets = [0, 768], sizes = [8, 256], strides = [1, 1]} : vector<8x1024xf32> to vector<8x256xf32>
    %244 = arith.mulf %237, %225 : vector<8x256xf32>
    %245 = arith.mulf %236, %242 : vector<8x256xf32>
    %246 = arith.addf %244, %245 : vector<8x256xf32>
    %247 = math.tanh %246 : vector<8x256xf32>
    %248 = arith.mulf %243, %247 : vector<8x256xf32>
    %c32_i32_63 = arith.constant 32 : i32
    %249 = vector.broadcast %c32_i32_63 : i32 to vector<8x256xi32>
    %250 = arith.cmpi sge, %8, %249 : vector<8x256xi32>
    %c256_i32 = arith.constant 256 : i32
    %251 = vector.broadcast %c256_i32 : i32 to vector<8x256xi32>
    %252 = arith.cmpi slt, %8, %251 : vector<8x256xi32>
    %253 = arith.andi %250, %252 : vector<8x256xi1>
    %254 = arith.select %253, %246, %225 : vector<8x256xi1>, vector<8x256xf32>
    %255 = arith.select %253, %248, %227 : vector<8x256xi1>, vector<8x256xf32>
    %cst_64 = arith.constant dense<0.000000e+00> : vector<8x1024xf32>
    %256 = tpu.matmul %255, %7, %cst_64 {dimension_numbers = #tpu.dot_dimension_numbers<[1], [0], [0], [1], [0, 0, 1, 1], [], []>} : vector<8x256xf32>, vector<256x1024xf32>, vector<8x1024xf32> -> vector<8x1024xf32>
    %c72 = arith.constant 72 : index
    %c0_65 = arith.constant 0 : index
    %257 = vector.load %arg8[%c72, %c0_65] : memref<120x1024xf32, #tpu.memory_space<vmem>>, vector<8x1024xf32>
    %258 = arith.addf %256, %257 : vector<8x1024xf32>
    %259 = arith.negf %258 : vector<8x1024xf32>
    %260 = math.exp %259 : vector<8x1024xf32>
    %cst_66 = arith.constant 1.000000e+00 : f32
    %261 = vector.broadcast %cst_66 : f32 to vector<8x1024xf32>
    %262 = arith.addf %261, %260 : vector<8x1024xf32>
    %263 = arith.divf %261, %262 : vector<8x1024xf32>
    %264 = vector.extract_strided_slice %263 {offsets = [0, 0], sizes = [8, 256], strides = [1, 1]} : vector<8x1024xf32> to vector<8x256xf32>
    %265 = vector.extract_strided_slice %263 {offsets = [0, 256], sizes = [8, 256], strides = [1, 1]} : vector<8x1024xf32> to vector<8x256xf32>
    %266 = vector.extract_strided_slice %263 {offsets = [0, 512], sizes = [8, 256], strides = [1, 1]} : vector<8x1024xf32> to vector<8x256xf32>
    %cst_67 = arith.constant 2.000000e+00 : f32
    %267 = vector.broadcast %cst_67 : f32 to vector<8x256xf32>
    %268 = arith.mulf %267, %266 : vector<8x256xf32>
    %cst_68 = arith.constant 1.000000e+00 : f32
    %269 = vector.broadcast %cst_68 : f32 to vector<8x256xf32>
    %270 = arith.subf %268, %269 : vector<8x256xf32>
    %271 = vector.extract_strided_slice %263 {offsets = [0, 768], sizes = [8, 256], strides = [1, 1]} : vector<8x1024xf32> to vector<8x256xf32>
    %272 = arith.mulf %265, %254 : vector<8x256xf32>
    %273 = arith.mulf %264, %270 : vector<8x256xf32>
    %274 = arith.addf %272, %273 : vector<8x256xf32>
    %275 = math.tanh %274 : vector<8x256xf32>
    %276 = arith.mulf %271, %275 : vector<8x256xf32>
    %c64_i32_69 = arith.constant 64 : i32
    %277 = vector.broadcast %c64_i32_69 : i32 to vector<8x256xi32>
    %278 = arith.cmpi sge, %8, %277 : vector<8x256xi32>
    %c256_i32_70 = arith.constant 256 : i32
    %279 = vector.broadcast %c256_i32_70 : i32 to vector<8x256xi32>
    %280 = arith.cmpi slt, %8, %279 : vector<8x256xi32>
    %281 = arith.andi %278, %280 : vector<8x256xi1>
    %282 = arith.select %281, %274, %254 : vector<8x256xi1>, vector<8x256xf32>
    %283 = arith.select %281, %276, %255 : vector<8x256xi1>, vector<8x256xf32>
    %cst_71 = arith.constant dense<0.000000e+00> : vector<8x1024xf32>
    %284 = tpu.matmul %283, %7, %cst_71 {dimension_numbers = #tpu.dot_dimension_numbers<[1], [0], [0], [1], [0, 0, 1, 1], [], []>} : vector<8x256xf32>, vector<256x1024xf32>, vector<8x1024xf32> -> vector<8x1024xf32>
    %c80 = arith.constant 80 : index
    %c0_72 = arith.constant 0 : index
    %285 = vector.load %arg8[%c80, %c0_72] : memref<120x1024xf32, #tpu.memory_space<vmem>>, vector<8x1024xf32>
    %286 = arith.addf %284, %285 : vector<8x1024xf32>
    %287 = arith.negf %286 : vector<8x1024xf32>
    %288 = math.exp %287 : vector<8x1024xf32>
    %cst_73 = arith.constant 1.000000e+00 : f32
    %289 = vector.broadcast %cst_73 : f32 to vector<8x1024xf32>
    %290 = arith.addf %289, %288 : vector<8x1024xf32>
    %291 = arith.divf %289, %290 : vector<8x1024xf32>
    %292 = vector.extract_strided_slice %291 {offsets = [0, 0], sizes = [8, 256], strides = [1, 1]} : vector<8x1024xf32> to vector<8x256xf32>
    %293 = vector.extract_strided_slice %291 {offsets = [0, 256], sizes = [8, 256], strides = [1, 1]} : vector<8x1024xf32> to vector<8x256xf32>
    %294 = vector.extract_strided_slice %291 {offsets = [0, 512], sizes = [8, 256], strides = [1, 1]} : vector<8x1024xf32> to vector<8x256xf32>
    %cst_74 = arith.constant 2.000000e+00 : f32
    %295 = vector.broadcast %cst_74 : f32 to vector<8x256xf32>
    %296 = arith.mulf %295, %294 : vector<8x256xf32>
    %cst_75 = arith.constant 1.000000e+00 : f32
    %297 = vector.broadcast %cst_75 : f32 to vector<8x256xf32>
    %298 = arith.subf %296, %297 : vector<8x256xf32>
    %299 = vector.extract_strided_slice %291 {offsets = [0, 768], sizes = [8, 256], strides = [1, 1]} : vector<8x1024xf32> to vector<8x256xf32>
    %300 = arith.mulf %293, %282 : vector<8x256xf32>
    %301 = arith.mulf %292, %298 : vector<8x256xf32>
    %302 = arith.addf %300, %301 : vector<8x256xf32>
    %303 = math.tanh %302 : vector<8x256xf32>
    %304 = arith.mulf %299, %303 : vector<8x256xf32>
    %c96_i32_76 = arith.constant 96 : i32
    %305 = vector.broadcast %c96_i32_76 : i32 to vector<8x256xi32>
    %306 = arith.cmpi sge, %8, %305 : vector<8x256xi32>
    %c256_i32_77 = arith.constant 256 : i32
    %307 = vector.broadcast %c256_i32_77 : i32 to vector<8x256xi32>
    %308 = arith.cmpi slt, %8, %307 : vector<8x256xi32>
    %309 = arith.andi %306, %308 : vector<8x256xi1>
    %310 = arith.select %309, %302, %282 : vector<8x256xi1>, vector<8x256xf32>
    %311 = arith.select %309, %304, %283 : vector<8x256xi1>, vector<8x256xf32>
    %cst_78 = arith.constant dense<0.000000e+00> : vector<8x1024xf32>
    %312 = tpu.matmul %311, %7, %cst_78 {dimension_numbers = #tpu.dot_dimension_numbers<[1], [0], [0], [1], [0, 0, 1, 1], [], []>} : vector<8x256xf32>, vector<256x1024xf32>, vector<8x1024xf32> -> vector<8x1024xf32>
    %c88 = arith.constant 88 : index
    %c0_79 = arith.constant 0 : index
    %313 = vector.load %arg8[%c88, %c0_79] : memref<120x1024xf32, #tpu.memory_space<vmem>>, vector<8x1024xf32>
    %314 = arith.addf %312, %313 : vector<8x1024xf32>
    %315 = arith.negf %314 : vector<8x1024xf32>
    %316 = math.exp %315 : vector<8x1024xf32>
    %cst_80 = arith.constant 1.000000e+00 : f32
    %317 = vector.broadcast %cst_80 : f32 to vector<8x1024xf32>
    %318 = arith.addf %317, %316 : vector<8x1024xf32>
    %319 = arith.divf %317, %318 : vector<8x1024xf32>
    %320 = vector.extract_strided_slice %319 {offsets = [0, 0], sizes = [8, 256], strides = [1, 1]} : vector<8x1024xf32> to vector<8x256xf32>
    %321 = vector.extract_strided_slice %319 {offsets = [0, 256], sizes = [8, 256], strides = [1, 1]} : vector<8x1024xf32> to vector<8x256xf32>
    %322 = vector.extract_strided_slice %319 {offsets = [0, 512], sizes = [8, 256], strides = [1, 1]} : vector<8x1024xf32> to vector<8x256xf32>
    %cst_81 = arith.constant 2.000000e+00 : f32
    %323 = vector.broadcast %cst_81 : f32 to vector<8x256xf32>
    %324 = arith.mulf %323, %322 : vector<8x256xf32>
    %cst_82 = arith.constant 1.000000e+00 : f32
    %325 = vector.broadcast %cst_82 : f32 to vector<8x256xf32>
    %326 = arith.subf %324, %325 : vector<8x256xf32>
    %327 = vector.extract_strided_slice %319 {offsets = [0, 768], sizes = [8, 256], strides = [1, 1]} : vector<8x1024xf32> to vector<8x256xf32>
    %328 = arith.mulf %321, %310 : vector<8x256xf32>
    %329 = arith.mulf %320, %326 : vector<8x256xf32>
    %330 = arith.addf %328, %329 : vector<8x256xf32>
    %331 = math.tanh %330 : vector<8x256xf32>
    %332 = arith.mulf %327, %331 : vector<8x256xf32>
    %c128_i32_83 = arith.constant 128 : i32
    %333 = vector.broadcast %c128_i32_83 : i32 to vector<8x256xi32>
    %334 = arith.cmpi sge, %8, %333 : vector<8x256xi32>
    %c256_i32_84 = arith.constant 256 : i32
    %335 = vector.broadcast %c256_i32_84 : i32 to vector<8x256xi32>
    %336 = arith.cmpi slt, %8, %335 : vector<8x256xi32>
    %337 = arith.andi %334, %336 : vector<8x256xi1>
    %338 = arith.select %337, %330, %310 : vector<8x256xi1>, vector<8x256xf32>
    %339 = arith.select %337, %332, %311 : vector<8x256xi1>, vector<8x256xf32>
    %cst_85 = arith.constant dense<0.000000e+00> : vector<8x1024xf32>
    %340 = tpu.matmul %339, %7, %cst_85 {dimension_numbers = #tpu.dot_dimension_numbers<[1], [0], [0], [1], [0, 0, 1, 1], [], []>} : vector<8x256xf32>, vector<256x1024xf32>, vector<8x1024xf32> -> vector<8x1024xf32>
    %c96 = arith.constant 96 : index
    %c0_86 = arith.constant 0 : index
    %341 = vector.load %arg8[%c96, %c0_86] : memref<120x1024xf32, #tpu.memory_space<vmem>>, vector<8x1024xf32>
    %342 = arith.addf %340, %341 : vector<8x1024xf32>
    %343 = arith.negf %342 : vector<8x1024xf32>
    %344 = math.exp %343 : vector<8x1024xf32>
    %cst_87 = arith.constant 1.000000e+00 : f32
    %345 = vector.broadcast %cst_87 : f32 to vector<8x1024xf32>
    %346 = arith.addf %345, %344 : vector<8x1024xf32>
    %347 = arith.divf %345, %346 : vector<8x1024xf32>
    %348 = vector.extract_strided_slice %347 {offsets = [0, 0], sizes = [8, 256], strides = [1, 1]} : vector<8x1024xf32> to vector<8x256xf32>
    %349 = vector.extract_strided_slice %347 {offsets = [0, 256], sizes = [8, 256], strides = [1, 1]} : vector<8x1024xf32> to vector<8x256xf32>
    %350 = vector.extract_strided_slice %347 {offsets = [0, 512], sizes = [8, 256], strides = [1, 1]} : vector<8x1024xf32> to vector<8x256xf32>
    %cst_88 = arith.constant 2.000000e+00 : f32
    %351 = vector.broadcast %cst_88 : f32 to vector<8x256xf32>
    %352 = arith.mulf %351, %350 : vector<8x256xf32>
    %cst_89 = arith.constant 1.000000e+00 : f32
    %353 = vector.broadcast %cst_89 : f32 to vector<8x256xf32>
    %354 = arith.subf %352, %353 : vector<8x256xf32>
    %355 = vector.extract_strided_slice %347 {offsets = [0, 768], sizes = [8, 256], strides = [1, 1]} : vector<8x1024xf32> to vector<8x256xf32>
    %356 = arith.mulf %349, %338 : vector<8x256xf32>
    %357 = arith.mulf %348, %354 : vector<8x256xf32>
    %358 = arith.addf %356, %357 : vector<8x256xf32>
    %359 = math.tanh %358 : vector<8x256xf32>
    %360 = arith.mulf %355, %359 : vector<8x256xf32>
    %c160_i32_90 = arith.constant 160 : i32
    %361 = vector.broadcast %c160_i32_90 : i32 to vector<8x256xi32>
    %362 = arith.cmpi sge, %8, %361 : vector<8x256xi32>
    %c256_i32_91 = arith.constant 256 : i32
    %363 = vector.broadcast %c256_i32_91 : i32 to vector<8x256xi32>
    %364 = arith.cmpi slt, %8, %363 : vector<8x256xi32>
    %365 = arith.andi %362, %364 : vector<8x256xi1>
    %366 = arith.select %365, %358, %338 : vector<8x256xi1>, vector<8x256xf32>
    %367 = arith.select %365, %360, %339 : vector<8x256xi1>, vector<8x256xf32>
    %cst_92 = arith.constant dense<0.000000e+00> : vector<8x1024xf32>
    %368 = tpu.matmul %367, %7, %cst_92 {dimension_numbers = #tpu.dot_dimension_numbers<[1], [0], [0], [1], [0, 0, 1, 1], [], []>} : vector<8x256xf32>, vector<256x1024xf32>, vector<8x1024xf32> -> vector<8x1024xf32>
    %c104 = arith.constant 104 : index
    %c0_93 = arith.constant 0 : index
    %369 = vector.load %arg8[%c104, %c0_93] : memref<120x1024xf32, #tpu.memory_space<vmem>>, vector<8x1024xf32>
    %370 = arith.addf %368, %369 : vector<8x1024xf32>
    %371 = arith.negf %370 : vector<8x1024xf32>
    %372 = math.exp %371 : vector<8x1024xf32>
    %cst_94 = arith.constant 1.000000e+00 : f32
    %373 = vector.broadcast %cst_94 : f32 to vector<8x1024xf32>
    %374 = arith.addf %373, %372 : vector<8x1024xf32>
    %375 = arith.divf %373, %374 : vector<8x1024xf32>
    %376 = vector.extract_strided_slice %375 {offsets = [0, 0], sizes = [8, 256], strides = [1, 1]} : vector<8x1024xf32> to vector<8x256xf32>
    %377 = vector.extract_strided_slice %375 {offsets = [0, 256], sizes = [8, 256], strides = [1, 1]} : vector<8x1024xf32> to vector<8x256xf32>
    %378 = vector.extract_strided_slice %375 {offsets = [0, 512], sizes = [8, 256], strides = [1, 1]} : vector<8x1024xf32> to vector<8x256xf32>
    %cst_95 = arith.constant 2.000000e+00 : f32
    %379 = vector.broadcast %cst_95 : f32 to vector<8x256xf32>
    %380 = arith.mulf %379, %378 : vector<8x256xf32>
    %cst_96 = arith.constant 1.000000e+00 : f32
    %381 = vector.broadcast %cst_96 : f32 to vector<8x256xf32>
    %382 = arith.subf %380, %381 : vector<8x256xf32>
    %383 = vector.extract_strided_slice %375 {offsets = [0, 768], sizes = [8, 256], strides = [1, 1]} : vector<8x1024xf32> to vector<8x256xf32>
    %384 = arith.mulf %377, %366 : vector<8x256xf32>
    %385 = arith.mulf %376, %382 : vector<8x256xf32>
    %386 = arith.addf %384, %385 : vector<8x256xf32>
    %387 = math.tanh %386 : vector<8x256xf32>
    %388 = arith.mulf %383, %387 : vector<8x256xf32>
    %c192_i32_97 = arith.constant 192 : i32
    %389 = vector.broadcast %c192_i32_97 : i32 to vector<8x256xi32>
    %390 = arith.cmpi sge, %8, %389 : vector<8x256xi32>
    %c256_i32_98 = arith.constant 256 : i32
    %391 = vector.broadcast %c256_i32_98 : i32 to vector<8x256xi32>
    %392 = arith.cmpi slt, %8, %391 : vector<8x256xi32>
    %393 = arith.andi %390, %392 : vector<8x256xi1>
    %394 = arith.select %393, %386, %366 : vector<8x256xi1>, vector<8x256xf32>
    %395 = arith.select %393, %388, %367 : vector<8x256xi1>, vector<8x256xf32>
    %cst_99 = arith.constant dense<0.000000e+00> : vector<8x1024xf32>
    %396 = tpu.matmul %395, %7, %cst_99 {dimension_numbers = #tpu.dot_dimension_numbers<[1], [0], [0], [1], [0, 0, 1, 1], [], []>} : vector<8x256xf32>, vector<256x1024xf32>, vector<8x1024xf32> -> vector<8x1024xf32>
    %c112 = arith.constant 112 : index
    %c0_100 = arith.constant 0 : index
    %397 = vector.load %arg8[%c112, %c0_100] : memref<120x1024xf32, #tpu.memory_space<vmem>>, vector<8x1024xf32>
    %398 = arith.addf %396, %397 : vector<8x1024xf32>
    %399 = arith.negf %398 : vector<8x1024xf32>
    %400 = math.exp %399 : vector<8x1024xf32>
    %cst_101 = arith.constant 1.000000e+00 : f32
    %401 = vector.broadcast %cst_101 : f32 to vector<8x1024xf32>
    %402 = arith.addf %401, %400 : vector<8x1024xf32>
    %403 = arith.divf %401, %402 : vector<8x1024xf32>
    %404 = vector.extract_strided_slice %403 {offsets = [0, 0], sizes = [8, 256], strides = [1, 1]} : vector<8x1024xf32> to vector<8x256xf32>
    %405 = vector.extract_strided_slice %403 {offsets = [0, 256], sizes = [8, 256], strides = [1, 1]} : vector<8x1024xf32> to vector<8x256xf32>
    %406 = vector.extract_strided_slice %403 {offsets = [0, 512], sizes = [8, 256], strides = [1, 1]} : vector<8x1024xf32> to vector<8x256xf32>
    %cst_102 = arith.constant 2.000000e+00 : f32
    %407 = vector.broadcast %cst_102 : f32 to vector<8x256xf32>
    %408 = arith.mulf %407, %406 : vector<8x256xf32>
    %cst_103 = arith.constant 1.000000e+00 : f32
    %409 = vector.broadcast %cst_103 : f32 to vector<8x256xf32>
    %410 = arith.subf %408, %409 : vector<8x256xf32>
    %411 = vector.extract_strided_slice %403 {offsets = [0, 768], sizes = [8, 256], strides = [1, 1]} : vector<8x1024xf32> to vector<8x256xf32>
    %412 = arith.mulf %405, %394 : vector<8x256xf32>
    %413 = arith.mulf %404, %410 : vector<8x256xf32>
    %414 = arith.addf %412, %413 : vector<8x256xf32>
    %415 = math.tanh %414 : vector<8x256xf32>
    %416 = arith.mulf %411, %415 : vector<8x256xf32>
    %c224_i32_104 = arith.constant 224 : i32
    %417 = vector.broadcast %c224_i32_104 : i32 to vector<8x256xi32>
    %418 = arith.cmpi sge, %8, %417 : vector<8x256xi32>
    %c256_i32_105 = arith.constant 256 : i32
    %419 = vector.broadcast %c256_i32_105 : i32 to vector<8x256xi32>
    %420 = arith.cmpi slt, %8, %419 : vector<8x256xi32>
    %421 = arith.andi %418, %420 : vector<8x256xi1>
    %422 = arith.select %421, %416, %395 : vector<8x256xi1>, vector<8x256xf32>
    %c0_106 = arith.constant 0 : index
    %c0_107 = arith.constant 0 : index
    %423 = vector.load %arg5[%c0_106, %c0_107] : memref<256x128xf32, #tpu.memory_space<vmem>>, vector<256x128xf32>
    %cst_108 = arith.constant dense<0.000000e+00> : vector<8x128xf32>
    %424 = tpu.matmul %422, %423, %cst_108 {dimension_numbers = #tpu.dot_dimension_numbers<[1], [0], [0], [1], [0, 0, 1, 1], [], []>} : vector<8x256xf32>, vector<256x128xf32>, vector<8x128xf32> -> vector<8x128xf32>
    %c0_109 = arith.constant 0 : index
    %c0_110 = arith.constant 0 : index
    %425 = vector.load %arg6[%c0_109, %c0_110] : memref<1x128xf32, #tpu.memory_space<vmem>>, vector<1x128xf32>
    %426 = vector.broadcast %425 : vector<1x128xf32> to vector<8x128xf32>
    %427 = arith.addf %424, %426 : vector<8x128xf32>
    %c0_111 = arith.constant 0 : index
    %c0_112 = arith.constant 0 : index
    %428 = vector.load %arg7[%c0_111, %c0_112] : memref<8x128xf32, #tpu.memory_space<vmem>>, vector<8x128xf32>
    tpu.vector_store %arg7[%c0_111, %c0_112], %427 {strides = array<i32>} : memref<8x128xf32, #tpu.memory_space<vmem>>, vector<8x128xf32>,
    return
  }
  func.func @transform_0(%arg0: i32) -> (i32, i32) {
    %c0_i32 = arith.constant 0 : i32
    %c0_i32_0 = arith.constant 0 : i32
    %c0_i32_1 = arith.constant 0 : i32
    return %c0_i32, %c0_i32_0 : i32, i32
  }
  func.func @transform_1(%arg0: i32) -> (i32, i32) {
    %c0_i32 = arith.constant 0 : i32
    %c0_i32_0 = arith.constant 0 : i32
    %c0_i32_1 = arith.constant 0 : i32
    return %c0_i32, %c0_i32_0 : i32, i32
  }
  func.func @transform_2(%arg0: i32) -> (i32, i32) {
    %c0_i32 = arith.constant 0 : i32
    %c0_i32_0 = arith.constant 0 : i32
    %c0_i32_1 = arith.constant 0 : i32
    return %c0_i32, %c0_i32_0 : i32, i32
  }
  func.func @transform_3(%arg0: i32) -> (i32, i32) {
    %c0_i32 = arith.constant 0 : i32
    %c0_i32_0 = arith.constant 0 : i32
    %c0_i32_1 = arith.constant 0 : i32
    return %c0_i32, %c0_i32_0 : i32, i32
  }
  func.func @transform_4(%arg0: i32) -> (i32, i32) {
    %c0_i32 = arith.constant 0 : i32
    %c0_i32_0 = arith.constant 0 : i32
    %c0_i32_1 = arith.constant 0 : i32
    return %c0_i32, %c0_i32_0 : i32, i32
  }
  func.func @transform_5(%arg0: i32) -> (i32, i32) {
    %c0_i32 = arith.constant 0 : i32
    %c0_i32_0 = arith.constant 0 : i32
    %c0_i32_1 = arith.constant 0 : i32
    return %c0_i32, %c0_i32_0 : i32, i32
  }
  func.func @transform_6(%arg0: i32) -> (i32, i32) {
    %c0_i32 = arith.constant 0 : i32
    %c0_i32_0 = arith.constant 0 : i32
    %c0_i32_1 = arith.constant 0 : i32
    return %c0_i32, %c0_i32_0 : i32, i32
  }
}

</mosaic_0001>

<bundles_post_ra>
// kernel: lstm_forward.1
= control target key start
LH: loop header
LB: loop body
LE: loop exit
PB: predicated region body
PF: predicated region fallthrough
CT: control target
= control target key end

     0   :  { %11 = vsyncpa [#allocation4], 0  ;;  %s14500_s0 = inlined_call_operand.vmem [shape: f32[120,32], index: 0, kind: input, shape index: {}]   ;;  %s14501_s1 = inlined_call_operand.hbm [shape: f32[32,1024], index: 1, kind: input, shape index: {}]   ;;  %s14502_s2 = inlined_call_operand.hbm [shape: f32[256,1024], index: 2, kind: input, shape index: {}]   ;;  %s14503_s3 = inlined_call_operand.vmem [shape: f32[1,1024], index: 3, kind: input, shape index: {}]   ;;  %s14504_s4 = inlined_call_operand.hbm [shape: f32[256,128], index: 4, kind: input, shape index: {}]   ;;  %s14505_s5 = inlined_call_operand.vmem [shape: f32[1,128], index: 5, kind: input, shape index: {}]   ;;  %s14506_s6 = inlined_call_operand.vmem [shape: f32[8,128], index: 6, kind: output, shape index: {}]  }
   0x1   :  { %12 = vsyncpa [#allocation6], 0  ;;  %s11579_s21 = smov [#allocation5]   ;;  %s11580_s23 = smov [#allocation3]  }
   0x2   :  { %s32_s22 = sshll.u32 %s11579_s21, 4  ;;  %s20_s24 = sshll.u32 %s11580_s23, 4  ;;  %s33_s22 = int_to_ptr.vmem [resolvable:$true] %s32_s22  ;;  %s11622_s24 = int_to_ptr.vmem [resolvable:$true] %s20_s24 }
   0x3   :  { %s11509_s27 = scalar_lea.hbm %s14502_s2, 32768 }
   0x4   :  { %p11510_p0 = scmp.ne.s32.totalorder %s14502_s2, %s11509_s27  ;;  %p11513_p1 = scmp.lt.u32.totalorder %s11509_s27, %s14502_s2 }
   0x6   :  { %p11515_p2 = pnand %p11513_p1, %p11510_p0 }
   0x8   :  { %11518 = shalt.err (!%p11515_p2)
}
   0x9   :  { %s11519_s8 = scalar_lea.vmem %s33_s22, 32768  ;;  %p11524_p4 = scmp.lt.s32.totalorder %s33_s22, %s33_s22 }
   0xa   :  { %p11520_p3 = scmp.ne.s32.totalorder %s33_s22, %s11519_s8  ;;  %p11525_p5 = scmp.lt.s32.totalorder %s11519_s8, %s11519_s8 }
   0xc   :  { %p11526_p6 = por %p11525_p5, %p11524_p4 }
   0xe   :  { %p11527_p7 = pnand %p11526_p6, %p11520_p3 }
  0x10   :  { %11530 = shalt.err (!%p11527_p7)
}
  0x11   :  { %s11581_s9 = smov 1024   ;;  %s11582_s10 = smov 64  }
  0x12   :  { %38 = dma.hbm_to_vmem [thread:$0]  %s14502_s2, 32768, %s33_s22, [#allocation6], %s11581_s9, %s11581_s9, %s11582_s10  }
  0x13   :  { %s11531_s15 = scalar_lea.hbm %s14501_s1, 4096 }
  0x14   :  { %p11532_p8 = scmp.ne.s32.totalorder %s14501_s1, %s11531_s15  ;;  %p11535_p9 = scmp.lt.u32.totalorder %s11531_s15, %s14501_s1 }
  0x16   :  { %p11537_p10 = pnand %p11535_p9, %p11532_p8 }
  0x18   :  { %11540 = shalt.err (!%p11537_p10)
}
  0x19   :  { %s11541_s20 = scalar_lea.vmem %s11622_s24, 4096  ;;  %p11546_p12 = scmp.lt.s32.totalorder %s11622_s24, %s11622_s24 }
  0x1a   :  { %p11542_p11 = scmp.ne.s32.totalorder %s11622_s24, %s11541_s20  ;;  %p11547_p13 = scmp.lt.s32.totalorder %s11541_s20, %s11541_s20 }
  0x1c   :  { %p11548_p0 = por %p11547_p13, %p11546_p12 }
  0x1e   :  { %p11549_p1 = pnand %p11548_p0, %p11542_p11 }
  0x20   :  { %11552 = shalt.err (!%p11549_p1)
}
  0x21   :  { %26 = dma.hbm_to_vmem [thread:$0]  %s14501_s1, 4096, %s11622_s24, [#allocation4], %s11581_s9, %s11581_s9, %s11582_s10  }
  0x22   :  { %s11583_s22 = smov [#allocation7]   ;;  %s11553_s27 = scalar_lea.hbm %s14504_s4, 4096 }
  0x23   :  { %s46_s23 = sshll.u32 %s11583_s22, 4  ;;  %p11554_p2 = scmp.ne.s32.totalorder %s14504_s4, %s11553_s27  ;;  %s47_s23 = int_to_ptr.vmem [resolvable:$true] %s46_s23 }
  0x24   :  { %p11557_p3 = scmp.lt.u32.totalorder %s11553_s27, %s14504_s4 }
  0x26   :  { %p11559_p4 = pnand %p11557_p3, %p11554_p2 }
  0x28   :  { %11562 = shalt.err (!%p11559_p4)
}
  0x29   :  { %s11563_s8 = scalar_lea.vmem %s47_s23, 4096  ;;  %p11568_p6 = scmp.lt.s32.totalorder %s47_s23, %s47_s23 }
  0x2a   :  { %p11564_p5 = scmp.ne.s32.totalorder %s47_s23, %s11563_s8  ;;  %p11569_p7 = scmp.lt.s32.totalorder %s11563_s8, %s11563_s8 }
  0x2c   :  { %p11570_p8 = por %p11569_p7, %p11568_p6 }
  0x2e   :  { %p11571_p9 = pnand %p11570_p8, %p11564_p5 }
  0x30   :  { %11574 = shalt.err (!%p11571_p9)
}
  0x31   :  { %s11584_s1 = smov 128   ;;  %s11585_s24 = smov 8  }
  0x32   :  { %52 = dma.hbm_to_vmem [thread:$0]  %s14504_s4, 4096, %s47_s23, [#allocation6], %s11584_s1, %s11584_s1, %s11585_s24  }
  0x33   :  { %11575 = dma.done.wait [#allocation4], 4096  }
  0x34   :  { %11576 = vsyncadd [#allocation4], 4294963200 }
  0x35   :  { %11577 = dma.done.wait [#allocation6], 36864  }
  0x36   :  { %11578 = vsyncadd [#allocation6], 4294930432  ;;  %v14507_v0 = vmov 0.0   ;;  %v80_v1 = vld [vmem:[#allocation3 + $0x8] sm:$0xff]  ;;  %v79_v3 = vld [vmem:[#allocation3] sm:$0xff]  ;;  %vm153_vm0 = vcmask 261120  }
  0x37   :  { %263 = vmatprep.mubr.f32.mxu0 %v14507_v0  ;;  %329 = vmatprep.mubr.f32.mxu1 %v14507_v0  ;;  %v88_v2 = vld [vmem:[#allocation3 + $0x48] sm:$0xff]  ;;  %v87_v5 = vld [vmem:[#allocation3 + $0x40] sm:$0xff]  ;;  %v82_v12 = vld [vmem:[#allocation3 + $0x18] sm:$0xff] }
  0x38   :  { %v6992_v4 = vpack.c.bf16 %v88_v2, %v80_v1  ;;  %v96_v6 = vld [vmem:[#allocation3 + $0x88] sm:$0xff]  ;;  %v6994_v8 = vpack.c.bf16 %v87_v5, %v79_v3  ;;  %v95_v10 = vld [vmem:[#allocation3 + $0x80] sm:$0xff]  ;;  %v90_v13 = vld [vmem:[#allocation3 + $0x58] sm:$0xff] }
  0x39   :  { %v104_v7 = vld [vmem:[#allocation3 + $0xc8] sm:$0xff]  ;;  %v103_v11 = vld [vmem:[#allocation3 + $0xc0] sm:$0xff]  ;;  %v7000_v15 = vpack.c.bf16 %v90_v13, %v82_v12  ;;  %v81_v16 = vld [vmem:[#allocation3 + $0x10] sm:$0xff] }
  0x3a   :  { %v6996_v9 = vpack.c.bf16 %v104_v7, %v96_v6  ;;  %6993 = vmatprep.subr.bf16.mxu0 %v6992_v4  ;;  %10896 = vmatprep.subr.bf16.mxu1 %v6992_v4  ;;  %v6998_v14 = vpack.c.bf16 %v103_v11, %v95_v10  ;;  %v89_v17 = vld [vmem:[#allocation3 + $0x50] sm:$0xff]  ;;  %v98_v18 = vld [vmem:[#allocation3 + $0x98] sm:$0xff]  ;;  %v11670_v20 = vld [vmem:[%s14500_s0] sm:$0xff] }
  0x3b   :  { %6995 = vmatpush1.bf16.msra.mxu0 %v6994_v8  ;;  %10898 = vmatpush1.bf16.msra.mxu1 %v6994_v8  ;;  %v106_v19 = vld [vmem:[#allocation3 + $0xd8] sm:$0xff]  ;;  %v7002_v22 = vpack.c.bf16 %v89_v17, %v81_v16  ;;  %v84_v23 = vld [vmem:[#allocation3 + $0x28] sm:$0xff]  ;;  %v97_v26 = vld [vmem:[#allocation3 + $0x90] sm:$0xff] }
  0x3c   :  { %6997 = vmatprep.subr.bf16.mxu0 %v6996_v9  ;;  %10897 = vmatprep.subr.bf16.mxu1 %v6996_v9  ;;  %v11675_v21 = vld [vmem:[%s14500_s0 + $0x58] sm:$0xff]  ;;  %v92_v24 = vld [vmem:[#allocation3 + $0x68] sm:$0xff]  ;;  %v7004_v25 = vpack.c.bf16 %v106_v19, %v98_v18  ;;  %v105_v27 = vld [vmem:[#allocation3 + $0xd0] sm:$0xff] }
  0x3d   :  { %v7008_v28 = vpack.c.bf16 %v92_v24, %v84_v23  ;;  %v83_v29 = vld [vmem:[#allocation3 + $0x20] sm:$0xff]  ;;  %v11684_v31 = vld [vmem:[%s14500_s0 + $0x8] sm:$0xff]  ;;  %v86_v32 = vld [vmem:[#allocation3 + $0x38] sm:$0xff]  ;;  %v7006_v37 = vpack.c.bf16 %v105_v27, %v97_v26 }
  0x3e   :  { %v91_v30 = vld [vmem:[#allocation3 + $0x60] sm:$0xff]  ;;  %v94_v33 = vld [vmem:[#allocation3 + $0x78] sm:$0xff]  ;;  %v100_v35 = vld [vmem:[#allocation3 + $0xa8] sm:$0xff] }
  0x3f   :  { %6999 = vmatpush1.bf16.msra.mxu0 %v6998_v14  ;;  %10899 = vmatpush1.bf16.msra.mxu1 %v6998_v14  ;;  %v11690_v34 = vld [vmem:[%s14500_s0 + $0x60] sm:$0xff]  ;;  %v108_v36 = vld [vmem:[#allocation3 + $0xe8] sm:$0xff]  ;;  %v7010_v38 = vpack.c.bf16 %v91_v30, %v83_v29  ;;  %v7016_v39 = vpack.c.bf16 %v94_v33, %v86_v32  ;;  %v11702_v45 = vld [vmem:[%s14500_s0 + $0x10] sm:$0xff] }
  0x40   :  { %7001 = vmatprep.subr.bf16.mxu1 %v7000_v15  ;;  %7009 = vmatprep.subr.bf16.mxu0 %v7008_v28  ;;  %v7012_v40 = vpack.c.bf16 %v108_v36, %v100_v35  ;;  %v99_v41 = vld [vmem:[#allocation3 + $0xa0] sm:$0xff]  ;;  %v940_v43 = vld [vmem:[#allocation5 + $0x8] sm:$0xff]  ;;  %v11720_v49 = vld [vmem:[%s14500_s0 + $0x18] sm:$0xff] }
  0x41   :  { %v107_v42 = vld [vmem:[#allocation3 + $0xe0] sm:$0xff]  ;;  %v948_v44 = vld [vmem:[#allocation5 + $0x48] sm:$0xff]  ;;  %v11725_v50 = vld [vmem:[%s14500_s0 + $0x70] sm:$0xff] }
  0x42   :  { %6738 = vmatmul.mubr.msk.f32.vlgmr.msra.gmra.mrb[0].mxu0 %vm153_vm0, %v11670_v20  ;;  %6749 = vmatmul.mubr.msk.f32.vlgmr.msra.gmra.mrb[0].mxu1 %vm153_vm0, %v11675_v21  ;;  %v11707_v46 = vld [vmem:[%s14500_s0 + $0x68] sm:$0xff]  ;;  %v7014_v47 = vpack.c.bf16 %v107_v42, %v99_v41  ;;  %v11709_v48 = vpack.c.bf16 %v948_v44, %v940_v43  ;;  %v85_v51 = vld [vmem:[#allocation3 + $0x30] sm:$0xff]  ;;  %v102_v53 = vld [vmem:[#allocation3 + $0xb8] sm:$0xff] }
  0x43   :  { %7003 = vmatpush1.bf16.msra.mxu1 %v7002_v22  ;;  %269 = vmatprep.mubr.f32.mxu0 %v14507_v0  ;;  %v93_v52 = vld [vmem:[#allocation3 + $0x70] sm:$0xff]  ;;  %v110_v54 = vld [vmem:[#allocation3 + $0xf8] sm:$0xff]  ;;  %v11737_v55 = vld [vmem:[%s14500_s0 + $0x20] sm:$0xff] }
  0x44   :  { %335 = vmatprep.mubr.f32.mxu1 %v14507_v0  ;;  %7005 = vmatprep.subr.bf16.mxu1 %v7004_v25  ;;  %14819 = vst [vmem:[#allocation10_spill] sm:$0xff] %v11709_v48  ;;  %v7018_v56 = vpack.c.bf16 %v93_v52, %v85_v51  ;;  %v7020_v57 = vpack.c.bf16 %v110_v54, %v102_v53  ;;  %v101_v58 = vld [vmem:[#allocation3 + $0xb0] sm:$0xff]  ;;  %v942_v60 = vld [vmem:[#allocation5 + $0x18] sm:$0xff]  ;;  %v11747_v62 = vld [vmem:[%s14500_s0 + $0x28] sm:$0xff] }
  0x45   :  { %7011 = vmatpush1.bf16.msra.mxu0 %v7010_v38  ;;  %v109_v59 = vld [vmem:[#allocation3 + $0xf0] sm:$0xff]  ;;  %v950_v61 = vld [vmem:[#allocation5 + $0x58] sm:$0xff]  ;;  %v11784_v4 = vld [vmem:[%s14500_s0 + $0x40] sm:$0xff] }
  0x46   :  { %6739 = vmatmul.mubr.msk.f32.gmra.mrb[2].mxu0 %vm153_vm0, %v11684_v31  ;;  %6750 = vmatmul.mubr.msk.f32.gmra.mrb[2].mxu1 %vm153_vm0, %v11690_v34  ;;  %v7022_v63 = vpack.c.bf16 %v109_v59, %v101_v58  ;;  %v11750_v1 = vpack.c.bf16 %v950_v61, %v942_v60  ;;  %v11761_v2 = vld [vmem:[%s14500_s0 + $0x30] sm:$0xff]  ;;  %v11773_v3 = vld [vmem:[%s14500_s0 + $0x38] sm:$0xff]  ;;  %v11795_v5 = vld [vmem:[%s14500_s0 + $0x48] sm:$0xff] }
  0x47   :  { %275 = vmatprep.mubr.f32.mxu0 %v14507_v0  ;;  %341 = vmatprep.mubr.f32.mxu1 %v14507_v0  ;;  %v11806_v6 = vld [vmem:[%s14500_s0 + $0x50] sm:$0xff]  ;;  %v939_v7 = vld [vmem:[#allocation5] sm:$0xff]  ;;  %v956_v9 = vld [vmem:[#allocation5 + $0x88] sm:$0xff] }
  0x48   :  { %7007 = vmatpush1.bf16.msra.mxu1 %v7006_v37  ;;  %7013 = vmatprep.subr.bf16.mxu0 %v7012_v40  ;;  %14820 = vst [vmem:[#allocation11_spill] sm:$0xff] %v11750_v1  ;;  %v947_v8 = vld [vmem:[#allocation5 + $0x40] sm:$0xff]  ;;  %v964_v10 = vld [vmem:[#allocation5 + $0xc8] sm:$0xff] }
  0x49   :  { %7017 = vmatprep.subr.bf16.mxu1 %v7016_v39  ;;  %7015 = vmatpush1.bf16.msra.mxu0 %v7014_v47  ;;  %v11814_v11 = vpack.c.bf16 %v947_v8, %v939_v7  ;;  %v11816_v12 = vpack.c.bf16 %v964_v10, %v956_v9  ;;  %v955_v13 = vld [vmem:[#allocation5 + $0x80] sm:$0xff]  ;;  %v972_v15 = vld [vmem:[#allocation5 + $0x108] sm:$0xff] }
  0x4a   :  { %6740 = vmatmul.mubr.msk.f32.gmra.mrb[4].mxu0 %vm153_vm0, %v11702_v45  ;;  %6751 = vmatmul.mubr.msk.f32.gmra.mrb[4].mxu1 %vm153_vm0, %v11707_v46  ;;  %v963_v14 = vld [vmem:[#allocation5 + $0xc0] sm:$0xff]  ;;  %v980_v16 = vld [vmem:[#allocation5 + $0x148] sm:$0xff] }
  0x4b   :  { %281 = vmatprep.mubr.f32.mxu0 %v14507_v0  ;;  %347 = vmatprep.mubr.f32.mxu1 %v14507_v0  ;;  %14821 = vst [vmem:[#allocation12_spill] sm:$0xff] %v11814_v11  ;;  %14822 = vst [vmem:[#allocation13_spill] sm:$0xff] %v11816_v12  ;;  %v11824_v17 = vpack.c.bf16 %v963_v14, %v955_v13  ;;  %v11828_v18 = vpack.c.bf16 %v980_v16, %v972_v15  ;;  %v971_v19 = vld [vmem:[#allocation5 + $0x100] sm:$0xff]  ;;  %v988_v23 = vld [vmem:[#allocation5 + $0x188] sm:$0xff] }
  0x4c   :  { %7025 = vmatprep.subr.bf16.mxu0 %v11709_v48  ;;  %v979_v22 = vld [vmem:[#allocation5 + $0x140] sm:$0xff]  ;;  %v996_v24 = vld [vmem:[#allocation5 + $0x1c8] sm:$0xff]  ;;  %v941_v13 = vld [vmem:[#allocation5 + $0x10] sm:$0xff] }
  0x4d   :  { %14823 = vst [vmem:[#allocation14_spill] sm:$0xff] %v11824_v17  ;;  %14824 = vst [vmem:[#allocation15_spill] sm:$0xff] %v11828_v18  ;;  %v11836_v25 = vpack.c.bf16 %v979_v22, %v971_v19  ;;  %v11840_v26 = vpack.c.bf16 %v996_v24, %v988_v23  ;;  %v987_v27 = vld [vmem:[#allocation5 + $0x180] sm:$0xff]  ;;  %v1004_v29 = vld [vmem:[#allocation5 + $0x208] sm:$0xff] }
  0x4e   :  { %6741 = vmatmul.mubr.msk.f32.gmra.mrb[6].mxu0 %vm153_vm0, %v11720_v49  ;;  %6752 = vmatmul.mubr.msk.f32.gmra.mrb[6].mxu1 %vm153_vm0, %v11725_v50  ;;  %v995_v28 = vld [vmem:[#allocation5 + $0x1c0] sm:$0xff]  ;;  %v1012_v30 = vld [vmem:[#allocation5 + $0x248] sm:$0xff]  ;;  %v949_v14 = vld [vmem:[#allocation5 + $0x50] sm:$0xff] }
  0x4f   :  { %287 = vmatprep.mubr.f32.mxu0 %v14507_v0  ;;  %418 = vmatprep.mubr.f32.mxu1 %v14507_v0  ;;  %14825 = vst [vmem:[#allocation16_spill] sm:$0xff] %v11836_v25  ;;  %14826 = vst [vmem:[#allocation17_spill] sm:$0xff] %v11840_v26  ;;  %v11848_v32 = vpack.c.bf16 %v995_v28, %v987_v27  ;;  %v11852_v33 = vpack.c.bf16 %v1012_v30, %v1004_v29  ;;  %v1003_v35 = vld [vmem:[#allocation5 + $0x200] sm:$0xff]  ;;  %v1020_v37 = vld [vmem:[#allocation5 + $0x288] sm:$0xff] }
  0x50   :  { %v1011_v36 = vld [vmem:[#allocation5 + $0x240] sm:$0xff]  ;;  %v1028_v38 = vld [vmem:[#allocation5 + $0x2c8] sm:$0xff]  ;;  %v958_v19 = vld [vmem:[#allocation5 + $0x98] sm:$0xff]  ;;  %v11910_v24 = vpack.c.bf16 %v949_v14, %v941_v13 }
  0x51   :  { %14827 = vst [vmem:[#allocation18_spill] sm:$0xff] %v11848_v32  ;;  %14828 = vst [vmem:[#allocation19_spill] sm:$0xff] %v11852_v33  ;;  %v11860_v39 = vpack.c.bf16 %v1011_v36, %v1003_v35  ;;  %v11864_v40 = vpack.c.bf16 %v1028_v38, %v1020_v37  ;;  %v1019_v41 = vld [vmem:[#allocation5 + $0x280] sm:$0xff]  ;;  %v1036_v43 = vld [vmem:[#allocation5 + $0x308] sm:$0xff] }
  0x52   :  { %6742 = vmatmul.mubr.msk.f32.gmra.mrb[8].mxu0 %vm153_vm0, %v11737_v55  ;;  %6753 = vmatmul.mubr.msk.f32.vlgmr.msra.gmra.mrb[8].mxu1 %vm153_vm0, %v11670_v20  ;;  %v1027_v42 = vld [vmem:[#allocation5 + $0x2c0] sm:$0xff]  ;;  %v1044_v44 = vld [vmem:[#allocation5 + $0x348] sm:$0xff]  ;;  %v966_v22 = vld [vmem:[#allocation5 + $0xd8] sm:$0xff]  ;;  %14838 = vst [vmem:[#allocation29_spill] sm:$0xff] %v11910_v24 }
  0x53   :  { %7019 = vmatpush1.bf16.msra.mxu1 %v7018_v56  ;;  %293 = vmatprep.mubr.f32.mxu0 %v14507_v0  ;;  %14829 = vst [vmem:[#allocation20_spill] sm:$0xff] %v11860_v39  ;;  %14830 = vst [vmem:[#allocation21_spill] sm:$0xff] %v11864_v40  ;;  %v11872_v47 = vpack.c.bf16 %v1027_v42, %v1019_v41  ;;  %v11876_v51 = vpack.c.bf16 %v1044_v44, %v1036_v43  ;;  %v1035_v52 = vld [vmem:[#allocation5 + $0x300] sm:$0xff]  ;;  %v1052_v54 = vld [vmem:[#allocation5 + $0x388] sm:$0xff] }
  0x54   :  { %424 = vmatprep.mubr.f32.mxu1 %v14507_v0  ;;  %7021 = vmatprep.subr.bf16.mxu1 %v7020_v57  ;;  %v1043_v53 = vld [vmem:[#allocation5 + $0x340] sm:$0xff]  ;;  %v1060_v56 = vld [vmem:[#allocation5 + $0x3c8] sm:$0xff]  ;;  %v11916_v30 = vpack.c.bf16 %v966_v22, %v958_v19  ;;  %v957_v35 = vld [vmem:[#allocation5 + $0x90] sm:$0xff] }
  0x55   :  { %14831 = vst [vmem:[#allocation22_spill] sm:$0xff] %v11872_v47  ;;  %14832 = vst [vmem:[#allocation23_spill] sm:$0xff] %v11876_v51  ;;  %v11884_v57 = vpack.c.bf16 %v1043_v53, %v1035_v52  ;;  %v11888_v58 = vpack.c.bf16 %v1060_v56, %v1052_v54  ;;  %v1051_v59 = vld [vmem:[#allocation5 + $0x380] sm:$0xff]  ;;  %v1068_v61 = vld [vmem:[#allocation5 + $0x408] sm:$0xff] }
  0x56   :  { %6743 = vmatmul.mubr.msk.f32.gmra.mrb[10].mxu0 %vm153_vm0, %v11747_v62  ;;  %6754 = vmatmul.mubr.msk.f32.gmra.mrb[10].mxu1 %vm153_vm0, %v11684_v31  ;;  %v1059_v60 = vld [vmem:[#allocation5 + $0x3c0] sm:$0xff]  ;;  %v1084_v15 = vld [vmem:[#allocation5 + $0x488] sm:$0xff]  ;;  %14840 = vst [vmem:[#allocation31_spill] sm:$0xff] %v11916_v30  ;;  %v965_v36 = vld [vmem:[#allocation5 + $0xd0] sm:$0xff] }
  0x57   :  { %299 = vmatprep.mubr.f32.mxu0 %v14507_v0  ;;  %430 = vmatprep.mubr.f32.mxu1 %v14507_v0  ;;  %14833 = vst [vmem:[#allocation24_spill] sm:$0xff] %v11884_v57  ;;  %14834 = vst [vmem:[#allocation25_spill] sm:$0xff] %v11888_v58  ;;  %v11896_v7 = vpack.c.bf16 %v1059_v60, %v1051_v59  ;;  %v1067_v8 = vld [vmem:[#allocation5 + $0x400] sm:$0xff]  ;;  %v1092_v16 = vld [vmem:[#allocation5 + $0x4c8] sm:$0xff]  ;;  %v11926_v44 = vpack.c.bf16 %v965_v36, %v957_v35 }
  0x58   :  { %7023 = vmatpush1.bf16.msra.mxu1 %v7022_v63  ;;  %v1076_v63 = vld [vmem:[#allocation5 + $0x448] sm:$0xff]  ;;  %v1075_v9 = vld [vmem:[#allocation5 + $0x440] sm:$0xff]  ;;  %v11914_v29 = vpack.c.bf16 %v1092_v16, %v1084_v15  ;;  %v974_v41 = vld [vmem:[#allocation5 + $0x118] sm:$0xff] }
  0x59   :  { %7089 = vmatprep.subr.bf16.mxu1 %v11750_v1  ;;  %14835 = vst [vmem:[#allocation26_spill] sm:$0xff] %v11896_v7  ;;  %v11900_v10 = vpack.c.bf16 %v1076_v63, %v1068_v61  ;;  %v11908_v23 = vpack.c.bf16 %v1075_v9, %v1067_v8  ;;  %v1083_v27 = vld [vmem:[#allocation5 + $0x480] sm:$0xff]  ;;  %v1100_v37 = vld [vmem:[#allocation5 + $0x508] sm:$0xff]  ;;  %v982_v42 = vld [vmem:[#allocation5 + $0x158] sm:$0xff] }
  0x5a   :  { %6744 = vmatmul.mubr.msk.f32.gmra.mrb[12].mxu0 %vm153_vm0, %v11761_v2  ;;  %6755 = vmatmul.mubr.msk.f32.gmra.mrb[12].mxu1 %vm153_vm0, %v11702_v45  ;;  %v1091_v28 = vld [vmem:[#allocation5 + $0x4c0] sm:$0xff]  ;;  %14839 = vst [vmem:[#allocation30_spill] sm:$0xff] %v11914_v29  ;;  %v1108_v38 = vld [vmem:[#allocation5 + $0x548] sm:$0xff]  ;;  %14842 = vst [vmem:[#allocation33_spill] sm:$0xff] %v11926_v44 }
  0x5b   :  { %305 = vmatprep.mubr.f32.mxu0 %v14507_v0  ;;  %436 = vmatprep.mubr.f32.mxu1 %v14507_v0  ;;  %14836 = vst [vmem:[#allocation27_spill] sm:$0xff] %v11900_v10  ;;  %14837 = vst [vmem:[#allocation28_spill] sm:$0xff] %v11908_v23  ;;  %v11924_v43 = vpack.c.bf16 %v1091_v28, %v1083_v27  ;;  %v1099_v52 = vld [vmem:[#allocation5 + $0x500] sm:$0xff]  ;;  %v11930_v54 = vpack.c.bf16 %v1108_v38, %v1100_v37  ;;  %v973_v56 = vld [vmem:[#allocation5 + $0x110] sm:$0xff] }
  0x5c   :  { %v1107_v53 = vld [vmem:[#allocation5 + $0x540] sm:$0xff]  ;;  %v981_v59 = vld [vmem:[#allocation5 + $0x150] sm:$0xff]  ;;  %v1116_v60 = vld [vmem:[#allocation5 + $0x588] sm:$0xff] }
  0x5d   :  { %14841 = vst [vmem:[#allocation32_spill] sm:$0xff] %v11924_v43  ;;  %14843 = vst [vmem:[#allocation34_spill] sm:$0xff] %v11930_v54  ;;  %v1124_v61 = vld [vmem:[#allocation5 + $0x5c8] sm:$0xff]  ;;  %v990_v63 = vld [vmem:[#allocation5 + $0x198] sm:$0xff]  ;;  %v11942_v9 = vpack.c.bf16 %v1107_v53, %v1099_v52  ;;  %v11944_v13 = vpack.c.bf16 %v981_v59, %v973_v56 }
  0x5e   :  { %6745 = vmatmul.mubr.msk.f32.gmra.mrb[14].mxu0 %vm153_vm0, %v11773_v3  ;;  %6756 = vmatmul.mubr.msk.f32.gmra.mrb[14].mxu1 %vm153_vm0, %v11720_v49  ;;  %v998_v8 = vld [vmem:[#allocation5 + $0x1d8] sm:$0xff]  ;;  %v1115_v14 = vld [vmem:[#allocation5 + $0x580] sm:$0xff]  ;;  %v11948_v16 = vpack.c.bf16 %v1124_v61, %v1116_v60  ;;  %v989_v22 = vld [vmem:[#allocation5 + $0x190] sm:$0xff] }
  0x5f   :  { %311 = vmatprep.mubr.f32.mxu0 %v14507_v0  ;;  %442 = vmatprep.mubr.f32.mxu1 %v14507_v0  ;;  %14845 = vst [vmem:[#allocation36_spill] sm:$0xff] %v11942_v9  ;;  %14846 = vst [vmem:[#allocation37_spill] sm:$0xff] %v11944_v13  ;;  %v1123_v15 = vld [vmem:[#allocation5 + $0x5c0] sm:$0xff]  ;;  %v11950_v19 = vpack.c.bf16 %v998_v8, %v990_v63  ;;  %v1132_v27 = vld [vmem:[#allocation5 + $0x608] sm:$0xff] }
  0x60   :  { %14847 = vst [vmem:[#allocation38_spill] sm:$0xff] %v11948_v16  ;;  %v1140_v28 = vld [vmem:[#allocation5 + $0x648] sm:$0xff]  ;;  %v1006_v35 = vld [vmem:[#allocation5 + $0x218] sm:$0xff]  ;;  %v11960_v37 = vpack.c.bf16 %v1123_v15, %v1115_v14  ;;  %v1005_v56 = vld [vmem:[#allocation5 + $0x210] sm:$0xff] }
  0x61   :  { %14848 = vst [vmem:[#allocation39_spill] sm:$0xff] %v11950_v19  ;;  %v1014_v36 = vld [vmem:[#allocation5 + $0x258] sm:$0xff]  ;;  %v11966_v52 = vpack.c.bf16 %v1140_v28, %v1132_v27  ;;  %v1148_v59 = vld [vmem:[#allocation5 + $0x688] sm:$0xff]  ;;  %v1147_v15 = vld [vmem:[#allocation5 + $0x680] sm:$0xff] }
  0x62   :  { %6746 = vmatmul.mubr.msk.f32.gmra.mrb[16].mxu0 %vm153_vm0, %v11784_v4  ;;  %6757 = vmatmul.mubr.msk.f32.gmra.mrb[16].mxu1 %vm153_vm0, %v11737_v55  ;;  %14849 = vst [vmem:[#allocation40_spill] sm:$0xff] %v11960_v37  ;;  %v11968_v53 = vpack.c.bf16 %v1014_v36, %v1006_v35  ;;  %v1156_v60 = vld [vmem:[#allocation5 + $0x6c8] sm:$0xff]  ;;  %v1022_v61 = vld [vmem:[#allocation5 + $0x298] sm:$0xff]  ;;  %v1021_v28 = vld [vmem:[#allocation5 + $0x290] sm:$0xff] }
  0x63   :  { %317 = vmatprep.mubr.f32.mxu0 %v14507_v0  ;;  %448 = vmatprep.mubr.f32.mxu1 %v14507_v0  ;;  %14851 = vst [vmem:[#allocation42_spill] sm:$0xff] %v11966_v52  ;;  %v1030_v63 = vld [vmem:[#allocation5 + $0x2d8] sm:$0xff]  ;;  %v1164_v35 = vld [vmem:[#allocation5 + $0x708] sm:$0xff] }
  0x64   :  { %14852 = vst [vmem:[#allocation43_spill] sm:$0xff] %v11968_v53  ;;  %v11986_v27 = vpack.c.bf16 %v1030_v63, %v1022_v61  ;;  %v1172_v36 = vld [vmem:[#allocation5 + $0x748] sm:$0xff] }
  0x65   :  { %v12002_v61 = vpack.c.bf16 %v1172_v36, %v1164_v35  ;;  %v1179_v36 = vld [vmem:[#allocation5 + $0x780] sm:$0xff] }
  0x66   :  { %6747 = vmatmul.mubr.msk.f32.gmra.mrb[18].mxu0 %vm153_vm0, %v11795_v5  ;;  %6758 = vmatmul.mubr.msk.f32.gmra.mrb[18].mxu1 %vm153_vm0, %v11747_v62  ;;  %14856 = vst [vmem:[#allocation47_spill] sm:$0xff] %v11986_v27 }
  0x67   :  { %323 = vmatprep.mubr.f32.mxu0 %v14507_v0  ;;  %454 = vmatprep.mubr.f32.mxu1 %v14507_v0  ;;  %14859 = vst [vmem:[#allocation50_spill] sm:$0xff] %v12002_v61 }
  0x6a   :  { %6748 = vmatmul.mubr.msk.f32.gmra.mrb[20].mxu0 %vm153_vm0, %v11806_v6  ;;  %6759 = vmatmul.mubr.msk.f32.gmra.mrb[20].mxu1 %vm153_vm0, %v11761_v2 }
  0x6b   :  { %460 = vmatprep.mubr.f32.mxu1 %v14507_v0  ;;  %573 = vmatprep.mubr.f32.mxu0 %v14507_v0 }
  0x6e   :  { %6760 = vmatmul.mubr.msk.f32.gmra.mrb[22].mxu1 %vm153_vm0, %v11773_v3  ;;  %6768 = vmatmul.mubr.msk.f32.vlgmr.msra.gmra.mrb[22].mxu0 %vm153_vm0, %v11670_v20 }
  0x6f   :  { %7027 = vmatpush1.bf16.msra.mxu0 %v11814_v11  ;;  %466 = vmatprep.mubr.f32.mxu1 %v14507_v0 }
  0x70   :  { %7029 = vmatprep.subr.bf16.mxu0 %v11816_v12  ;;  %579 = vmatprep.mubr.f32.mxu0 %v14507_v0 }
  0x72   :  { %6761 = vmatmul.mubr.msk.f32.gmra.mrb[24].mxu1 %vm153_vm0, %v11784_v4  ;;  %6769 = vmatmul.mubr.msk.f32.gmra.mrb[24].mxu0 %vm153_vm0, %v11684_v31 }
  0x73   :  { %7031 = vmatpush1.bf16.msra.mxu0 %v11824_v17  ;;  %472 = vmatprep.mubr.f32.mxu1 %v14507_v0 }
  0x74   :  { %7033 = vmatprep.subr.bf16.mxu0 %v11828_v18  ;;  %585 = vmatprep.mubr.f32.mxu0 %v14507_v0 }
  0x76   :  { %6762 = vmatmul.mubr.msk.f32.gmra.mrb[26].mxu1 %vm153_vm0, %v11795_v5  ;;  %6770 = vmatmul.mubr.msk.f32.gmra.mrb[26].mxu0 %vm153_vm0, %v11702_v45 }
  0x77   :  { %7035 = vmatpush1.bf16.msra.mxu0 %v11836_v25  ;;  %478 = vmatprep.mubr.f32.mxu1 %v14507_v0 }
  0x78   :  { %7037 = vmatprep.subr.bf16.mxu0 %v11840_v26  ;;  %591 = vmatprep.mubr.f32.mxu0 %v14507_v0 }
  0x7a   :  { %6763 = vmatmul.mubr.msk.f32.gmra.mrb[28].mxu1 %vm153_vm0, %v11806_v6  ;;  %6771 = vmatmul.mubr.msk.f32.gmra.mrb[28].mxu0 %vm153_vm0, %v11720_v49 }
  0x7b   :  { %7039 = vmatpush1.bf16.msra.mxu0 %v11848_v32  ;;  %484 = vmatprep.mubr.f32.mxu1 %v14507_v0 }
  0x7c   :  { %7041 = vmatprep.subr.bf16.mxu0 %v11852_v33  ;;  %597 = vmatprep.mubr.f32.mxu0 %v14507_v0 }
  0x7e   :  { %6764 = vmatmul.mubr.msk.f32.gmra.mrb[30].mxu1 %vm153_vm0, %v11675_v21  ;;  %6772 = vmatmul.mubr.msk.f32.gmra.mrb[30].mxu0 %vm153_vm0, %v11737_v55 }
  0x7f   :  { %7043 = vmatpush1.bf16.msra.mxu0 %v11860_v39  ;;  %490 = vmatprep.mubr.f32.mxu1 %v14507_v0 }
  0x80   :  { %7045 = vmatprep.subr.bf16.mxu0 %v11864_v40  ;;  %603 = vmatprep.mubr.f32.mxu0 %v14507_v0 }
  0x82   :  { %6765 = vmatmul.mubr.msk.f32.gmra.mrb[32].mxu1 %vm153_vm0, %v11690_v34  ;;  %6773 = vmatmul.mubr.msk.f32.gmra.mrb[32].mxu0 %vm153_vm0, %v11747_v62 }
  0x83   :  { %7047 = vmatpush1.bf16.msra.mxu0 %v11872_v47  ;;  %496 = vmatprep.mubr.f32.mxu1 %v14507_v0 }
  0x84   :  { %7049 = vmatprep.subr.bf16.mxu0 %v11876_v51  ;;  %609 = vmatprep.mubr.f32.mxu0 %v14507_v0 }
  0x86   :  { %6766 = vmatmul.mubr.msk.f32.gmra.mrb[34].mxu1 %vm153_vm0, %v11707_v46  ;;  %6774 = vmatmul.mubr.msk.f32.gmra.mrb[34].mxu0 %vm153_vm0, %v11761_v2 }
  0x87   :  { %7051 = vmatpush1.bf16.msra.mxu0 %v11884_v57  ;;  %502 = vmatprep.mubr.f32.mxu1 %v14507_v0 }
  0x88   :  { %7053 = vmatprep.subr.bf16.mxu0 %v11888_v58  ;;  %615 = vmatprep.mubr.f32.mxu0 %v14507_v0 }
  0x8a   :  { %6767 = vmatmul.mubr.msk.f32.gmra.mrb[36].mxu1 %vm153_vm0, %v11725_v50  ;;  %6775 = vmatmul.mubr.msk.f32.gmra.mrb[36].mxu0 %vm153_vm0, %v11773_v3 }
  0x8b   :  { %7055 = vmatpush1.bf16.msra.mxu0 %v11896_v7  ;;  %728 = vmatprep.mubr.f32.mxu1 %v14507_v0 }
  0x8c   :  { %7057 = vmatprep.subr.bf16.mxu0 %v11900_v10  ;;  %621 = vmatprep.mubr.f32.mxu0 %v14507_v0 }
  0x8e   :  { %6783 = vmatmul.mubr.msk.f32.vlgmr.msra.gmra.mrb[38].mxu1 %vm153_vm0, %v11670_v20  ;;  %6776 = vmatmul.mubr.msk.f32.gmra.mrb[38].mxu0 %vm153_vm0, %v11784_v4  ;;  %v11932_v20 = vpack.c.bf16 %v982_v42, %v974_v41  ;;  %v1131_v41 = vld [vmem:[#allocation5 + $0x600] sm:$0xff] }
  0x8f   :  { %7059 = vmatpush1.bf16.msra.mxu0 %v11908_v23  ;;  %7091 = vmatpush1.bf16.msra.mxu1 %v11910_v24  ;;  %v1139_v42 = vld [vmem:[#allocation5 + $0x640] sm:$0xff] }
  0x90   :  { %7061 = vmatprep.subr.bf16.mxu0 %v11914_v29  ;;  %7093 = vmatprep.subr.bf16.mxu1 %v11916_v30  ;;  %14844 = vst [vmem:[#allocation35_spill] sm:$0xff] %v11932_v20  ;;  %v11978_v8 = vpack.c.bf16 %v1139_v42, %v1131_v41  ;;  %v1038_v41 = vld [vmem:[#allocation5 + $0x318] sm:$0xff] }
  0x91   :  { %627 = vmatprep.mubr.f32.mxu0 %v14507_v0  ;;  %734 = vmatprep.mubr.f32.mxu1 %v14507_v0  ;;  %v1046_v42 = vld [vmem:[#allocation5 + $0x358] sm:$0xff] }
  0x92   :  { %6777 = vmatmul.mubr.msk.f32.gmra.mrb[40].mxu0 %vm153_vm0, %v11795_v5  ;;  %6784 = vmatmul.mubr.msk.f32.gmra.mrb[40].mxu1 %vm153_vm0, %v11684_v31  ;;  %v997_v31 = vld [vmem:[#allocation5 + $0x1d0] sm:$0xff]  ;;  %14853 = vst [vmem:[#allocation44_spill] sm:$0xff] %v11978_v8  ;;  %v12004_v63 = vpack.c.bf16 %v1046_v42, %v1038_v41  ;;  %v1187_v41 = vld [vmem:[#allocation5 + $0x7c0] sm:$0xff] }
  0x93   :  { %7063 = vmatpush1.bf16.msra.mxu0 %v11924_v43  ;;  %7095 = vmatpush1.bf16.msra.mxu1 %v11926_v44  ;;  %v11962_v38 = vpack.c.bf16 %v997_v31, %v989_v22  ;;  %v1155_v22 = vld [vmem:[#allocation5 + $0x6c0] sm:$0xff]  ;;  %v11984_v31 = vpack.c.bf16 %v1156_v60, %v1148_v59 }
  0x94   :  { %7065 = vmatprep.subr.bf16.mxu0 %v11930_v54  ;;  %7097 = vmatprep.subr.bf16.mxu1 %v11932_v20  ;;  %v1163_v59 = vld [vmem:[#allocation5 + $0x700] sm:$0xff]  ;;  %14860 = vst [vmem:[#allocation51_spill] sm:$0xff] %v12004_v63 }
  0x95   :  { %633 = vmatprep.mubr.f32.mxu0 %v14507_v0  ;;  %740 = vmatprep.mubr.f32.mxu1 %v14507_v0  ;;  %14850 = vst [vmem:[#allocation41_spill] sm:$0xff] %v11962_v38  ;;  %14855 = vst [vmem:[#allocation46_spill] sm:$0xff] %v11984_v31  ;;  %v1171_v60 = vld [vmem:[#allocation5 + $0x740] sm:$0xff] }
  0x96   :  { %6778 = vmatmul.mubr.msk.f32.gmra.mrb[42].mxu0 %vm153_vm0, %v11806_v6  ;;  %6785 = vmatmul.mubr.msk.f32.gmra.mrb[42].mxu1 %vm153_vm0, %v11702_v45  ;;  %v1013_v45 = vld [vmem:[#allocation5 + $0x250] sm:$0xff] }
  0x97   :  { %7067 = vmatpush1.bf16.msra.mxu0 %v11942_v9  ;;  %7099 = vmatpush1.bf16.msra.mxu1 %v11944_v13  ;;  %v11980_v14 = vpack.c.bf16 %v1013_v45, %v1005_v56  ;;  %v11996_v56 = vpack.c.bf16 %v1155_v22, %v1147_v15  ;;  %v1188_v15 = vld [vmem:[#allocation5 + $0x7c8] sm:$0xff]  ;;  %v1054_v22 = vld [vmem:[#allocation5 + $0x398] sm:$0xff] }
  0x98   :  { %7069 = vmatprep.subr.bf16.mxu0 %v11948_v16  ;;  %7101 = vmatprep.subr.bf16.mxu1 %v11950_v19 }
  0x99   :  { %639 = vmatprep.mubr.f32.mxu0 %v14507_v0  ;;  %746 = vmatprep.mubr.f32.mxu1 %v14507_v0  ;;  %14854 = vst [vmem:[#allocation45_spill] sm:$0xff] %v11980_v14  ;;  %14857 = vst [vmem:[#allocation48_spill] sm:$0xff] %v11996_v56 }
  0x9a   :  { %6779 = vmatmul.mubr.msk.f32.gmra.mrb[44].mxu0 %vm153_vm0, %v11675_v21  ;;  %6786 = vmatmul.mubr.msk.f32.gmra.mrb[44].mxu1 %vm153_vm0, %v11720_v49  ;;  %v1029_v49 = vld [vmem:[#allocation5 + $0x2d0] sm:$0xff] }
  0x9b   :  { %7071 = vmatpush1.bf16.msra.mxu0 %v11960_v37  ;;  %7103 = vmatpush1.bf16.msra.mxu1 %v11962_v38  ;;  %v11998_v45 = vpack.c.bf16 %v1029_v49, %v1021_v28  ;;  %v1062_v28 = vld [vmem:[#allocation5 + $0x3d8] sm:$0xff]  ;;  %v12014_v49 = vpack.c.bf16 %v1171_v60, %v1163_v59  ;;  %v952_v60 = vld [vmem:[#allocation5 + $0x68] sm:$0xff] }
  0x9c   :  { %7073 = vmatprep.subr.bf16.mxu0 %v11966_v52  ;;  %7105 = vmatprep.subr.bf16.mxu1 %v11968_v53  ;;  %v1180_v52 = vld [vmem:[#allocation5 + $0x788] sm:$0xff]  ;;  %v1078_v59 = vld [vmem:[#allocation5 + $0x458] sm:$0xff] }
  0x9d   :  { %645 = vmatprep.mubr.f32.mxu0 %v14507_v0  ;;  %752 = vmatprep.mubr.f32.mxu1 %v14507_v0  ;;  %14858 = vst [vmem:[#allocation49_spill] sm:$0xff] %v11998_v45  ;;  %v1037_v0 = vld [vmem:[#allocation5 + $0x310] sm:$0xff]  ;;  %14862 = vst [vmem:[#allocation52_spill] sm:$0xff] %v12014_v49  ;;  %v12020_v42 = vpack.c.bf16 %v1188_v15, %v1180_v52  ;;  %v12032_v52 = vpack.c.bf16 %v1187_v41, %v1179_v36  ;;  %v1094_v36 = vld [vmem:[#allocation5 + $0x4d8] sm:$0xff] }
  0x9e   :  { %6780 = vmatmul.mubr.msk.f32.gmra.mrb[46].mxu0 %vm153_vm0, %v11690_v34  ;;  %6787 = vmatmul.mubr.msk.f32.gmra.mrb[46].mxu1 %vm153_vm0, %v11737_v55  ;;  %v1045_v55 = vld [vmem:[#allocation5 + $0x350] sm:$0xff]  ;;  %v968_v41 = vld [vmem:[#allocation5 + $0xe8] sm:$0xff] }
  0x9f   :  { %7075 = vmatpush1.bf16.msra.mxu0 %v11978_v8  ;;  %7107 = vmatpush1.bf16.msra.mxu1 %v11980_v14  ;;  %v14861_v8 = vmov 0.0   ;;  %v12016_v35 = vpack.c.bf16 %v1045_v55, %v1037_v0  ;;  %14864 = vst [vmem:[#allocation54_spill] sm:$0xff] %v12020_v42  ;;  %v1070_v14 = vld [vmem:[#allocation5 + $0x418] sm:$0xff]  ;;  %v944_v0 = vld [vmem:[#allocation5 + $0x28] sm:$0xff]  ;;  %14866 = vst [vmem:[#allocation56_spill] sm:$0xff] %v12032_v52 }
  0xa0   :  { %7077 = vmatprep.subr.bf16.mxu0 %v11984_v31  ;;  %7109 = vmatprep.subr.bf16.mxu1 %v11986_v27  ;;  %v12022_v31 = vpack.c.bf16 %v1062_v28, %v1054_v22  ;;  %v1053_v27 = vld [vmem:[#allocation5 + $0x390] sm:$0xff]  ;;  %v12038_v28 = vpack.c.bf16 %v1078_v59, %v1070_v14 }
  0xa1   :  { %651 = vmatprep.mubr.f32.mxu0 %v14861_v8  ;;  %758 = vmatprep.mubr.f32.mxu1 %v14861_v8  ;;  %14863 = vst [vmem:[#allocation53_spill] sm:$0xff] %v12016_v35  ;;  %v1069_v15 = vld [vmem:[#allocation5 + $0x410] sm:$0xff] }
  0xa2   :  { %6781 = vmatmul.mubr.msk.f32.gmra.mrb[48].mxu0 %vm153_vm0, %v11707_v46  ;;  %6788 = vmatmul.mubr.msk.f32.gmra.mrb[48].mxu1 %vm153_vm0, %v11747_v62  ;;  %14865 = vst [vmem:[#allocation55_spill] sm:$0xff] %v12022_v31  ;;  %v1061_v62 = vld [vmem:[#allocation5 + $0x3d0] sm:$0xff]  ;;  %14868 = vst [vmem:[#allocation58_spill] sm:$0xff] %v12038_v28 }
  0xa3   :  { %7079 = vmatpush1.bf16.msra.mxu0 %v11996_v56  ;;  %7111 = vmatpush1.bf16.msra.mxu1 %v11998_v45  ;;  %v12034_v55 = vpack.c.bf16 %v1061_v62, %v1053_v27  ;;  %v1077_v22 = vld [vmem:[#allocation5 + $0x450] sm:$0xff]  ;;  %v1086_v56 = vld [vmem:[#allocation5 + $0x498] sm:$0xff]  ;;  %v960_v27 = vld [vmem:[#allocation5 + $0xa8] sm:$0xff] }
  0xa4   :  { %7081 = vmatprep.subr.bf16.mxu0 %v12002_v61  ;;  %7113 = vmatprep.subr.bf16.mxu1 %v12004_v63  ;;  %v12040_v61 = vpack.c.bf16 %v952_v60, %v944_v0  ;;  %v943_v63 = vld [vmem:[#allocation5 + $0x20] sm:$0xff]  ;;  %v12048_v14 = vpack.c.bf16 %v1077_v22, %v1069_v15  ;;  %v1085_v59 = vld [vmem:[#allocation5 + $0x490] sm:$0xff]  ;;  %v12054_v60 = vpack.c.bf16 %v1094_v36, %v1086_v56  ;;  %v976_v15 = vld [vmem:[#allocation5 + $0x128] sm:$0xff] }
  0xa5   :  { %657 = vmatprep.mubr.f32.mxu0 %v14861_v8  ;;  %764 = vmatprep.mubr.f32.mxu1 %v14861_v8  ;;  %14867 = vst [vmem:[#allocation57_spill] sm:$0xff] %v12034_v55  ;;  %v1093_v0 = vld [vmem:[#allocation5 + $0x4d0] sm:$0xff]  ;;  %v984_v22 = vld [vmem:[#allocation5 + $0x168] sm:$0xff] }
  0xa6   :  { %6782 = vmatmul.mubr.msk.f32.gmra.mrb[50].mxu0 %vm153_vm0, %v11725_v50  ;;  %6789 = vmatmul.mubr.msk.f32.gmra.mrb[50].mxu1 %vm153_vm0, %v11761_v2  ;;  %14869 = vst [vmem:[#allocation59_spill] sm:$0xff] %v12040_v61  ;;  %v951_v2 = vld [vmem:[#allocation5 + $0x60] sm:$0xff]  ;;  %14870 = vst [vmem:[#allocation60_spill] sm:$0xff] %v12048_v14  ;;  %v12064_v56 = vpack.c.bf16 %v1093_v0, %v1085_v59  ;;  %v1109_v36 = vld [vmem:[#allocation5 + $0x550] sm:$0xff] }
  0xa7   :  { %7083 = vmatpush1.bf16.msra.mxu0 %v12014_v49  ;;  %7115 = vmatpush1.bf16.msra.mxu1 %v12016_v35  ;;  %v12050_v62 = vpack.c.bf16 %v951_v2, %v943_v63  ;;  %14872 = vst [vmem:[#allocation62_spill] sm:$0xff] %v12054_v60  ;;  %v1102_v49 = vld [vmem:[#allocation5 + $0x518] sm:$0xff]  ;;  %v1101_v2 = vld [vmem:[#allocation5 + $0x510] sm:$0xff]  ;;  %v992_v59 = vld [vmem:[#allocation5 + $0x1a8] sm:$0xff] }
  0xa8   :  { %7085 = vmatprep.subr.bf16.mxu0 %v12020_v42  ;;  %7117 = vmatprep.subr.bf16.mxu1 %v12022_v31  ;;  %v12056_v42 = vpack.c.bf16 %v968_v41, %v960_v27  ;;  %v959_v31 = vld [vmem:[#allocation5 + $0xa0] sm:$0xff]  ;;  %14874 = vst [vmem:[#allocation64_spill] sm:$0xff] %v12064_v56  ;;  %v12072_v41 = vpack.c.bf16 %v984_v22, %v976_v15  ;;  %v1000_v0 = vld [vmem:[#allocation5 + $0x1e8] sm:$0xff] }
  0xa9   :  { %770 = vmatprep.mubr.f32.mxu1 %v14861_v8  ;;  %1270 = vmatprep.mubr.f32.mxu0 %v14861_v8  ;;  %14871 = vst [vmem:[#allocation61_spill] sm:$0xff] %v12050_v62  ;;  %v12088_v22 = vpack.c.bf16 %v1000_v0, %v992_v59 }
  0xaa   :  { %6790 = vmatmul.mubr.msk.f32.gmra.mrb[52].mxu1 %vm153_vm0, %v11773_v3  ;;  %14873 = vst [vmem:[#allocation63_spill] sm:$0xff] %v12056_v42  ;;  %v967_v3 = vld [vmem:[#allocation5 + $0xe0] sm:$0xff]  ;;  %14877 = vst [vmem:[#allocation67_spill] sm:$0xff] %v12072_v41 }
  0xab   :  { %7087 = vmatpush1.bf16.msra.mxu0 %v12032_v52  ;;  %7119 = vmatpush1.bf16.msra.mxu1 %v12034_v55  ;;  %v1110_v52 = vld [vmem:[#allocation5 + $0x558] sm:$0xff]  ;;  %v12066_v63 = vpack.c.bf16 %v967_v3, %v959_v31  ;;  %v12080_v31 = vpack.c.bf16 %v1109_v36, %v1101_v2  ;;  %v1125_v3 = vld [vmem:[#allocation5 + $0x5d0] sm:$0xff]  ;;  %14881 = vst [vmem:[#allocation71_spill] sm:$0xff] %v12088_v22  ;;  %v1008_v2 = vld [vmem:[#allocation5 + $0x228] sm:$0xff] }
  0xac   :  { %7121 = vmatprep.subr.bf16.mxu1 %v12038_v28  ;;  %7153 = vmatprep.subr.bf16.mxu0 %v12040_v61  ;;  %v12070_v27 = vpack.c.bf16 %v1110_v52, %v1102_v49  ;;  %v975_v61 = vld [vmem:[#allocation5 + $0x120] sm:$0xff]  ;;  %v1118_v28 = vld [vmem:[#allocation5 + $0x598] sm:$0xff]  ;;  %v1117_v52 = vld [vmem:[#allocation5 + $0x590] sm:$0xff] }
  0xad   :  { %776 = vmatprep.mubr.f32.mxu1 %v14861_v8  ;;  %14875 = vst [vmem:[#allocation65_spill] sm:$0xff] %v12066_v63  ;;  %14878 = vst [vmem:[#allocation68_spill] sm:$0xff] %v12080_v31  ;;  %v1016_v36 = vld [vmem:[#allocation5 + $0x268] sm:$0xff] }
  0xae   :  { %1271 = vmatmul.mubr.f32.vlgmr.msra.gmra.mrb[0].mxu0 %v14861_v8  ;;  %6791 = vmatmul.mubr.msk.f32.gmra.mrb[54].mxu1 %vm153_vm0, %v11784_v4  ;;  %14876 = vst [vmem:[#allocation66_spill] sm:$0xff] %v12070_v27  ;;  %v983_v4 = vld [vmem:[#allocation5 + $0x160] sm:$0xff]  ;;  %v12103_v0 = vpack.c.bf16 %v1016_v36, %v1008_v2 }
  0xaf   :  { %7123 = vmatpush1.bf16.msra.mxu1 %v12048_v14  ;;  %7155 = vmatpush1.bf16.msra.mxu0 %v12050_v62  ;;  %v1126_v62 = vld [vmem:[#allocation5 + $0x5d8] sm:$0xff]  ;;  %v12082_v49 = vpack.c.bf16 %v983_v4, %v975_v61  ;;  %v12095_v61 = vpack.c.bf16 %v1125_v3, %v1117_v52  ;;  %v1141_v4 = vld [vmem:[#allocation5 + $0x650] sm:$0xff]  ;;  %v1024_v52 = vld [vmem:[#allocation5 + $0x2a8] sm:$0xff] }
  0xb0   :  { %7125 = vmatprep.subr.bf16.mxu1 %v12054_v60  ;;  %7157 = vmatprep.subr.bf16.mxu0 %v12056_v42  ;;  %v12086_v15 = vpack.c.bf16 %v1126_v62, %v1118_v28  ;;  %v991_v42 = vld [vmem:[#allocation5 + $0x1a0] sm:$0xff]  ;;  %v1134_v60 = vld [vmem:[#allocation5 + $0x618] sm:$0xff]  ;;  %v1133_v62 = vld [vmem:[#allocation5 + $0x610] sm:$0xff]  ;;  %14885 = vst [vmem:[#allocation75_spill] sm:$0xff] %v12103_v0 }
  0xb1   :  { %782 = vmatprep.mubr.f32.mxu1 %v14861_v8  ;;  %1412 = vmatprep.mubr.f32.mxu0 %v14861_v8  ;;  %14879 = vst [vmem:[#allocation69_spill] sm:$0xff] %v12082_v49  ;;  %14882 = vst [vmem:[#allocation72_spill] sm:$0xff] %v12095_v61  ;;  %v1032_v3 = vld [vmem:[#allocation5 + $0x2e8] sm:$0xff] }
  0xb2   :  { %6792 = vmatmul.mubr.msk.f32.gmra.mrb[56].mxu1 %vm153_vm0, %v11795_v5  ;;  %14880 = vst [vmem:[#allocation70_spill] sm:$0xff] %v12086_v15  ;;  %v999_v5 = vld [vmem:[#allocation5 + $0x1e0] sm:$0xff]  ;;  %v12118_v36 = vpack.c.bf16 %v1032_v3, %v1024_v52 }
  0xb3   :  { %7127 = vmatpush1.bf16.msra.mxu1 %v12064_v56  ;;  %7159 = vmatpush1.bf16.msra.mxu0 %v12066_v63  ;;  %v1142_v63 = vld [vmem:[#allocation5 + $0x658] sm:$0xff]  ;;  %v12097_v28 = vpack.c.bf16 %v999_v5, %v991_v42  ;;  %v12110_v42 = vpack.c.bf16 %v1141_v4, %v1133_v62  ;;  %v1157_v5 = vld [vmem:[#allocation5 + $0x6d0] sm:$0xff]  ;;  %v1040_v62 = vld [vmem:[#allocation5 + $0x328] sm:$0xff] }
  0xb4   :  { %7129 = vmatprep.subr.bf16.mxu1 %v12070_v27  ;;  %7161 = vmatprep.subr.bf16.mxu0 %v12072_v41  ;;  %v12101_v59 = vpack.c.bf16 %v1142_v63, %v1134_v60  ;;  %v1007_v41 = vld [vmem:[#allocation5 + $0x220] sm:$0xff]  ;;  %v1150_v27 = vld [vmem:[#allocation5 + $0x698] sm:$0xff]  ;;  %v1149_v63 = vld [vmem:[#allocation5 + $0x690] sm:$0xff]  ;;  %14889 = vst [vmem:[#allocation79_spill] sm:$0xff] %v12118_v36 }
  0xb5   :  { %788 = vmatprep.mubr.f32.mxu1 %v14861_v8  ;;  %14883 = vst [vmem:[#allocation73_spill] sm:$0xff] %v12097_v28  ;;  %14886 = vst [vmem:[#allocation76_spill] sm:$0xff] %v12110_v42  ;;  %v1048_v4 = vld [vmem:[#allocation5 + $0x368] sm:$0xff] }
  0xb6   :  { %6793 = vmatmul.mubr.msk.f32.gmra.mrb[58].mxu1 %vm153_vm0, %v11806_v6  ;;  %14884 = vst [vmem:[#allocation74_spill] sm:$0xff] %v12101_v59  ;;  %v1015_v6 = vld [vmem:[#allocation5 + $0x260] sm:$0xff]  ;;  %v12133_v3 = vpack.c.bf16 %v1048_v4, %v1040_v62 }
  0xb7   :  { %7131 = vmatpush1.bf16.msra.mxu1 %v12080_v31  ;;  %7163 = vmatpush1.bf16.msra.mxu0 %v12082_v49  ;;  %v1158_v49 = vld [vmem:[#allocation5 + $0x6d8] sm:$0xff]  ;;  %v12112_v60 = vpack.c.bf16 %v1015_v6, %v1007_v41  ;;  %v12125_v41 = vpack.c.bf16 %v1157_v5, %v1149_v63  ;;  %v1173_v6 = vld [vmem:[#allocation5 + $0x750] sm:$0xff]  ;;  %v1056_v63 = vld [vmem:[#allocation5 + $0x3a8] sm:$0xff] }
  0xb8   :  { %7133 = vmatprep.subr.bf16.mxu1 %v12086_v15  ;;  %7165 = vmatprep.subr.bf16.mxu0 %v12088_v22  ;;  %v12116_v2 = vpack.c.bf16 %v1158_v49, %v1150_v27  ;;  %v1023_v22 = vld [vmem:[#allocation5 + $0x2a0] sm:$0xff]  ;;  %v1166_v15 = vld [vmem:[#allocation5 + $0x718] sm:$0xff]  ;;  %v1165_v49 = vld [vmem:[#allocation5 + $0x710] sm:$0xff]  ;;  %14893 = vst [vmem:[#allocation83_spill] sm:$0xff] %v12133_v3 }
  0xb9   :  { %794 = vmatprep.mubr.f32.mxu1 %v14861_v8  ;;  %14887 = vst [vmem:[#allocation77_spill] sm:$0xff] %v12112_v60  ;;  %14890 = vst [vmem:[#allocation80_spill] sm:$0xff] %v12125_v41  ;;  %v1064_v5 = vld [vmem:[#allocation5 + $0x3e8] sm:$0xff] }
  0xba   :  { %6794 = vmatmul.mubr.msk.f32.gmra.mrb[60].mxu1 %vm153_vm0, %v11675_v21  ;;  %14888 = vst [vmem:[#allocation78_spill] sm:$0xff] %v12116_v2  ;;  %v1031_v21 = vld [vmem:[#allocation5 + $0x2e0] sm:$0xff]  ;;  %v12148_v4 = vpack.c.bf16 %v1064_v5, %v1056_v63 }
  0xbb   :  { %7135 = vmatpush1.bf16.msra.mxu1 %v12095_v61  ;;  %7167 = vmatpush1.bf16.msra.mxu0 %v12097_v28  ;;  %v1174_v28 = vld [vmem:[#allocation5 + $0x758] sm:$0xff]  ;;  %v12127_v27 = vpack.c.bf16 %v1031_v21, %v1023_v22  ;;  %v12140_v22 = vpack.c.bf16 %v1173_v6, %v1165_v49  ;;  %v1189_v21 = vld [vmem:[#allocation5 + $0x7d0] sm:$0xff] }
  0xbc   :  { %7137 = vmatprep.subr.bf16.mxu1 %v12101_v59  ;;  %7169 = vmatprep.subr.bf16.mxu0 %v12103_v0  ;;  %v12131_v52 = vpack.c.bf16 %v1174_v28, %v1166_v15  ;;  %v1039_v0 = vld [vmem:[#allocation5 + $0x320] sm:$0xff]  ;;  %v1182_v59 = vld [vmem:[#allocation5 + $0x798] sm:$0xff]  ;;  %v1181_v28 = vld [vmem:[#allocation5 + $0x790] sm:$0xff]  ;;  %14897 = vst [vmem:[#allocation87_spill] sm:$0xff] %v12148_v4 }
  0xbd   :  { %800 = vmatprep.mubr.f32.mxu1 %v14861_v8  ;;  %14891 = vst [vmem:[#allocation81_spill] sm:$0xff] %v12127_v27  ;;  %14894 = vst [vmem:[#allocation84_spill] sm:$0xff] %v12140_v22  ;;  %v946_v49 = vld [vmem:[#allocation5 + $0x38] sm:$0xff] }
  0xbe   :  { %6795 = vmatmul.mubr.msk.f32.gmra.mrb[62].mxu1 %vm153_vm0, %v11690_v34  ;;  %14892 = vst [vmem:[#allocation82_spill] sm:$0xff] %v12131_v52  ;;  %v1047_v34 = vld [vmem:[#allocation5 + $0x360] sm:$0xff]  ;;  %v954_v6 = vld [vmem:[#allocation5 + $0x78] sm:$0xff] }
  0xbf   :  { %7139 = vmatpush1.bf16.msra.mxu1 %v12110_v42  ;;  %7171 = vmatpush1.bf16.msra.mxu0 %v12112_v60  ;;  %v1190_v60 = vld [vmem:[#allocation5 + $0x7d8] sm:$0xff]  ;;  %v12142_v15 = vpack.c.bf16 %v1047_v34, %v1039_v0  ;;  %v12155_v0 = vpack.c.bf16 %v1189_v21, %v1181_v28  ;;  %v1079_v34 = vld [vmem:[#allocation5 + $0x460] sm:$0xff]  ;;  %v12163_v5 = vpack.c.bf16 %v954_v6, %v946_v49 }
  0xc0   :  { %7141 = vmatprep.subr.bf16.mxu1 %v12116_v2  ;;  %7173 = vmatprep.subr.bf16.mxu0 %v12118_v36  ;;  %v12146_v62 = vpack.c.bf16 %v1190_v60, %v1182_v59  ;;  %v1055_v36 = vld [vmem:[#allocation5 + $0x3a0] sm:$0xff]  ;;  %v1072_v2 = vld [vmem:[#allocation5 + $0x428] sm:$0xff]  ;;  %v962_v28 = vld [vmem:[#allocation5 + $0xb8] sm:$0xff] }
  0xc1   :  { %806 = vmatprep.mubr.f32.mxu1 %v14861_v8  ;;  %14895 = vst [vmem:[#allocation85_spill] sm:$0xff] %v12142_v15  ;;  %14898 = vst [vmem:[#allocation88_spill] sm:$0xff] %v12155_v0  ;;  %v1071_v60 = vld [vmem:[#allocation5 + $0x420] sm:$0xff]  ;;  %v970_v21 = vld [vmem:[#allocation5 + $0xf8] sm:$0xff] }
  0xc2   :  { %6796 = vmatmul.mubr.msk.f32.gmra.mrb[64].mxu1 %vm153_vm0, %v11707_v46  ;;  %14896 = vst [vmem:[#allocation86_spill] sm:$0xff] %v12146_v62  ;;  %v1063_v46 = vld [vmem:[#allocation5 + $0x3e0] sm:$0xff]  ;;  %14901 = vst [vmem:[#allocation91_spill] sm:$0xff] %v12163_v5  ;;  %v12176_v6 = vpack.c.bf16 %v970_v21, %v962_v28  ;;  %v977_v28 = vld [vmem:[#allocation5 + $0x130] sm:$0xff] }
  0xc3   :  { %7143 = vmatpush1.bf16.msra.mxu1 %v12125_v41  ;;  %7175 = vmatpush1.bf16.msra.mxu0 %v12127_v27  ;;  %v1080_v27 = vld [vmem:[#allocation5 + $0x468] sm:$0xff]  ;;  %v12157_v59 = vpack.c.bf16 %v1063_v46, %v1055_v36  ;;  %v12168_v36 = vpack.c.bf16 %v1079_v34, %v1071_v60  ;;  %v978_v41 = vld [vmem:[#allocation5 + $0x138] sm:$0xff]  ;;  %v985_v21 = vld [vmem:[#allocation5 + $0x170] sm:$0xff] }
  0xc4   :  { %7145 = vmatprep.subr.bf16.mxu1 %v12131_v52  ;;  %7177 = vmatprep.subr.bf16.mxu0 %v12133_v3  ;;  %v12161_v63 = vpack.c.bf16 %v1080_v27, %v1072_v2  ;;  %v945_v3 = vld [vmem:[#allocation5 + $0x30] sm:$0xff]  ;;  %v1088_v52 = vld [vmem:[#allocation5 + $0x4a8] sm:$0xff]  ;;  %v1087_v2 = vld [vmem:[#allocation5 + $0x4a0] sm:$0xff]  ;;  %14905 = vst [vmem:[#allocation95_spill] sm:$0xff] %v12176_v6 }
  0xc5   :  { %812 = vmatprep.mubr.f32.mxu1 %v14861_v8  ;;  %14899 = vst [vmem:[#allocation89_spill] sm:$0xff] %v12157_v59  ;;  %14902 = vst [vmem:[#allocation92_spill] sm:$0xff] %v12168_v36  ;;  %v1095_v27 = vld [vmem:[#allocation5 + $0x4e0] sm:$0xff] }
  0xc6   :  { %6797 = vmatmul.mubr.msk.f32.gmra.mrb[66].mxu1 %vm153_vm0, %v11725_v50  ;;  %14900 = vst [vmem:[#allocation90_spill] sm:$0xff] %v12161_v63  ;;  %v953_v50 = vld [vmem:[#allocation5 + $0x70] sm:$0xff] }
  0xc7   :  { %7147 = vmatpush1.bf16.msra.mxu1 %v12140_v22  ;;  %7179 = vmatpush1.bf16.msra.mxu0 %v12142_v15  ;;  %v1096_v15 = vld [vmem:[#allocation5 + $0x4e8] sm:$0xff]  ;;  %v12170_v46 = vpack.c.bf16 %v953_v50, %v945_v3  ;;  %v12181_v3 = vpack.c.bf16 %v1095_v27, %v1087_v2  ;;  %v993_v2 = vld [vmem:[#allocation5 + $0x1b0] sm:$0xff] }
  0xc8   :  { %7149 = vmatprep.subr.bf16.mxu1 %v12146_v62  ;;  %7181 = vmatprep.subr.bf16.mxu0 %v12148_v4  ;;  %v12174_v49 = vpack.c.bf16 %v1096_v15, %v1088_v52  ;;  %v961_v4 = vld [vmem:[#allocation5 + $0xb0] sm:$0xff]  ;;  %v1104_v22 = vld [vmem:[#allocation5 + $0x528] sm:$0xff]  ;;  %v1103_v52 = vld [vmem:[#allocation5 + $0x520] sm:$0xff] }
  0xc9   :  { %1341 = vmatprep.mubr.f32.mxu1 %v14861_v8  ;;  %14903 = vst [vmem:[#allocation93_spill] sm:$0xff] %v12170_v46  ;;  %v969_v62 = vld [vmem:[#allocation5 + $0xf0] sm:$0xff]  ;;  %14906 = vst [vmem:[#allocation96_spill] sm:$0xff] %v12181_v3  ;;  %v1111_v15 = vld [vmem:[#allocation5 + $0x560] sm:$0xff] }
  0xca   :  { %14904 = vst [vmem:[#allocation94_spill] sm:$0xff] %v12174_v49  ;;  %v12183_v60 = vpack.c.bf16 %v969_v62, %v961_v4  ;;  %v12194_v62 = vpack.c.bf16 %v1111_v15, %v1103_v52  ;;  %v12196_v4 = vpack.c.bf16 %v985_v21, %v977_v28  ;;  %v1001_v27 = vld [vmem:[#allocation5 + $0x1f0] sm:$0xff]  ;;  %v1135_v28 = vld [vmem:[#allocation5 + $0x620] sm:$0xff] }
  0xcb   :  { %7151 = vmatpush1.bf16.msra.mxu1 %v12155_v0  ;;  %7183 = vmatpush1.bf16.msra.mxu0 %v12157_v59  ;;  %v1112_v0 = vld [vmem:[#allocation5 + $0x568] sm:$0xff]  ;;  %v986_v59 = vld [vmem:[#allocation5 + $0x178] sm:$0xff]  ;;  %v12208_v15 = vpack.c.bf16 %v1001_v27, %v993_v2  ;;  %v1143_v21 = vld [vmem:[#allocation5 + $0x660] sm:$0xff] }
  0xcc   :  { %7185 = vmatprep.subr.bf16.mxu0 %v12161_v63  ;;  %7217 = vmatprep.subr.bf16.mxu1 %v12163_v5  ;;  %14907 = vst [vmem:[#allocation97_spill] sm:$0xff] %v12183_v60  ;;  %v12187_v34 = vpack.c.bf16 %v1112_v0, %v1104_v22  ;;  %v12189_v50 = vpack.c.bf16 %v986_v59, %v978_v41  ;;  %v1120_v63 = vld [vmem:[#allocation5 + $0x5a8] sm:$0xff]  ;;  %v994_v5 = vld [vmem:[#allocation5 + $0x1b8] sm:$0xff]  ;;  %14910 = vst [vmem:[#allocation100_spill] sm:$0xff] %v12194_v62 }
  0xcd   :  { %14911 = vst [vmem:[#allocation101_spill] sm:$0xff] %v12196_v4  ;;  %v1119_v22 = vld [vmem:[#allocation5 + $0x5a0] sm:$0xff]  ;;  %14915 = vst [vmem:[#allocation105_spill] sm:$0xff] %v12208_v15 }
  0xce   :  { %1342 = vmatmul.mubr.f32.vlgmr.msra.gmra.mrb[8].mxu1 %v14861_v8  ;;  %14908 = vst [vmem:[#allocation98_spill] sm:$0xff] %v12187_v34  ;;  %14909 = vst [vmem:[#allocation99_spill] sm:$0xff] %v12189_v50  ;;  %v1127_v0 = vld [vmem:[#allocation5 + $0x5e0] sm:$0xff] }
  0xcf   :  { %7187 = vmatpush1.bf16.msra.mxu0 %v12168_v36  ;;  %7219 = vmatpush1.bf16.msra.mxu1 %v12170_v46  ;;  %v1128_v36 = vld [vmem:[#allocation5 + $0x5e8] sm:$0xff]  ;;  %v1002_v46 = vld [vmem:[#allocation5 + $0x1f8] sm:$0xff]  ;;  %v12206_v52 = vpack.c.bf16 %v1127_v0, %v1119_v22  ;;  %v12218_v22 = vpack.c.bf16 %v1143_v21, %v1135_v28  ;;  %v1151_v2 = vld [vmem:[#allocation5 + $0x6a0] sm:$0xff] }
  0xd0   :  { %7189 = vmatprep.subr.bf16.mxu0 %v12174_v49  ;;  %7221 = vmatprep.subr.bf16.mxu1 %v12176_v6  ;;  %v12200_v41 = vpack.c.bf16 %v1128_v36, %v1120_v63  ;;  %v12202_v59 = vpack.c.bf16 %v1002_v46, %v994_v5  ;;  %v1136_v49 = vld [vmem:[#allocation5 + $0x628] sm:$0xff]  ;;  %v1010_v6 = vld [vmem:[#allocation5 + $0x238] sm:$0xff]  ;;  %v1009_v36 = vld [vmem:[#allocation5 + $0x230] sm:$0xff] }
  0xd1   :  { %1483 = vmatprep.mubr.f32.mxu1 %v14861_v8  ;;  %14914 = vst [vmem:[#allocation104_spill] sm:$0xff] %v12206_v52  ;;  %v1017_v46 = vld [vmem:[#allocation5 + $0x270] sm:$0xff]  ;;  %14918 = vst [vmem:[#allocation108_spill] sm:$0xff] %v12218_v22  ;;  %v1159_v27 = vld [vmem:[#allocation5 + $0x6e0] sm:$0xff] }
  0xd2   :  { %14912 = vst [vmem:[#allocation102_spill] sm:$0xff] %v12200_v41  ;;  %14913 = vst [vmem:[#allocation103_spill] sm:$0xff] %v12202_v59  ;;  %v12220_v0 = vpack.c.bf16 %v1017_v46, %v1009_v36  ;;  %v12230_v28 = vpack.c.bf16 %v1159_v27, %v1151_v2  ;;  %v1167_v36 = vld [vmem:[#allocation5 + $0x720] sm:$0xff] }
  0xd3   :  { %7191 = vmatpush1.bf16.msra.mxu0 %v12181_v3  ;;  %7223 = vmatpush1.bf16.msra.mxu1 %v12183_v60  ;;  %v1144_v3 = vld [vmem:[#allocation5 + $0x668] sm:$0xff]  ;;  %v1018_v60 = vld [vmem:[#allocation5 + $0x278] sm:$0xff]  ;;  %v1175_v46 = vld [vmem:[#allocation5 + $0x760] sm:$0xff] }
  0xd4   :  { %7193 = vmatprep.subr.bf16.mxu0 %v12187_v34  ;;  %7225 = vmatprep.subr.bf16.mxu1 %v12189_v50  ;;  %v12212_v63 = vpack.c.bf16 %v1144_v3, %v1136_v49  ;;  %v12214_v5 = vpack.c.bf16 %v1018_v60, %v1010_v6  ;;  %v1152_v34 = vld [vmem:[#allocation5 + $0x6a8] sm:$0xff]  ;;  %v1026_v50 = vld [vmem:[#allocation5 + $0x2b8] sm:$0xff]  ;;  %14919 = vst [vmem:[#allocation109_spill] sm:$0xff] %v12220_v0  ;;  %v1025_v3 = vld [vmem:[#allocation5 + $0x2b0] sm:$0xff] }
  0xd5   :  { %v1033_v60 = vld [vmem:[#allocation5 + $0x2f0] sm:$0xff]  ;;  %14922 = vst [vmem:[#allocation112_spill] sm:$0xff] %v12230_v28  ;;  %v12242_v2 = vpack.c.bf16 %v1175_v46, %v1167_v36 }
  0xd6   :  { %14916 = vst [vmem:[#allocation106_spill] sm:$0xff] %v12212_v63  ;;  %14917 = vst [vmem:[#allocation107_spill] sm:$0xff] %v12214_v5  ;;  %v12232_v21 = vpack.c.bf16 %v1033_v60, %v1025_v3  ;;  %v1183_v3 = vld [vmem:[#allocation5 + $0x7a0] sm:$0xff]  ;;  %v1065_v60 = vld [vmem:[#allocation5 + $0x3f0] sm:$0xff] }
  0xd7   :  { %7195 = vmatpush1.bf16.msra.mxu0 %v12194_v62  ;;  %7227 = vmatpush1.bf16.msra.mxu1 %v12196_v4  ;;  %v1160_v62 = vld [vmem:[#allocation5 + $0x6e8] sm:$0xff]  ;;  %v1034_v4 = vld [vmem:[#allocation5 + $0x2f8] sm:$0xff]  ;;  %14926 = vst [vmem:[#allocation116_spill] sm:$0xff] %v12242_v2 }
  0xd8   :  { %7197 = vmatprep.subr.bf16.mxu0 %v12200_v41  ;;  %7229 = vmatprep.subr.bf16.mxu1 %v12202_v59  ;;  %v12224_v49 = vpack.c.bf16 %v1160_v62, %v1152_v34  ;;  %v12226_v6 = vpack.c.bf16 %v1034_v4, %v1026_v50  ;;  %v1168_v41 = vld [vmem:[#allocation5 + $0x728] sm:$0xff]  ;;  %v1042_v59 = vld [vmem:[#allocation5 + $0x338] sm:$0xff]  ;;  %14923 = vst [vmem:[#allocation113_spill] sm:$0xff] %v12232_v21  ;;  %v1041_v62 = vld [vmem:[#allocation5 + $0x330] sm:$0xff] }
  0xd9   :  { %v1049_v4 = vld [vmem:[#allocation5 + $0x370] sm:$0xff] }
  0xda   :  { %14920 = vst [vmem:[#allocation110_spill] sm:$0xff] %v12224_v49  ;;  %14921 = vst [vmem:[#allocation111_spill] sm:$0xff] %v12226_v6  ;;  %v12244_v27 = vpack.c.bf16 %v1049_v4, %v1041_v62  ;;  %v1098_v62 = vld [vmem:[#allocation5 + $0x4f8] sm:$0xff] }
  0xdb   :  { %7199 = vmatpush1.bf16.msra.mxu0 %v12206_v52  ;;  %7231 = vmatpush1.bf16.msra.mxu1 %v12208_v15  ;;  %v1176_v52 = vld [vmem:[#allocation5 + $0x768] sm:$0xff]  ;;  %v1050_v15 = vld [vmem:[#allocation5 + $0x378] sm:$0xff] }
  0xdc   :  { %7201 = vmatprep.subr.bf16.mxu0 %v12212_v63  ;;  %7233 = vmatprep.subr.bf16.mxu1 %v12214_v5  ;;  %v12236_v34 = vpack.c.bf16 %v1176_v52, %v1168_v41  ;;  %v12238_v50 = vpack.c.bf16 %v1050_v15, %v1042_v59  ;;  %v1184_v63 = vld [vmem:[#allocation5 + $0x7a8] sm:$0xff]  ;;  %v1058_v5 = vld [vmem:[#allocation5 + $0x3b8] sm:$0xff]  ;;  %14927 = vst [vmem:[#allocation117_spill] sm:$0xff] %v12244_v27  ;;  %v1191_v52 = vld [vmem:[#allocation5 + $0x7e0] sm:$0xff] }
  0xdd   :  { %v1057_v15 = vld [vmem:[#allocation5 + $0x3b0] sm:$0xff]  ;;  %v12254_v36 = vpack.c.bf16 %v1191_v52, %v1183_v3 }
  0xde   :  { %14924 = vst [vmem:[#allocation114_spill] sm:$0xff] %v12236_v34  ;;  %14925 = vst [vmem:[#allocation115_spill] sm:$0xff] %v12238_v50  ;;  %v12256_v46 = vpack.c.bf16 %v1065_v60, %v1057_v15  ;;  %v1089_v52 = vld [vmem:[#allocation5 + $0x4b0] sm:$0xff] }
  0xdf   :  { %7203 = vmatpush1.bf16.msra.mxu0 %v12218_v22  ;;  %7235 = vmatpush1.bf16.msra.mxu1 %v12220_v0  ;;  %v1192_v22 = vld [vmem:[#allocation5 + $0x7e8] sm:$0xff]  ;;  %v1066_v0 = vld [vmem:[#allocation5 + $0x3f8] sm:$0xff]  ;;  %14930 = vst [vmem:[#allocation120_spill] sm:$0xff] %v12254_v36  ;;  %v1097_v15 = vld [vmem:[#allocation5 + $0x4f0] sm:$0xff] }
  0xe0   :  { %7205 = vmatprep.subr.bf16.mxu0 %v12224_v49  ;;  %7237 = vmatprep.subr.bf16.mxu1 %v12226_v6  ;;  %v12248_v41 = vpack.c.bf16 %v1192_v22, %v1184_v63  ;;  %v12250_v59 = vpack.c.bf16 %v1066_v0, %v1058_v5  ;;  %v1074_v49 = vld [vmem:[#allocation5 + $0x438] sm:$0xff]  ;;  %14931 = vst [vmem:[#allocation121_spill] sm:$0xff] %v12256_v46  ;;  %v1073_v5 = vld [vmem:[#allocation5 + $0x430] sm:$0xff] }
  0xe1   :  { %v1081_v22 = vld [vmem:[#allocation5 + $0x470] sm:$0xff]  ;;  %v1090_v0 = vld [vmem:[#allocation5 + $0x4b8] sm:$0xff]  ;;  %v12272_v60 = vpack.c.bf16 %v1097_v15, %v1089_v52 }
  0xe2   :  { %14928 = vst [vmem:[#allocation118_spill] sm:$0xff] %v12248_v41  ;;  %14929 = vst [vmem:[#allocation119_spill] sm:$0xff] %v12250_v59  ;;  %v12264_v4 = vpack.c.bf16 %v1081_v22, %v1073_v5  ;;  %v12267_v3 = vpack.c.bf16 %v1098_v62, %v1090_v0  ;;  %v1105_v22 = vld [vmem:[#allocation5 + $0x530] sm:$0xff]  ;;  %v1122_v62 = vld [vmem:[#allocation5 + $0x5b8] sm:$0xff] }
  0xe3   :  { %7207 = vmatpush1.bf16.msra.mxu0 %v12230_v28  ;;  %7239 = vmatpush1.bf16.msra.mxu1 %v12232_v21  ;;  %v1082_v28 = vld [vmem:[#allocation5 + $0x478] sm:$0xff]  ;;  %14935 = vst [vmem:[#allocation125_spill] sm:$0xff] %v12272_v60  ;;  %v1113_v0 = vld [vmem:[#allocation5 + $0x570] sm:$0xff] }
  0xe4   :  { %7209 = vmatprep.subr.bf16.mxu0 %v12236_v34  ;;  %7241 = vmatprep.subr.bf16.mxu1 %v12238_v50  ;;  %v12260_v63 = vpack.c.bf16 %v1082_v28, %v1074_v49  ;;  %14933 = vst [vmem:[#allocation123_spill] sm:$0xff] %v12264_v4  ;;  %14934 = vst [vmem:[#allocation124_spill] sm:$0xff] %v12267_v3  ;;  %v1106_v49 = vld [vmem:[#allocation5 + $0x538] sm:$0xff]  ;;  %v1121_v15 = vld [vmem:[#allocation5 + $0x5b0] sm:$0xff] }
  0xe5   :  { %v1114_v28 = vld [vmem:[#allocation5 + $0x578] sm:$0xff] }
  0xe6   :  { %14932 = vst [vmem:[#allocation122_spill] sm:$0xff] %v12260_v63  ;;  %v12276_v5 = vpack.c.bf16 %v1114_v28, %v1106_v49  ;;  %v1129_v49 = vld [vmem:[#allocation5 + $0x5f0] sm:$0xff]  ;;  %v1138_v28 = vld [vmem:[#allocation5 + $0x638] sm:$0xff] }
  0xe7   :  { %7211 = vmatpush1.bf16.msra.mxu0 %v12242_v2  ;;  %7243 = vmatpush1.bf16.msra.mxu1 %v12244_v27 }
  0xe8   :  { %7213 = vmatprep.subr.bf16.mxu0 %v12248_v41  ;;  %7245 = vmatprep.subr.bf16.mxu1 %v12250_v59  ;;  %14936 = vst [vmem:[#allocation126_spill] sm:$0xff] %v12276_v5 }
  0xeb   :  { %7215 = vmatpush1.bf16.msra.mxu0 %v12254_v36  ;;  %7247 = vmatpush1.bf16.msra.mxu1 %v12256_v46  ;;  %v12281_v36 = vpack.c.bf16 %v1113_v0, %v1105_v22  ;;  %v1137_v0 = vld [vmem:[#allocation5 + $0x630] sm:$0xff] }
  0xec   :  { %7249 = vmatprep.subr.bf16.mxu1 %v12260_v63  ;;  %7281 = vmatprep.subr.bf16.mxu0 %v11709_v48  ;;  %v1130_v48 = vld [vmem:[#allocation5 + $0x5f8] sm:$0xff] }
  0xed   :  { %14937 = vst [vmem:[#allocation127_spill] sm:$0xff] %v12281_v36  ;;  %v12285_v52 = vpack.c.bf16 %v1130_v48, %v1122_v62  ;;  %v1154_v48 = vld [vmem:[#allocation5 + $0x6b8] sm:$0xff] }
  0xee   :  { %1413 = vmatmul.mubr.f32.vlgmr.msra.gmra.mrb[22].mxu0 %v14861_v8  ;;  %v1162_v62 = vld [vmem:[#allocation5 + $0x6f8] sm:$0xff] }
  0xef   :  { %7251 = vmatpush1.bf16.msra.mxu1 %v12264_v4  ;;  %7283 = vmatpush1.bf16.msra.mxu0 %v11814_v11  ;;  %14938 = vst [vmem:[#allocation128_spill] sm:$0xff] %v12285_v52  ;;  %v12289_v11 = vpack.c.bf16 %v1129_v49, %v1121_v15  ;;  %v12301_v15 = vpack.c.bf16 %v1162_v62, %v1154_v48  ;;  %v1153_v49 = vld [vmem:[#allocation5 + $0x6b0] sm:$0xff]  ;;  %v1186_v48 = vld [vmem:[#allocation5 + $0x7b8] sm:$0xff] }
  0xf0   :  { %7253 = vmatprep.subr.bf16.mxu1 %v12267_v3  ;;  %7285 = vmatprep.subr.bf16.mxu0 %v11816_v12  ;;  %v1146_v12 = vld [vmem:[#allocation5 + $0x678] sm:$0xff] }
  0xf1   :  { %1634 = vmatprep.mubr.f32.mxu0 %v14861_v8  ;;  %14939 = vst [vmem:[#allocation129_spill] sm:$0xff] %v12289_v11  ;;  %v12293_v22 = vpack.c.bf16 %v1146_v12, %v1138_v28  ;;  %14942 = vst [vmem:[#allocation132_spill] sm:$0xff] %v12301_v15  ;;  %v1170_v12 = vld [vmem:[#allocation5 + $0x738] sm:$0xff] }
  0xf2   :  { %v1178_v28 = vld [vmem:[#allocation5 + $0x778] sm:$0xff] }
  0xf3   :  { %7255 = vmatpush1.bf16.msra.mxu1 %v12272_v60  ;;  %7287 = vmatpush1.bf16.msra.mxu0 %v11824_v17  ;;  %14940 = vst [vmem:[#allocation130_spill] sm:$0xff] %v12293_v22  ;;  %v1145_v17 = vld [vmem:[#allocation5 + $0x670] sm:$0xff]  ;;  %v1194_v62 = vld [vmem:[#allocation5 + $0x7f8] sm:$0xff] }
  0xf4   :  { %7257 = vmatprep.subr.bf16.mxu1 %v12276_v5  ;;  %7289 = vmatprep.subr.bf16.mxu0 %v11828_v18  ;;  %v12297_v18 = vpack.c.bf16 %v1145_v17, %v1137_v0  ;;  %v12309_v17 = vpack.c.bf16 %v1178_v28, %v1170_v12  ;;  %v1169_v0 = vld [vmem:[#allocation5 + $0x730] sm:$0xff] }
  0xf6   :  { %14941 = vst [vmem:[#allocation131_spill] sm:$0xff] %v12297_v18  ;;  %14944 = vst [vmem:[#allocation134_spill] sm:$0xff] %v12309_v17 }
  0xf7   :  { %7259 = vmatpush1.bf16.msra.mxu1 %v12281_v36  ;;  %7291 = vmatpush1.bf16.msra.mxu0 %v11836_v25  ;;  %v1161_v25 = vld [vmem:[#allocation5 + $0x6f0] sm:$0xff] }
  0xf8   :  { %7261 = vmatprep.subr.bf16.mxu1 %v12285_v52  ;;  %7293 = vmatprep.subr.bf16.mxu0 %v11840_v26  ;;  %v12305_v26 = vpack.c.bf16 %v1161_v25, %v1153_v49  ;;  %v12317_v25 = vpack.c.bf16 %v1194_v62, %v1186_v48  ;;  %v1185_v49 = vld [vmem:[#allocation5 + $0x7b0] sm:$0xff]  ;;  %v14950_v48 = vld [vmem:[#allocation42_spill] sm:$0xff] }
  0xfa   :  { %14943 = vst [vmem:[#allocation133_spill] sm:$0xff] %v12305_v26  ;;  %14946 = vst [vmem:[#allocation136_spill] sm:$0xff] %v12317_v25 }
  0xfb   :  { %7263 = vmatpush1.bf16.msra.mxu1 %v12289_v11  ;;  %7295 = vmatpush1.bf16.msra.mxu0 %v11848_v32  ;;  %v1177_v32 = vld [vmem:[#allocation5 + $0x770] sm:$0xff] }
  0xfc   :  { %7265 = vmatprep.subr.bf16.mxu1 %v12293_v22  ;;  %7297 = vmatprep.subr.bf16.mxu0 %v11852_v33  ;;  %v12313_v33 = vpack.c.bf16 %v1177_v32, %v1169_v0 }
  0xfe   :  { %14945 = vst [vmem:[#allocation135_spill] sm:$0xff] %v12313_v33 }
  0xff   :  { %7267 = vmatpush1.bf16.msra.mxu1 %v12297_v18  ;;  %7299 = vmatpush1.bf16.msra.mxu0 %v11860_v39  ;;  %v1193_v39 = vld [vmem:[#allocation5 + $0x7f0] sm:$0xff] }
 0x100   :  { %7269 = vmatprep.subr.bf16.mxu1 %v12301_v15  ;;  %7301 = vmatprep.subr.bf16.mxu0 %v11864_v40  ;;  %v12321_v12 = vpack.c.bf16 %v1193_v39, %v1185_v49 }
 0x102   :  { %14947 = vst [vmem:[#allocation137_spill] sm:$0xff] %v12321_v12 }
 0x103   :  { %7271 = vmatpush1.bf16.msra.mxu1 %v12305_v26  ;;  %7303 = vmatpush1.bf16.msra.mxu0 %v11872_v47 }
 0x104   :  { %7273 = vmatprep.subr.bf16.mxu1 %v12309_v17  ;;  %7305 = vmatprep.subr.bf16.mxu0 %v11876_v51 }
 0x107   :  { %7275 = vmatpush1.bf16.msra.mxu1 %v12313_v33  ;;  %7307 = vmatpush1.bf16.msra.mxu0 %v11884_v57 }
 0x108   :  { %7277 = vmatprep.subr.bf16.mxu1 %v12317_v25  ;;  %7309 = vmatprep.subr.bf16.mxu0 %v11888_v58 }
 0x10b   :  { %7279 = vmatpush1.bf16.msra.mxu1 %v12321_v12  ;;  %7311 = vmatpush1.bf16.msra.mxu0 %v11896_v7 }
 0x10c   :  { %7345 = vmatprep.subr.bf16.mxu1 %v11750_v1  ;;  %7313 = vmatprep.subr.bf16.mxu0 %v11900_v10 }
 0x10e   :  { %1484 = vmatmul.mubr.f32.vlgmr.msra.gmra.mrb[38].mxu1 %v14861_v8 }
 0x10f   :  { %7347 = vmatpush1.bf16.msra.mxu1 %v11910_v24  ;;  %7315 = vmatpush1.bf16.msra.mxu0 %v11908_v23 }
 0x110   :  { %7349 = vmatprep.subr.bf16.mxu1 %v11916_v30  ;;  %7317 = vmatprep.subr.bf16.mxu0 %v11914_v29 }
 0x111   :  { %1705 = vmatprep.mubr.f32.mxu1 %v14861_v8 }
 0x113   :  { %7351 = vmatpush1.bf16.msra.mxu1 %v11926_v44  ;;  %7319 = vmatpush1.bf16.msra.mxu0 %v11924_v43  ;;  %v14972_v43 = vld [vmem:[#allocation82_spill] sm:$0xff] }
 0x114   :  { %7353 = vmatprep.subr.bf16.mxu1 %v11932_v20  ;;  %7321 = vmatprep.subr.bf16.mxu0 %v11930_v54  ;;  %v14958_v54 = vld [vmem:[#allocation51_spill] sm:$0xff] }
 0x115   :  { %v331_v32 = vpop.f32.mrb[0].mxu1 }
 0x116   :  { %v12340_v39 = vpop.f32.mrb[1].mxu1  ;;  %v14952_v32 = vld [vmem:[#allocation45_spill] sm:$0xff] }
 0x117   :  { %14948 = vst [vmem:[#allocation138_spill] sm:$0xff] %v12340_v39  ;;  %7355 = vmatpush1.bf16.msra.mxu1 %v11944_v13  ;;  %7323 = vmatpush1.bf16.msra.mxu0 %v11942_v9  ;;  %v14953_v39 = vld [vmem:[#allocation44_spill] sm:$0xff]  ;;  %v14954_v9 = vld [vmem:[#allocation47_spill] sm:$0xff] }
 0x118   :  { %7357 = vmatprep.subr.bf16.mxu1 %v11950_v19  ;;  %7325 = vmatprep.subr.bf16.mxu0 %v11948_v16 }
 0x119   :  { %v337_v28 = vpop.f32.mrb[2].mxu1 }
 0x11a   :  { %v12346_v0 = vpop.f32.mrb[3].mxu1  ;;  %v14955_v28 = vld [vmem:[#allocation46_spill] sm:$0xff] }
 0x11b   :  { %14949 = vst [vmem:[#allocation139_spill] sm:$0xff] %v12346_v0  ;;  %7359 = vmatpush1.bf16.msra.mxu1 %v11962_v38  ;;  %7327 = vmatpush1.bf16.msra.mxu0 %v11960_v37  ;;  %v14957_v37 = vld [vmem:[#allocation48_spill] sm:$0xff] }
 0x11c   :  { %7361 = vmatprep.subr.bf16.mxu1 %v11968_v53  ;;  %7329 = vmatprep.subr.bf16.mxu0 %v14950_v48  ;;  %v14962_v48 = vld [vmem:[#allocation54_spill] sm:$0xff] }
 0x11d   :  { %v343_v62 = vpop.f32.mrb[4].mxu1 }
 0x11e   :  { %v12352_v49 = vpop.f32.mrb[5].mxu1  ;;  %v14959_v62 = vld [vmem:[#allocation50_spill] sm:$0xff] }
 0x11f   :  { %14951 = vst [vmem:[#allocation140_spill] sm:$0xff] %v12352_v49  ;;  %7363 = vmatpush1.bf16.msra.mxu1 %v14952_v32  ;;  %7331 = vmatpush1.bf16.msra.mxu0 %v14953_v39  ;;  %v14960_v49 = vld [vmem:[#allocation52_spill] sm:$0xff]  ;;  %v14961_v39 = vld [vmem:[#allocation55_spill] sm:$0xff] }
 0x120   :  { %7365 = vmatprep.subr.bf16.mxu1 %v14954_v9  ;;  %7333 = vmatprep.subr.bf16.mxu0 %v14955_v28  ;;  %v14965_v28 = vld [vmem:[#allocation59_spill] sm:$0xff] }
 0x121   :  { %v349_v0 = vpop.f32.mrb[6].mxu1 }
 0x122   :  { %v12358_v16 = vpop.f32.mrb[7].mxu1  ;;  %v14963_v0 = vld [vmem:[#allocation56_spill] sm:$0xff] }
 0x123   :  { %14956 = vst [vmem:[#allocation141_spill] sm:$0xff] %v12358_v16  ;;  %7367 = vmatpush1.bf16.msra.mxu1 %v11998_v45  ;;  %7335 = vmatpush1.bf16.msra.mxu0 %v14957_v37  ;;  %v14964_v16 = vld [vmem:[#allocation58_spill] sm:$0xff] }
 0x124   :  { %7369 = vmatprep.subr.bf16.mxu1 %v14958_v54  ;;  %7337 = vmatprep.subr.bf16.mxu0 %v14959_v62  ;;  %v14966_v37 = vld [vmem:[#allocation62_spill] sm:$0xff] }
 0x125   :  { %v14967_v62 = vld [vmem:[#allocation66_spill] sm:$0xff] }
 0x127   :  { %7371 = vmatpush1.bf16.msra.mxu1 %v12016_v35  ;;  %7339 = vmatpush1.bf16.msra.mxu0 %v14960_v49  ;;  %v14968_v49 = vld [vmem:[#allocation70_spill] sm:$0xff] }
 0x128   :  { %7373 = vmatprep.subr.bf16.mxu1 %v14961_v39  ;;  %7341 = vmatprep.subr.bf16.mxu0 %v14962_v48  ;;  %v14969_v48 = vld [vmem:[#allocation74_spill] sm:$0xff] }
 0x12b   :  { %7375 = vmatpush1.bf16.msra.mxu1 %v12034_v55  ;;  %7343 = vmatpush1.bf16.msra.mxu0 %v14963_v0  ;;  %v14970_v0 = vld [vmem:[#allocation78_spill] sm:$0xff] }
 0x12c   :  { %7377 = vmatprep.subr.bf16.mxu1 %v14964_v16  ;;  %7409 = vmatprep.subr.bf16.mxu0 %v14965_v28  ;;  %v14971_v28 = vld [vmem:[#allocation80_spill] sm:$0xff] }
 0x12f   :  { %7379 = vmatpush1.bf16.msra.mxu1 %v12048_v14  ;;  %v113_v14 = vlaneseq }
 0x130   :  { %7381 = vmatprep.subr.bf16.mxu1 %v14966_v37  ;;  %v14973_v37 = vld [vmem:[#allocation84_spill] sm:$0xff] }
 0x133   :  { %7383 = vmatpush1.bf16.msra.mxu1 %v12064_v56  ;;  %v14974_v56 = vld [vmem:[#allocation86_spill] sm:$0xff] }
 0x134   :  { %7385 = vmatprep.subr.bf16.mxu1 %v14967_v62  ;;  %v14975_v62 = vld [vmem:[#allocation88_spill] sm:$0xff] }
 0x137   :  { %7387 = vmatpush1.bf16.msra.mxu1 %v12080_v31  ;;  %v14976_v31 = vld [vmem:[#allocation91_spill] sm:$0xff] }
 0x138   :  { %7389 = vmatprep.subr.bf16.mxu1 %v14968_v49 }
 0x13b   :  { %7391 = vmatpush1.bf16.msra.mxu1 %v12095_v61 }
 0x13c   :  { %7393 = vmatprep.subr.bf16.mxu1 %v14969_v48 }
 0x13f   :  { %7395 = vmatpush1.bf16.msra.mxu1 %v12110_v42  ;;  %v12388_v42 = vshrl.u32 %v113_v14, 7 }
 0x140   :  { %7397 = vmatprep.subr.bf16.mxu1 %v14970_v0 }
 0x141   :  { %14977 = vst [vmem:[#allocation142_spill] sm:$0xff] %v12388_v42  ;;  %v123_v0 = vsub.s32 2, %v12388_v42 }
 0x143   :  { %7399 = vmatpush1.bf16.msra.mxu1 %v14971_v28  ;;  %v115_v28 = vsub.s32 0, %v12388_v42 }
 0x144   :  { %7401 = vmatprep.subr.bf16.mxu1 %v14972_v43 }
 0x147   :  { %7403 = vmatpush1.bf16.msra.mxu1 %v14973_v37  ;;  %v111_v37 = vld [vmem:[%s14503_s3] sm:$0xff] }
 0x148   :  { %7405 = vmatprep.subr.bf16.mxu1 %v14974_v56  ;;  %v12395_v56 = vrot.slane %v111_v37, %v123_v0 }
 0x14a   :  { %14978 = vst [vmem:[#allocation143_spill] sm:$0xff] %v12395_v56 }
 0x14b   :  { %7407 = vmatpush1.bf16.msra.mxu1 %v14975_v62  ;;  %v12397_v62 = vrot.slane %v111_v37, %v115_v28 }
 0x14c   :  { %7473 = vmatprep.subr.bf16.mxu1 %v14976_v31  ;;  %v131_v31 = vsub.s32 4, %v12388_v42 }
 0x14d   :  { %14979 = vst [vmem:[#allocation144_spill] sm:$0xff] %v12397_v62 }
 0x14e   :  { %v12402_v43 = vrot.slane %v111_v37, %v131_v31  ;;  %v139_v31 = vsub.s32 6, %v12388_v42  ;;  %v14997_v42 = vld [vmem:[#allocation107_spill] sm:$0xff] }
 0x150   :  { %14980 = vst [vmem:[#allocation145_spill] sm:$0xff] %v12402_v43 }
 0x181   :  { %v1272_v49 = vpop.f32.mrb[0].mxu0 }
 0x182   :  { %v1274_v61 = vpop.f32.mrb[1].mxu0 }
 0x1a1   :  { %v1343_v29 = vpop.f32.mrb[8].mxu1 }
 0x1a2   :  { %v1345_v48 = vpop.f32.mrb[9].mxu1  ;;  %v10926_v61 = vadd.f32 %v1343_v29, %v12395_v56 }
 0x1a3   :  { %v10900_v48 = vadd.f32 %v1272_v49, %v12397_v62 }
 0x1a4   :  { %v6800_v23 = vmul.f32 -1.442695, %v10926_v61 }
 0x1a5   :  { %v6798_v16 = vmul.f32 -1.442695, %v10900_v48  ;;  %v12406_v48 = vrot.slane %v111_v37, %v139_v31  ;;  %v12412_v37 = vand.u32 127, %v113_v14  ;;  %v14984_v14 = vld [vmem:[#allocation63_spill] sm:$0xff] }
 0x1a6   :  { %11112 = vpow2.f32 %v6800_v23 }
 0x1a7   :  { %11114 = vpow2.f32 %v6798_v16  ;;  %14981 = vst [vmem:[#allocation146_spill] sm:$0xff] %v12412_v37  ;;  %vm1554_vm1 = vcmp.lt.s32.totalorder %v12412_v37, 32  ;;  %vm1916_vm2 = vcmp.lt.s32.totalorder %v12412_v37, 64  ;;  %vm2278_vm3 = vcmp.lt.s32.totalorder %v12412_v37, 96  ;;  %v15176_v37 = vld [vmem:[#allocation135_spill] sm:$0xff] }
 0x1b0   :  { %v11113_v28 = vpop.eup %11112 }
 0x1b1   :  { %v11115_v0 = vpop.eup %11114  ;;  %v1516_v35 = vadd.f32 1.0, %v11113_v28 }
 0x1b2   :  { %v1514_v29 = vadd.f32 1.0, %v11115_v0 }
 0x1c1   :  { %v1414_v10 = vpop.f32.mrb[22].mxu0 }
 0x1c2   :  { %v10948_v55 = vadd.f32 %v1414_v10, %v12402_v43  ;;  %v1416_v7 = vpop.f32.mrb[23].mxu0 }
 0x1c4   :  { %v6802_v39 = vmul.f32 -1.442695, %v10948_v55 }
 0x1c6   :  { %11116 = vpow2.f32 %v6802_v39 }
 0x1d0   :  { %v11117_v58 = vpop.eup %11116 }
 0x1d1   :  { %v1518_v57 = vadd.f32 1.0, %v11117_v58 }
 0x1d3   :  { %11118 = vrcp.f32 %v1518_v57 }
 0x1d4   :  { %11120 = vrcp.f32 %v1516_v35 }
 0x1d5   :  { %11122 = vrcp.f32 %v1514_v29 }
 0x1dd   :  { %v11119_v49 = vpop.eup %11118 }
 0x1de   :  { %v1538_v61 = vmul.f32 2.0, %v11119_v49  ;;  %v11121_v7 = vpop.eup %11120 }
 0x1df   :  { %v11123_v23 = vpop.eup %11122  ;;  %v1542_v55 = vmul.f32 0.0, %v11121_v7  ;;  %v14985_v7 = vld [vmem:[#allocation95_spill] sm:$0xff] }
 0x1e0   :  { %v6806_v10 = vadd.f32 -1.0, %v1538_v61  ;;  %v14983_v61 = vld [vmem:[#allocation93_spill] sm:$0xff] }
 0x1e1   :  { %v1485_v16 = vpop.f32.mrb[38].mxu1 }
 0x1e2   :  { %v1544_v39 = vmul.f32 %v11123_v23, %v6806_v10  ;;  %v10970_v43 = vadd.f32 %v1485_v16, %v12406_v48  ;;  %v1487_v28 = vpop.f32.mrb[39].mxu1  ;;  %v14986_v10 = vld [vmem:[#allocation65_spill] sm:$0xff]  ;;  %v14988_v16 = vld [vmem:[#allocation67_spill] sm:$0xff] }
 0x1e3   :  { %v14987_v23 = vld [vmem:[#allocation97_spill] sm:$0xff] }
 0x1e4   :  { %v12409_v58 = vadd.f32 %v1544_v39, %v1542_v55  ;;  %v6804_v57 = vmul.f32 -1.442695, %v10970_v43  ;;  %v14982_v43 = vld [vmem:[#allocation61_spill] sm:$0xff]  ;;  %v14989_v55 = vld [vmem:[#allocation99_spill] sm:$0xff] }
 0x1e5   :  { %v14990_v39 = vld [vmem:[#allocation69_spill] sm:$0xff] }
 0x1e6   :  { %11124 = vpow2.f32 %v6804_v57  ;;  %v14991_v28 = vld [vmem:[#allocation101_spill] sm:$0xff]  ;;  %v14992_v57 = vld [vmem:[#allocation71_spill] sm:$0xff] }
 0x1e7   :  { %11126 = vtanh.f32 %v12409_v58 }
 0x1f0   :  { %v11125_v35 = vpop.eup %11124 }
 0x1f1   :  { %v1520_v0 = vadd.f32 1.0, %v11125_v35  ;;  %v11127_v29 = vpop.eup %11126  ;;  %v14993_v35 = vld [vmem:[#allocation103_spill] sm:$0xff] }
 0x1f3   :  { %11128 = vrcp.f32 %v1520_v0  ;;  %v14994_v0 = vld [vmem:[#allocation73_spill] sm:$0xff] }
 0x1fd   :  { %v11129_v31 = vpop.eup %11128 }
 0x1fe   :  { %v12414_v49 = vmul.f32 %v11129_v31, %v11127_v29  ;;  %v14995_v29 = vld [vmem:[#allocation105_spill] sm:$0xff]  ;;  %v14996_v31 = vld [vmem:[#allocation75_spill] sm:$0xff] }
 0x200   :  { %6808 = vmatmul.mubr.msk.f32.vlgmr.msra.gmra.mrb[2].mxu0 %vm1554_vm1, %v12414_v49  ;;  %6809 = vmatmul.mubr.msk.f32.vlgmr.msra.gmra.mrb[10].mxu1 %vm1554_vm1, %v12414_v49 }
 0x201   :  { %7411 = vmatpush1.bf16.msra.mxu0 %v14982_v43  ;;  %7475 = vmatpush1.bf16.msra.mxu1 %v14983_v61 }
 0x202   :  { %7413 = vmatprep.subr.bf16.mxu0 %v14984_v14  ;;  %7477 = vmatprep.subr.bf16.mxu1 %v14985_v7 }
 0x203   :  { %1776 = vmatprep.mubr.f32.mxu0 %v14861_v8  ;;  %1847 = vmatprep.mubr.f32.mxu1 %v14861_v8 }
 0x205   :  { %7415 = vmatpush1.bf16.msra.mxu0 %v14986_v10  ;;  %7479 = vmatpush1.bf16.msra.mxu1 %v14987_v23  ;;  %v14998_v23 = vld [vmem:[#allocation77_spill] sm:$0xff] }
 0x206   :  { %7417 = vmatprep.subr.bf16.mxu0 %v14988_v16  ;;  %7481 = vmatprep.subr.bf16.mxu1 %v14989_v55  ;;  %v14999_v16 = vld [vmem:[#allocation109_spill] sm:$0xff]  ;;  %v15000_v55 = vld [vmem:[#allocation79_spill] sm:$0xff] }
 0x209   :  { %7419 = vmatpush1.bf16.msra.mxu0 %v14990_v39  ;;  %7483 = vmatpush1.bf16.msra.mxu1 %v14991_v28  ;;  %v15001_v28 = vld [vmem:[#allocation81_spill] sm:$0xff] }
 0x20a   :  { %7421 = vmatprep.subr.bf16.mxu0 %v14992_v57  ;;  %7485 = vmatprep.subr.bf16.mxu1 %v14993_v35  ;;  %v15002_v35 = vld [vmem:[#allocation83_spill] sm:$0xff] }
 0x20d   :  { %7423 = vmatpush1.bf16.msra.mxu0 %v14994_v0  ;;  %7487 = vmatpush1.bf16.msra.mxu1 %v14995_v29  ;;  %v15003_v29 = vld [vmem:[#allocation85_spill] sm:$0xff] }
 0x20e   :  { %7425 = vmatprep.subr.bf16.mxu0 %v14996_v31  ;;  %7489 = vmatprep.subr.bf16.mxu1 %v14997_v42  ;;  %v15004_v42 = vld [vmem:[#allocation87_spill] sm:$0xff] }
 0x211   :  { %7427 = vmatpush1.bf16.msra.mxu0 %v14998_v23  ;;  %7491 = vmatpush1.bf16.msra.mxu1 %v14999_v16  ;;  %v15005_v16 = vld [vmem:[#allocation89_spill] sm:$0xff] }
 0x212   :  { %7429 = vmatprep.subr.bf16.mxu0 %v15000_v55  ;;  %7493 = vmatprep.subr.bf16.mxu1 %v12226_v6  ;;  %v15006_v6 = vld [vmem:[#allocation90_spill] sm:$0xff] }
 0x215   :  { %7431 = vmatpush1.bf16.msra.mxu0 %v15001_v28  ;;  %7495 = vmatpush1.bf16.msra.mxu1 %v12232_v21  ;;  %v15007_v21 = vld [vmem:[#allocation92_spill] sm:$0xff] }
 0x216   :  { %7433 = vmatprep.subr.bf16.mxu0 %v15002_v35  ;;  %7497 = vmatprep.subr.bf16.mxu1 %v12238_v50  ;;  %v15008_v50 = vld [vmem:[#allocation94_spill] sm:$0xff] }
 0x219   :  { %7435 = vmatpush1.bf16.msra.mxu0 %v15003_v29  ;;  %7499 = vmatpush1.bf16.msra.mxu1 %v12244_v27  ;;  %v15009_v27 = vld [vmem:[#allocation96_spill] sm:$0xff] }
 0x21a   :  { %7437 = vmatprep.subr.bf16.mxu0 %v15004_v42  ;;  %7501 = vmatprep.subr.bf16.mxu1 %v12250_v59  ;;  %v15010_v59 = vld [vmem:[#allocation98_spill] sm:$0xff] }
 0x21d   :  { %7439 = vmatpush1.bf16.msra.mxu0 %v15005_v16  ;;  %7503 = vmatpush1.bf16.msra.mxu1 %v12256_v46  ;;  %v15011_v46 = vld [vmem:[#allocation100_spill] sm:$0xff] }
 0x21e   :  { %7441 = vmatprep.subr.bf16.mxu0 %v15006_v6  ;;  %7505 = vmatprep.subr.bf16.mxu1 %v12260_v63  ;;  %v15012_v63 = vld [vmem:[#allocation102_spill] sm:$0xff] }
 0x221   :  { %7443 = vmatpush1.bf16.msra.mxu0 %v15007_v21  ;;  %7507 = vmatpush1.bf16.msra.mxu1 %v12264_v4  ;;  %v15013_v4 = vld [vmem:[#allocation104_spill] sm:$0xff] }
 0x222   :  { %7445 = vmatprep.subr.bf16.mxu0 %v15008_v50  ;;  %7509 = vmatprep.subr.bf16.mxu1 %v12267_v3  ;;  %v15014_v3 = vld [vmem:[#allocation106_spill] sm:$0xff] }
 0x225   :  { %7447 = vmatpush1.bf16.msra.mxu0 %v15009_v27  ;;  %7511 = vmatpush1.bf16.msra.mxu1 %v12272_v60  ;;  %v15015_v60 = vld [vmem:[#allocation108_spill] sm:$0xff] }
 0x226   :  { %7449 = vmatprep.subr.bf16.mxu0 %v15010_v59  ;;  %7513 = vmatprep.subr.bf16.mxu1 %v12276_v5  ;;  %v15016_v5 = vld [vmem:[#allocation110_spill] sm:$0xff] }
 0x229   :  { %7451 = vmatpush1.bf16.msra.mxu0 %v15011_v46  ;;  %7515 = vmatpush1.bf16.msra.mxu1 %v12281_v36  ;;  %v15017_v36 = vld [vmem:[#allocation112_spill] sm:$0xff] }
 0x22a   :  { %7453 = vmatprep.subr.bf16.mxu0 %v15012_v63  ;;  %7517 = vmatprep.subr.bf16.mxu1 %v12285_v52 }
 0x22d   :  { %7455 = vmatpush1.bf16.msra.mxu0 %v15013_v4  ;;  %7519 = vmatpush1.bf16.msra.mxu1 %v12289_v11 }
 0x22e   :  { %7457 = vmatprep.subr.bf16.mxu0 %v15014_v3  ;;  %7521 = vmatprep.subr.bf16.mxu1 %v12293_v22 }
 0x231   :  { %7459 = vmatpush1.bf16.msra.mxu0 %v15015_v60  ;;  %7523 = vmatpush1.bf16.msra.mxu1 %v12297_v18  ;;  %v15018_v18 = vld [vmem:[#allocation120_spill] sm:$0xff] }
 0x232   :  { %7461 = vmatprep.subr.bf16.mxu0 %v15016_v5  ;;  %7525 = vmatprep.subr.bf16.mxu1 %v12301_v15  ;;  %v15019_v15 = vld [vmem:[#allocation10_spill] sm:$0xff] }
 0x235   :  { %7463 = vmatpush1.bf16.msra.mxu0 %v15017_v36  ;;  %7527 = vmatpush1.bf16.msra.mxu1 %v12305_v26 }
 0x236   :  { %7465 = vmatprep.subr.bf16.mxu0 %v12236_v34  ;;  %7529 = vmatprep.subr.bf16.mxu1 %v12309_v17 }
 0x239   :  { %7467 = vmatpush1.bf16.msra.mxu0 %v12242_v2  ;;  %7531 = vmatpush1.bf16.msra.mxu1 %v12313_v33  ;;  %v15020_v33 = vld [vmem:[#allocation12_spill] sm:$0xff] }
 0x23a   :  { %7469 = vmatprep.subr.bf16.mxu0 %v12248_v41  ;;  %7533 = vmatprep.subr.bf16.mxu1 %v12317_v25  ;;  %v15021_v25 = vld [vmem:[#allocation13_spill] sm:$0xff] }
 0x23d   :  { %7471 = vmatpush1.bf16.msra.mxu0 %v15018_v18  ;;  %7535 = vmatpush1.bf16.msra.mxu1 %v12321_v12  ;;  %v15024_v12 = vld [vmem:[#allocation16_spill] sm:$0xff] }
 0x23e   :  { %7537 = vmatprep.subr.bf16.mxu0 %v15019_v15  ;;  %7601 = vmatprep.subr.bf16.mxu1 %v11750_v1  ;;  %v15022_v1 = vld [vmem:[#allocation14_spill] sm:$0xff]  ;;  %v15023_v15 = vld [vmem:[#allocation15_spill] sm:$0xff] }
 0x240   :  { %6810 = vmatmul.mubr.msk.f32.vlgmr.msra.gmra.mrb[24].mxu0 %vm1554_vm1, %v12414_v49  ;;  %6811 = vmatmul.mubr.msk.f32.vlgmr.msra.gmra.mrb[40].mxu1 %vm1554_vm1, %v12414_v49 }
 0x241   :  { %7539 = vmatpush1.bf16.msra.mxu0 %v15020_v33  ;;  %7603 = vmatpush1.bf16.msra.mxu1 %v11910_v24  ;;  %v15025_v24 = vld [vmem:[#allocation17_spill] sm:$0xff] }
 0x242   :  { %7541 = vmatprep.subr.bf16.mxu0 %v15021_v25  ;;  %7605 = vmatprep.subr.bf16.mxu1 %v11916_v30  ;;  %v15026_v30 = vld [vmem:[#allocation18_spill] sm:$0xff]  ;;  %v15027_v25 = vld [vmem:[#allocation19_spill] sm:$0xff] }
 0x243   :  { %1996 = vmatprep.mubr.f32.mxu0 %v14861_v8  ;;  %2067 = vmatprep.mubr.f32.mxu1 %v14861_v8 }
 0x245   :  { %7543 = vmatpush1.bf16.msra.mxu0 %v15022_v1  ;;  %7607 = vmatpush1.bf16.msra.mxu1 %v11926_v44  ;;  %v15028_v44 = vld [vmem:[#allocation20_spill] sm:$0xff] }
 0x246   :  { %7545 = vmatprep.subr.bf16.mxu0 %v15023_v15  ;;  %7609 = vmatprep.subr.bf16.mxu1 %v11932_v20 }
 0x249   :  { %7547 = vmatpush1.bf16.msra.mxu0 %v15024_v12  ;;  %7611 = vmatpush1.bf16.msra.mxu1 %v11944_v13  ;;  %v15069_v13 = vld [vmem:[#allocation145_spill] sm:$0xff] }
 0x24a   :  { %7549 = vmatprep.subr.bf16.mxu0 %v15025_v24  ;;  %7613 = vmatprep.subr.bf16.mxu1 %v11950_v19 }
 0x24d   :  { %7551 = vmatpush1.bf16.msra.mxu0 %v15026_v30  ;;  %7615 = vmatpush1.bf16.msra.mxu1 %v11962_v38  ;;  %v15029_v38 = vld [vmem:[#allocation24_spill] sm:$0xff] }
 0x24e   :  { %7553 = vmatprep.subr.bf16.mxu0 %v15027_v25  ;;  %7617 = vmatprep.subr.bf16.mxu1 %v11968_v53  ;;  %v15030_v25 = vld [vmem:[#allocation53_spill] sm:$0xff] }
 0x24f   :  { %v15031_v53 = vld [vmem:[#allocation25_spill] sm:$0xff] }
 0x251   :  { %7555 = vmatpush1.bf16.msra.mxu0 %v15028_v44  ;;  %7619 = vmatpush1.bf16.msra.mxu1 %v14952_v32  ;;  %v15032_v44 = vld [vmem:[#allocation55_spill] sm:$0xff]  ;;  %v15033_v32 = vld [vmem:[#allocation26_spill] sm:$0xff] }
 0x252   :  { %7557 = vmatprep.subr.bf16.mxu0 %v11864_v40  ;;  %7621 = vmatprep.subr.bf16.mxu1 %v14954_v9  ;;  %v15034_v40 = vld [vmem:[#allocation57_spill] sm:$0xff]  ;;  %v15035_v9 = vld [vmem:[#allocation27_spill] sm:$0xff] }
 0x255   :  { %7559 = vmatpush1.bf16.msra.mxu0 %v11872_v47  ;;  %7623 = vmatpush1.bf16.msra.mxu1 %v11998_v45  ;;  %v15036_v47 = vld [vmem:[#allocation58_spill] sm:$0xff]  ;;  %v15037_v45 = vld [vmem:[#allocation28_spill] sm:$0xff] }
 0x256   :  { %7561 = vmatprep.subr.bf16.mxu0 %v11876_v51  ;;  %7625 = vmatprep.subr.bf16.mxu1 %v14958_v54  ;;  %v15038_v51 = vld [vmem:[#allocation60_spill] sm:$0xff]  ;;  %v15039_v54 = vld [vmem:[#allocation30_spill] sm:$0xff] }
 0x259   :  { %7563 = vmatpush1.bf16.msra.mxu0 %v15029_v38  ;;  %7627 = vmatpush1.bf16.msra.mxu1 %v15030_v25  ;;  %v15040_v38 = vld [vmem:[#allocation62_spill] sm:$0xff]  ;;  %v15041_v25 = vld [vmem:[#allocation32_spill] sm:$0xff] }
 0x25a   :  { %7565 = vmatprep.subr.bf16.mxu0 %v15031_v53  ;;  %7629 = vmatprep.subr.bf16.mxu1 %v15032_v44  ;;  %v15042_v53 = vld [vmem:[#allocation64_spill] sm:$0xff]  ;;  %v15043_v44 = vld [vmem:[#allocation34_spill] sm:$0xff] }
 0x25d   :  { %7567 = vmatpush1.bf16.msra.mxu0 %v15033_v32  ;;  %7631 = vmatpush1.bf16.msra.mxu1 %v15034_v40  ;;  %v15044_v32 = vld [vmem:[#allocation66_spill] sm:$0xff]  ;;  %v15045_v40 = vld [vmem:[#allocation36_spill] sm:$0xff] }
 0x25e   :  { %7569 = vmatprep.subr.bf16.mxu0 %v15035_v9  ;;  %7633 = vmatprep.subr.bf16.mxu1 %v15036_v47  ;;  %v15046_v9 = vld [vmem:[#allocation68_spill] sm:$0xff]  ;;  %v15047_v47 = vld [vmem:[#allocation38_spill] sm:$0xff] }
 0x261   :  { %7571 = vmatpush1.bf16.msra.mxu0 %v15037_v45  ;;  %7635 = vmatpush1.bf16.msra.mxu1 %v15038_v51  ;;  %v15048_v45 = vld [vmem:[#allocation70_spill] sm:$0xff]  ;;  %v15049_v51 = vld [vmem:[#allocation40_spill] sm:$0xff] }
 0x262   :  { %7573 = vmatprep.subr.bf16.mxu0 %v15039_v54  ;;  %7637 = vmatprep.subr.bf16.mxu1 %v15040_v38  ;;  %v15050_v54 = vld [vmem:[#allocation72_spill] sm:$0xff]  ;;  %v15051_v38 = vld [vmem:[#allocation42_spill] sm:$0xff] }
 0x265   :  { %7575 = vmatpush1.bf16.msra.mxu0 %v15041_v25  ;;  %7639 = vmatpush1.bf16.msra.mxu1 %v15042_v53  ;;  %v15052_v25 = vld [vmem:[#allocation74_spill] sm:$0xff]  ;;  %v15053_v53 = vld [vmem:[#allocation44_spill] sm:$0xff] }
 0x266   :  { %7577 = vmatprep.subr.bf16.mxu0 %v15043_v44  ;;  %7641 = vmatprep.subr.bf16.mxu1 %v15044_v32  ;;  %v15054_v44 = vld [vmem:[#allocation76_spill] sm:$0xff]  ;;  %v15055_v32 = vld [vmem:[#allocation46_spill] sm:$0xff] }
 0x269   :  { %7579 = vmatpush1.bf16.msra.mxu0 %v15045_v40  ;;  %7643 = vmatpush1.bf16.msra.mxu1 %v15046_v9  ;;  %v15056_v40 = vld [vmem:[#allocation78_spill] sm:$0xff]  ;;  %v15057_v9 = vld [vmem:[#allocation48_spill] sm:$0xff] }
 0x26a   :  { %7581 = vmatprep.subr.bf16.mxu0 %v15047_v47  ;;  %7645 = vmatprep.subr.bf16.mxu1 %v15048_v45  ;;  %v15058_v47 = vld [vmem:[#allocation80_spill] sm:$0xff]  ;;  %v15059_v45 = vld [vmem:[#allocation50_spill] sm:$0xff] }
 0x26d   :  { %7583 = vmatpush1.bf16.msra.mxu0 %v15049_v51  ;;  %7647 = vmatpush1.bf16.msra.mxu1 %v15050_v54  ;;  %v15060_v51 = vld [vmem:[#allocation82_spill] sm:$0xff]  ;;  %v15061_v54 = vld [vmem:[#allocation52_spill] sm:$0xff] }
 0x26e   :  { %7585 = vmatprep.subr.bf16.mxu0 %v15051_v38  ;;  %7649 = vmatprep.subr.bf16.mxu1 %v15052_v25  ;;  %v15062_v38 = vld [vmem:[#allocation84_spill] sm:$0xff]  ;;  %v15063_v25 = vld [vmem:[#allocation54_spill] sm:$0xff] }
 0x271   :  { %7587 = vmatpush1.bf16.msra.mxu0 %v15053_v53  ;;  %7651 = vmatpush1.bf16.msra.mxu1 %v15054_v44  ;;  %v15064_v53 = vld [vmem:[#allocation86_spill] sm:$0xff]  ;;  %v15065_v44 = vld [vmem:[#allocation56_spill] sm:$0xff] }
 0x272   :  { %7589 = vmatprep.subr.bf16.mxu0 %v15055_v32  ;;  %7653 = vmatprep.subr.bf16.mxu1 %v15056_v40  ;;  %v15066_v32 = vld [vmem:[#allocation88_spill] sm:$0xff]  ;;  %v15067_v40 = vld [vmem:[#allocation59_spill] sm:$0xff] }
 0x275   :  { %7591 = vmatpush1.bf16.msra.mxu0 %v15057_v9  ;;  %7655 = vmatpush1.bf16.msra.mxu1 %v15058_v47  ;;  %v15068_v9 = vld [vmem:[#allocation91_spill] sm:$0xff] }
 0x276   :  { %7593 = vmatprep.subr.bf16.mxu0 %v15059_v45  ;;  %7657 = vmatprep.subr.bf16.mxu1 %v15060_v51 }
 0x279   :  { %7595 = vmatpush1.bf16.msra.mxu0 %v15061_v54  ;;  %7659 = vmatpush1.bf16.msra.mxu1 %v15062_v38 }
 0x27a   :  { %7597 = vmatprep.subr.bf16.mxu0 %v15063_v25  ;;  %7661 = vmatprep.subr.bf16.mxu1 %v15064_v53 }
 0x27d   :  { %7599 = vmatpush1.bf16.msra.mxu0 %v15065_v44  ;;  %7663 = vmatpush1.bf16.msra.mxu1 %v15066_v32 }
 0x27e   :  { %7665 = vmatprep.subr.bf16.mxu0 %v15067_v40  ;;  %7729 = vmatprep.subr.bf16.mxu1 %v15068_v9 }
 0x2d3   :  { %v1636_v47 = vpop.f32.mrb[2].mxu0  ;;  %v1707_v45 = vpop.f32.mrb[10].mxu1 }
 0x2d4   :  { %v1638_v30 = vpop.f32.mrb[3].mxu0  ;;  %v1709_v51 = vpop.f32.mrb[11].mxu1  ;;  %v10927_v54 = vadd.f32 %v1707_v45, %v12395_v56  ;;  %v10901_v38 = vadd.f32 %v1636_v47, %v12397_v62 }
 0x2d6   :  { %v6814_v19 = vmul.f32 -1.442695, %v10927_v54  ;;  %v6812_v25 = vmul.f32 -1.442695, %v10901_v38 }
 0x2d8   :  { %11130 = vpow2.f32 %v6814_v19 }
 0x2d9   :  { %11132 = vpow2.f32 %v6812_v25 }
 0x2e2   :  { %v11131_v30 = vpop.eup %11130 }
 0x2e3   :  { %v11133_v51 = vpop.eup %11132  ;;  %v1880_v56 = vadd.f32 1.0, %v11131_v30 }
 0x2e4   :  { %v1878_v54 = vadd.f32 1.0, %v11133_v51 }
 0x313   :  { %v1778_v24 = vpop.f32.mrb[24].mxu0  ;;  %v1849_v53 = vpop.f32.mrb[40].mxu1 }
 0x314   :  { %v10949_v44 = vadd.f32 %v1778_v24, %v15069_v13  ;;  %v1780_v12 = vpop.f32.mrb[25].mxu0  ;;  %v1851_v32 = vpop.f32.mrb[41].mxu1  ;;  %v10971_v9 = vadd.f32 %v1849_v53, %v12406_v48 }
 0x316   :  { %v6816_v40 = vmul.f32 -1.442695, %v10949_v44  ;;  %v6818_v45 = vmul.f32 -1.442695, %v10971_v9 }
 0x318   :  { %11134 = vpow2.f32 %v6816_v40  ;;  %v1558_v40 = vsel %vm1554_vm1, %v12409_v58, 0.0  ;;  %v15070_v58 = vld [vmem:[#allocation97_spill] sm:$0xff] }
 0x322   :  { %v11135_v20 = vpop.eup %11134 }
 0x323   :  { %v1882_v47 = vadd.f32 1.0, %v11135_v20 }
 0x325   :  { %11136 = vrcp.f32 %v1882_v47  ;;  %v1560_v47 = vsel %vm1554_vm1, %v12414_v49, 0.0  ;;  %v15071_v49 = vld [vmem:[#allocation67_spill] sm:$0xff] }
 0x326   :  { %11138 = vpow2.f32 %v6818_v45 }
 0x327   :  { %11140 = vrcp.f32 %v1880_v56 }
 0x328   :  { %11142 = vrcp.f32 %v1878_v54 }
 0x32f   :  { %v11137_v24 = vpop.eup %11136 }
 0x330   :  { %v11139_v38 = vpop.eup %11138  ;;  %v1902_v12 = vmul.f32 2.0, %v11137_v24  ;;  %v15072_v24 = vld [vmem:[#allocation99_spill] sm:$0xff] }
 0x331   :  { %v11141_v19 = vpop.eup %11140  ;;  %v1884_v53 = vadd.f32 1.0, %v11139_v38  ;;  %v15073_v38 = vld [vmem:[#allocation101_spill] sm:$0xff] }
 0x332   :  { %v6820_v44 = vadd.f32 -1.0, %v1902_v12  ;;  %v11143_v25 = vpop.eup %11142  ;;  %v1906_v32 = vmul.f32 %v11141_v19, %v1558_v40  ;;  %v15074_v12 = vld [vmem:[#allocation103_spill] sm:$0xff]  ;;  %v15075_v19 = vld [vmem:[#allocation105_spill] sm:$0xff] }
 0x333   :  { %11144 = vrcp.f32 %v1884_v53  ;;  %v15079_v53 = vld [vmem:[#allocation113_spill] sm:$0xff] }
 0x334   :  { %v1908_v9 = vmul.f32 %v11143_v25, %v6820_v44  ;;  %v15076_v44 = vld [vmem:[#allocation107_spill] sm:$0xff]  ;;  %v15077_v25 = vld [vmem:[#allocation109_spill] sm:$0xff] }
 0x336   :  { %v1910_v20 = vadd.f32 %v1908_v9, %v1906_v32  ;;  %v15080_v32 = vld [vmem:[#allocation115_spill] sm:$0xff]  ;;  %v15081_v9 = vld [vmem:[#allocation117_spill] sm:$0xff] }
 0x338   :  { %11146 = vtanh.f32 %v1910_v20  ;;  %v12569_v56 = vsel %vm1916_vm2, %v1910_v20, %v1558_v40  ;;  %v15078_v40 = vld [vmem:[#allocation111_spill] sm:$0xff] }
 0x339   :  { %v15082_v20 = vld [vmem:[#allocation119_spill] sm:$0xff] }
 0x33d   :  { %v11145_v30 = vpop.eup %11144 }
 0x342   :  { %v11147_v51 = vpop.eup %11146 }
 0x343   :  { %v1914_v45 = vmul.f32 %v11147_v51, %v11145_v30  ;;  %v15083_v30 = vld [vmem:[#allocation121_spill] sm:$0xff]  ;;  %v15084_v51 = vld [vmem:[#allocation122_spill] sm:$0xff] }
 0x345   :  { %v12574_v54 = vsel %vm1916_vm2, %v1914_v45, %v1560_v47  ;;  %v15085_v45 = vld [vmem:[#allocation123_spill] sm:$0xff]  ;;  %v15086_v47 = vld [vmem:[#allocation124_spill] sm:$0xff] }
 0x346   :  { %1997 = vmatmul.mubr.f32.vlgmr.msra.gmra.mrb[4].mxu0 %v12574_v54  ;;  %2068 = vmatmul.mubr.f32.vlgmr.msra.gmra.mrb[12].mxu1 %v12574_v54 }
 0x347   :  { %7667 = vmatpush1.bf16.msra.mxu0 %v14982_v43  ;;  %7731 = vmatpush1.bf16.msra.mxu1 %v14983_v61 }
 0x348   :  { %7669 = vmatprep.subr.bf16.mxu0 %v14984_v14  ;;  %7733 = vmatprep.subr.bf16.mxu1 %v14985_v7 }
 0x349   :  { %2138 = vmatprep.mubr.f32.mxu0 %v14861_v8  ;;  %2209 = vmatprep.mubr.f32.mxu1 %v14861_v8 }
 0x34b   :  { %7671 = vmatpush1.bf16.msra.mxu0 %v14986_v10  ;;  %7735 = vmatpush1.bf16.msra.mxu1 %v15070_v58 }
 0x34c   :  { %7673 = vmatprep.subr.bf16.mxu0 %v15071_v49  ;;  %7737 = vmatprep.subr.bf16.mxu1 %v15072_v24 }
 0x34f   :  { %7675 = vmatpush1.bf16.msra.mxu0 %v14990_v39  ;;  %7739 = vmatpush1.bf16.msra.mxu1 %v15073_v38 }
 0x350   :  { %7677 = vmatprep.subr.bf16.mxu0 %v14992_v57  ;;  %7741 = vmatprep.subr.bf16.mxu1 %v15074_v12 }
 0x353   :  { %7679 = vmatpush1.bf16.msra.mxu0 %v14994_v0  ;;  %7743 = vmatpush1.bf16.msra.mxu1 %v15075_v19 }
 0x354   :  { %7681 = vmatprep.subr.bf16.mxu0 %v14996_v31  ;;  %7745 = vmatprep.subr.bf16.mxu1 %v15076_v44 }
 0x357   :  { %7683 = vmatpush1.bf16.msra.mxu0 %v14998_v23  ;;  %7747 = vmatpush1.bf16.msra.mxu1 %v15077_v25 }
 0x358   :  { %7685 = vmatprep.subr.bf16.mxu0 %v15000_v55  ;;  %7749 = vmatprep.subr.bf16.mxu1 %v15078_v40 }
 0x35b   :  { %7687 = vmatpush1.bf16.msra.mxu0 %v15001_v28  ;;  %7751 = vmatpush1.bf16.msra.mxu1 %v15079_v53 }
 0x35c   :  { %7689 = vmatprep.subr.bf16.mxu0 %v15002_v35  ;;  %7753 = vmatprep.subr.bf16.mxu1 %v15080_v32 }
 0x35f   :  { %7691 = vmatpush1.bf16.msra.mxu0 %v15003_v29  ;;  %7755 = vmatpush1.bf16.msra.mxu1 %v15081_v9 }
 0x360   :  { %7693 = vmatprep.subr.bf16.mxu0 %v15004_v42  ;;  %7757 = vmatprep.subr.bf16.mxu1 %v15082_v20  ;;  %v15087_v42 = vld [vmem:[#allocation125_spill] sm:$0xff] }
 0x363   :  { %7695 = vmatpush1.bf16.msra.mxu0 %v15005_v16  ;;  %7759 = vmatpush1.bf16.msra.mxu1 %v15083_v30  ;;  %v15088_v16 = vld [vmem:[#allocation126_spill] sm:$0xff] }
 0x364   :  { %7697 = vmatprep.subr.bf16.mxu0 %v15006_v6  ;;  %7761 = vmatprep.subr.bf16.mxu1 %v15084_v51  ;;  %v15089_v6 = vld [vmem:[#allocation127_spill] sm:$0xff] }
 0x367   :  { %7699 = vmatpush1.bf16.msra.mxu0 %v15007_v21  ;;  %7763 = vmatpush1.bf16.msra.mxu1 %v15085_v45 }
 0x368   :  { %7701 = vmatprep.subr.bf16.mxu0 %v15008_v50  ;;  %7765 = vmatprep.subr.bf16.mxu1 %v15086_v47 }
 0x36b   :  { %7703 = vmatpush1.bf16.msra.mxu0 %v15009_v27  ;;  %7767 = vmatpush1.bf16.msra.mxu1 %v15087_v42 }
 0x36c   :  { %7705 = vmatprep.subr.bf16.mxu0 %v15010_v59  ;;  %7769 = vmatprep.subr.bf16.mxu1 %v15088_v16  ;;  %v15090_v59 = vld [vmem:[#allocation131_spill] sm:$0xff] }
 0x36f   :  { %7707 = vmatpush1.bf16.msra.mxu0 %v15011_v46  ;;  %7771 = vmatpush1.bf16.msra.mxu1 %v15089_v6  ;;  %v15091_v46 = vld [vmem:[#allocation132_spill] sm:$0xff] }
 0x370   :  { %7709 = vmatprep.subr.bf16.mxu0 %v15012_v63  ;;  %7773 = vmatprep.subr.bf16.mxu1 %v12285_v52 }
 0x373   :  { %7711 = vmatpush1.bf16.msra.mxu0 %v15013_v4  ;;  %7775 = vmatpush1.bf16.msra.mxu1 %v12289_v11 }
 0x374   :  { %7713 = vmatprep.subr.bf16.mxu0 %v15014_v3  ;;  %7777 = vmatprep.subr.bf16.mxu1 %v12293_v22  ;;  %v15092_v3 = vld [vmem:[#allocation135_spill] sm:$0xff] }
 0x377   :  { %7715 = vmatpush1.bf16.msra.mxu0 %v15015_v60  ;;  %7779 = vmatpush1.bf16.msra.mxu1 %v15090_v59  ;;  %v15093_v60 = vld [vmem:[#allocation136_spill] sm:$0xff] }
 0x378   :  { %7717 = vmatprep.subr.bf16.mxu0 %v15016_v5  ;;  %7781 = vmatprep.subr.bf16.mxu1 %v15091_v46  ;;  %v15094_v5 = vld [vmem:[#allocation137_spill] sm:$0xff]  ;;  %v15095_v46 = vld [vmem:[#allocation10_spill] sm:$0xff] }
 0x37b   :  { %7719 = vmatpush1.bf16.msra.mxu0 %v15017_v36  ;;  %7783 = vmatpush1.bf16.msra.mxu1 %v12305_v26  ;;  %v15096_v36 = vld [vmem:[#allocation11_spill] sm:$0xff] }
 0x37c   :  { %7721 = vmatprep.subr.bf16.mxu0 %v12236_v34  ;;  %7785 = vmatprep.subr.bf16.mxu1 %v12309_v17  ;;  %v15158_v34 = vld [vmem:[#allocation143_spill] sm:$0xff] }
 0x37f   :  { %7723 = vmatpush1.bf16.msra.mxu0 %v12242_v2  ;;  %7787 = vmatpush1.bf16.msra.mxu1 %v15092_v3  ;;  %v15097_v2 = vld [vmem:[#allocation29_spill] sm:$0xff] }
 0x380   :  { %7725 = vmatprep.subr.bf16.mxu0 %v12248_v41  ;;  %7789 = vmatprep.subr.bf16.mxu1 %v15093_v60  ;;  %v15098_v3 = vld [vmem:[#allocation13_spill] sm:$0xff]  ;;  %v15099_v41 = vld [vmem:[#allocation31_spill] sm:$0xff] }
 0x381   :  { %v15108_v60 = vld [vmem:[#allocation19_spill] sm:$0xff] }
 0x383   :  { %7727 = vmatpush1.bf16.msra.mxu0 %v15018_v18  ;;  %7791 = vmatpush1.bf16.msra.mxu1 %v15094_v5  ;;  %v15102_v5 = vld [vmem:[#allocation16_spill] sm:$0xff]  ;;  %v15107_v18 = vld [vmem:[#allocation41_spill] sm:$0xff] }
 0x384   :  { %7793 = vmatprep.subr.bf16.mxu0 %v15095_v46  ;;  %7857 = vmatprep.subr.bf16.mxu1 %v15096_v36  ;;  %v15100_v46 = vld [vmem:[#allocation33_spill] sm:$0xff]  ;;  %v15101_v36 = vld [vmem:[#allocation35_spill] sm:$0xff] }
 0x386   :  { %2139 = vmatmul.mubr.f32.vlgmr.msra.gmra.mrb[26].mxu0 %v12574_v54  ;;  %2210 = vmatmul.mubr.f32.vlgmr.msra.gmra.mrb[42].mxu1 %v12574_v54 }
 0x387   :  { %7795 = vmatpush1.bf16.msra.mxu0 %v15020_v33  ;;  %7859 = vmatpush1.bf16.msra.mxu1 %v15097_v2  ;;  %v15103_v33 = vld [vmem:[#allocation37_spill] sm:$0xff] }
 0x388   :  { %7797 = vmatprep.subr.bf16.mxu0 %v15098_v3  ;;  %7861 = vmatprep.subr.bf16.mxu1 %v15099_v41  ;;  %v15104_v2 = vld [vmem:[#allocation17_spill] sm:$0xff]  ;;  %v15105_v3 = vld [vmem:[#allocation39_spill] sm:$0xff]  ;;  %v15106_v41 = vld [vmem:[#allocation18_spill] sm:$0xff] }
 0x389   :  { %2358 = vmatprep.mubr.f32.mxu0 %v14861_v8  ;;  %2429 = vmatprep.mubr.f32.mxu1 %v14861_v8 }
 0x38b   :  { %7799 = vmatpush1.bf16.msra.mxu0 %v15022_v1  ;;  %7863 = vmatpush1.bf16.msra.mxu1 %v15100_v46  ;;  %v15109_v1 = vld [vmem:[#allocation43_spill] sm:$0xff]  ;;  %v15110_v46 = vld [vmem:[#allocation20_spill] sm:$0xff] }
 0x38c   :  { %7801 = vmatprep.subr.bf16.mxu0 %v15023_v15  ;;  %7865 = vmatprep.subr.bf16.mxu1 %v15101_v36  ;;  %v15111_v15 = vld [vmem:[#allocation45_spill] sm:$0xff] }
 0x38d   :  { %v15112_v36 = vld [vmem:[#allocation21_spill] sm:$0xff] }
 0x38f   :  { %7803 = vmatpush1.bf16.msra.mxu0 %v15102_v5  ;;  %7867 = vmatpush1.bf16.msra.mxu1 %v15103_v33  ;;  %v15113_v5 = vld [vmem:[#allocation47_spill] sm:$0xff]  ;;  %v15114_v33 = vld [vmem:[#allocation22_spill] sm:$0xff] }
 0x390   :  { %7805 = vmatprep.subr.bf16.mxu0 %v15104_v2  ;;  %7869 = vmatprep.subr.bf16.mxu1 %v15105_v3  ;;  %v15115_v2 = vld [vmem:[#allocation49_spill] sm:$0xff]  ;;  %v15116_v3 = vld [vmem:[#allocation23_spill] sm:$0xff] }
 0x393   :  { %7807 = vmatpush1.bf16.msra.mxu0 %v15106_v41  ;;  %7871 = vmatpush1.bf16.msra.mxu1 %v15107_v18  ;;  %v15117_v41 = vld [vmem:[#allocation51_spill] sm:$0xff]  ;;  %v15118_v18 = vld [vmem:[#allocation24_spill] sm:$0xff] }
 0x394   :  { %7809 = vmatprep.subr.bf16.mxu0 %v15108_v60  ;;  %7873 = vmatprep.subr.bf16.mxu1 %v15109_v1  ;;  %v15119_v60 = vld [vmem:[#allocation53_spill] sm:$0xff] }
 0x395   :  { %v15120_v1 = vld [vmem:[#allocation25_spill] sm:$0xff] }
 0x397   :  { %7811 = vmatpush1.bf16.msra.mxu0 %v15110_v46  ;;  %7875 = vmatpush1.bf16.msra.mxu1 %v15111_v15  ;;  %v15121_v46 = vld [vmem:[#allocation55_spill] sm:$0xff]  ;;  %v15122_v15 = vld [vmem:[#allocation26_spill] sm:$0xff] }
 0x398   :  { %7813 = vmatprep.subr.bf16.mxu0 %v15112_v36  ;;  %7877 = vmatprep.subr.bf16.mxu1 %v15113_v5  ;;  %v15123_v36 = vld [vmem:[#allocation57_spill] sm:$0xff]  ;;  %v15124_v5 = vld [vmem:[#allocation27_spill] sm:$0xff] }
 0x39b   :  { %7815 = vmatpush1.bf16.msra.mxu0 %v15114_v33  ;;  %7879 = vmatpush1.bf16.msra.mxu1 %v15115_v2  ;;  %v15125_v33 = vld [vmem:[#allocation58_spill] sm:$0xff]  ;;  %v15126_v2 = vld [vmem:[#allocation28_spill] sm:$0xff] }
 0x39c   :  { %7817 = vmatprep.subr.bf16.mxu0 %v15116_v3  ;;  %7881 = vmatprep.subr.bf16.mxu1 %v15117_v41  ;;  %v15127_v3 = vld [vmem:[#allocation60_spill] sm:$0xff]  ;;  %v15128_v41 = vld [vmem:[#allocation30_spill] sm:$0xff] }
 0x39f   :  { %7819 = vmatpush1.bf16.msra.mxu0 %v15118_v18  ;;  %7883 = vmatpush1.bf16.msra.mxu1 %v15119_v60  ;;  %v15129_v18 = vld [vmem:[#allocation62_spill] sm:$0xff]  ;;  %v15130_v60 = vld [vmem:[#allocation32_spill] sm:$0xff] }
 0x3a0   :  { %7821 = vmatprep.subr.bf16.mxu0 %v15120_v1  ;;  %7885 = vmatprep.subr.bf16.mxu1 %v15121_v46  ;;  %v15131_v1 = vld [vmem:[#allocation64_spill] sm:$0xff]  ;;  %v15132_v46 = vld [vmem:[#allocation34_spill] sm:$0xff] }
 0x3a3   :  { %7823 = vmatpush1.bf16.msra.mxu0 %v15122_v15  ;;  %7887 = vmatpush1.bf16.msra.mxu1 %v15123_v36  ;;  %v15133_v15 = vld [vmem:[#allocation66_spill] sm:$0xff]  ;;  %v15134_v36 = vld [vmem:[#allocation36_spill] sm:$0xff] }
 0x3a4   :  { %7825 = vmatprep.subr.bf16.mxu0 %v15124_v5  ;;  %7889 = vmatprep.subr.bf16.mxu1 %v15125_v33  ;;  %v15135_v5 = vld [vmem:[#allocation68_spill] sm:$0xff]  ;;  %v15136_v33 = vld [vmem:[#allocation38_spill] sm:$0xff] }
 0x3a7   :  { %7827 = vmatpush1.bf16.msra.mxu0 %v15126_v2  ;;  %7891 = vmatpush1.bf16.msra.mxu1 %v15127_v3  ;;  %v15137_v2 = vld [vmem:[#allocation70_spill] sm:$0xff]  ;;  %v15138_v3 = vld [vmem:[#allocation40_spill] sm:$0xff] }
 0x3a8   :  { %7829 = vmatprep.subr.bf16.mxu0 %v15128_v41  ;;  %7893 = vmatprep.subr.bf16.mxu1 %v15129_v18  ;;  %v15139_v41 = vld [vmem:[#allocation72_spill] sm:$0xff]  ;;  %v15140_v18 = vld [vmem:[#allocation42_spill] sm:$0xff] }
 0x3ab   :  { %7831 = vmatpush1.bf16.msra.mxu0 %v15130_v60  ;;  %7895 = vmatpush1.bf16.msra.mxu1 %v15131_v1  ;;  %v15141_v60 = vld [vmem:[#allocation74_spill] sm:$0xff]  ;;  %v15142_v1 = vld [vmem:[#allocation44_spill] sm:$0xff] }
 0x3ac   :  { %7833 = vmatprep.subr.bf16.mxu0 %v15132_v46  ;;  %7897 = vmatprep.subr.bf16.mxu1 %v15133_v15  ;;  %v15143_v46 = vld [vmem:[#allocation76_spill] sm:$0xff]  ;;  %v15144_v15 = vld [vmem:[#allocation46_spill] sm:$0xff] }
 0x3af   :  { %7835 = vmatpush1.bf16.msra.mxu0 %v15134_v36  ;;  %7899 = vmatpush1.bf16.msra.mxu1 %v15135_v5  ;;  %v15145_v36 = vld [vmem:[#allocation78_spill] sm:$0xff]  ;;  %v15146_v5 = vld [vmem:[#allocation48_spill] sm:$0xff] }
 0x3b0   :  { %7837 = vmatprep.subr.bf16.mxu0 %v15136_v33  ;;  %7901 = vmatprep.subr.bf16.mxu1 %v15137_v2  ;;  %v15147_v33 = vld [vmem:[#allocation80_spill] sm:$0xff]  ;;  %v15148_v2 = vld [vmem:[#allocation50_spill] sm:$0xff] }
 0x3b3   :  { %7839 = vmatpush1.bf16.msra.mxu0 %v15138_v3  ;;  %7903 = vmatpush1.bf16.msra.mxu1 %v15139_v41  ;;  %v15149_v3 = vld [vmem:[#allocation82_spill] sm:$0xff]  ;;  %v15150_v41 = vld [vmem:[#allocation52_spill] sm:$0xff] }
 0x3b4   :  { %7841 = vmatprep.subr.bf16.mxu0 %v15140_v18  ;;  %7905 = vmatprep.subr.bf16.mxu1 %v15141_v60  ;;  %v15151_v18 = vld [vmem:[#allocation84_spill] sm:$0xff]  ;;  %v15152_v60 = vld [vmem:[#allocation54_spill] sm:$0xff] }
 0x3b7   :  { %7843 = vmatpush1.bf16.msra.mxu0 %v15142_v1  ;;  %7907 = vmatpush1.bf16.msra.mxu1 %v15143_v46  ;;  %v15153_v1 = vld [vmem:[#allocation86_spill] sm:$0xff]  ;;  %v15154_v46 = vld [vmem:[#allocation56_spill] sm:$0xff] }
 0x3b8   :  { %7845 = vmatprep.subr.bf16.mxu0 %v15144_v15  ;;  %7909 = vmatprep.subr.bf16.mxu1 %v15145_v36  ;;  %v15155_v15 = vld [vmem:[#allocation88_spill] sm:$0xff]  ;;  %v15156_v36 = vld [vmem:[#allocation59_spill] sm:$0xff] }
 0x3bb   :  { %7847 = vmatpush1.bf16.msra.mxu0 %v15146_v5  ;;  %7911 = vmatpush1.bf16.msra.mxu1 %v15147_v33  ;;  %v15157_v5 = vld [vmem:[#allocation91_spill] sm:$0xff] }
 0x3bc   :  { %7849 = vmatprep.subr.bf16.mxu0 %v15148_v2  ;;  %7913 = vmatprep.subr.bf16.mxu1 %v15149_v3 }
 0x3bf   :  { %7851 = vmatpush1.bf16.msra.mxu0 %v15150_v41  ;;  %7915 = vmatpush1.bf16.msra.mxu1 %v15151_v18 }
 0x3c0   :  { %7853 = vmatprep.subr.bf16.mxu0 %v15152_v60  ;;  %7917 = vmatprep.subr.bf16.mxu1 %v15153_v1 }
 0x3c3   :  { %7855 = vmatpush1.bf16.msra.mxu0 %v15154_v46  ;;  %7919 = vmatpush1.bf16.msra.mxu1 %v15155_v15 }
 0x3c4   :  { %7921 = vmatprep.subr.bf16.mxu0 %v15156_v36  ;;  %7985 = vmatprep.subr.bf16.mxu1 %v15157_v5 }
 0x419   :  { %v1998_v33 = vpop.f32.mrb[4].mxu0  ;;  %v2069_v2 = vpop.f32.mrb[12].mxu1 }
 0x41a   :  { %v2000_v17 = vpop.f32.mrb[5].mxu0  ;;  %v2071_v3 = vpop.f32.mrb[13].mxu1  ;;  %v10928_v41 = vadd.f32 %v2069_v2, %v15158_v34  ;;  %v10902_v18 = vadd.f32 %v1998_v33, %v12397_v62 }
 0x41c   :  { %v6824_v26 = vmul.f32 -1.442695, %v10928_v41  ;;  %v6822_v60 = vmul.f32 -1.442695, %v10902_v18 }
 0x41e   :  { %11148 = vpow2.f32 %v6824_v26 }
 0x41f   :  { %11150 = vpow2.f32 %v6822_v60 }
 0x428   :  { %v11149_v17 = vpop.eup %11148 }
 0x429   :  { %v11151_v3 = vpop.eup %11150  ;;  %v2242_v34 = vadd.f32 1.0, %v11149_v17 }
 0x42a   :  { %v2240_v41 = vadd.f32 1.0, %v11151_v3 }
 0x459   :  { %v2140_v59 = vpop.f32.mrb[26].mxu0  ;;  %v2211_v1 = vpop.f32.mrb[42].mxu1 }
 0x45a   :  { %v10950_v46 = vadd.f32 %v2140_v59, %v15069_v13  ;;  %v2142_v22 = vpop.f32.mrb[27].mxu0  ;;  %v2213_v15 = vpop.f32.mrb[43].mxu1  ;;  %v10972_v5 = vadd.f32 %v2211_v1, %v12406_v48 }
 0x45c   :  { %v6826_v36 = vmul.f32 -1.442695, %v10950_v46  ;;  %v6828_v2 = vmul.f32 -1.442695, %v10972_v5 }
 0x45e   :  { %11152 = vpow2.f32 %v6826_v36 }
 0x468   :  { %v11153_v11 = vpop.eup %11152 }
 0x469   :  { %v2244_v33 = vadd.f32 1.0, %v11153_v11 }
 0x46b   :  { %11154 = vrcp.f32 %v2244_v33  ;;  %v15161_v33 = vld [vmem:[#allocation90_spill] sm:$0xff] }
 0x46c   :  { %11156 = vpow2.f32 %v6828_v2 }
 0x46d   :  { %11158 = vrcp.f32 %v2242_v34 }
 0x46e   :  { %11160 = vrcp.f32 %v2240_v41  ;;  %v15162_v41 = vld [vmem:[#allocation98_spill] sm:$0xff] }
 0x475   :  { %v11155_v18 = vpop.eup %11154 }
 0x476   :  { %v11157_v59 = vpop.eup %11156  ;;  %v2264_v22 = vmul.f32 2.0, %v11155_v18  ;;  %v15163_v18 = vld [vmem:[#allocation100_spill] sm:$0xff] }
 0x477   :  { %v11159_v26 = vpop.eup %11158  ;;  %v2246_v36 = vadd.f32 1.0, %v11157_v59  ;;  %v15164_v59 = vld [vmem:[#allocation129_spill] sm:$0xff] }
 0x478   :  { %v6830_v46 = vadd.f32 -1.0, %v2264_v22  ;;  %v11161_v60 = vpop.eup %11160  ;;  %v2268_v1 = vmul.f32 %v11159_v26, %v12569_v56  ;;  %v15165_v22 = vld [vmem:[#allocation106_spill] sm:$0xff] }
 0x479   :  { %11162 = vrcp.f32 %v2246_v36  ;;  %v15166_v26 = vld [vmem:[#allocation130_spill] sm:$0xff] }
 0x47a   :  { %v2270_v15 = vmul.f32 %v11161_v60, %v6830_v46  ;;  %v15167_v46 = vld [vmem:[#allocation108_spill] sm:$0xff]  ;;  %v15168_v60 = vld [vmem:[#allocation131_spill] sm:$0xff]  ;;  %v15169_v36 = vld [vmem:[#allocation110_spill] sm:$0xff] }
 0x47c   :  { %v2272_v5 = vadd.f32 %v2270_v15, %v2268_v1  ;;  %v15170_v15 = vld [vmem:[#allocation132_spill] sm:$0xff] }
 0x47d   :  { %v15171_v1 = vld [vmem:[#allocation112_spill] sm:$0xff] }
 0x47e   :  { %11164 = vtanh.f32 %v2272_v5  ;;  %v12719_v11 = vsel %vm2278_vm3, %v2272_v5, %v12569_v56  ;;  %v15159_v56 = vld [vmem:[#allocation87_spill] sm:$0xff]  ;;  %v15172_v5 = vld [vmem:[#allocation133_spill] sm:$0xff] }
 0x483   :  { %v11163_v34 = vpop.eup %11162 }
 0x488   :  { %v11165_v17 = vpop.eup %11164 }
 0x489   :  { %v2276_v3 = vmul.f32 %v11165_v17, %v11163_v34  ;;  %v15173_v34 = vld [vmem:[#allocation114_spill] sm:$0xff] }
 0x48a   :  { %v15174_v17 = vld [vmem:[#allocation134_spill] sm:$0xff] }
 0x48b   :  { %v12722_v2 = vsel %vm2278_vm3, %v2276_v3, %v12574_v54  ;;  %v15160_v54 = vld [vmem:[#allocation89_spill] sm:$0xff]  ;;  %v15175_v3 = vld [vmem:[#allocation116_spill] sm:$0xff] }
 0x48c   :  { %2359 = vmatmul.mubr.f32.vlgmr.msra.gmra.mrb[6].mxu0 %v12722_v2  ;;  %2430 = vmatmul.mubr.f32.vlgmr.msra.gmra.mrb[14].mxu1 %v12722_v2 }
 0x48d   :  { %7923 = vmatpush1.bf16.msra.mxu0 %v14982_v43  ;;  %7987 = vmatpush1.bf16.msra.mxu1 %v14983_v61 }
 0x48e   :  { %7925 = vmatprep.subr.bf16.mxu0 %v14984_v14  ;;  %7989 = vmatprep.subr.bf16.mxu1 %v14985_v7 }
 0x48f   :  { %2500 = vmatprep.mubr.f32.mxu0 %v14861_v8  ;;  %2571 = vmatprep.mubr.f32.mxu1 %v14861_v8 }
 0x491   :  { %7927 = vmatpush1.bf16.msra.mxu0 %v14986_v10  ;;  %7991 = vmatpush1.bf16.msra.mxu1 %v15070_v58 }
 0x492   :  { %7929 = vmatprep.subr.bf16.mxu0 %v15071_v49  ;;  %7993 = vmatprep.subr.bf16.mxu1 %v15072_v24 }
 0x495   :  { %7931 = vmatpush1.bf16.msra.mxu0 %v14990_v39  ;;  %7995 = vmatpush1.bf16.msra.mxu1 %v15073_v38 }
 0x496   :  { %7933 = vmatprep.subr.bf16.mxu0 %v14992_v57  ;;  %7997 = vmatprep.subr.bf16.mxu1 %v15074_v12 }
 0x499   :  { %7935 = vmatpush1.bf16.msra.mxu0 %v14994_v0  ;;  %7999 = vmatpush1.bf16.msra.mxu1 %v15075_v19 }
 0x49a   :  { %7937 = vmatprep.subr.bf16.mxu0 %v14996_v31  ;;  %8001 = vmatprep.subr.bf16.mxu1 %v15076_v44 }
 0x49d   :  { %7939 = vmatpush1.bf16.msra.mxu0 %v14998_v23  ;;  %8003 = vmatpush1.bf16.msra.mxu1 %v15077_v25 }
 0x49e   :  { %7941 = vmatprep.subr.bf16.mxu0 %v15000_v55  ;;  %8005 = vmatprep.subr.bf16.mxu1 %v15078_v40 }
 0x4a1   :  { %7943 = vmatpush1.bf16.msra.mxu0 %v15001_v28  ;;  %8007 = vmatpush1.bf16.msra.mxu1 %v15079_v53 }
 0x4a2   :  { %7945 = vmatprep.subr.bf16.mxu0 %v15002_v35  ;;  %8009 = vmatprep.subr.bf16.mxu1 %v15080_v32 }
 0x4a5   :  { %7947 = vmatpush1.bf16.msra.mxu0 %v15003_v29  ;;  %8011 = vmatpush1.bf16.msra.mxu1 %v15081_v9 }
 0x4a6   :  { %7949 = vmatprep.subr.bf16.mxu0 %v15159_v56  ;;  %8013 = vmatprep.subr.bf16.mxu1 %v15082_v20 }
 0x4a9   :  { %7951 = vmatpush1.bf16.msra.mxu0 %v15160_v54  ;;  %8015 = vmatpush1.bf16.msra.mxu1 %v15083_v30 }
 0x4aa   :  { %7953 = vmatprep.subr.bf16.mxu0 %v15161_v33  ;;  %8017 = vmatprep.subr.bf16.mxu1 %v15084_v51 }
 0x4ad   :  { %7955 = vmatpush1.bf16.msra.mxu0 %v15007_v21  ;;  %8019 = vmatpush1.bf16.msra.mxu1 %v15085_v45 }
 0x4ae   :  { %7957 = vmatprep.subr.bf16.mxu0 %v15008_v50  ;;  %8021 = vmatprep.subr.bf16.mxu1 %v15086_v47 }
 0x4b1   :  { %7959 = vmatpush1.bf16.msra.mxu0 %v15009_v27  ;;  %8023 = vmatpush1.bf16.msra.mxu1 %v15087_v42 }
 0x4b2   :  { %7961 = vmatprep.subr.bf16.mxu0 %v15162_v41  ;;  %8025 = vmatprep.subr.bf16.mxu1 %v15088_v16 }
 0x4b5   :  { %7963 = vmatpush1.bf16.msra.mxu0 %v15163_v18  ;;  %8027 = vmatpush1.bf16.msra.mxu1 %v15089_v6 }
 0x4b6   :  { %7965 = vmatprep.subr.bf16.mxu0 %v15012_v63  ;;  %8029 = vmatprep.subr.bf16.mxu1 %v12285_v52 }
 0x4b9   :  { %7967 = vmatpush1.bf16.msra.mxu0 %v15013_v4  ;;  %8031 = vmatpush1.bf16.msra.mxu1 %v15164_v59 }
 0x4ba   :  { %7969 = vmatprep.subr.bf16.mxu0 %v15165_v22  ;;  %8033 = vmatprep.subr.bf16.mxu1 %v15166_v26  ;;  %v15177_v26 = vld [vmem:[#allocation118_spill] sm:$0xff] }
 0x4bd   :  { %7971 = vmatpush1.bf16.msra.mxu0 %v15167_v46  ;;  %8035 = vmatpush1.bf16.msra.mxu1 %v15168_v60  ;;  %v15178_v46 = vld [vmem:[#allocation136_spill] sm:$0xff] }
 0x4be   :  { %7973 = vmatprep.subr.bf16.mxu0 %v15169_v36  ;;  %8037 = vmatprep.subr.bf16.mxu1 %v15170_v15  ;;  %v15179_v60 = vld [vmem:[#allocation120_spill] sm:$0xff]  ;;  %v15180_v36 = vld [vmem:[#allocation137_spill] sm:$0xff]  ;;  %v15181_v15 = vld [vmem:[#allocation10_spill] sm:$0xff] }
 0x4c1   :  { %7975 = vmatpush1.bf16.msra.mxu0 %v15171_v1  ;;  %8039 = vmatpush1.bf16.msra.mxu1 %v15172_v5  ;;  %v15182_v1 = vld [vmem:[#allocation11_spill] sm:$0xff] }
 0x4c2   :  { %7977 = vmatprep.subr.bf16.mxu0 %v15173_v34  ;;  %8041 = vmatprep.subr.bf16.mxu1 %v15174_v17  ;;  %v15183_v17 = vld [vmem:[#allocation12_spill] sm:$0xff]  ;;  %v15197_v34 = vld [vmem:[#allocation19_spill] sm:$0xff] }
 0x4c3   :  { %v15247_v5 = vld [vmem:[#allocation143_spill] sm:$0xff] }
 0x4c5   :  { %7979 = vmatpush1.bf16.msra.mxu0 %v15175_v3  ;;  %8043 = vmatpush1.bf16.msra.mxu1 %v15176_v37  ;;  %v15184_v3 = vld [vmem:[#allocation29_spill] sm:$0xff] }
 0x4c6   :  { %7981 = vmatprep.subr.bf16.mxu0 %v15177_v26  ;;  %8045 = vmatprep.subr.bf16.mxu1 %v15178_v46  ;;  %v15185_v37 = vld [vmem:[#allocation13_spill] sm:$0xff]  ;;  %v15186_v26 = vld [vmem:[#allocation31_spill] sm:$0xff] }
 0x4c7   :  { %v15196_v46 = vld [vmem:[#allocation41_spill] sm:$0xff] }
 0x4c9   :  { %7983 = vmatpush1.bf16.msra.mxu0 %v15179_v60  ;;  %8047 = vmatpush1.bf16.msra.mxu1 %v15180_v36  ;;  %v15187_v36 = vld [vmem:[#allocation14_spill] sm:$0xff]  ;;  %v15190_v60 = vld [vmem:[#allocation35_spill] sm:$0xff] }
 0x4ca   :  { %8049 = vmatprep.subr.bf16.mxu0 %v15181_v15  ;;  %8113 = vmatprep.subr.bf16.mxu1 %v15182_v1  ;;  %v15188_v15 = vld [vmem:[#allocation33_spill] sm:$0xff]  ;;  %v15189_v1 = vld [vmem:[#allocation15_spill] sm:$0xff] }
 0x4cc   :  { %2501 = vmatmul.mubr.f32.vlgmr.msra.gmra.mrb[28].mxu0 %v12722_v2  ;;  %2572 = vmatmul.mubr.f32.vlgmr.msra.gmra.mrb[44].mxu1 %v12722_v2  ;;  %v15191_v2 = vld [vmem:[#allocation16_spill] sm:$0xff] }
 0x4cd   :  { %8051 = vmatpush1.bf16.msra.mxu0 %v15183_v17  ;;  %8115 = vmatpush1.bf16.msra.mxu1 %v15184_v3  ;;  %v15192_v17 = vld [vmem:[#allocation37_spill] sm:$0xff] }
 0x4ce   :  { %8053 = vmatprep.subr.bf16.mxu0 %v15185_v37  ;;  %8117 = vmatprep.subr.bf16.mxu1 %v15186_v26  ;;  %v15193_v3 = vld [vmem:[#allocation17_spill] sm:$0xff]  ;;  %v15194_v37 = vld [vmem:[#allocation39_spill] sm:$0xff]  ;;  %v15195_v26 = vld [vmem:[#allocation18_spill] sm:$0xff] }
 0x4cf   :  { %2720 = vmatprep.mubr.f32.mxu0 %v14861_v8  ;;  %2791 = vmatprep.mubr.f32.mxu1 %v14861_v8 }
 0x4d1   :  { %8055 = vmatpush1.bf16.msra.mxu0 %v15187_v36  ;;  %8119 = vmatpush1.bf16.msra.mxu1 %v15188_v15  ;;  %v15198_v36 = vld [vmem:[#allocation43_spill] sm:$0xff]  ;;  %v15199_v15 = vld [vmem:[#allocation20_spill] sm:$0xff] }
 0x4d2   :  { %8057 = vmatprep.subr.bf16.mxu0 %v15189_v1  ;;  %8121 = vmatprep.subr.bf16.mxu1 %v15190_v60  ;;  %v15200_v1 = vld [vmem:[#allocation45_spill] sm:$0xff] }
 0x4d3   :  { %v15201_v60 = vld [vmem:[#allocation21_spill] sm:$0xff] }
 0x4d5   :  { %8059 = vmatpush1.bf16.msra.mxu0 %v15191_v2  ;;  %8123 = vmatpush1.bf16.msra.mxu1 %v15192_v17  ;;  %v15202_v2 = vld [vmem:[#allocation47_spill] sm:$0xff]  ;;  %v15203_v17 = vld [vmem:[#allocation22_spill] sm:$0xff] }
 0x4d6   :  { %8061 = vmatprep.subr.bf16.mxu0 %v15193_v3  ;;  %8125 = vmatprep.subr.bf16.mxu1 %v15194_v37  ;;  %v15204_v3 = vld [vmem:[#allocation49_spill] sm:$0xff]  ;;  %v15205_v37 = vld [vmem:[#allocation23_spill] sm:$0xff] }
 0x4d9   :  { %8063 = vmatpush1.bf16.msra.mxu0 %v15195_v26  ;;  %8127 = vmatpush1.bf16.msra.mxu1 %v15196_v46  ;;  %v15206_v26 = vld [vmem:[#allocation51_spill] sm:$0xff]  ;;  %v15207_v46 = vld [vmem:[#allocation24_spill] sm:$0xff] }
 0x4da   :  { %8065 = vmatprep.subr.bf16.mxu0 %v15197_v34  ;;  %8129 = vmatprep.subr.bf16.mxu1 %v15198_v36  ;;  %v15208_v34 = vld [vmem:[#allocation53_spill] sm:$0xff] }
 0x4db   :  { %v15209_v36 = vld [vmem:[#allocation25_spill] sm:$0xff] }
 0x4dd   :  { %8067 = vmatpush1.bf16.msra.mxu0 %v15199_v15  ;;  %8131 = vmatpush1.bf16.msra.mxu1 %v15200_v1  ;;  %v15210_v15 = vld [vmem:[#allocation55_spill] sm:$0xff]  ;;  %v15211_v1 = vld [vmem:[#allocation26_spill] sm:$0xff] }
 0x4de   :  { %8069 = vmatprep.subr.bf16.mxu0 %v15201_v60  ;;  %8133 = vmatprep.subr.bf16.mxu1 %v15202_v2  ;;  %v15212_v60 = vld [vmem:[#allocation57_spill] sm:$0xff]  ;;  %v15213_v2 = vld [vmem:[#allocation27_spill] sm:$0xff] }
 0x4e1   :  { %8071 = vmatpush1.bf16.msra.mxu0 %v15203_v17  ;;  %8135 = vmatpush1.bf16.msra.mxu1 %v15204_v3  ;;  %v15214_v17 = vld [vmem:[#allocation58_spill] sm:$0xff]  ;;  %v15215_v3 = vld [vmem:[#allocation28_spill] sm:$0xff] }
 0x4e2   :  { %8073 = vmatprep.subr.bf16.mxu0 %v15205_v37  ;;  %8137 = vmatprep.subr.bf16.mxu1 %v15206_v26  ;;  %v15216_v37 = vld [vmem:[#allocation60_spill] sm:$0xff]  ;;  %v15217_v26 = vld [vmem:[#allocation30_spill] sm:$0xff] }
 0x4e5   :  { %8075 = vmatpush1.bf16.msra.mxu0 %v15207_v46  ;;  %8139 = vmatpush1.bf16.msra.mxu1 %v15208_v34  ;;  %v15218_v46 = vld [vmem:[#allocation62_spill] sm:$0xff]  ;;  %v15219_v34 = vld [vmem:[#allocation32_spill] sm:$0xff] }
 0x4e6   :  { %8077 = vmatprep.subr.bf16.mxu0 %v15209_v36  ;;  %8141 = vmatprep.subr.bf16.mxu1 %v15210_v15  ;;  %v15220_v36 = vld [vmem:[#allocation64_spill] sm:$0xff]  ;;  %v15221_v15 = vld [vmem:[#allocation34_spill] sm:$0xff] }
 0x4e9   :  { %8079 = vmatpush1.bf16.msra.mxu0 %v15211_v1  ;;  %8143 = vmatpush1.bf16.msra.mxu1 %v15212_v60  ;;  %v15222_v1 = vld [vmem:[#allocation66_spill] sm:$0xff]  ;;  %v15223_v60 = vld [vmem:[#allocation36_spill] sm:$0xff] }
 0x4ea   :  { %8081 = vmatprep.subr.bf16.mxu0 %v15213_v2  ;;  %8145 = vmatprep.subr.bf16.mxu1 %v15214_v17  ;;  %v15224_v2 = vld [vmem:[#allocation68_spill] sm:$0xff]  ;;  %v15225_v17 = vld [vmem:[#allocation38_spill] sm:$0xff] }
 0x4ed   :  { %8083 = vmatpush1.bf16.msra.mxu0 %v15215_v3  ;;  %8147 = vmatpush1.bf16.msra.mxu1 %v15216_v37  ;;  %v15226_v3 = vld [vmem:[#allocation70_spill] sm:$0xff]  ;;  %v15227_v37 = vld [vmem:[#allocation40_spill] sm:$0xff] }
 0x4ee   :  { %8085 = vmatprep.subr.bf16.mxu0 %v15217_v26  ;;  %8149 = vmatprep.subr.bf16.mxu1 %v15218_v46  ;;  %v15228_v26 = vld [vmem:[#allocation72_spill] sm:$0xff]  ;;  %v15229_v46 = vld [vmem:[#allocation42_spill] sm:$0xff] }
 0x4f1   :  { %8087 = vmatpush1.bf16.msra.mxu0 %v15219_v34  ;;  %8151 = vmatpush1.bf16.msra.mxu1 %v15220_v36  ;;  %v15230_v34 = vld [vmem:[#allocation74_spill] sm:$0xff]  ;;  %v15231_v36 = vld [vmem:[#allocation44_spill] sm:$0xff] }
 0x4f2   :  { %8089 = vmatprep.subr.bf16.mxu0 %v15221_v15  ;;  %8153 = vmatprep.subr.bf16.mxu1 %v15222_v1  ;;  %v15232_v15 = vld [vmem:[#allocation76_spill] sm:$0xff]  ;;  %v15233_v1 = vld [vmem:[#allocation46_spill] sm:$0xff] }
 0x4f5   :  { %8091 = vmatpush1.bf16.msra.mxu0 %v15223_v60  ;;  %8155 = vmatpush1.bf16.msra.mxu1 %v15224_v2  ;;  %v15234_v60 = vld [vmem:[#allocation78_spill] sm:$0xff]  ;;  %v15235_v2 = vld [vmem:[#allocation48_spill] sm:$0xff] }
 0x4f6   :  { %8093 = vmatprep.subr.bf16.mxu0 %v15225_v17  ;;  %8157 = vmatprep.subr.bf16.mxu1 %v15226_v3  ;;  %v15236_v17 = vld [vmem:[#allocation80_spill] sm:$0xff]  ;;  %v15237_v3 = vld [vmem:[#allocation50_spill] sm:$0xff] }
 0x4f9   :  { %8095 = vmatpush1.bf16.msra.mxu0 %v15227_v37  ;;  %8159 = vmatpush1.bf16.msra.mxu1 %v15228_v26  ;;  %v15238_v37 = vld [vmem:[#allocation82_spill] sm:$0xff]  ;;  %v15239_v26 = vld [vmem:[#allocation52_spill] sm:$0xff] }
 0x4fa   :  { %8097 = vmatprep.subr.bf16.mxu0 %v15229_v46  ;;  %8161 = vmatprep.subr.bf16.mxu1 %v15230_v34  ;;  %v15240_v46 = vld [vmem:[#allocation84_spill] sm:$0xff]  ;;  %v15241_v34 = vld [vmem:[#allocation54_spill] sm:$0xff] }
 0x4fd   :  { %8099 = vmatpush1.bf16.msra.mxu0 %v15231_v36  ;;  %8163 = vmatpush1.bf16.msra.mxu1 %v15232_v15  ;;  %v15242_v36 = vld [vmem:[#allocation86_spill] sm:$0xff]  ;;  %v15243_v15 = vld [vmem:[#allocation56_spill] sm:$0xff] }
 0x4fe   :  { %8101 = vmatprep.subr.bf16.mxu0 %v15233_v1  ;;  %8165 = vmatprep.subr.bf16.mxu1 %v15234_v60  ;;  %v15244_v1 = vld [vmem:[#allocation88_spill] sm:$0xff]  ;;  %v15245_v60 = vld [vmem:[#allocation59_spill] sm:$0xff] }
 0x501   :  { %8103 = vmatpush1.bf16.msra.mxu0 %v15235_v2  ;;  %8167 = vmatpush1.bf16.msra.mxu1 %v15236_v17  ;;  %v15246_v2 = vld [vmem:[#allocation91_spill] sm:$0xff] }
 0x502   :  { %8105 = vmatprep.subr.bf16.mxu0 %v15237_v3  ;;  %8169 = vmatprep.subr.bf16.mxu1 %v15238_v37 }
 0x505   :  { %8107 = vmatpush1.bf16.msra.mxu0 %v15239_v26  ;;  %8171 = vmatpush1.bf16.msra.mxu1 %v15240_v46 }
 0x506   :  { %8109 = vmatprep.subr.bf16.mxu0 %v15241_v34  ;;  %8173 = vmatprep.subr.bf16.mxu1 %v15242_v36 }
 0x509   :  { %8111 = vmatpush1.bf16.msra.mxu0 %v15243_v15  ;;  %8175 = vmatpush1.bf16.msra.mxu1 %v15244_v1 }
 0x50a   :  { %8177 = vmatprep.subr.bf16.mxu0 %v15245_v60  ;;  %8241 = vmatprep.subr.bf16.mxu1 %v15246_v2 }
 0x55f   :  { %v2360_v17 = vpop.f32.mrb[6].mxu0  ;;  %v2431_v3 = vpop.f32.mrb[14].mxu1 }
 0x560   :  { %v10929_v37 = vadd.f32 %v2431_v3, %v15247_v5  ;;  %v2362_v22 = vpop.f32.mrb[7].mxu0  ;;  %v2433_v26 = vpop.f32.mrb[15].mxu1  ;;  %v10903_v1 = vadd.f32 %v2360_v17, %v12397_v62 }
 0x562   :  { %v6834_v59 = vmul.f32 -1.442695, %v10929_v37  ;;  %v6832_v4 = vmul.f32 -1.442695, %v10903_v1 }
 0x564   :  { %11166 = vpow2.f32 %v6834_v59 }
 0x56e   :  { %v11167_v46 = vpop.eup %11166 }
 0x56f   :  { %v2604_v34 = vadd.f32 1.0, %v11167_v46 }
 0x571   :  { %11168 = vrcp.f32 %v2604_v34 }
 0x572   :  { %11170 = vpow2.f32 %v6832_v4 }
 0x57b   :  { %v11169_v36 = vpop.eup %11168 }
 0x57c   :  { %v2630_v15 = vmul.f32 %v11169_v36, %v12719_v11  ;;  %v11171_v59 = vpop.eup %11170 }
 0x57d   :  { %v2602_v34 = vadd.f32 1.0, %v11171_v59  ;;  %v15251_v59 = vld [vmem:[#allocation104_spill] sm:$0xff] }
 0x59f   :  { %v2502_v60 = vpop.f32.mrb[28].mxu0  ;;  %v2573_v52 = vpop.f32.mrb[44].mxu1 }
 0x5a0   :  { %v10951_v2 = vadd.f32 %v2502_v60, %v15069_v13  ;;  %v2504_v63 = vpop.f32.mrb[29].mxu0  ;;  %v2575_v6 = vpop.f32.mrb[45].mxu1  ;;  %v10973_v37 = vadd.f32 %v2573_v52, %v12406_v48 }
 0x5a2   :  { %v6836_v3 = vmul.f32 -1.442695, %v10951_v2  ;;  %v6838_v26 = vmul.f32 -1.442695, %v10973_v37  ;;  %v15250_v37 = vld [vmem:[#allocation128_spill] sm:$0xff] }
 0x5a4   :  { %11172 = vpow2.f32 %v6836_v3 }
 0x5ae   :  { %v11173_v22 = vpop.eup %11172 }
 0x5af   :  { %v2606_v46 = vadd.f32 1.0, %v11173_v22  ;;  %v15252_v22 = vld [vmem:[#allocation129_spill] sm:$0xff] }
 0x5b1   :  { %11174 = vrcp.f32 %v2606_v46  ;;  %v15254_v46 = vld [vmem:[#allocation130_spill] sm:$0xff] }
 0x5b2   :  { %11176 = vpow2.f32 %v6838_v26  ;;  %v15253_v26 = vld [vmem:[#allocation106_spill] sm:$0xff] }
 0x5b3   :  { %11178 = vrcp.f32 %v2602_v34  ;;  %v15255_v34 = vld [vmem:[#allocation108_spill] sm:$0xff] }
 0x5bb   :  { %v11175_v11 = vpop.eup %11174 }
 0x5bc   :  { %v11177_v36 = vpop.eup %11176  ;;  %v2626_v1 = vmul.f32 2.0, %v11175_v11  ;;  %v15256_v11 = vld [vmem:[#allocation131_spill] sm:$0xff] }
 0x5bd   :  { %v11179_v60 = vpop.eup %11178  ;;  %v2608_v63 = vadd.f32 1.0, %v11177_v36  ;;  %v15257_v36 = vld [vmem:[#allocation110_spill] sm:$0xff] }
 0x5be   :  { %v6840_v17 = vadd.f32 -1.0, %v2626_v1  ;;  %v15258_v1 = vld [vmem:[#allocation132_spill] sm:$0xff] }
 0x5bf   :  { %11180 = vrcp.f32 %v2608_v63  ;;  %v15261_v63 = vld [vmem:[#allocation114_spill] sm:$0xff] }
 0x5c0   :  { %v2632_v6 = vmul.f32 %v11179_v60, %v6840_v17  ;;  %v15259_v17 = vld [vmem:[#allocation112_spill] sm:$0xff]  ;;  %v15260_v60 = vld [vmem:[#allocation133_spill] sm:$0xff] }
 0x5c2   :  { %v12865_v2 = vadd.f32 %v2632_v6, %v2630_v15  ;;  %v15249_v15 = vld [vmem:[#allocation102_spill] sm:$0xff] }
 0x5c3   :  { %v15262_v6 = vld [vmem:[#allocation134_spill] sm:$0xff] }
 0x5c4   :  { %11182 = vtanh.f32 %v12865_v2 }
 0x5c9   :  { %v11181_v4 = vpop.eup %11180 }
 0x5ce   :  { %v11183_v52 = vpop.eup %11182 }
 0x5cf   :  { %v12868_v3 = vmul.f32 %v11183_v52, %v11181_v4  ;;  %v15263_v4 = vld [vmem:[#allocation116_spill] sm:$0xff]  ;;  %v15264_v52 = vld [vmem:[#allocation135_spill] sm:$0xff] }
 0x5d1   :  { %2721 = vmatmul.mubr.f32.vlgmr.msra.gmra.mrb[8].mxu0 %v12868_v3  ;;  %2792 = vmatmul.mubr.f32.vlgmr.msra.gmra.mrb[16].mxu1 %v12868_v3 }
 0x5d2   :  { %8179 = vmatpush1.bf16.msra.mxu0 %v14982_v43  ;;  %8243 = vmatpush1.bf16.msra.mxu1 %v14983_v61 }
 0x5d3   :  { %8181 = vmatprep.subr.bf16.mxu0 %v14984_v14  ;;  %8245 = vmatprep.subr.bf16.mxu1 %v14985_v7 }
 0x5d4   :  { %2862 = vmatprep.mubr.f32.mxu0 %v14861_v8  ;;  %2933 = vmatprep.mubr.f32.mxu1 %v14861_v8  ;;  %v15248_v8 = vld [vmem:[#allocation127_spill] sm:$0xff] }
 0x5d6   :  { %8183 = vmatpush1.bf16.msra.mxu0 %v14986_v10  ;;  %8247 = vmatpush1.bf16.msra.mxu1 %v15070_v58 }
 0x5d7   :  { %8185 = vmatprep.subr.bf16.mxu0 %v15071_v49  ;;  %8249 = vmatprep.subr.bf16.mxu1 %v15072_v24 }
 0x5da   :  { %8187 = vmatpush1.bf16.msra.mxu0 %v14990_v39  ;;  %8251 = vmatpush1.bf16.msra.mxu1 %v15073_v38 }
 0x5db   :  { %8189 = vmatprep.subr.bf16.mxu0 %v14992_v57  ;;  %8253 = vmatprep.subr.bf16.mxu1 %v15074_v12 }
 0x5de   :  { %8191 = vmatpush1.bf16.msra.mxu0 %v14994_v0  ;;  %8255 = vmatpush1.bf16.msra.mxu1 %v15075_v19 }
 0x5df   :  { %8193 = vmatprep.subr.bf16.mxu0 %v14996_v31  ;;  %8257 = vmatprep.subr.bf16.mxu1 %v15076_v44 }
 0x5e2   :  { %8195 = vmatpush1.bf16.msra.mxu0 %v14998_v23  ;;  %8259 = vmatpush1.bf16.msra.mxu1 %v15077_v25 }
 0x5e3   :  { %8197 = vmatprep.subr.bf16.mxu0 %v15000_v55  ;;  %8261 = vmatprep.subr.bf16.mxu1 %v15078_v40 }
 0x5e6   :  { %8199 = vmatpush1.bf16.msra.mxu0 %v15001_v28  ;;  %8263 = vmatpush1.bf16.msra.mxu1 %v15079_v53 }
 0x5e7   :  { %8201 = vmatprep.subr.bf16.mxu0 %v15002_v35  ;;  %8265 = vmatprep.subr.bf16.mxu1 %v15080_v32 }
 0x5ea   :  { %8203 = vmatpush1.bf16.msra.mxu0 %v15003_v29  ;;  %8267 = vmatpush1.bf16.msra.mxu1 %v15081_v9 }
 0x5eb   :  { %8205 = vmatprep.subr.bf16.mxu0 %v15159_v56  ;;  %8269 = vmatprep.subr.bf16.mxu1 %v15082_v20 }
 0x5ee   :  { %8207 = vmatpush1.bf16.msra.mxu0 %v15160_v54  ;;  %8271 = vmatpush1.bf16.msra.mxu1 %v15083_v30 }
 0x5ef   :  { %8209 = vmatprep.subr.bf16.mxu0 %v15161_v33  ;;  %8273 = vmatprep.subr.bf16.mxu1 %v15084_v51 }
 0x5f2   :  { %8211 = vmatpush1.bf16.msra.mxu0 %v15007_v21  ;;  %8275 = vmatpush1.bf16.msra.mxu1 %v15085_v45 }
 0x5f3   :  { %8213 = vmatprep.subr.bf16.mxu0 %v15008_v50  ;;  %8277 = vmatprep.subr.bf16.mxu1 %v15086_v47 }
 0x5f6   :  { %8215 = vmatpush1.bf16.msra.mxu0 %v15009_v27  ;;  %8279 = vmatpush1.bf16.msra.mxu1 %v15087_v42 }
 0x5f7   :  { %8217 = vmatprep.subr.bf16.mxu0 %v15162_v41  ;;  %8281 = vmatprep.subr.bf16.mxu1 %v15088_v16 }
 0x5fa   :  { %8219 = vmatpush1.bf16.msra.mxu0 %v15163_v18  ;;  %8283 = vmatpush1.bf16.msra.mxu1 %v15248_v8 }
 0x5fb   :  { %8221 = vmatprep.subr.bf16.mxu0 %v15249_v15  ;;  %8285 = vmatprep.subr.bf16.mxu1 %v15250_v37 }
 0x5fe   :  { %8223 = vmatpush1.bf16.msra.mxu0 %v15251_v59  ;;  %8287 = vmatpush1.bf16.msra.mxu1 %v15252_v22 }
 0x5ff   :  { %8225 = vmatprep.subr.bf16.mxu0 %v15253_v26  ;;  %8289 = vmatprep.subr.bf16.mxu1 %v15254_v46  ;;  %v15265_v46 = vld [vmem:[#allocation118_spill] sm:$0xff] }
 0x600   :  { %v15335_v26 = vld [vmem:[#allocation142_spill] sm:$0xff] }
 0x602   :  { %8227 = vmatpush1.bf16.msra.mxu0 %v15255_v34  ;;  %8291 = vmatpush1.bf16.msra.mxu1 %v15256_v11  ;;  %v15266_v34 = vld [vmem:[#allocation136_spill] sm:$0xff] }
 0x603   :  { %8229 = vmatprep.subr.bf16.mxu0 %v15257_v36  ;;  %8293 = vmatprep.subr.bf16.mxu1 %v15258_v1  ;;  %v15267_v11 = vld [vmem:[#allocation120_spill] sm:$0xff]  ;;  %v15268_v36 = vld [vmem:[#allocation137_spill] sm:$0xff]  ;;  %v15269_v1 = vld [vmem:[#allocation10_spill] sm:$0xff] }
 0x606   :  { %8231 = vmatpush1.bf16.msra.mxu0 %v15259_v17  ;;  %8295 = vmatpush1.bf16.msra.mxu1 %v15260_v60  ;;  %v15270_v17 = vld [vmem:[#allocation11_spill] sm:$0xff] }
 0x607   :  { %8233 = vmatprep.subr.bf16.mxu0 %v15261_v63  ;;  %8297 = vmatprep.subr.bf16.mxu1 %v15262_v6  ;;  %v15271_v6 = vld [vmem:[#allocation12_spill] sm:$0xff]  ;;  %v15280_v63 = vld [vmem:[#allocation37_spill] sm:$0xff] }
 0x60a   :  { %8235 = vmatpush1.bf16.msra.mxu0 %v15263_v4  ;;  %8299 = vmatpush1.bf16.msra.mxu1 %v15264_v52  ;;  %v15272_v4 = vld [vmem:[#allocation29_spill] sm:$0xff] }
 0x60b   :  { %8237 = vmatprep.subr.bf16.mxu0 %v15265_v46  ;;  %8301 = vmatprep.subr.bf16.mxu1 %v15266_v34  ;;  %v15273_v52 = vld [vmem:[#allocation13_spill] sm:$0xff]  ;;  %v15274_v46 = vld [vmem:[#allocation31_spill] sm:$0xff]  ;;  %v15275_v34 = vld [vmem:[#allocation14_spill] sm:$0xff] }
 0x60e   :  { %8239 = vmatpush1.bf16.msra.mxu0 %v15267_v11  ;;  %8303 = vmatpush1.bf16.msra.mxu1 %v15268_v36  ;;  %v15276_v11 = vld [vmem:[#allocation33_spill] sm:$0xff]  ;;  %v15277_v36 = vld [vmem:[#allocation15_spill] sm:$0xff] }
 0x60f   :  { %8305 = vmatprep.subr.bf16.mxu0 %v15269_v1  ;;  %8369 = vmatprep.subr.bf16.mxu1 %v15270_v17  ;;  %v15278_v1 = vld [vmem:[#allocation35_spill] sm:$0xff]  ;;  %v15279_v17 = vld [vmem:[#allocation16_spill] sm:$0xff] }
 0x611   :  { %2863 = vmatmul.mubr.f32.vlgmr.msra.gmra.mrb[30].mxu0 %v12868_v3  ;;  %2934 = vmatmul.mubr.f32.vlgmr.msra.gmra.mrb[46].mxu1 %v12868_v3  ;;  %v15281_v3 = vld [vmem:[#allocation17_spill] sm:$0xff] }
 0x612   :  { %8307 = vmatpush1.bf16.msra.mxu0 %v15271_v6  ;;  %8371 = vmatpush1.bf16.msra.mxu1 %v15272_v4  ;;  %v15282_v6 = vld [vmem:[#allocation39_spill] sm:$0xff]  ;;  %v15283_v4 = vld [vmem:[#allocation18_spill] sm:$0xff] }
 0x613   :  { %8309 = vmatprep.subr.bf16.mxu0 %v15273_v52  ;;  %8373 = vmatprep.subr.bf16.mxu1 %v15274_v46  ;;  %v15284_v52 = vld [vmem:[#allocation41_spill] sm:$0xff]  ;;  %v15285_v46 = vld [vmem:[#allocation19_spill] sm:$0xff] }
 0x616   :  { %8311 = vmatpush1.bf16.msra.mxu0 %v15275_v34  ;;  %8375 = vmatpush1.bf16.msra.mxu1 %v15276_v11  ;;  %v15286_v34 = vld [vmem:[#allocation43_spill] sm:$0xff]  ;;  %v15287_v11 = vld [vmem:[#allocation20_spill] sm:$0xff] }
 0x617   :  { %8313 = vmatprep.subr.bf16.mxu0 %v15277_v36  ;;  %8377 = vmatprep.subr.bf16.mxu1 %v15278_v1  ;;  %v15288_v36 = vld [vmem:[#allocation45_spill] sm:$0xff] }
 0x618   :  { %v15289_v1 = vld [vmem:[#allocation21_spill] sm:$0xff] }
 0x61a   :  { %8315 = vmatpush1.bf16.msra.mxu0 %v15279_v17  ;;  %8379 = vmatpush1.bf16.msra.mxu1 %v15280_v63  ;;  %v15290_v17 = vld [vmem:[#allocation47_spill] sm:$0xff]  ;;  %v15291_v63 = vld [vmem:[#allocation22_spill] sm:$0xff] }
 0x61b   :  { %8317 = vmatprep.subr.bf16.mxu0 %v15281_v3  ;;  %8381 = vmatprep.subr.bf16.mxu1 %v15282_v6  ;;  %v15292_v3 = vld [vmem:[#allocation49_spill] sm:$0xff]  ;;  %v15293_v6 = vld [vmem:[#allocation23_spill] sm:$0xff] }
 0x61e   :  { %8319 = vmatpush1.bf16.msra.mxu0 %v15283_v4  ;;  %8383 = vmatpush1.bf16.msra.mxu1 %v15284_v52  ;;  %v15294_v4 = vld [vmem:[#allocation51_spill] sm:$0xff]  ;;  %v15295_v52 = vld [vmem:[#allocation24_spill] sm:$0xff] }
 0x61f   :  { %8321 = vmatprep.subr.bf16.mxu0 %v15285_v46  ;;  %8385 = vmatprep.subr.bf16.mxu1 %v15286_v34  ;;  %v15296_v46 = vld [vmem:[#allocation53_spill] sm:$0xff] }
 0x620   :  { %v15297_v34 = vld [vmem:[#allocation25_spill] sm:$0xff] }
 0x622   :  { %8323 = vmatpush1.bf16.msra.mxu0 %v15287_v11  ;;  %8387 = vmatpush1.bf16.msra.mxu1 %v15288_v36  ;;  %v15298_v11 = vld [vmem:[#allocation55_spill] sm:$0xff]  ;;  %v15299_v36 = vld [vmem:[#allocation26_spill] sm:$0xff] }
 0x623   :  { %8325 = vmatprep.subr.bf16.mxu0 %v15289_v1  ;;  %8389 = vmatprep.subr.bf16.mxu1 %v15290_v17  ;;  %v15300_v1 = vld [vmem:[#allocation57_spill] sm:$0xff]  ;;  %v15301_v17 = vld [vmem:[#allocation27_spill] sm:$0xff] }
 0x626   :  { %8327 = vmatpush1.bf16.msra.mxu0 %v15291_v63  ;;  %8391 = vmatpush1.bf16.msra.mxu1 %v15292_v3  ;;  %v15302_v63 = vld [vmem:[#allocation58_spill] sm:$0xff]  ;;  %v15303_v3 = vld [vmem:[#allocation28_spill] sm:$0xff] }
 0x627   :  { %8329 = vmatprep.subr.bf16.mxu0 %v15293_v6  ;;  %8393 = vmatprep.subr.bf16.mxu1 %v15294_v4  ;;  %v15304_v6 = vld [vmem:[#allocation60_spill] sm:$0xff]  ;;  %v15305_v4 = vld [vmem:[#allocation30_spill] sm:$0xff] }
 0x62a   :  { %8331 = vmatpush1.bf16.msra.mxu0 %v15295_v52  ;;  %8395 = vmatpush1.bf16.msra.mxu1 %v15296_v46  ;;  %v15306_v52 = vld [vmem:[#allocation62_spill] sm:$0xff]  ;;  %v15307_v46 = vld [vmem:[#allocation32_spill] sm:$0xff] }
 0x62b   :  { %8333 = vmatprep.subr.bf16.mxu0 %v15297_v34  ;;  %8397 = vmatprep.subr.bf16.mxu1 %v15298_v11  ;;  %v15308_v34 = vld [vmem:[#allocation64_spill] sm:$0xff]  ;;  %v15309_v11 = vld [vmem:[#allocation34_spill] sm:$0xff] }
 0x62e   :  { %8335 = vmatpush1.bf16.msra.mxu0 %v15299_v36  ;;  %8399 = vmatpush1.bf16.msra.mxu1 %v15300_v1  ;;  %v15310_v36 = vld [vmem:[#allocation66_spill] sm:$0xff]  ;;  %v15311_v1 = vld [vmem:[#allocation36_spill] sm:$0xff] }
 0x62f   :  { %8337 = vmatprep.subr.bf16.mxu0 %v15301_v17  ;;  %8401 = vmatprep.subr.bf16.mxu1 %v15302_v63  ;;  %v15312_v17 = vld [vmem:[#allocation68_spill] sm:$0xff]  ;;  %v15313_v63 = vld [vmem:[#allocation38_spill] sm:$0xff] }
 0x632   :  { %8339 = vmatpush1.bf16.msra.mxu0 %v15303_v3  ;;  %8403 = vmatpush1.bf16.msra.mxu1 %v15304_v6  ;;  %v15314_v3 = vld [vmem:[#allocation70_spill] sm:$0xff]  ;;  %v15315_v6 = vld [vmem:[#allocation40_spill] sm:$0xff] }
 0x633   :  { %8341 = vmatprep.subr.bf16.mxu0 %v15305_v4  ;;  %8405 = vmatprep.subr.bf16.mxu1 %v15306_v52  ;;  %v15316_v4 = vld [vmem:[#allocation72_spill] sm:$0xff]  ;;  %v15317_v52 = vld [vmem:[#allocation42_spill] sm:$0xff] }
 0x636   :  { %8343 = vmatpush1.bf16.msra.mxu0 %v15307_v46  ;;  %8407 = vmatpush1.bf16.msra.mxu1 %v15308_v34  ;;  %v15318_v46 = vld [vmem:[#allocation74_spill] sm:$0xff]  ;;  %v15319_v34 = vld [vmem:[#allocation44_spill] sm:$0xff] }
 0x637   :  { %8345 = vmatprep.subr.bf16.mxu0 %v15309_v11  ;;  %8409 = vmatprep.subr.bf16.mxu1 %v15310_v36  ;;  %v15320_v11 = vld [vmem:[#allocation76_spill] sm:$0xff]  ;;  %v15321_v36 = vld [vmem:[#allocation46_spill] sm:$0xff] }
 0x63a   :  { %8347 = vmatpush1.bf16.msra.mxu0 %v15311_v1  ;;  %8411 = vmatpush1.bf16.msra.mxu1 %v15312_v17  ;;  %v15322_v1 = vld [vmem:[#allocation78_spill] sm:$0xff]  ;;  %v15323_v17 = vld [vmem:[#allocation48_spill] sm:$0xff] }
 0x63b   :  { %8349 = vmatprep.subr.bf16.mxu0 %v15313_v63  ;;  %8413 = vmatprep.subr.bf16.mxu1 %v15314_v3  ;;  %v15324_v63 = vld [vmem:[#allocation80_spill] sm:$0xff]  ;;  %v15325_v3 = vld [vmem:[#allocation50_spill] sm:$0xff] }
 0x63e   :  { %8351 = vmatpush1.bf16.msra.mxu0 %v15315_v6  ;;  %8415 = vmatpush1.bf16.msra.mxu1 %v15316_v4  ;;  %v15326_v6 = vld [vmem:[#allocation82_spill] sm:$0xff]  ;;  %v15327_v4 = vld [vmem:[#allocation52_spill] sm:$0xff] }
 0x63f   :  { %8353 = vmatprep.subr.bf16.mxu0 %v15317_v52  ;;  %8417 = vmatprep.subr.bf16.mxu1 %v15318_v46  ;;  %v15328_v52 = vld [vmem:[#allocation84_spill] sm:$0xff]  ;;  %v15329_v46 = vld [vmem:[#allocation54_spill] sm:$0xff] }
 0x642   :  { %8355 = vmatpush1.bf16.msra.mxu0 %v15319_v34  ;;  %8419 = vmatpush1.bf16.msra.mxu1 %v15320_v11  ;;  %v15330_v34 = vld [vmem:[#allocation86_spill] sm:$0xff]  ;;  %v15331_v11 = vld [vmem:[#allocation56_spill] sm:$0xff] }
 0x643   :  { %8357 = vmatprep.subr.bf16.mxu0 %v15321_v36  ;;  %8421 = vmatprep.subr.bf16.mxu1 %v15322_v1  ;;  %v15332_v36 = vld [vmem:[#allocation88_spill] sm:$0xff]  ;;  %v15333_v1 = vld [vmem:[#allocation59_spill] sm:$0xff] }
 0x646   :  { %8359 = vmatpush1.bf16.msra.mxu0 %v15323_v17  ;;  %8423 = vmatpush1.bf16.msra.mxu1 %v15324_v63  ;;  %v15334_v17 = vld [vmem:[#allocation91_spill] sm:$0xff] }
 0x647   :  { %8361 = vmatprep.subr.bf16.mxu0 %v15325_v3  ;;  %8425 = vmatprep.subr.bf16.mxu1 %v15326_v6 }
 0x64a   :  { %8363 = vmatpush1.bf16.msra.mxu0 %v15327_v4  ;;  %8427 = vmatpush1.bf16.msra.mxu1 %v15328_v52  ;;  %v127_v4 = vsub.s32 3, %v15335_v26  ;;  %v119_v52 = vsub.s32 1, %v15335_v26 }
 0x64b   :  { %8365 = vmatprep.subr.bf16.mxu0 %v15329_v46  ;;  %8429 = vmatprep.subr.bf16.mxu1 %v15330_v34 }
 0x64e   :  { %8367 = vmatpush1.bf16.msra.mxu0 %v15331_v11  ;;  %8431 = vmatpush1.bf16.msra.mxu1 %v15332_v36  ;;  %v11508_v11 = vld [vmem:[%s14503_s3] sm:$0xff] }
 0x64f   :  { %8433 = vmatprep.subr.bf16.mxu0 %v15333_v1  ;;  %8497 = vmatprep.subr.bf16.mxu1 %v15334_v17  ;;  %v13010_v34 = vrot.slane %v11508_v11, %v127_v4  ;;  %v135_v1 = vsub.s32 5, %v15335_v26  ;;  %v13014_v36 = vrot.slane %v11508_v11, %v119_v52 }
 0x651   :  { %15336 = vst [vmem:[#allocation61_spill] sm:$0xff] %v13010_v34  ;;  %15337 = vst [vmem:[#allocation93_spill] sm:$0xff] %v13014_v36  ;;  %v13018_v15 = vrot.slane %v11508_v11, %v135_v1 }
 0x653   :  { %15338 = vst [vmem:[#allocation63_spill] sm:$0xff] %v13018_v15 }
 0x6a4   :  { %v2722_v63 = vpop.f32.mrb[8].mxu0  ;;  %v2793_v3 = vpop.f32.mrb[16].mxu1 }
 0x6a5   :  { %v2724_v60 = vpop.f32.mrb[9].mxu0  ;;  %v2795_v6 = vpop.f32.mrb[17].mxu1  ;;  %v10930_v46 = vadd.f32 %v2793_v3, %v15247_v5  ;;  %v10904_v17 = vadd.f32 %v2722_v63, %v12397_v62 }
 0x6a6   :  { %v10931_v59 = vadd.f32 %v2795_v6, %v13010_v34  ;;  %v10905_v37 = vadd.f32 %v2724_v60, %v13014_v36  ;;  %v143_v6 = vsub.s32 7, %v15335_v26 }
 0x6a7   :  { %v6844_v22 = vmul.f32 -1.442695, %v10930_v46  ;;  %v6842_v3 = vmul.f32 -1.442695, %v10904_v17 }
 0x6a8   :  { %v6845_v5 = vmul.f32 -1.442695, %v10931_v59  ;;  %v6843_v42 = vmul.f32 -1.442695, %v10905_v37 }
 0x6a9   :  { %11184 = vpow2.f32 %v6844_v22  ;;  %v13023_v22 = vrot.slane %v11508_v11, %v143_v6 }
 0x6aa   :  { %11186 = vpow2.f32 %v6842_v3 }
 0x6ab   :  { %11188 = vpow2.f32 %v6845_v5  ;;  %15339 = vst [vmem:[#allocation95_spill] sm:$0xff] %v13023_v22 }
 0x6b3   :  { %v11185_v59 = vpop.eup %11184 }
 0x6b4   :  { %v2966_v17 = vadd.f32 1.0, %v11185_v59 }
 0x6e4   :  { %v2864_v8 = vpop.f32.mrb[30].mxu0  ;;  %v2935_v18 = vpop.f32.mrb[46].mxu1 }
 0x6e5   :  { %v10952_v4 = vadd.f32 %v2864_v8, %v15069_v13  ;;  %v2866_v16 = vpop.f32.mrb[31].mxu0  ;;  %v2937_v41 = vpop.f32.mrb[47].mxu1 }
 0x6e6   :  { %v10953_v63 = vadd.f32 %v2866_v16, %v13018_v15  ;;  %v10975_v1 = vadd.f32 %v2937_v41, %v13023_v22  ;;  %v11187_v8 = vpop.eup %11186  ;;  %v10974_v16 = vadd.f32 %v2935_v18, %v12406_v48 }
 0x6e7   :  { %v6846_v46 = vmul.f32 -1.442695, %v10952_v4  ;;  %v11189_v52 = vpop.eup %11188  ;;  %v2964_v5 = vadd.f32 1.0, %v11187_v8 }
 0x6e8   :  { %v6847_v60 = vmul.f32 -1.442695, %v10953_v63  ;;  %v6849_v3 = vmul.f32 -1.442695, %v10975_v1  ;;  %v2967_v63 = vadd.f32 1.0, %v11189_v52  ;;  %v15340_v52 = vld [vmem:[#allocation146_spill] sm:$0xff] }
 0x6e9   :  { %11190 = vpow2.f32 %v6846_v46  ;;  %v6848_v11 = vmul.f32 -1.442695, %v10974_v16 }
 0x6ea   :  { %11192 = vpow2.f32 %v6843_v42 }
 0x6eb   :  { %11194 = vpow2.f32 %v6847_v60 }
 0x6ec   :  { %11196 = vrcp.f32 %v2966_v17 }
 0x6f3   :  { %v11191_v37 = vpop.eup %11190 }
 0x6f4   :  { %v11193_v4 = vpop.eup %11192  ;;  %v2968_v15 = vadd.f32 1.0, %v11191_v37 }
 0x6f5   :  { %v11195_v26 = vpop.eup %11194  ;;  %v2965_v46 = vadd.f32 1.0, %v11193_v4 }
 0x6f6   :  { %11198 = vrcp.f32 %v2968_v15  ;;  %v2969_v42 = vadd.f32 1.0, %v11195_v26  ;;  %v11197_v41 = vpop.eup %11196  ;;  %v13028_v15 = vadd.s32 128, %v15340_v52  ;;  %v15357_v52 = vld [vmem:[#allocation112_spill] sm:$0xff] }
 0x6f7   :  { %11200 = vpow2.f32 %v6849_v3  ;;  %v2992_v3 = vmul.f32 %v11197_v41, %v12865_v2 }
 0x6f8   :  { %11202 = vrcp.f32 %v2969_v42  ;;  %15341 = vst [vmem:[#allocation65_spill] sm:$0xff] %v13028_v15  ;;  %vm3003_vm4 = vcmp.lt.s32.totalorder %v13028_v15, 160  ;;  %vm3365_vm5 = vcmp.lt.s32.totalorder %v13028_v15, 192  ;;  %vm3727_vm6 = vcmp.lt.s32.totalorder %v13028_v15, 224  ;;  %v15551_v15 = vld [vmem:[#allocation114_spill] sm:$0xff] }
 0x6f9   :  { %11204 = vrcp.f32 %v2964_v5 }
 0x6fa   :  { %11206 = vrcp.f32 %v2967_v63 }
 0x6fb   :  { %11208 = vpow2.f32 %v6848_v11 }
 0x6fc   :  { %11210 = vrcp.f32 %v2965_v46 }
 0x700   :  { %v11199_v6 = vpop.eup %11198 }
 0x701   :  { %v11201_v18 = vpop.eup %11200  ;;  %v2988_v60 = vmul.f32 2.0, %v11199_v6 }
 0x702   :  { %v11203_v59 = vpop.eup %11202  ;;  %v2971_v5 = vadd.f32 1.0, %v11201_v18 }
 0x703   :  { %v11205_v1 = vpop.eup %11204  ;;  %v6850_v37 = vadd.f32 -1.0, %v2988_v60  ;;  %v2989_v8 = vmul.f32 2.0, %v11203_v59 }
 0x704   :  { %v11207_v17 = vpop.eup %11206  ;;  %11212 = vrcp.f32 %v2971_v5  ;;  %v15346_v5 = vld [vmem:[#allocation127_spill] sm:$0xff] }
 0x705   :  { %v11209_v16 = vpop.eup %11208  ;;  %v2994_v4 = vmul.f32 %v11205_v1, %v6850_v37  ;;  %v6851_v26 = vadd.f32 -1.0, %v2989_v8  ;;  %v2993_v42 = vmul.f32 0.0, %v11207_v17 }
 0x706   :  { %v11211_v63 = vpop.eup %11210  ;;  %v2970_v6 = vadd.f32 1.0, %v11209_v16  ;;  %v15342_v16 = vld [vmem:[#allocation125_spill] sm:$0xff] }
 0x707   :  { %v13031_v11 = vadd.f32 %v2994_v4, %v2992_v3  ;;  %v2995_v46 = vmul.f32 %v11211_v63, %v6851_v26  ;;  %v15343_v3 = vld [vmem:[#allocation98_spill] sm:$0xff]  ;;  %v15345_v26 = vld [vmem:[#allocation100_spill] sm:$0xff] }
 0x708   :  { %v15344_v4 = vld [vmem:[#allocation126_spill] sm:$0xff] }
 0x709   :  { %v2997_v60 = vadd.f32 %v2995_v46, %v2993_v42  ;;  %11214 = vtanh.f32 %v13031_v11  ;;  %v15347_v63 = vld [vmem:[#allocation102_spill] sm:$0xff]  ;;  %v15348_v42 = vld [vmem:[#allocation128_spill] sm:$0xff] }
 0x70a   :  { %v15349_v46 = vld [vmem:[#allocation104_spill] sm:$0xff] }
 0x70b   :  { %11216 = vtanh.f32 %v2997_v60  ;;  %v13037_v59 = vsel %vm3003_vm4, %v2997_v60, 0.0  ;;  %v15351_v60 = vld [vmem:[#allocation106_spill] sm:$0xff] }
 0x70c   :  { %11218 = vrcp.f32 %v2970_v6  ;;  %v15350_v6 = vld [vmem:[#allocation129_spill] sm:$0xff] }
 0x70e   :  { %v11213_v2 = vpop.eup %11212 }
 0x713   :  { %v11215_v41 = vpop.eup %11214 }
 0x715   :  { %v11217_v18 = vpop.eup %11216 }
 0x716   :  { %v11219_v1 = vpop.eup %11218  ;;  %v3001_v37 = vmul.f32 %v11217_v18, %v11213_v2  ;;  %v15352_v2 = vld [vmem:[#allocation130_spill] sm:$0xff]  ;;  %v15354_v18 = vld [vmem:[#allocation131_spill] sm:$0xff] }
 0x717   :  { %v13039_v8 = vmul.f32 %v11219_v1, %v11215_v41  ;;  %v15353_v41 = vld [vmem:[#allocation108_spill] sm:$0xff]  ;;  %v15355_v1 = vld [vmem:[#allocation110_spill] sm:$0xff] }
 0x718   :  { %6852 = vmatprep.mubr.msk.f32.mxu0 %vm3003_vm4, %v3001_v37  ;;  %6853 = vmatprep.mubr.msk.f32.mxu1 %vm3003_vm4, %v3001_v37  ;;  %v13047_v17 = vsel %vm3003_vm4, %v3001_v37, 0.0 }
 0x719   :  { %3083 = vmatmul.mubr.f32.vlgmr.msra.gmra.mrb[10].mxu0 %v13039_v8  ;;  %3154 = vmatmul.mubr.f32.vlgmr.msra.gmra.mrb[18].mxu1 %v13039_v8 }
 0x71a   :  { %8435 = vmatpush1.bf16.msra.mxu0 %v14982_v43  ;;  %8499 = vmatpush1.bf16.msra.mxu1 %v14983_v61 }
 0x71b   :  { %6854 = vmatprep.mubr.msk.f32.mxu0 %vm3003_vm4, %v3001_v37  ;;  %6855 = vmatprep.mubr.msk.f32.mxu1 %vm3003_vm4, %v3001_v37  ;;  %v15356_v37 = vld [vmem:[#allocation132_spill] sm:$0xff] }
 0x71c   :  { %8437 = vmatprep.subr.bf16.mxu0 %v14984_v14  ;;  %8501 = vmatprep.subr.bf16.mxu1 %v14985_v7 }
 0x71e   :  { %8439 = vmatpush1.bf16.msra.mxu0 %v14986_v10  ;;  %8503 = vmatpush1.bf16.msra.mxu1 %v15070_v58 }
 0x71f   :  { %8441 = vmatprep.subr.bf16.mxu0 %v15071_v49  ;;  %8505 = vmatprep.subr.bf16.mxu1 %v15072_v24 }
 0x722   :  { %8443 = vmatpush1.bf16.msra.mxu0 %v14990_v39  ;;  %8507 = vmatpush1.bf16.msra.mxu1 %v15073_v38 }
 0x723   :  { %8445 = vmatprep.subr.bf16.mxu0 %v14992_v57  ;;  %8509 = vmatprep.subr.bf16.mxu1 %v15074_v12 }
 0x726   :  { %8447 = vmatpush1.bf16.msra.mxu0 %v14994_v0  ;;  %8511 = vmatpush1.bf16.msra.mxu1 %v15075_v19 }
 0x727   :  { %8449 = vmatprep.subr.bf16.mxu0 %v14996_v31  ;;  %8513 = vmatprep.subr.bf16.mxu1 %v15076_v44 }
 0x72a   :  { %8451 = vmatpush1.bf16.msra.mxu0 %v14998_v23  ;;  %8515 = vmatpush1.bf16.msra.mxu1 %v15077_v25 }
 0x72b   :  { %8453 = vmatprep.subr.bf16.mxu0 %v15000_v55  ;;  %8517 = vmatprep.subr.bf16.mxu1 %v15078_v40 }
 0x72e   :  { %8455 = vmatpush1.bf16.msra.mxu0 %v15001_v28  ;;  %8519 = vmatpush1.bf16.msra.mxu1 %v15079_v53 }
 0x72f   :  { %8457 = vmatprep.subr.bf16.mxu0 %v15002_v35  ;;  %8521 = vmatprep.subr.bf16.mxu1 %v15080_v32 }
 0x732   :  { %8459 = vmatpush1.bf16.msra.mxu0 %v15003_v29  ;;  %8523 = vmatpush1.bf16.msra.mxu1 %v15081_v9 }
 0x733   :  { %8461 = vmatprep.subr.bf16.mxu0 %v15159_v56  ;;  %8525 = vmatprep.subr.bf16.mxu1 %v15082_v20 }
 0x736   :  { %8463 = vmatpush1.bf16.msra.mxu0 %v15160_v54  ;;  %8527 = vmatpush1.bf16.msra.mxu1 %v15083_v30 }
 0x737   :  { %8465 = vmatprep.subr.bf16.mxu0 %v15161_v33  ;;  %8529 = vmatprep.subr.bf16.mxu1 %v15084_v51 }
 0x73a   :  { %8467 = vmatpush1.bf16.msra.mxu0 %v15007_v21  ;;  %8531 = vmatpush1.bf16.msra.mxu1 %v15085_v45 }
 0x73b   :  { %8469 = vmatprep.subr.bf16.mxu0 %v15008_v50  ;;  %8533 = vmatprep.subr.bf16.mxu1 %v15086_v47  ;;  %v15434_v47 = vld [vmem:[#allocation63_spill] sm:$0xff] }
 0x73e   :  { %8471 = vmatpush1.bf16.msra.mxu0 %v15009_v27  ;;  %8535 = vmatpush1.bf16.msra.mxu1 %v15342_v16 }
 0x73f   :  { %8473 = vmatprep.subr.bf16.mxu0 %v15343_v3  ;;  %8537 = vmatprep.subr.bf16.mxu1 %v15344_v4 }
 0x742   :  { %8475 = vmatpush1.bf16.msra.mxu0 %v15345_v26  ;;  %8539 = vmatpush1.bf16.msra.mxu1 %v15346_v5  ;;  %v15433_v5 = vld [vmem:[#allocation143_spill] sm:$0xff] }
 0x743   :  { %8477 = vmatprep.subr.bf16.mxu0 %v15347_v63  ;;  %8541 = vmatprep.subr.bf16.mxu1 %v15348_v42  ;;  %v15358_v63 = vld [vmem:[#allocation133_spill] sm:$0xff]  ;;  %v15359_v42 = vld [vmem:[#allocation114_spill] sm:$0xff] }
 0x746   :  { %8479 = vmatpush1.bf16.msra.mxu0 %v15349_v46  ;;  %8543 = vmatpush1.bf16.msra.mxu1 %v15350_v6  ;;  %v15360_v46 = vld [vmem:[#allocation134_spill] sm:$0xff]  ;;  %v15361_v6 = vld [vmem:[#allocation116_spill] sm:$0xff] }
 0x747   :  { %8481 = vmatprep.subr.bf16.mxu0 %v15351_v60  ;;  %8545 = vmatprep.subr.bf16.mxu1 %v15352_v2  ;;  %v15362_v60 = vld [vmem:[#allocation135_spill] sm:$0xff]  ;;  %v15363_v2 = vld [vmem:[#allocation118_spill] sm:$0xff] }
 0x74a   :  { %8483 = vmatpush1.bf16.msra.mxu0 %v15353_v41  ;;  %8547 = vmatpush1.bf16.msra.mxu1 %v15354_v18  ;;  %v15364_v41 = vld [vmem:[#allocation136_spill] sm:$0xff] }
 0x74b   :  { %8485 = vmatprep.subr.bf16.mxu0 %v15355_v1  ;;  %8549 = vmatprep.subr.bf16.mxu1 %v15356_v37  ;;  %v15365_v18 = vld [vmem:[#allocation120_spill] sm:$0xff]  ;;  %v15366_v1 = vld [vmem:[#allocation137_spill] sm:$0xff]  ;;  %v15367_v37 = vld [vmem:[#allocation10_spill] sm:$0xff] }
 0x74e   :  { %8487 = vmatpush1.bf16.msra.mxu0 %v15357_v52  ;;  %8551 = vmatpush1.bf16.msra.mxu1 %v15358_v63  ;;  %v15368_v52 = vld [vmem:[#allocation11_spill] sm:$0xff] }
 0x74f   :  { %8489 = vmatprep.subr.bf16.mxu0 %v15359_v42  ;;  %8553 = vmatprep.subr.bf16.mxu1 %v15360_v46  ;;  %v15369_v46 = vld [vmem:[#allocation12_spill] sm:$0xff]  ;;  %v15378_v42 = vld [vmem:[#allocation37_spill] sm:$0xff] }
 0x752   :  { %8491 = vmatpush1.bf16.msra.mxu0 %v15361_v6  ;;  %8555 = vmatpush1.bf16.msra.mxu1 %v15362_v60  ;;  %v15370_v6 = vld [vmem:[#allocation29_spill] sm:$0xff] }
 0x753   :  { %8493 = vmatprep.subr.bf16.mxu0 %v15363_v2  ;;  %8557 = vmatprep.subr.bf16.mxu1 %v15364_v41  ;;  %v15371_v60 = vld [vmem:[#allocation13_spill] sm:$0xff]  ;;  %v15372_v2 = vld [vmem:[#allocation31_spill] sm:$0xff]  ;;  %v15373_v41 = vld [vmem:[#allocation14_spill] sm:$0xff] }
 0x756   :  { %8495 = vmatpush1.bf16.msra.mxu0 %v15365_v18  ;;  %8559 = vmatpush1.bf16.msra.mxu1 %v15366_v1  ;;  %v15374_v18 = vld [vmem:[#allocation33_spill] sm:$0xff]  ;;  %v15375_v1 = vld [vmem:[#allocation15_spill] sm:$0xff] }
 0x757   :  { %8561 = vmatprep.subr.bf16.mxu0 %v15367_v37  ;;  %8625 = vmatprep.subr.bf16.mxu1 %v15368_v52  ;;  %v15376_v37 = vld [vmem:[#allocation35_spill] sm:$0xff]  ;;  %v15377_v52 = vld [vmem:[#allocation16_spill] sm:$0xff] }
 0x759   :  { %3225 = vmatmul.mubr.f32.vlgmr.msra.gmra.mrb[32].mxu0 %v13039_v8  ;;  %3296 = vmatmul.mubr.f32.vlgmr.msra.gmra.mrb[48].mxu1 %v13039_v8  ;;  %v15379_v8 = vld [vmem:[#allocation17_spill] sm:$0xff] }
 0x75a   :  { %8563 = vmatpush1.bf16.msra.mxu0 %v15369_v46  ;;  %8627 = vmatpush1.bf16.msra.mxu1 %v15370_v6  ;;  %v15380_v46 = vld [vmem:[#allocation39_spill] sm:$0xff]  ;;  %v15381_v6 = vld [vmem:[#allocation18_spill] sm:$0xff] }
 0x75b   :  { %8565 = vmatprep.subr.bf16.mxu0 %v15371_v60  ;;  %8629 = vmatprep.subr.bf16.mxu1 %v15372_v2  ;;  %v15382_v60 = vld [vmem:[#allocation41_spill] sm:$0xff]  ;;  %v15383_v2 = vld [vmem:[#allocation19_spill] sm:$0xff] }
 0x75e   :  { %8567 = vmatpush1.bf16.msra.mxu0 %v15373_v41  ;;  %8631 = vmatpush1.bf16.msra.mxu1 %v15374_v18  ;;  %v15384_v41 = vld [vmem:[#allocation43_spill] sm:$0xff]  ;;  %v15385_v18 = vld [vmem:[#allocation20_spill] sm:$0xff] }
 0x75f   :  { %8569 = vmatprep.subr.bf16.mxu0 %v15375_v1  ;;  %8633 = vmatprep.subr.bf16.mxu1 %v15376_v37  ;;  %v15386_v1 = vld [vmem:[#allocation45_spill] sm:$0xff] }
 0x760   :  { %v15387_v37 = vld [vmem:[#allocation21_spill] sm:$0xff] }
 0x762   :  { %8571 = vmatpush1.bf16.msra.mxu0 %v15377_v52  ;;  %8635 = vmatpush1.bf16.msra.mxu1 %v15378_v42  ;;  %v15388_v52 = vld [vmem:[#allocation47_spill] sm:$0xff]  ;;  %v15389_v42 = vld [vmem:[#allocation22_spill] sm:$0xff] }
 0x763   :  { %8573 = vmatprep.subr.bf16.mxu0 %v15379_v8  ;;  %8637 = vmatprep.subr.bf16.mxu1 %v15380_v46  ;;  %v15390_v8 = vld [vmem:[#allocation49_spill] sm:$0xff]  ;;  %v15391_v46 = vld [vmem:[#allocation23_spill] sm:$0xff] }
 0x766   :  { %8575 = vmatpush1.bf16.msra.mxu0 %v15381_v6  ;;  %8639 = vmatpush1.bf16.msra.mxu1 %v15382_v60  ;;  %v15392_v6 = vld [vmem:[#allocation51_spill] sm:$0xff]  ;;  %v15393_v60 = vld [vmem:[#allocation24_spill] sm:$0xff] }
 0x767   :  { %8577 = vmatprep.subr.bf16.mxu0 %v15383_v2  ;;  %8641 = vmatprep.subr.bf16.mxu1 %v15384_v41  ;;  %v15394_v2 = vld [vmem:[#allocation53_spill] sm:$0xff] }
 0x768   :  { %v15395_v41 = vld [vmem:[#allocation25_spill] sm:$0xff] }
 0x76a   :  { %8579 = vmatpush1.bf16.msra.mxu0 %v15385_v18  ;;  %8643 = vmatpush1.bf16.msra.mxu1 %v15386_v1  ;;  %v15396_v18 = vld [vmem:[#allocation55_spill] sm:$0xff]  ;;  %v15397_v1 = vld [vmem:[#allocation26_spill] sm:$0xff] }
 0x76b   :  { %8581 = vmatprep.subr.bf16.mxu0 %v15387_v37  ;;  %8645 = vmatprep.subr.bf16.mxu1 %v15388_v52  ;;  %v15398_v37 = vld [vmem:[#allocation57_spill] sm:$0xff]  ;;  %v15399_v52 = vld [vmem:[#allocation27_spill] sm:$0xff] }
 0x76e   :  { %8583 = vmatpush1.bf16.msra.mxu0 %v15389_v42  ;;  %8647 = vmatpush1.bf16.msra.mxu1 %v15390_v8  ;;  %v15400_v42 = vld [vmem:[#allocation58_spill] sm:$0xff]  ;;  %v15401_v8 = vld [vmem:[#allocation28_spill] sm:$0xff] }
 0x76f   :  { %8585 = vmatprep.subr.bf16.mxu0 %v15391_v46  ;;  %8649 = vmatprep.subr.bf16.mxu1 %v15392_v6  ;;  %v15402_v46 = vld [vmem:[#allocation60_spill] sm:$0xff]  ;;  %v15403_v6 = vld [vmem:[#allocation30_spill] sm:$0xff] }
 0x772   :  { %8587 = vmatpush1.bf16.msra.mxu0 %v15393_v60  ;;  %8651 = vmatpush1.bf16.msra.mxu1 %v15394_v2  ;;  %v15404_v60 = vld [vmem:[#allocation62_spill] sm:$0xff]  ;;  %v15405_v2 = vld [vmem:[#allocation32_spill] sm:$0xff] }
 0x773   :  { %8589 = vmatprep.subr.bf16.mxu0 %v15395_v41  ;;  %8653 = vmatprep.subr.bf16.mxu1 %v15396_v18  ;;  %v15406_v41 = vld [vmem:[#allocation64_spill] sm:$0xff]  ;;  %v15407_v18 = vld [vmem:[#allocation34_spill] sm:$0xff] }
 0x776   :  { %8591 = vmatpush1.bf16.msra.mxu0 %v15397_v1  ;;  %8655 = vmatpush1.bf16.msra.mxu1 %v15398_v37  ;;  %v15408_v1 = vld [vmem:[#allocation66_spill] sm:$0xff]  ;;  %v15409_v37 = vld [vmem:[#allocation36_spill] sm:$0xff] }
 0x777   :  { %8593 = vmatprep.subr.bf16.mxu0 %v15399_v52  ;;  %8657 = vmatprep.subr.bf16.mxu1 %v15400_v42  ;;  %v15410_v52 = vld [vmem:[#allocation68_spill] sm:$0xff]  ;;  %v15411_v42 = vld [vmem:[#allocation38_spill] sm:$0xff] }
 0x77a   :  { %8595 = vmatpush1.bf16.msra.mxu0 %v15401_v8  ;;  %8659 = vmatpush1.bf16.msra.mxu1 %v15402_v46  ;;  %v15412_v8 = vld [vmem:[#allocation70_spill] sm:$0xff]  ;;  %v15413_v46 = vld [vmem:[#allocation40_spill] sm:$0xff] }
 0x77b   :  { %8597 = vmatprep.subr.bf16.mxu0 %v15403_v6  ;;  %8661 = vmatprep.subr.bf16.mxu1 %v15404_v60  ;;  %v15414_v6 = vld [vmem:[#allocation72_spill] sm:$0xff]  ;;  %v15415_v60 = vld [vmem:[#allocation42_spill] sm:$0xff] }
 0x77e   :  { %8599 = vmatpush1.bf16.msra.mxu0 %v15405_v2  ;;  %8663 = vmatpush1.bf16.msra.mxu1 %v15406_v41  ;;  %v15416_v2 = vld [vmem:[#allocation74_spill] sm:$0xff]  ;;  %v15417_v41 = vld [vmem:[#allocation44_spill] sm:$0xff] }
 0x77f   :  { %8601 = vmatprep.subr.bf16.mxu0 %v15407_v18  ;;  %8665 = vmatprep.subr.bf16.mxu1 %v15408_v1  ;;  %v15418_v18 = vld [vmem:[#allocation76_spill] sm:$0xff]  ;;  %v15419_v1 = vld [vmem:[#allocation46_spill] sm:$0xff] }
 0x782   :  { %8603 = vmatpush1.bf16.msra.mxu0 %v15409_v37  ;;  %8667 = vmatpush1.bf16.msra.mxu1 %v15410_v52  ;;  %v15420_v37 = vld [vmem:[#allocation78_spill] sm:$0xff]  ;;  %v15421_v52 = vld [vmem:[#allocation48_spill] sm:$0xff] }
 0x783   :  { %8605 = vmatprep.subr.bf16.mxu0 %v15411_v42  ;;  %8669 = vmatprep.subr.bf16.mxu1 %v15412_v8  ;;  %v15422_v42 = vld [vmem:[#allocation80_spill] sm:$0xff]  ;;  %v15423_v8 = vld [vmem:[#allocation50_spill] sm:$0xff] }
 0x786   :  { %8607 = vmatpush1.bf16.msra.mxu0 %v15413_v46  ;;  %8671 = vmatpush1.bf16.msra.mxu1 %v15414_v6  ;;  %v15424_v46 = vld [vmem:[#allocation82_spill] sm:$0xff]  ;;  %v15425_v6 = vld [vmem:[#allocation52_spill] sm:$0xff] }
 0x787   :  { %8609 = vmatprep.subr.bf16.mxu0 %v15415_v60  ;;  %8673 = vmatprep.subr.bf16.mxu1 %v15416_v2  ;;  %v15426_v60 = vld [vmem:[#allocation84_spill] sm:$0xff]  ;;  %v15427_v2 = vld [vmem:[#allocation54_spill] sm:$0xff] }
 0x78a   :  { %8611 = vmatpush1.bf16.msra.mxu0 %v15417_v41  ;;  %8675 = vmatpush1.bf16.msra.mxu1 %v15418_v18  ;;  %v15428_v41 = vld [vmem:[#allocation86_spill] sm:$0xff]  ;;  %v15429_v18 = vld [vmem:[#allocation56_spill] sm:$0xff] }
 0x78b   :  { %8613 = vmatprep.subr.bf16.mxu0 %v15419_v1  ;;  %8677 = vmatprep.subr.bf16.mxu1 %v15420_v37  ;;  %v15430_v1 = vld [vmem:[#allocation88_spill] sm:$0xff]  ;;  %v15431_v37 = vld [vmem:[#allocation59_spill] sm:$0xff] }
 0x78e   :  { %8615 = vmatpush1.bf16.msra.mxu0 %v15421_v52  ;;  %8679 = vmatpush1.bf16.msra.mxu1 %v15422_v42  ;;  %v15432_v52 = vld [vmem:[#allocation91_spill] sm:$0xff] }
 0x78f   :  { %8617 = vmatprep.subr.bf16.mxu0 %v15423_v8  ;;  %8681 = vmatprep.subr.bf16.mxu1 %v15424_v46 }
 0x792   :  { %8619 = vmatpush1.bf16.msra.mxu0 %v15425_v6  ;;  %8683 = vmatpush1.bf16.msra.mxu1 %v15426_v60 }
 0x793   :  { %8621 = vmatprep.subr.bf16.mxu0 %v15427_v2  ;;  %8685 = vmatprep.subr.bf16.mxu1 %v15428_v41 }
 0x796   :  { %8623 = vmatpush1.bf16.msra.mxu0 %v15429_v18  ;;  %8687 = vmatpush1.bf16.msra.mxu1 %v15430_v1 }
 0x797   :  { %8689 = vmatprep.subr.bf16.mxu0 %v15431_v37  ;;  %8753 = vmatprep.subr.bf16.mxu1 %v15432_v52 }
 0x7ec   :  { %v3084_v42 = vpop.f32.mrb[10].mxu0  ;;  %v3155_v8 = vpop.f32.mrb[18].mxu1 }
 0x7ed   :  { %v3086_v63 = vpop.f32.mrb[11].mxu0  ;;  %v3157_v46 = vpop.f32.mrb[19].mxu1  ;;  %v10932_v6 = vadd.f32 %v3155_v8, %v15433_v5  ;;  %v10906_v60 = vadd.f32 %v3084_v42, %v12397_v62 }
 0x7ee   :  { %v10933_v2 = vadd.f32 %v3157_v46, %v13010_v34  ;;  %v10907_v41 = vadd.f32 %v3086_v63, %v13014_v36 }
 0x7ef   :  { %v6858_v26 = vmul.f32 -1.442695, %v10932_v6  ;;  %v6856_v18 = vmul.f32 -1.442695, %v10906_v60 }
 0x7f0   :  { %v6859_v1 = vmul.f32 -1.442695, %v10933_v2  ;;  %v6857_v27 = vmul.f32 -1.442695, %v10907_v41 }
 0x7f1   :  { %11220 = vpow2.f32 %v6858_v26 }
 0x7f2   :  { %11222 = vpow2.f32 %v6856_v18 }
 0x7f3   :  { %11224 = vpow2.f32 %v6859_v1 }
 0x7fb   :  { %v11221_v63 = vpop.eup %11220 }
 0x7fc   :  { %v11223_v46 = vpop.eup %11222  ;;  %v3328_v6 = vadd.f32 1.0, %v11221_v63 }
 0x7fd   :  { %v11225_v60 = vpop.eup %11224  ;;  %v3326_v18 = vadd.f32 1.0, %v11223_v46 }
 0x82c   :  { %v3226_v4 = vpop.f32.mrb[32].mxu0  ;;  %v3297_v37 = vpop.f32.mrb[48].mxu1 }
 0x82d   :  { %v10954_v52 = vadd.f32 %v3226_v4, %v15069_v13  ;;  %v3228_v3 = vpop.f32.mrb[33].mxu0  ;;  %v3299_v16 = vpop.f32.mrb[49].mxu1  ;;  %v10976_v41 = vadd.f32 %v3297_v37, %v12406_v48 }
 0x82e   :  { %v10955_v50 = vadd.f32 %v3228_v3, %v15434_v47  ;;  %v10977_v26 = vadd.f32 %v3299_v16, %v13023_v22 }
 0x82f   :  { %v6860_v8 = vmul.f32 -1.442695, %v10954_v52  ;;  %v3329_v52 = vadd.f32 1.0, %v11225_v60  ;;  %v6862_v1 = vmul.f32 -1.442695, %v10976_v41 }
 0x830   :  { %v6861_v42 = vmul.f32 -1.442695, %v10955_v50  ;;  %v6863_v4 = vmul.f32 -1.442695, %v10977_v26 }
 0x831   :  { %11226 = vpow2.f32 %v6860_v8 }
 0x832   :  { %11228 = vpow2.f32 %v6857_v27 }
 0x833   :  { %11230 = vpow2.f32 %v6861_v42 }
 0x834   :  { %11232 = vrcp.f32 %v3328_v6 }
 0x83b   :  { %v11227_v2 = vpop.eup %11226 }
 0x83c   :  { %v11229_v13 = vpop.eup %11228  ;;  %v3330_v36 = vadd.f32 1.0, %v11227_v2 }
 0x83d   :  { %v11231_v3 = vpop.eup %11230  ;;  %v3327_v27 = vadd.f32 1.0, %v11229_v13 }
 0x83e   :  { %11234 = vrcp.f32 %v3330_v36  ;;  %v3331_v50 = vadd.f32 1.0, %v11231_v3  ;;  %v11233_v16 = vpop.eup %11232 }
 0x83f   :  { %11236 = vpow2.f32 %v6863_v4  ;;  %v3354_v36 = vmul.f32 %v11233_v16, %v13031_v11 }
 0x840   :  { %11238 = vrcp.f32 %v3331_v50 }
 0x841   :  { %11240 = vrcp.f32 %v3326_v18 }
 0x842   :  { %11242 = vrcp.f32 %v3329_v52 }
 0x843   :  { %11244 = vrcp.f32 %v3327_v27 }
 0x844   :  { %11246 = vpow2.f32 %v6862_v1 }
 0x848   :  { %v11235_v8 = vpop.eup %11234 }
 0x849   :  { %v11237_v42 = vpop.eup %11236  ;;  %v3350_v63 = vmul.f32 2.0, %v11235_v8 }
 0x84a   :  { %v11239_v26 = vpop.eup %11238  ;;  %v3333_v41 = vadd.f32 1.0, %v11237_v42 }
 0x84b   :  { %v11241_v37 = vpop.eup %11240  ;;  %v6864_v2 = vadd.f32 -1.0, %v3350_v63  ;;  %v3351_v46 = vmul.f32 2.0, %v11239_v26 }
 0x84c   :  { %v11243_v6 = vpop.eup %11242  ;;  %11248 = vrcp.f32 %v3333_v41  ;;  %v15443_v41 = vld [vmem:[#allocation102_spill] sm:$0xff] }
 0x84d   :  { %v11245_v60 = vpop.eup %11244  ;;  %v3356_v13 = vmul.f32 %v11241_v37, %v6864_v2  ;;  %v6865_v4 = vadd.f32 -1.0, %v3351_v46  ;;  %v3355_v52 = vmul.f32 %v11243_v6, %v13037_v59  ;;  %v15437_v46 = vld [vmem:[#allocation96_spill] sm:$0xff]  ;;  %v15438_v6 = vld [vmem:[#allocation125_spill] sm:$0xff] }
 0x84e   :  { %v11247_v3 = vpop.eup %11246 }
 0x84f   :  { %v13194_v18 = vadd.f32 %v3356_v13, %v3354_v36  ;;  %v3357_v50 = vmul.f32 %v11245_v60, %v6865_v4  ;;  %v3332_v27 = vadd.f32 1.0, %v11247_v3  ;;  %v15439_v60 = vld [vmem:[#allocation98_spill] sm:$0xff]  ;;  %v15441_v13 = vld [vmem:[#allocation100_spill] sm:$0xff]  ;;  %v15442_v4 = vld [vmem:[#allocation127_spill] sm:$0xff] }
 0x850   :  { %v15440_v36 = vld [vmem:[#allocation126_spill] sm:$0xff]  ;;  %v15444_v3 = vld [vmem:[#allocation128_spill] sm:$0xff] }
 0x851   :  { %v3359_v1 = vadd.f32 %v3357_v50, %v3355_v52  ;;  %11250 = vtanh.f32 %v13194_v18  ;;  %v15445_v52 = vld [vmem:[#allocation104_spill] sm:$0xff]  ;;  %v15446_v50 = vld [vmem:[#allocation129_spill] sm:$0xff] }
 0x853   :  { %11252 = vtanh.f32 %v3359_v1  ;;  %v13200_v8 = vsel %vm3365_vm5, %v3359_v1, %v13037_v59  ;;  %v15435_v59 = vld [vmem:[#allocation94_spill] sm:$0xff] }
 0x854   :  { %11254 = vrcp.f32 %v3332_v27  ;;  %v15447_v27 = vld [vmem:[#allocation106_spill] sm:$0xff] }
 0x855   :  { %v15448_v1 = vld [vmem:[#allocation130_spill] sm:$0xff] }
 0x856   :  { %v11249_v11 = vpop.eup %11248 }
 0x85b   :  { %v11251_v16 = vpop.eup %11250 }
 0x85d   :  { %v11253_v42 = vpop.eup %11252 }
 0x85e   :  { %v3363_v63 = vmul.f32 %v11253_v42, %v11249_v11  ;;  %v11255_v26 = vpop.eup %11254  ;;  %v15449_v11 = vld [vmem:[#allocation108_spill] sm:$0xff]  ;;  %v15451_v42 = vld [vmem:[#allocation110_spill] sm:$0xff] }
 0x85f   :  { %v13205_v2 = vmul.f32 %v11255_v26, %v11251_v16  ;;  %v15450_v16 = vld [vmem:[#allocation131_spill] sm:$0xff]  ;;  %v15453_v26 = vld [vmem:[#allocation112_spill] sm:$0xff] }
 0x860   :  { %v13203_v37 = vsel %vm3365_vm5, %v3363_v63, %v13047_v17  ;;  %v15436_v17 = vld [vmem:[#allocation124_spill] sm:$0xff] }
 0x861   :  { %3444 = vmatprep.mubr.f32.mxu0 %v13203_v37  ;;  %3515 = vmatprep.mubr.f32.mxu1 %v13203_v37  ;;  %v15452_v63 = vld [vmem:[#allocation132_spill] sm:$0xff] }
 0x862   :  { %3445 = vmatmul.mubr.f32.vlgmr.msra.gmra.mrb[12].mxu0 %v13205_v2  ;;  %3516 = vmatmul.mubr.f32.vlgmr.msra.gmra.mrb[20].mxu1 %v13205_v2 }
 0x863   :  { %8691 = vmatpush1.bf16.msra.mxu0 %v14982_v43  ;;  %8755 = vmatpush1.bf16.msra.mxu1 %v14983_v61 }
 0x864   :  { %3586 = vmatprep.mubr.f32.mxu0 %v13203_v37  ;;  %3657 = vmatprep.mubr.f32.mxu1 %v13203_v37 }
 0x865   :  { %8693 = vmatprep.subr.bf16.mxu0 %v14984_v14  ;;  %8757 = vmatprep.subr.bf16.mxu1 %v14985_v7 }
 0x867   :  { %8695 = vmatpush1.bf16.msra.mxu0 %v14986_v10  ;;  %8759 = vmatpush1.bf16.msra.mxu1 %v15070_v58 }
 0x868   :  { %8697 = vmatprep.subr.bf16.mxu0 %v15071_v49  ;;  %8761 = vmatprep.subr.bf16.mxu1 %v15072_v24 }
 0x86b   :  { %8699 = vmatpush1.bf16.msra.mxu0 %v14990_v39  ;;  %8763 = vmatpush1.bf16.msra.mxu1 %v15073_v38 }
 0x86c   :  { %8701 = vmatprep.subr.bf16.mxu0 %v14992_v57  ;;  %8765 = vmatprep.subr.bf16.mxu1 %v15074_v12 }
 0x86f   :  { %8703 = vmatpush1.bf16.msra.mxu0 %v14994_v0  ;;  %8767 = vmatpush1.bf16.msra.mxu1 %v15075_v19 }
 0x870   :  { %8705 = vmatprep.subr.bf16.mxu0 %v14996_v31  ;;  %8769 = vmatprep.subr.bf16.mxu1 %v15076_v44 }
 0x873   :  { %8707 = vmatpush1.bf16.msra.mxu0 %v14998_v23  ;;  %8771 = vmatpush1.bf16.msra.mxu1 %v15077_v25 }
 0x874   :  { %8709 = vmatprep.subr.bf16.mxu0 %v15000_v55  ;;  %8773 = vmatprep.subr.bf16.mxu1 %v15078_v40 }
 0x877   :  { %8711 = vmatpush1.bf16.msra.mxu0 %v15001_v28  ;;  %8775 = vmatpush1.bf16.msra.mxu1 %v15079_v53 }
 0x878   :  { %8713 = vmatprep.subr.bf16.mxu0 %v15002_v35  ;;  %8777 = vmatprep.subr.bf16.mxu1 %v15080_v32 }
 0x87b   :  { %8715 = vmatpush1.bf16.msra.mxu0 %v15003_v29  ;;  %8779 = vmatpush1.bf16.msra.mxu1 %v15081_v9 }
 0x87c   :  { %8717 = vmatprep.subr.bf16.mxu0 %v15159_v56  ;;  %8781 = vmatprep.subr.bf16.mxu1 %v15082_v20 }
 0x87f   :  { %8719 = vmatpush1.bf16.msra.mxu0 %v15160_v54  ;;  %8783 = vmatpush1.bf16.msra.mxu1 %v15083_v30 }
 0x880   :  { %8721 = vmatprep.subr.bf16.mxu0 %v15161_v33  ;;  %8785 = vmatprep.subr.bf16.mxu1 %v15084_v51 }
 0x883   :  { %8723 = vmatpush1.bf16.msra.mxu0 %v15007_v21  ;;  %8787 = vmatpush1.bf16.msra.mxu1 %v15085_v45 }
 0x884   :  { %8725 = vmatprep.subr.bf16.mxu0 %v15435_v59  ;;  %8789 = vmatprep.subr.bf16.mxu1 %v15436_v17 }
 0x887   :  { %8727 = vmatpush1.bf16.msra.mxu0 %v15437_v46  ;;  %8791 = vmatpush1.bf16.msra.mxu1 %v15438_v6 }
 0x888   :  { %8729 = vmatprep.subr.bf16.mxu0 %v15439_v60  ;;  %8793 = vmatprep.subr.bf16.mxu1 %v15440_v36  ;;  %v15530_v60 = vld [vmem:[#allocation145_spill] sm:$0xff] }
 0x88b   :  { %8731 = vmatpush1.bf16.msra.mxu0 %v15441_v13  ;;  %8795 = vmatpush1.bf16.msra.mxu1 %v15442_v4 }
 0x88c   :  { %8733 = vmatprep.subr.bf16.mxu0 %v15443_v41  ;;  %8797 = vmatprep.subr.bf16.mxu1 %v15444_v3  ;;  %v15454_v41 = vld [vmem:[#allocation133_spill] sm:$0xff]  ;;  %v15455_v3 = vld [vmem:[#allocation114_spill] sm:$0xff] }
 0x88f   :  { %8735 = vmatpush1.bf16.msra.mxu0 %v15445_v52  ;;  %8799 = vmatpush1.bf16.msra.mxu1 %v15446_v50  ;;  %v15456_v52 = vld [vmem:[#allocation134_spill] sm:$0xff]  ;;  %v15457_v50 = vld [vmem:[#allocation116_spill] sm:$0xff] }
 0x890   :  { %8737 = vmatprep.subr.bf16.mxu0 %v15447_v27  ;;  %8801 = vmatprep.subr.bf16.mxu1 %v15448_v1  ;;  %v15458_v27 = vld [vmem:[#allocation135_spill] sm:$0xff]  ;;  %v15459_v1 = vld [vmem:[#allocation118_spill] sm:$0xff] }
 0x893   :  { %8739 = vmatpush1.bf16.msra.mxu0 %v15449_v11  ;;  %8803 = vmatpush1.bf16.msra.mxu1 %v15450_v16  ;;  %v15460_v11 = vld [vmem:[#allocation136_spill] sm:$0xff] }
 0x894   :  { %8741 = vmatprep.subr.bf16.mxu0 %v15451_v42  ;;  %8805 = vmatprep.subr.bf16.mxu1 %v15452_v63  ;;  %v15461_v16 = vld [vmem:[#allocation120_spill] sm:$0xff]  ;;  %v15462_v42 = vld [vmem:[#allocation137_spill] sm:$0xff]  ;;  %v15463_v63 = vld [vmem:[#allocation10_spill] sm:$0xff] }
 0x897   :  { %8743 = vmatpush1.bf16.msra.mxu0 %v15453_v26  ;;  %8807 = vmatpush1.bf16.msra.mxu1 %v15454_v41  ;;  %v15464_v26 = vld [vmem:[#allocation11_spill] sm:$0xff] }
 0x898   :  { %8745 = vmatprep.subr.bf16.mxu0 %v15455_v3  ;;  %8809 = vmatprep.subr.bf16.mxu1 %v15456_v52  ;;  %v15465_v52 = vld [vmem:[#allocation12_spill] sm:$0xff]  ;;  %v15474_v3 = vld [vmem:[#allocation37_spill] sm:$0xff] }
 0x89b   :  { %8747 = vmatpush1.bf16.msra.mxu0 %v15457_v50  ;;  %8811 = vmatpush1.bf16.msra.mxu1 %v15458_v27  ;;  %v15466_v50 = vld [vmem:[#allocation29_spill] sm:$0xff] }
 0x89c   :  { %8749 = vmatprep.subr.bf16.mxu0 %v15459_v1  ;;  %8813 = vmatprep.subr.bf16.mxu1 %v15460_v11  ;;  %v15467_v27 = vld [vmem:[#allocation13_spill] sm:$0xff]  ;;  %v15468_v1 = vld [vmem:[#allocation31_spill] sm:$0xff]  ;;  %v15469_v11 = vld [vmem:[#allocation14_spill] sm:$0xff] }
 0x89f   :  { %8751 = vmatpush1.bf16.msra.mxu0 %v15461_v16  ;;  %8815 = vmatpush1.bf16.msra.mxu1 %v15462_v42  ;;  %v15470_v16 = vld [vmem:[#allocation33_spill] sm:$0xff]  ;;  %v15471_v42 = vld [vmem:[#allocation15_spill] sm:$0xff] }
 0x8a0   :  { %8817 = vmatprep.subr.bf16.mxu0 %v15463_v63  ;;  %8881 = vmatprep.subr.bf16.mxu1 %v15464_v26  ;;  %v15472_v63 = vld [vmem:[#allocation35_spill] sm:$0xff]  ;;  %v15473_v26 = vld [vmem:[#allocation16_spill] sm:$0xff] }
 0x8a2   :  { %3587 = vmatmul.mubr.f32.vlgmr.msra.gmra.mrb[34].mxu0 %v13205_v2  ;;  %3658 = vmatmul.mubr.f32.vlgmr.msra.gmra.mrb[50].mxu1 %v13205_v2  ;;  %v15475_v2 = vld [vmem:[#allocation17_spill] sm:$0xff] }
 0x8a3   :  { %8819 = vmatpush1.bf16.msra.mxu0 %v15465_v52  ;;  %8883 = vmatpush1.bf16.msra.mxu1 %v15466_v50  ;;  %v15476_v52 = vld [vmem:[#allocation39_spill] sm:$0xff]  ;;  %v15477_v50 = vld [vmem:[#allocation18_spill] sm:$0xff] }
 0x8a4   :  { %8821 = vmatprep.subr.bf16.mxu0 %v15467_v27  ;;  %8885 = vmatprep.subr.bf16.mxu1 %v15468_v1  ;;  %v15478_v27 = vld [vmem:[#allocation41_spill] sm:$0xff]  ;;  %v15479_v1 = vld [vmem:[#allocation19_spill] sm:$0xff] }
 0x8a7   :  { %8823 = vmatpush1.bf16.msra.mxu0 %v15469_v11  ;;  %8887 = vmatpush1.bf16.msra.mxu1 %v15470_v16  ;;  %v15480_v11 = vld [vmem:[#allocation43_spill] sm:$0xff]  ;;  %v15481_v16 = vld [vmem:[#allocation20_spill] sm:$0xff] }
 0x8a8   :  { %8825 = vmatprep.subr.bf16.mxu0 %v15471_v42  ;;  %8889 = vmatprep.subr.bf16.mxu1 %v15472_v63  ;;  %v15482_v42 = vld [vmem:[#allocation45_spill] sm:$0xff] }
 0x8a9   :  { %v15483_v63 = vld [vmem:[#allocation21_spill] sm:$0xff] }
 0x8ab   :  { %8827 = vmatpush1.bf16.msra.mxu0 %v15473_v26  ;;  %8891 = vmatpush1.bf16.msra.mxu1 %v15474_v3  ;;  %v15484_v26 = vld [vmem:[#allocation47_spill] sm:$0xff]  ;;  %v15485_v3 = vld [vmem:[#allocation22_spill] sm:$0xff] }
 0x8ac   :  { %8829 = vmatprep.subr.bf16.mxu0 %v15475_v2  ;;  %8893 = vmatprep.subr.bf16.mxu1 %v15476_v52  ;;  %v15486_v2 = vld [vmem:[#allocation49_spill] sm:$0xff]  ;;  %v15487_v52 = vld [vmem:[#allocation23_spill] sm:$0xff] }
 0x8af   :  { %8831 = vmatpush1.bf16.msra.mxu0 %v15477_v50  ;;  %8895 = vmatpush1.bf16.msra.mxu1 %v15478_v27  ;;  %v15488_v50 = vld [vmem:[#allocation51_spill] sm:$0xff]  ;;  %v15489_v27 = vld [vmem:[#allocation24_spill] sm:$0xff] }
 0x8b0   :  { %8833 = vmatprep.subr.bf16.mxu0 %v15479_v1  ;;  %8897 = vmatprep.subr.bf16.mxu1 %v15480_v11  ;;  %v15490_v1 = vld [vmem:[#allocation53_spill] sm:$0xff] }
 0x8b1   :  { %v15491_v11 = vld [vmem:[#allocation25_spill] sm:$0xff] }
 0x8b3   :  { %8835 = vmatpush1.bf16.msra.mxu0 %v15481_v16  ;;  %8899 = vmatpush1.bf16.msra.mxu1 %v15482_v42  ;;  %v15492_v16 = vld [vmem:[#allocation55_spill] sm:$0xff]  ;;  %v15493_v42 = vld [vmem:[#allocation26_spill] sm:$0xff] }
 0x8b4   :  { %8837 = vmatprep.subr.bf16.mxu0 %v15483_v63  ;;  %8901 = vmatprep.subr.bf16.mxu1 %v15484_v26  ;;  %v15494_v63 = vld [vmem:[#allocation57_spill] sm:$0xff]  ;;  %v15495_v26 = vld [vmem:[#allocation27_spill] sm:$0xff] }
 0x8b7   :  { %8839 = vmatpush1.bf16.msra.mxu0 %v15485_v3  ;;  %8903 = vmatpush1.bf16.msra.mxu1 %v15486_v2  ;;  %v15496_v3 = vld [vmem:[#allocation58_spill] sm:$0xff]  ;;  %v15497_v2 = vld [vmem:[#allocation28_spill] sm:$0xff] }
 0x8b8   :  { %8841 = vmatprep.subr.bf16.mxu0 %v15487_v52  ;;  %8905 = vmatprep.subr.bf16.mxu1 %v15488_v50  ;;  %v15498_v52 = vld [vmem:[#allocation60_spill] sm:$0xff]  ;;  %v15499_v50 = vld [vmem:[#allocation30_spill] sm:$0xff] }
 0x8bb   :  { %8843 = vmatpush1.bf16.msra.mxu0 %v15489_v27  ;;  %8907 = vmatpush1.bf16.msra.mxu1 %v15490_v1  ;;  %v15500_v27 = vld [vmem:[#allocation62_spill] sm:$0xff]  ;;  %v15501_v1 = vld [vmem:[#allocation32_spill] sm:$0xff] }
 0x8bc   :  { %8845 = vmatprep.subr.bf16.mxu0 %v15491_v11  ;;  %8909 = vmatprep.subr.bf16.mxu1 %v15492_v16  ;;  %v15502_v11 = vld [vmem:[#allocation64_spill] sm:$0xff]  ;;  %v15503_v16 = vld [vmem:[#allocation34_spill] sm:$0xff] }
 0x8bf   :  { %8847 = vmatpush1.bf16.msra.mxu0 %v15493_v42  ;;  %8911 = vmatpush1.bf16.msra.mxu1 %v15494_v63  ;;  %v15504_v42 = vld [vmem:[#allocation66_spill] sm:$0xff]  ;;  %v15505_v63 = vld [vmem:[#allocation36_spill] sm:$0xff] }
 0x8c0   :  { %8849 = vmatprep.subr.bf16.mxu0 %v15495_v26  ;;  %8913 = vmatprep.subr.bf16.mxu1 %v15496_v3  ;;  %v15506_v26 = vld [vmem:[#allocation68_spill] sm:$0xff]  ;;  %v15507_v3 = vld [vmem:[#allocation38_spill] sm:$0xff] }
 0x8c3   :  { %8851 = vmatpush1.bf16.msra.mxu0 %v15497_v2  ;;  %8915 = vmatpush1.bf16.msra.mxu1 %v15498_v52  ;;  %v15508_v2 = vld [vmem:[#allocation70_spill] sm:$0xff]  ;;  %v15509_v52 = vld [vmem:[#allocation40_spill] sm:$0xff] }
 0x8c4   :  { %8853 = vmatprep.subr.bf16.mxu0 %v15499_v50  ;;  %8917 = vmatprep.subr.bf16.mxu1 %v15500_v27  ;;  %v15510_v50 = vld [vmem:[#allocation72_spill] sm:$0xff]  ;;  %v15511_v27 = vld [vmem:[#allocation42_spill] sm:$0xff] }
 0x8c7   :  { %8855 = vmatpush1.bf16.msra.mxu0 %v15501_v1  ;;  %8919 = vmatpush1.bf16.msra.mxu1 %v15502_v11  ;;  %v15512_v1 = vld [vmem:[#allocation74_spill] sm:$0xff]  ;;  %v15513_v11 = vld [vmem:[#allocation44_spill] sm:$0xff] }
 0x8c8   :  { %8857 = vmatprep.subr.bf16.mxu0 %v15503_v16  ;;  %8921 = vmatprep.subr.bf16.mxu1 %v15504_v42  ;;  %v15514_v16 = vld [vmem:[#allocation76_spill] sm:$0xff]  ;;  %v15515_v42 = vld [vmem:[#allocation46_spill] sm:$0xff] }
 0x8cb   :  { %8859 = vmatpush1.bf16.msra.mxu0 %v15505_v63  ;;  %8923 = vmatpush1.bf16.msra.mxu1 %v15506_v26  ;;  %v15516_v63 = vld [vmem:[#allocation78_spill] sm:$0xff]  ;;  %v15517_v26 = vld [vmem:[#allocation48_spill] sm:$0xff] }
 0x8cc   :  { %8861 = vmatprep.subr.bf16.mxu0 %v15507_v3  ;;  %8925 = vmatprep.subr.bf16.mxu1 %v15508_v2  ;;  %v15518_v3 = vld [vmem:[#allocation80_spill] sm:$0xff]  ;;  %v15519_v2 = vld [vmem:[#allocation50_spill] sm:$0xff] }
 0x8cf   :  { %8863 = vmatpush1.bf16.msra.mxu0 %v15509_v52  ;;  %8927 = vmatpush1.bf16.msra.mxu1 %v15510_v50  ;;  %v15520_v52 = vld [vmem:[#allocation82_spill] sm:$0xff]  ;;  %v15521_v50 = vld [vmem:[#allocation52_spill] sm:$0xff] }
 0x8d0   :  { %8865 = vmatprep.subr.bf16.mxu0 %v15511_v27  ;;  %8929 = vmatprep.subr.bf16.mxu1 %v15512_v1  ;;  %v15522_v27 = vld [vmem:[#allocation84_spill] sm:$0xff]  ;;  %v15523_v1 = vld [vmem:[#allocation54_spill] sm:$0xff] }
 0x8d3   :  { %8867 = vmatpush1.bf16.msra.mxu0 %v15513_v11  ;;  %8931 = vmatpush1.bf16.msra.mxu1 %v15514_v16  ;;  %v15524_v11 = vld [vmem:[#allocation86_spill] sm:$0xff]  ;;  %v15525_v16 = vld [vmem:[#allocation56_spill] sm:$0xff] }
 0x8d4   :  { %8869 = vmatprep.subr.bf16.mxu0 %v15515_v42  ;;  %8933 = vmatprep.subr.bf16.mxu1 %v15516_v63  ;;  %v15526_v42 = vld [vmem:[#allocation88_spill] sm:$0xff]  ;;  %v15527_v63 = vld [vmem:[#allocation59_spill] sm:$0xff] }
 0x8d7   :  { %8871 = vmatpush1.bf16.msra.mxu0 %v15517_v26  ;;  %8935 = vmatpush1.bf16.msra.mxu1 %v15518_v3  ;;  %v15528_v26 = vld [vmem:[#allocation91_spill] sm:$0xff] }
 0x8d8   :  { %8873 = vmatprep.subr.bf16.mxu0 %v15519_v2  ;;  %8937 = vmatprep.subr.bf16.mxu1 %v15520_v52 }
 0x8db   :  { %8875 = vmatpush1.bf16.msra.mxu0 %v15521_v50  ;;  %8939 = vmatpush1.bf16.msra.mxu1 %v15522_v27 }
 0x8dc   :  { %8877 = vmatprep.subr.bf16.mxu0 %v15523_v1  ;;  %8941 = vmatprep.subr.bf16.mxu1 %v15524_v11  ;;  %v15529_v11 = vld [vmem:[#allocation93_spill] sm:$0xff] }
 0x8df   :  { %8879 = vmatpush1.bf16.msra.mxu0 %v15525_v16  ;;  %8943 = vmatpush1.bf16.msra.mxu1 %v15526_v42 }
 0x8e0   :  { %8945 = vmatprep.subr.bf16.mxu0 %v15527_v63  ;;  %9009 = vmatprep.subr.bf16.mxu1 %v15528_v26 }
 0x935   :  { %v3446_v3 = vpop.f32.mrb[12].mxu0  ;;  %v3517_v2 = vpop.f32.mrb[20].mxu1 }
 0x936   :  { %v3448_v41 = vpop.f32.mrb[13].mxu0  ;;  %v3519_v52 = vpop.f32.mrb[21].mxu1  ;;  %v10934_v50 = vadd.f32 %v3517_v2, %v15433_v5  ;;  %v10908_v27 = vadd.f32 %v3446_v3, %v12397_v62 }
 0x937   :  { %v10935_v1 = vadd.f32 %v3519_v52, %v13010_v34  ;;  %v10909_v13 = vadd.f32 %v3448_v41, %v15529_v11 }
 0x938   :  { %v6868_v4 = vmul.f32 -1.442695, %v10934_v50  ;;  %v6866_v16 = vmul.f32 -1.442695, %v10908_v27 }
 0x939   :  { %v6869_v42 = vmul.f32 -1.442695, %v10935_v1  ;;  %v6867_v17 = vmul.f32 -1.442695, %v10909_v13 }
 0x93a   :  { %11256 = vpow2.f32 %v6868_v4 }
 0x93b   :  { %11258 = vpow2.f32 %v6866_v16 }
 0x93c   :  { %11260 = vpow2.f32 %v6869_v42 }
 0x944   :  { %v11257_v41 = vpop.eup %11256 }
 0x945   :  { %v11259_v52 = vpop.eup %11258  ;;  %v3690_v50 = vadd.f32 1.0, %v11257_v41 }
 0x946   :  { %v11261_v27 = vpop.eup %11260  ;;  %v3688_v16 = vadd.f32 1.0, %v11259_v52 }
 0x947   :  { %v3691_v42 = vadd.f32 1.0, %v11261_v27 }
 0x975   :  { %v3588_v36 = vpop.f32.mrb[34].mxu0  ;;  %v3659_v63 = vpop.f32.mrb[50].mxu1 }
 0x976   :  { %v10956_v26 = vadd.f32 %v3588_v36, %v15530_v60  ;;  %v3590_v6 = vpop.f32.mrb[35].mxu0  ;;  %v3661_v46 = vpop.f32.mrb[51].mxu1  ;;  %v10978_v13 = vadd.f32 %v3659_v63, %v12406_v48 }
 0x977   :  { %v10957_v59 = vadd.f32 %v3590_v6, %v15434_v47  ;;  %v10979_v4 = vadd.f32 %v3661_v46, %v13023_v22 }
 0x978   :  { %v6870_v2 = vmul.f32 -1.442695, %v10956_v26  ;;  %v6872_v26 = vmul.f32 -1.442695, %v10978_v13 }
 0x979   :  { %v6871_v3 = vmul.f32 -1.442695, %v10957_v59  ;;  %v6873_v36 = vmul.f32 -1.442695, %v10979_v4 }
 0x97a   :  { %11262 = vpow2.f32 %v6870_v2 }
 0x97b   :  { %11264 = vpow2.f32 %v6867_v17 }
 0x97c   :  { %11266 = vpow2.f32 %v6871_v3 }
 0x97d   :  { %11268 = vrcp.f32 %v3690_v50 }
 0x984   :  { %v11263_v1 = vpop.eup %11262 }
 0x985   :  { %v11265_v60 = vpop.eup %11264  ;;  %v3692_v11 = vadd.f32 1.0, %v11263_v1 }
 0x986   :  { %v11267_v6 = vpop.eup %11266  ;;  %v3689_v17 = vadd.f32 1.0, %v11265_v60 }
 0x987   :  { %11270 = vrcp.f32 %v3692_v11  ;;  %v3693_v59 = vadd.f32 1.0, %v11267_v6  ;;  %v11269_v46 = vpop.eup %11268 }
 0x988   :  { %11272 = vpow2.f32 %v6873_v36  ;;  %v3716_v11 = vmul.f32 %v11269_v46, %v13194_v18 }
 0x989   :  { %11274 = vrcp.f32 %v3693_v59 }
 0x98a   :  { %11276 = vrcp.f32 %v3688_v16 }
 0x98b   :  { %11278 = vrcp.f32 %v3691_v42 }
 0x98c   :  { %11280 = vrcp.f32 %v3689_v17 }
 0x98d   :  { %11282 = vpow2.f32 %v6872_v26 }
 0x991   :  { %v11271_v2 = vpop.eup %11270 }
 0x992   :  { %v11273_v3 = vpop.eup %11272  ;;  %v3712_v41 = vmul.f32 2.0, %v11271_v2 }
 0x993   :  { %v11275_v4 = vpop.eup %11274  ;;  %v3695_v13 = vadd.f32 1.0, %v11273_v3 }
 0x994   :  { %v11277_v63 = vpop.eup %11276  ;;  %v6874_v1 = vadd.f32 -1.0, %v3712_v41  ;;  %v3713_v52 = vmul.f32 2.0, %v11275_v4 }
 0x995   :  { %v11279_v50 = vpop.eup %11278  ;;  %11284 = vrcp.f32 %v3695_v13  ;;  %v15539_v13 = vld [vmem:[#allocation102_spill] sm:$0xff] }
 0x996   :  { %v11281_v27 = vpop.eup %11280  ;;  %v3718_v60 = vmul.f32 %v11277_v63, %v6874_v1  ;;  %v6875_v36 = vadd.f32 -1.0, %v3713_v52  ;;  %v3717_v59 = vmul.f32 %v11279_v50, %v13200_v8  ;;  %v15533_v52 = vld [vmem:[#allocation96_spill] sm:$0xff]  ;;  %v15534_v50 = vld [vmem:[#allocation125_spill] sm:$0xff] }
 0x997   :  { %v11283_v6 = vpop.eup %11282 }
 0x998   :  { %v13352_v16 = vadd.f32 %v3718_v60, %v3716_v11  ;;  %v3719_v42 = vmul.f32 %v11281_v27, %v6875_v36  ;;  %v3694_v17 = vadd.f32 1.0, %v11283_v6  ;;  %v15535_v27 = vld [vmem:[#allocation98_spill] sm:$0xff]  ;;  %v15537_v60 = vld [vmem:[#allocation100_spill] sm:$0xff]  ;;  %v15538_v36 = vld [vmem:[#allocation127_spill] sm:$0xff] }
 0x999   :  { %v15536_v11 = vld [vmem:[#allocation126_spill] sm:$0xff]  ;;  %v15540_v6 = vld [vmem:[#allocation128_spill] sm:$0xff] }
 0x99a   :  { %v3721_v26 = vadd.f32 %v3719_v42, %v3717_v59  ;;  %11286 = vtanh.f32 %v13352_v16  ;;  %v15541_v42 = vld [vmem:[#allocation104_spill] sm:$0xff]  ;;  %v15542_v59 = vld [vmem:[#allocation129_spill] sm:$0xff] }
 0x99c   :  { %11288 = vtanh.f32 %v3721_v26  ;;  %v13358_v2 = vsel %vm3727_vm6, %v3721_v26, %v13200_v8  ;;  %v15531_v8 = vld [vmem:[#allocation94_spill] sm:$0xff] }
 0x99d   :  { %11290 = vrcp.f32 %v3694_v17  ;;  %v15543_v17 = vld [vmem:[#allocation106_spill] sm:$0xff] }
 0x99e   :  { %v15544_v26 = vld [vmem:[#allocation130_spill] sm:$0xff] }
 0x99f   :  { %v11285_v18 = vpop.eup %11284 }
 0x9a4   :  { %v11287_v46 = vpop.eup %11286 }
 0x9a6   :  { %v11289_v3 = vpop.eup %11288 }
 0x9a7   :  { %v3725_v41 = vmul.f32 %v11289_v3, %v11285_v18  ;;  %v11291_v4 = vpop.eup %11290  ;;  %v15545_v18 = vld [vmem:[#allocation108_spill] sm:$0xff]  ;;  %v15547_v3 = vld [vmem:[#allocation110_spill] sm:$0xff] }
 0x9a8   :  { %v13361_v1 = vmul.f32 %v11291_v4, %v11287_v46  ;;  %v15546_v46 = vld [vmem:[#allocation131_spill] sm:$0xff]  ;;  %v15549_v4 = vld [vmem:[#allocation112_spill] sm:$0xff] }
 0x9a9   :  { %v3733_v63 = vsel %vm3727_vm6, %v3725_v41, %v13203_v37  ;;  %v15532_v37 = vld [vmem:[#allocation124_spill] sm:$0xff] }
 0x9aa   :  { %3806 = vmatprep.mubr.f32.mxu0 %v3733_v63  ;;  %3877 = vmatprep.mubr.f32.mxu1 %v3733_v63  ;;  %v15548_v41 = vld [vmem:[#allocation132_spill] sm:$0xff] }
 0x9ab   :  { %3807 = vmatmul.mubr.f32.vlgmr.msra.gmra.mrb[14].mxu0 %v13361_v1  ;;  %3878 = vmatmul.mubr.f32.vlgmr.msra.gmra.mrb[22].mxu1 %v13361_v1 }
 0x9ac   :  { %8947 = vmatpush1.bf16.msra.mxu0 %v14982_v43  ;;  %9011 = vmatpush1.bf16.msra.mxu1 %v14983_v61 }
 0x9ad   :  { %3948 = vmatprep.mubr.f32.mxu0 %v3733_v63  ;;  %4019 = vmatprep.mubr.f32.mxu1 %v3733_v63  ;;  %v15550_v63 = vld [vmem:[#allocation133_spill] sm:$0xff] }
 0x9ae   :  { %8949 = vmatprep.subr.bf16.mxu0 %v14984_v14  ;;  %9013 = vmatprep.subr.bf16.mxu1 %v14985_v7 }
 0x9b0   :  { %8951 = vmatpush1.bf16.msra.mxu0 %v14986_v10  ;;  %9015 = vmatpush1.bf16.msra.mxu1 %v15070_v58 }
 0x9b1   :  { %8953 = vmatprep.subr.bf16.mxu0 %v15071_v49  ;;  %9017 = vmatprep.subr.bf16.mxu1 %v15072_v24 }
 0x9b4   :  { %8955 = vmatpush1.bf16.msra.mxu0 %v14990_v39  ;;  %9019 = vmatpush1.bf16.msra.mxu1 %v15073_v38 }
 0x9b5   :  { %8957 = vmatprep.subr.bf16.mxu0 %v14992_v57  ;;  %9021 = vmatprep.subr.bf16.mxu1 %v15074_v12 }
 0x9b8   :  { %8959 = vmatpush1.bf16.msra.mxu0 %v14994_v0  ;;  %9023 = vmatpush1.bf16.msra.mxu1 %v15075_v19 }
 0x9b9   :  { %8961 = vmatprep.subr.bf16.mxu0 %v14996_v31  ;;  %9025 = vmatprep.subr.bf16.mxu1 %v15076_v44 }
 0x9bc   :  { %8963 = vmatpush1.bf16.msra.mxu0 %v14998_v23  ;;  %9027 = vmatpush1.bf16.msra.mxu1 %v15077_v25 }
 0x9bd   :  { %8965 = vmatprep.subr.bf16.mxu0 %v15000_v55  ;;  %9029 = vmatprep.subr.bf16.mxu1 %v15078_v40 }
 0x9c0   :  { %8967 = vmatpush1.bf16.msra.mxu0 %v15001_v28  ;;  %9031 = vmatpush1.bf16.msra.mxu1 %v15079_v53 }
 0x9c1   :  { %8969 = vmatprep.subr.bf16.mxu0 %v15002_v35  ;;  %9033 = vmatprep.subr.bf16.mxu1 %v15080_v32 }
 0x9c4   :  { %8971 = vmatpush1.bf16.msra.mxu0 %v15003_v29  ;;  %9035 = vmatpush1.bf16.msra.mxu1 %v15081_v9 }
 0x9c5   :  { %8973 = vmatprep.subr.bf16.mxu0 %v15159_v56  ;;  %9037 = vmatprep.subr.bf16.mxu1 %v15082_v20 }
 0x9c8   :  { %8975 = vmatpush1.bf16.msra.mxu0 %v15160_v54  ;;  %9039 = vmatpush1.bf16.msra.mxu1 %v15083_v30 }
 0x9c9   :  { %8977 = vmatprep.subr.bf16.mxu0 %v15161_v33  ;;  %9041 = vmatprep.subr.bf16.mxu1 %v15084_v51 }
 0x9cc   :  { %8979 = vmatpush1.bf16.msra.mxu0 %v15007_v21  ;;  %9043 = vmatpush1.bf16.msra.mxu1 %v15085_v45 }
 0x9cd   :  { %8981 = vmatprep.subr.bf16.mxu0 %v15531_v8  ;;  %9045 = vmatprep.subr.bf16.mxu1 %v15532_v37 }
 0x9d0   :  { %8983 = vmatpush1.bf16.msra.mxu0 %v15533_v52  ;;  %9047 = vmatpush1.bf16.msra.mxu1 %v15534_v50 }
 0x9d1   :  { %8985 = vmatprep.subr.bf16.mxu0 %v15535_v27  ;;  %9049 = vmatprep.subr.bf16.mxu1 %v15536_v11 }
 0x9d4   :  { %8987 = vmatpush1.bf16.msra.mxu0 %v15537_v60  ;;  %9051 = vmatpush1.bf16.msra.mxu1 %v15538_v36 }
 0x9d5   :  { %8989 = vmatprep.subr.bf16.mxu0 %v15539_v13  ;;  %9053 = vmatprep.subr.bf16.mxu1 %v15540_v6 }
 0x9d8   :  { %8991 = vmatpush1.bf16.msra.mxu0 %v15541_v42  ;;  %9055 = vmatpush1.bf16.msra.mxu1 %v15542_v59  ;;  %v15552_v42 = vld [vmem:[#allocation134_spill] sm:$0xff]  ;;  %v15553_v59 = vld [vmem:[#allocation116_spill] sm:$0xff] }
 0x9d9   :  { %8993 = vmatprep.subr.bf16.mxu0 %v15543_v17  ;;  %9057 = vmatprep.subr.bf16.mxu1 %v15544_v26  ;;  %v15554_v17 = vld [vmem:[#allocation135_spill] sm:$0xff]  ;;  %v15555_v26 = vld [vmem:[#allocation118_spill] sm:$0xff] }
 0x9dc   :  { %8995 = vmatpush1.bf16.msra.mxu0 %v15545_v18  ;;  %9059 = vmatpush1.bf16.msra.mxu1 %v15546_v46  ;;  %v15556_v18 = vld [vmem:[#allocation136_spill] sm:$0xff] }
 0x9dd   :  { %8997 = vmatprep.subr.bf16.mxu0 %v15547_v3  ;;  %9061 = vmatprep.subr.bf16.mxu1 %v15548_v41  ;;  %v15557_v46 = vld [vmem:[#allocation120_spill] sm:$0xff]  ;;  %v15558_v3 = vld [vmem:[#allocation137_spill] sm:$0xff]  ;;  %v15559_v41 = vld [vmem:[#allocation10_spill] sm:$0xff] }
 0x9e0   :  { %8999 = vmatpush1.bf16.msra.mxu0 %v15549_v4  ;;  %9063 = vmatpush1.bf16.msra.mxu1 %v15550_v63  ;;  %v15560_v4 = vld [vmem:[#allocation11_spill] sm:$0xff] }
 0x9e1   :  { %9001 = vmatprep.subr.bf16.mxu0 %v15551_v15  ;;  %9065 = vmatprep.subr.bf16.mxu1 %v15552_v42  ;;  %v15561_v42 = vld [vmem:[#allocation12_spill] sm:$0xff]  ;;  %v15570_v15 = vld [vmem:[#allocation37_spill] sm:$0xff] }
 0x9e4   :  { %9003 = vmatpush1.bf16.msra.mxu0 %v15553_v59  ;;  %9067 = vmatpush1.bf16.msra.mxu1 %v15554_v17  ;;  %v15562_v59 = vld [vmem:[#allocation29_spill] sm:$0xff] }
 0x9e5   :  { %9005 = vmatprep.subr.bf16.mxu0 %v15555_v26  ;;  %9069 = vmatprep.subr.bf16.mxu1 %v15556_v18  ;;  %v15563_v17 = vld [vmem:[#allocation13_spill] sm:$0xff]  ;;  %v15564_v26 = vld [vmem:[#allocation31_spill] sm:$0xff]  ;;  %v15565_v18 = vld [vmem:[#allocation14_spill] sm:$0xff] }
 0x9e8   :  { %9007 = vmatpush1.bf16.msra.mxu0 %v15557_v46  ;;  %9071 = vmatpush1.bf16.msra.mxu1 %v15558_v3  ;;  %v15566_v46 = vld [vmem:[#allocation33_spill] sm:$0xff]  ;;  %v15567_v3 = vld [vmem:[#allocation15_spill] sm:$0xff] }
 0x9e9   :  { %9073 = vmatprep.subr.bf16.mxu0 %v15559_v41  ;;  %9137 = vmatprep.subr.bf16.mxu1 %v15560_v4  ;;  %v15568_v41 = vld [vmem:[#allocation35_spill] sm:$0xff]  ;;  %v15569_v4 = vld [vmem:[#allocation16_spill] sm:$0xff] }
 0x9eb   :  { %3949 = vmatmul.mubr.f32.vlgmr.msra.gmra.mrb[36].mxu0 %v13361_v1  ;;  %4020 = vmatmul.mubr.f32.vlgmr.msra.gmra.mrb[52].mxu1 %v13361_v1  ;;  %v15571_v1 = vld [vmem:[#allocation17_spill] sm:$0xff] }
 0x9ec   :  { %9075 = vmatpush1.bf16.msra.mxu0 %v15561_v42  ;;  %9139 = vmatpush1.bf16.msra.mxu1 %v15562_v59  ;;  %v15572_v42 = vld [vmem:[#allocation39_spill] sm:$0xff]  ;;  %v15573_v59 = vld [vmem:[#allocation18_spill] sm:$0xff] }
 0x9ed   :  { %9077 = vmatprep.subr.bf16.mxu0 %v15563_v17  ;;  %9141 = vmatprep.subr.bf16.mxu1 %v15564_v26  ;;  %v15574_v17 = vld [vmem:[#allocation41_spill] sm:$0xff]  ;;  %v15575_v26 = vld [vmem:[#allocation19_spill] sm:$0xff] }
 0x9f0   :  { %9079 = vmatpush1.bf16.msra.mxu0 %v15565_v18  ;;  %9143 = vmatpush1.bf16.msra.mxu1 %v15566_v46  ;;  %v15576_v18 = vld [vmem:[#allocation43_spill] sm:$0xff]  ;;  %v15577_v46 = vld [vmem:[#allocation20_spill] sm:$0xff] }
 0x9f1   :  { %9081 = vmatprep.subr.bf16.mxu0 %v15567_v3  ;;  %9145 = vmatprep.subr.bf16.mxu1 %v15568_v41  ;;  %v15578_v3 = vld [vmem:[#allocation45_spill] sm:$0xff] }
 0x9f2   :  { %v15579_v41 = vld [vmem:[#allocation21_spill] sm:$0xff] }
 0x9f4   :  { %9083 = vmatpush1.bf16.msra.mxu0 %v15569_v4  ;;  %9147 = vmatpush1.bf16.msra.mxu1 %v15570_v15  ;;  %v15580_v4 = vld [vmem:[#allocation47_spill] sm:$0xff]  ;;  %v15581_v15 = vld [vmem:[#allocation22_spill] sm:$0xff] }
 0x9f5   :  { %9085 = vmatprep.subr.bf16.mxu0 %v15571_v1  ;;  %9149 = vmatprep.subr.bf16.mxu1 %v15572_v42  ;;  %v15582_v1 = vld [vmem:[#allocation49_spill] sm:$0xff]  ;;  %v15583_v42 = vld [vmem:[#allocation23_spill] sm:$0xff] }
 0x9f8   :  { %9087 = vmatpush1.bf16.msra.mxu0 %v15573_v59  ;;  %9151 = vmatpush1.bf16.msra.mxu1 %v15574_v17  ;;  %v15584_v59 = vld [vmem:[#allocation51_spill] sm:$0xff]  ;;  %v15585_v17 = vld [vmem:[#allocation24_spill] sm:$0xff] }
 0x9f9   :  { %9089 = vmatprep.subr.bf16.mxu0 %v15575_v26  ;;  %9153 = vmatprep.subr.bf16.mxu1 %v15576_v18  ;;  %v15586_v26 = vld [vmem:[#allocation53_spill] sm:$0xff] }
 0x9fa   :  { %v15587_v18 = vld [vmem:[#allocation25_spill] sm:$0xff] }
 0x9fc   :  { %9091 = vmatpush1.bf16.msra.mxu0 %v15577_v46  ;;  %9155 = vmatpush1.bf16.msra.mxu1 %v15578_v3  ;;  %v15588_v46 = vld [vmem:[#allocation55_spill] sm:$0xff]  ;;  %v15589_v3 = vld [vmem:[#allocation26_spill] sm:$0xff] }
 0x9fd   :  { %9093 = vmatprep.subr.bf16.mxu0 %v15579_v41  ;;  %9157 = vmatprep.subr.bf16.mxu1 %v15580_v4  ;;  %v15590_v41 = vld [vmem:[#allocation57_spill] sm:$0xff]  ;;  %v15591_v4 = vld [vmem:[#allocation27_spill] sm:$0xff] }
 0xa00   :  { %9095 = vmatpush1.bf16.msra.mxu0 %v15581_v15  ;;  %9159 = vmatpush1.bf16.msra.mxu1 %v15582_v1  ;;  %v15592_v15 = vld [vmem:[#allocation58_spill] sm:$0xff]  ;;  %v15593_v1 = vld [vmem:[#allocation28_spill] sm:$0xff] }
 0xa01   :  { %9097 = vmatprep.subr.bf16.mxu0 %v15583_v42  ;;  %9161 = vmatprep.subr.bf16.mxu1 %v15584_v59  ;;  %v15594_v42 = vld [vmem:[#allocation60_spill] sm:$0xff]  ;;  %v15595_v59 = vld [vmem:[#allocation30_spill] sm:$0xff] }
 0xa04   :  { %9099 = vmatpush1.bf16.msra.mxu0 %v15585_v17  ;;  %9163 = vmatpush1.bf16.msra.mxu1 %v15586_v26  ;;  %v15596_v17 = vld [vmem:[#allocation62_spill] sm:$0xff]  ;;  %v15597_v26 = vld [vmem:[#allocation32_spill] sm:$0xff] }
 0xa05   :  { %9101 = vmatprep.subr.bf16.mxu0 %v15587_v18  ;;  %9165 = vmatprep.subr.bf16.mxu1 %v15588_v46  ;;  %v15598_v18 = vld [vmem:[#allocation64_spill] sm:$0xff]  ;;  %v15599_v46 = vld [vmem:[#allocation34_spill] sm:$0xff] }
 0xa08   :  { %9103 = vmatpush1.bf16.msra.mxu0 %v15589_v3  ;;  %9167 = vmatpush1.bf16.msra.mxu1 %v15590_v41  ;;  %v15600_v3 = vld [vmem:[#allocation66_spill] sm:$0xff]  ;;  %v15601_v41 = vld [vmem:[#allocation36_spill] sm:$0xff] }
 0xa09   :  { %9105 = vmatprep.subr.bf16.mxu0 %v15591_v4  ;;  %9169 = vmatprep.subr.bf16.mxu1 %v15592_v15  ;;  %v15602_v4 = vld [vmem:[#allocation68_spill] sm:$0xff]  ;;  %v15603_v15 = vld [vmem:[#allocation38_spill] sm:$0xff] }
 0xa0c   :  { %9107 = vmatpush1.bf16.msra.mxu0 %v15593_v1  ;;  %9171 = vmatpush1.bf16.msra.mxu1 %v15594_v42  ;;  %v15604_v1 = vld [vmem:[#allocation70_spill] sm:$0xff]  ;;  %v15605_v42 = vld [vmem:[#allocation40_spill] sm:$0xff] }
 0xa0d   :  { %9109 = vmatprep.subr.bf16.mxu0 %v15595_v59  ;;  %9173 = vmatprep.subr.bf16.mxu1 %v15596_v17  ;;  %v15606_v59 = vld [vmem:[#allocation72_spill] sm:$0xff]  ;;  %v15607_v17 = vld [vmem:[#allocation42_spill] sm:$0xff] }
 0xa10   :  { %9111 = vmatpush1.bf16.msra.mxu0 %v15597_v26  ;;  %9175 = vmatpush1.bf16.msra.mxu1 %v15598_v18  ;;  %v15608_v26 = vld [vmem:[#allocation74_spill] sm:$0xff]  ;;  %v15609_v18 = vld [vmem:[#allocation44_spill] sm:$0xff] }
 0xa11   :  { %9113 = vmatprep.subr.bf16.mxu0 %v15599_v46  ;;  %9177 = vmatprep.subr.bf16.mxu1 %v15600_v3  ;;  %v15610_v46 = vld [vmem:[#allocation76_spill] sm:$0xff]  ;;  %v15611_v3 = vld [vmem:[#allocation46_spill] sm:$0xff] }
 0xa14   :  { %9115 = vmatpush1.bf16.msra.mxu0 %v15601_v41  ;;  %9179 = vmatpush1.bf16.msra.mxu1 %v15602_v4  ;;  %v15612_v41 = vld [vmem:[#allocation78_spill] sm:$0xff]  ;;  %v15613_v4 = vld [vmem:[#allocation48_spill] sm:$0xff] }
 0xa15   :  { %9117 = vmatprep.subr.bf16.mxu0 %v15603_v15  ;;  %9181 = vmatprep.subr.bf16.mxu1 %v15604_v1  ;;  %v15614_v15 = vld [vmem:[#allocation80_spill] sm:$0xff]  ;;  %v15615_v1 = vld [vmem:[#allocation50_spill] sm:$0xff] }
 0xa18   :  { %9119 = vmatpush1.bf16.msra.mxu0 %v15605_v42  ;;  %9183 = vmatpush1.bf16.msra.mxu1 %v15606_v59  ;;  %v15616_v42 = vld [vmem:[#allocation82_spill] sm:$0xff]  ;;  %v15617_v59 = vld [vmem:[#allocation52_spill] sm:$0xff] }
 0xa19   :  { %9121 = vmatprep.subr.bf16.mxu0 %v15607_v17  ;;  %9185 = vmatprep.subr.bf16.mxu1 %v15608_v26  ;;  %v15618_v17 = vld [vmem:[#allocation84_spill] sm:$0xff]  ;;  %v15619_v26 = vld [vmem:[#allocation54_spill] sm:$0xff] }
 0xa1c   :  { %9123 = vmatpush1.bf16.msra.mxu0 %v15609_v18  ;;  %9187 = vmatpush1.bf16.msra.mxu1 %v15610_v46  ;;  %v15620_v18 = vld [vmem:[#allocation86_spill] sm:$0xff]  ;;  %v15621_v46 = vld [vmem:[#allocation56_spill] sm:$0xff] }
 0xa1d   :  { %9125 = vmatprep.subr.bf16.mxu0 %v15611_v3  ;;  %9189 = vmatprep.subr.bf16.mxu1 %v15612_v41  ;;  %v15622_v3 = vld [vmem:[#allocation88_spill] sm:$0xff]  ;;  %v15623_v41 = vld [vmem:[#allocation59_spill] sm:$0xff] }
 0xa20   :  { %9127 = vmatpush1.bf16.msra.mxu0 %v15613_v4  ;;  %9191 = vmatpush1.bf16.msra.mxu1 %v15614_v15  ;;  %v15624_v4 = vld [vmem:[#allocation91_spill] sm:$0xff] }
 0xa21   :  { %9129 = vmatprep.subr.bf16.mxu0 %v15615_v1  ;;  %9193 = vmatprep.subr.bf16.mxu1 %v15616_v42 }
 0xa24   :  { %9131 = vmatpush1.bf16.msra.mxu0 %v15617_v59  ;;  %9195 = vmatpush1.bf16.msra.mxu1 %v15618_v17 }
 0xa25   :  { %9133 = vmatprep.subr.bf16.mxu0 %v15619_v26  ;;  %9197 = vmatprep.subr.bf16.mxu1 %v15620_v18 }
 0xa28   :  { %9135 = vmatpush1.bf16.msra.mxu0 %v15621_v46  ;;  %9199 = vmatpush1.bf16.msra.mxu1 %v15622_v3 }
 0xa29   :  { %9201 = vmatprep.subr.bf16.mxu0 %v15623_v41  ;;  %9265 = vmatprep.subr.bf16.mxu1 %v15624_v4  ;;  %v15625_v4 = vld [vmem:[#allocation93_spill] sm:$0xff] }
 0xa7e   :  { %v3808_v15 = vpop.f32.mrb[14].mxu0  ;;  %v3879_v1 = vpop.f32.mrb[22].mxu1 }
 0xa7f   :  { %v3810_v63 = vpop.f32.mrb[15].mxu0  ;;  %v3881_v42 = vpop.f32.mrb[23].mxu1  ;;  %v10936_v3 = vadd.f32 %v3879_v1, %v15433_v5  ;;  %v10910_v41 = vadd.f32 %v3808_v15, %v12397_v62 }
 0xa80   :  { %v10937_v59 = vadd.f32 %v3881_v42, %v13010_v34  ;;  %v10911_v36 = vadd.f32 %v3810_v63, %v15625_v4  ;;  %v15626_v42 = vld [vmem:[#allocation145_spill] sm:$0xff] }
 0xa81   :  { %v6878_v13 = vmul.f32 -1.442695, %v10936_v3  ;;  %v6876_v60 = vmul.f32 -1.442695, %v10910_v41 }
 0xa82   :  { %v6879_v6 = vmul.f32 -1.442695, %v10937_v59 }
 0xa84   :  { %11292 = vpow2.f32 %v6879_v6 }
 0xa8e   :  { %v11293_v17 = vpop.eup %11292 }
 0xa8f   :  { %v4053_v26 = vadd.f32 1.0, %v11293_v17  ;;  %v6877_v17 = vmul.f32 -1.442695, %v10911_v36 }
 0xa91   :  { %11294 = vrcp.f32 %v4053_v26 }
 0xa92   :  { %11296 = vpow2.f32 %v6878_v13 }
 0xa93   :  { %11298 = vpow2.f32 %v6876_v60 }
 0xa9b   :  { %v11295_v18 = vpop.eup %11294 }
 0xa9c   :  { %v4079_v46 = vmul.f32 %v11295_v18, %v13358_v2  ;;  %v11297_v15 = vpop.eup %11296 }
 0xa9d   :  { %v4052_v3 = vadd.f32 1.0, %v11297_v15  ;;  %v11299_v13 = vpop.eup %11298 }
 0xabe   :  { %v3950_v11 = vpop.f32.mrb[36].mxu0  ;;  %v4021_v27 = vpop.f32.mrb[52].mxu1 }
 0xabf   :  { %v10958_v59 = vadd.f32 %v3950_v11, %v15626_v42  ;;  %v3952_v6 = vpop.f32.mrb[37].mxu0  ;;  %v4023_v34 = vpop.f32.mrb[53].mxu1  ;;  %v10980_v63 = vadd.f32 %v4021_v27, %v12406_v48 }
 0xac0   :  { %v10959_v26 = vadd.f32 %v3952_v6, %v15434_v47  ;;  %v10981_v18 = vadd.f32 %v4023_v34, %v13023_v22  ;;  %v4050_v6 = vadd.f32 1.0, %v11299_v13 }
 0xac1   :  { %v6880_v50 = vmul.f32 -1.442695, %v10958_v59  ;;  %v6882_v59 = vmul.f32 -1.442695, %v10980_v63 }
 0xac2   :  { %v6881_v2 = vmul.f32 -1.442695, %v10959_v26  ;;  %v6883_v11 = vmul.f32 -1.442695, %v10981_v18 }
 0xac3   :  { %11300 = vpow2.f32 %v6880_v50 }
 0xac4   :  { %11302 = vpow2.f32 %v6877_v17 }
 0xac5   :  { %11304 = vpow2.f32 %v6881_v2 }
 0xac6   :  { %11306 = vrcp.f32 %v4052_v3 }
 0xacd   :  { %v11301_v41 = vpop.eup %11300 }
 0xace   :  { %v11303_v1 = vpop.eup %11302  ;;  %v4054_v42 = vadd.f32 1.0, %v11301_v41 }
 0xacf   :  { %v11305_v36 = vpop.eup %11304  ;;  %v4051_v50 = vadd.f32 1.0, %v11303_v1 }
 0xad0   :  { %11308 = vrcp.f32 %v4054_v42  ;;  %v4055_v60 = vadd.f32 1.0, %v11305_v36  ;;  %v11307_v34 = vpop.eup %11306 }
 0xad1   :  { %11310 = vpow2.f32 %v6883_v11  ;;  %v4078_v3 = vmul.f32 %v11307_v34, %v13352_v16 }
 0xad2   :  { %11312 = vrcp.f32 %v4055_v60 }
 0xad3   :  { %11314 = vrcp.f32 %v4050_v6 }
 0xad4   :  { %11316 = vpow2.f32 %v6882_v59 }
 0xad5   :  { %11318 = vrcp.f32 %v4051_v50 }
 0xada   :  { %v11309_v17 = vpop.eup %11308 }
 0xadb   :  { %v11311_v26 = vpop.eup %11310  ;;  %v4074_v2 = vmul.f32 2.0, %v11309_v17 }
 0xadc   :  { %v11313_v27 = vpop.eup %11312  ;;  %v4057_v63 = vadd.f32 1.0, %v11311_v26  ;;  %v15629_v26 = vld [vmem:[#allocation126_spill] sm:$0xff] }
 0xadd   :  { %v6884_v15 = vadd.f32 -1.0, %v4074_v2  ;;  %v4075_v18 = vmul.f32 2.0, %v11313_v27  ;;  %v11315_v41 = vpop.eup %11314  ;;  %v15630_v27 = vld [vmem:[#allocation100_spill] sm:$0xff] }
 0xade   :  { %v11317_v22 = vpop.eup %11316  ;;  %11320 = vrcp.f32 %v4057_v63  ;;  %v15637_v63 = vld [vmem:[#allocation130_spill] sm:$0xff] }
 0xadf   :  { %v4080_v42 = vmul.f32 %v11315_v41, %v6884_v15  ;;  %v6885_v13 = vadd.f32 -1.0, %v4075_v18  ;;  %v11319_v11 = vpop.eup %11318  ;;  %v4056_v6 = vadd.f32 1.0, %v11317_v22  ;;  %v15627_v22 = vld [vmem:[#allocation125_spill] sm:$0xff]  ;;  %v15631_v15 = vld [vmem:[#allocation127_spill] sm:$0xff]  ;;  %v15632_v18 = vld [vmem:[#allocation102_spill] sm:$0xff] }
 0xae0   :  { %v15633_v41 = vld [vmem:[#allocation128_spill] sm:$0xff] }
 0xae1   :  { %v13505_v1 = vadd.f32 %v4080_v42, %v4078_v3  ;;  %v4081_v36 = vmul.f32 %v11319_v11, %v6885_v13  ;;  %v15634_v3 = vld [vmem:[#allocation104_spill] sm:$0xff]  ;;  %v15635_v42 = vld [vmem:[#allocation129_spill] sm:$0xff]  ;;  %v15636_v13 = vld [vmem:[#allocation106_spill] sm:$0xff] }
 0xae2   :  { %v15638_v11 = vld [vmem:[#allocation108_spill] sm:$0xff] }
 0xae3   :  { %v13507_v60 = vadd.f32 %v4081_v36, %v4079_v46  ;;  %11322 = vtanh.f32 %v13505_v1  ;;  %v15628_v46 = vld [vmem:[#allocation98_spill] sm:$0xff]  ;;  %v15639_v36 = vld [vmem:[#allocation131_spill] sm:$0xff] }
 0xae5   :  { %11324 = vtanh.f32 %v13507_v60 }
 0xae6   :  { %11326 = vrcp.f32 %v4056_v6  ;;  %v15640_v6 = vld [vmem:[#allocation110_spill] sm:$0xff] }
 0xae8   :  { %v11321_v59 = vpop.eup %11320 }
 0xaed   :  { %v11323_v50 = vpop.eup %11322 }
 0xaef   :  { %v11325_v17 = vpop.eup %11324 }
 0xaf0   :  { %v11327_v16 = vpop.eup %11326  ;;  %v4087_v34 = vmul.f32 %v11325_v17, %v11321_v59  ;;  %v15641_v59 = vld [vmem:[#allocation132_spill] sm:$0xff]  ;;  %v15643_v17 = vld [vmem:[#allocation133_spill] sm:$0xff] }
 0xaf1   :  { %v13511_v2 = vmul.f32 %v11327_v16, %v11323_v50  ;;  %v15642_v50 = vld [vmem:[#allocation112_spill] sm:$0xff]  ;;  %v15644_v16 = vld [vmem:[#allocation114_spill] sm:$0xff] }
 0xaf2   :  { %4160 = vmatprep.mubr.f32.mxu0 %v4087_v34  ;;  %4231 = vmatprep.mubr.f32.mxu1 %v4087_v34 }
 0xaf3   :  { %4161 = vmatmul.mubr.f32.vlgmr.msra.gmra.mrb[16].mxu0 %v13511_v2  ;;  %4232 = vmatmul.mubr.f32.vlgmr.msra.gmra.mrb[24].mxu1 %v13511_v2 }
 0xaf4   :  { %9203 = vmatpush1.bf16.msra.mxu0 %v14982_v43  ;;  %9267 = vmatpush1.bf16.msra.mxu1 %v14983_v61 }
 0xaf5   :  { %4302 = vmatprep.mubr.f32.mxu0 %v4087_v34  ;;  %4373 = vmatprep.mubr.f32.mxu1 %v4087_v34  ;;  %v15645_v34 = vld [vmem:[#allocation134_spill] sm:$0xff] }
 0xaf6   :  { %9205 = vmatprep.subr.bf16.mxu0 %v14984_v14  ;;  %9269 = vmatprep.subr.bf16.mxu1 %v14985_v7 }
 0xaf8   :  { %9207 = vmatpush1.bf16.msra.mxu0 %v14986_v10  ;;  %9271 = vmatpush1.bf16.msra.mxu1 %v15070_v58 }
 0xaf9   :  { %9209 = vmatprep.subr.bf16.mxu0 %v15071_v49  ;;  %9273 = vmatprep.subr.bf16.mxu1 %v15072_v24 }
 0xafc   :  { %9211 = vmatpush1.bf16.msra.mxu0 %v14990_v39  ;;  %9275 = vmatpush1.bf16.msra.mxu1 %v15073_v38 }
 0xafd   :  { %9213 = vmatprep.subr.bf16.mxu0 %v14992_v57  ;;  %9277 = vmatprep.subr.bf16.mxu1 %v15074_v12 }
 0xb00   :  { %9215 = vmatpush1.bf16.msra.mxu0 %v14994_v0  ;;  %9279 = vmatpush1.bf16.msra.mxu1 %v15075_v19 }
 0xb01   :  { %9217 = vmatprep.subr.bf16.mxu0 %v14996_v31  ;;  %9281 = vmatprep.subr.bf16.mxu1 %v15076_v44 }
 0xb04   :  { %9219 = vmatpush1.bf16.msra.mxu0 %v14998_v23  ;;  %9283 = vmatpush1.bf16.msra.mxu1 %v15077_v25 }
 0xb05   :  { %9221 = vmatprep.subr.bf16.mxu0 %v15000_v55  ;;  %9285 = vmatprep.subr.bf16.mxu1 %v15078_v40 }
 0xb08   :  { %9223 = vmatpush1.bf16.msra.mxu0 %v15001_v28  ;;  %9287 = vmatpush1.bf16.msra.mxu1 %v15079_v53 }
 0xb09   :  { %9225 = vmatprep.subr.bf16.mxu0 %v15002_v35  ;;  %9289 = vmatprep.subr.bf16.mxu1 %v15080_v32 }
 0xb0c   :  { %9227 = vmatpush1.bf16.msra.mxu0 %v15003_v29  ;;  %9291 = vmatpush1.bf16.msra.mxu1 %v15081_v9 }
 0xb0d   :  { %9229 = vmatprep.subr.bf16.mxu0 %v15159_v56  ;;  %9293 = vmatprep.subr.bf16.mxu1 %v15082_v20 }
 0xb10   :  { %9231 = vmatpush1.bf16.msra.mxu0 %v15160_v54  ;;  %9295 = vmatpush1.bf16.msra.mxu1 %v15083_v30 }
 0xb11   :  { %9233 = vmatprep.subr.bf16.mxu0 %v15161_v33  ;;  %9297 = vmatprep.subr.bf16.mxu1 %v15084_v51 }
 0xb14   :  { %9235 = vmatpush1.bf16.msra.mxu0 %v15007_v21  ;;  %9299 = vmatpush1.bf16.msra.mxu1 %v15085_v45 }
 0xb15   :  { %9237 = vmatprep.subr.bf16.mxu0 %v15531_v8  ;;  %9301 = vmatprep.subr.bf16.mxu1 %v15532_v37 }
 0xb18   :  { %9239 = vmatpush1.bf16.msra.mxu0 %v15533_v52  ;;  %9303 = vmatpush1.bf16.msra.mxu1 %v15627_v22 }
 0xb19   :  { %9241 = vmatprep.subr.bf16.mxu0 %v15628_v46  ;;  %9305 = vmatprep.subr.bf16.mxu1 %v15629_v26 }
 0xb1c   :  { %9243 = vmatpush1.bf16.msra.mxu0 %v15630_v27  ;;  %9307 = vmatpush1.bf16.msra.mxu1 %v15631_v15 }
 0xb1d   :  { %9245 = vmatprep.subr.bf16.mxu0 %v15632_v18  ;;  %9309 = vmatprep.subr.bf16.mxu1 %v15633_v41  ;;  %v15718_v18 = vld [vmem:[#allocation61_spill] sm:$0xff] }
 0xb20   :  { %9247 = vmatpush1.bf16.msra.mxu0 %v15634_v3  ;;  %9311 = vmatpush1.bf16.msra.mxu1 %v15635_v42  ;;  %v15646_v42 = vld [vmem:[#allocation116_spill] sm:$0xff] }
 0xb21   :  { %9249 = vmatprep.subr.bf16.mxu0 %v15636_v13  ;;  %9313 = vmatprep.subr.bf16.mxu1 %v15637_v63  ;;  %v15647_v13 = vld [vmem:[#allocation135_spill] sm:$0xff]  ;;  %v15648_v63 = vld [vmem:[#allocation118_spill] sm:$0xff] }
 0xb24   :  { %9251 = vmatpush1.bf16.msra.mxu0 %v15638_v11  ;;  %9315 = vmatpush1.bf16.msra.mxu1 %v15639_v36  ;;  %v15649_v11 = vld [vmem:[#allocation136_spill] sm:$0xff] }
 0xb25   :  { %9253 = vmatprep.subr.bf16.mxu0 %v15640_v6  ;;  %9317 = vmatprep.subr.bf16.mxu1 %v15641_v59  ;;  %v15650_v36 = vld [vmem:[#allocation120_spill] sm:$0xff]  ;;  %v15651_v6 = vld [vmem:[#allocation137_spill] sm:$0xff]  ;;  %v15652_v59 = vld [vmem:[#allocation10_spill] sm:$0xff] }
 0xb28   :  { %9255 = vmatpush1.bf16.msra.mxu0 %v15642_v50  ;;  %9319 = vmatpush1.bf16.msra.mxu1 %v15643_v17  ;;  %v15653_v50 = vld [vmem:[#allocation11_spill] sm:$0xff]  ;;  %v15664_v17 = vld [vmem:[#allocation17_spill] sm:$0xff] }
 0xb29   :  { %9257 = vmatprep.subr.bf16.mxu0 %v15644_v16  ;;  %9321 = vmatprep.subr.bf16.mxu1 %v15645_v34  ;;  %v15654_v34 = vld [vmem:[#allocation12_spill] sm:$0xff]  ;;  %v15663_v16 = vld [vmem:[#allocation37_spill] sm:$0xff] }
 0xb2c   :  { %9259 = vmatpush1.bf16.msra.mxu0 %v15646_v42  ;;  %9323 = vmatpush1.bf16.msra.mxu1 %v15647_v13  ;;  %v15655_v42 = vld [vmem:[#allocation29_spill] sm:$0xff] }
 0xb2d   :  { %9261 = vmatprep.subr.bf16.mxu0 %v15648_v63  ;;  %9325 = vmatprep.subr.bf16.mxu1 %v15649_v11  ;;  %v15656_v13 = vld [vmem:[#allocation13_spill] sm:$0xff]  ;;  %v15657_v63 = vld [vmem:[#allocation31_spill] sm:$0xff]  ;;  %v15658_v11 = vld [vmem:[#allocation14_spill] sm:$0xff] }
 0xb30   :  { %9263 = vmatpush1.bf16.msra.mxu0 %v15650_v36  ;;  %9327 = vmatpush1.bf16.msra.mxu1 %v15651_v6  ;;  %v15659_v36 = vld [vmem:[#allocation33_spill] sm:$0xff]  ;;  %v15660_v6 = vld [vmem:[#allocation15_spill] sm:$0xff] }
 0xb31   :  { %9329 = vmatprep.subr.bf16.mxu0 %v15652_v59  ;;  %9393 = vmatprep.subr.bf16.mxu1 %v15653_v50  ;;  %v15661_v59 = vld [vmem:[#allocation35_spill] sm:$0xff]  ;;  %v15662_v50 = vld [vmem:[#allocation16_spill] sm:$0xff] }
 0xb33   :  { %4303 = vmatmul.mubr.f32.vlgmr.msra.gmra.mrb[38].mxu0 %v13511_v2  ;;  %4374 = vmatmul.mubr.f32.vlgmr.msra.gmra.mrb[54].mxu1 %v13511_v2 }
 0xb34   :  { %9331 = vmatpush1.bf16.msra.mxu0 %v15654_v34  ;;  %9395 = vmatpush1.bf16.msra.mxu1 %v15655_v42  ;;  %v15665_v34 = vld [vmem:[#allocation39_spill] sm:$0xff]  ;;  %v15666_v42 = vld [vmem:[#allocation18_spill] sm:$0xff] }
 0xb35   :  { %9333 = vmatprep.subr.bf16.mxu0 %v15656_v13  ;;  %9397 = vmatprep.subr.bf16.mxu1 %v15657_v63  ;;  %v15667_v13 = vld [vmem:[#allocation41_spill] sm:$0xff]  ;;  %v15668_v63 = vld [vmem:[#allocation19_spill] sm:$0xff] }
 0xb38   :  { %9335 = vmatpush1.bf16.msra.mxu0 %v15658_v11  ;;  %9399 = vmatpush1.bf16.msra.mxu1 %v15659_v36  ;;  %v15669_v11 = vld [vmem:[#allocation43_spill] sm:$0xff]  ;;  %v15670_v36 = vld [vmem:[#allocation20_spill] sm:$0xff] }
 0xb39   :  { %9337 = vmatprep.subr.bf16.mxu0 %v15660_v6  ;;  %9401 = vmatprep.subr.bf16.mxu1 %v15661_v59  ;;  %v15671_v6 = vld [vmem:[#allocation45_spill] sm:$0xff] }
 0xb3a   :  { %v15672_v59 = vld [vmem:[#allocation21_spill] sm:$0xff] }
 0xb3c   :  { %9339 = vmatpush1.bf16.msra.mxu0 %v15662_v50  ;;  %9403 = vmatpush1.bf16.msra.mxu1 %v15663_v16  ;;  %v15673_v50 = vld [vmem:[#allocation47_spill] sm:$0xff]  ;;  %v15674_v16 = vld [vmem:[#allocation22_spill] sm:$0xff] }
 0xb3d   :  { %9341 = vmatprep.subr.bf16.mxu0 %v15664_v17  ;;  %9405 = vmatprep.subr.bf16.mxu1 %v15665_v34  ;;  %v15675_v17 = vld [vmem:[#allocation49_spill] sm:$0xff]  ;;  %v15676_v34 = vld [vmem:[#allocation23_spill] sm:$0xff] }
 0xb40   :  { %9343 = vmatpush1.bf16.msra.mxu0 %v15666_v42  ;;  %9407 = vmatpush1.bf16.msra.mxu1 %v15667_v13  ;;  %v15677_v42 = vld [vmem:[#allocation51_spill] sm:$0xff]  ;;  %v15678_v13 = vld [vmem:[#allocation24_spill] sm:$0xff] }
 0xb41   :  { %9345 = vmatprep.subr.bf16.mxu0 %v15668_v63  ;;  %9409 = vmatprep.subr.bf16.mxu1 %v15669_v11  ;;  %v15679_v63 = vld [vmem:[#allocation53_spill] sm:$0xff] }
 0xb42   :  { %v15680_v11 = vld [vmem:[#allocation25_spill] sm:$0xff] }
 0xb44   :  { %9347 = vmatpush1.bf16.msra.mxu0 %v15670_v36  ;;  %9411 = vmatpush1.bf16.msra.mxu1 %v15671_v6  ;;  %v15681_v36 = vld [vmem:[#allocation55_spill] sm:$0xff]  ;;  %v15682_v6 = vld [vmem:[#allocation26_spill] sm:$0xff] }
 0xb45   :  { %9349 = vmatprep.subr.bf16.mxu0 %v15672_v59  ;;  %9413 = vmatprep.subr.bf16.mxu1 %v15673_v50  ;;  %v15683_v59 = vld [vmem:[#allocation57_spill] sm:$0xff]  ;;  %v15684_v50 = vld [vmem:[#allocation27_spill] sm:$0xff] }
 0xb48   :  { %9351 = vmatpush1.bf16.msra.mxu0 %v15674_v16  ;;  %9415 = vmatpush1.bf16.msra.mxu1 %v15675_v17  ;;  %v15685_v16 = vld [vmem:[#allocation58_spill] sm:$0xff]  ;;  %v15686_v17 = vld [vmem:[#allocation28_spill] sm:$0xff] }
 0xb49   :  { %9353 = vmatprep.subr.bf16.mxu0 %v15676_v34  ;;  %9417 = vmatprep.subr.bf16.mxu1 %v15677_v42  ;;  %v15687_v34 = vld [vmem:[#allocation60_spill] sm:$0xff]  ;;  %v15688_v42 = vld [vmem:[#allocation30_spill] sm:$0xff] }
 0xb4c   :  { %9355 = vmatpush1.bf16.msra.mxu0 %v15678_v13  ;;  %9419 = vmatpush1.bf16.msra.mxu1 %v15679_v63  ;;  %v15689_v13 = vld [vmem:[#allocation62_spill] sm:$0xff]  ;;  %v15690_v63 = vld [vmem:[#allocation32_spill] sm:$0xff] }
 0xb4d   :  { %9357 = vmatprep.subr.bf16.mxu0 %v15680_v11  ;;  %9421 = vmatprep.subr.bf16.mxu1 %v15681_v36  ;;  %v15691_v11 = vld [vmem:[#allocation64_spill] sm:$0xff]  ;;  %v15692_v36 = vld [vmem:[#allocation34_spill] sm:$0xff] }
 0xb50   :  { %9359 = vmatpush1.bf16.msra.mxu0 %v15682_v6  ;;  %9423 = vmatpush1.bf16.msra.mxu1 %v15683_v59  ;;  %v15693_v6 = vld [vmem:[#allocation66_spill] sm:$0xff]  ;;  %v15694_v59 = vld [vmem:[#allocation36_spill] sm:$0xff] }
 0xb51   :  { %9361 = vmatprep.subr.bf16.mxu0 %v15684_v50  ;;  %9425 = vmatprep.subr.bf16.mxu1 %v15685_v16  ;;  %v15695_v50 = vld [vmem:[#allocation68_spill] sm:$0xff]  ;;  %v15696_v16 = vld [vmem:[#allocation38_spill] sm:$0xff] }
 0xb54   :  { %9363 = vmatpush1.bf16.msra.mxu0 %v15686_v17  ;;  %9427 = vmatpush1.bf16.msra.mxu1 %v15687_v34  ;;  %v15697_v17 = vld [vmem:[#allocation70_spill] sm:$0xff]  ;;  %v15698_v34 = vld [vmem:[#allocation40_spill] sm:$0xff] }
 0xb55   :  { %9365 = vmatprep.subr.bf16.mxu0 %v15688_v42  ;;  %9429 = vmatprep.subr.bf16.mxu1 %v15689_v13  ;;  %v15699_v42 = vld [vmem:[#allocation72_spill] sm:$0xff]  ;;  %v15700_v13 = vld [vmem:[#allocation42_spill] sm:$0xff] }
 0xb58   :  { %9367 = vmatpush1.bf16.msra.mxu0 %v15690_v63  ;;  %9431 = vmatpush1.bf16.msra.mxu1 %v15691_v11  ;;  %v15701_v63 = vld [vmem:[#allocation74_spill] sm:$0xff]  ;;  %v15702_v11 = vld [vmem:[#allocation44_spill] sm:$0xff] }
 0xb59   :  { %9369 = vmatprep.subr.bf16.mxu0 %v15692_v36  ;;  %9433 = vmatprep.subr.bf16.mxu1 %v15693_v6  ;;  %v15703_v36 = vld [vmem:[#allocation76_spill] sm:$0xff]  ;;  %v15704_v6 = vld [vmem:[#allocation46_spill] sm:$0xff] }
 0xb5c   :  { %9371 = vmatpush1.bf16.msra.mxu0 %v15694_v59  ;;  %9435 = vmatpush1.bf16.msra.mxu1 %v15695_v50  ;;  %v15705_v59 = vld [vmem:[#allocation78_spill] sm:$0xff]  ;;  %v15706_v50 = vld [vmem:[#allocation48_spill] sm:$0xff] }
 0xb5d   :  { %9373 = vmatprep.subr.bf16.mxu0 %v15696_v16  ;;  %9437 = vmatprep.subr.bf16.mxu1 %v15697_v17  ;;  %v15707_v16 = vld [vmem:[#allocation80_spill] sm:$0xff]  ;;  %v15708_v17 = vld [vmem:[#allocation50_spill] sm:$0xff] }
 0xb60   :  { %9375 = vmatpush1.bf16.msra.mxu0 %v15698_v34  ;;  %9439 = vmatpush1.bf16.msra.mxu1 %v15699_v42  ;;  %v15709_v34 = vld [vmem:[#allocation82_spill] sm:$0xff]  ;;  %v15710_v42 = vld [vmem:[#allocation52_spill] sm:$0xff] }
 0xb61   :  { %9377 = vmatprep.subr.bf16.mxu0 %v15700_v13  ;;  %9441 = vmatprep.subr.bf16.mxu1 %v15701_v63  ;;  %v15711_v13 = vld [vmem:[#allocation84_spill] sm:$0xff]  ;;  %v15712_v63 = vld [vmem:[#allocation54_spill] sm:$0xff] }
 0xb64   :  { %9379 = vmatpush1.bf16.msra.mxu0 %v15702_v11  ;;  %9443 = vmatpush1.bf16.msra.mxu1 %v15703_v36  ;;  %v15713_v11 = vld [vmem:[#allocation86_spill] sm:$0xff]  ;;  %v15714_v36 = vld [vmem:[#allocation56_spill] sm:$0xff] }
 0xb65   :  { %9381 = vmatprep.subr.bf16.mxu0 %v15704_v6  ;;  %9445 = vmatprep.subr.bf16.mxu1 %v15705_v59  ;;  %v15715_v6 = vld [vmem:[#allocation88_spill] sm:$0xff]  ;;  %v15716_v59 = vld [vmem:[#allocation59_spill] sm:$0xff] }
 0xb68   :  { %9383 = vmatpush1.bf16.msra.mxu0 %v15706_v50  ;;  %9447 = vmatpush1.bf16.msra.mxu1 %v15707_v16  ;;  %v15717_v50 = vld [vmem:[#allocation91_spill] sm:$0xff] }
 0xb69   :  { %9385 = vmatprep.subr.bf16.mxu0 %v15708_v17  ;;  %9449 = vmatprep.subr.bf16.mxu1 %v15709_v34 }
 0xb6c   :  { %9387 = vmatpush1.bf16.msra.mxu0 %v15710_v42  ;;  %9451 = vmatpush1.bf16.msra.mxu1 %v15711_v13 }
 0xb6d   :  { %9389 = vmatprep.subr.bf16.mxu0 %v15712_v63  ;;  %9453 = vmatprep.subr.bf16.mxu1 %v15713_v11 }
 0xb70   :  { %9391 = vmatpush1.bf16.msra.mxu0 %v15714_v36  ;;  %9455 = vmatpush1.bf16.msra.mxu1 %v15715_v6 }
 0xb71   :  { %9457 = vmatprep.subr.bf16.mxu0 %v15716_v59  ;;  %9521 = vmatprep.subr.bf16.mxu1 %v15717_v50  ;;  %v15719_v50 = vld [vmem:[#allocation145_spill] sm:$0xff] }
 0xbc6   :  { %v4162_v16 = vpop.f32.mrb[16].mxu0  ;;  %v4233_v17 = vpop.f32.mrb[24].mxu1 }
 0xbc7   :  { %v4164_v3 = vpop.f32.mrb[17].mxu0  ;;  %v4235_v34 = vpop.f32.mrb[25].mxu1  ;;  %v10912_v42 = vadd.f32 %v4162_v16, %v12397_v62  ;;  %v10938_v13 = vadd.f32 %v4233_v17, %v15433_v5  ;;  %v15720_v17 = vld [vmem:[#allocation95_spill] sm:$0xff] }
 0xbc8   :  { %v10939_v11 = vadd.f32 %v4235_v34, %v15718_v18  ;;  %v10913_v36 = vadd.f32 %v4164_v3, %v15625_v4 }
 0xbc9   :  { %v6886_v41 = vmul.f32 -1.442695, %v10912_v42  ;;  %v6888_v63 = vmul.f32 -1.442695, %v10938_v13 }
 0xbca   :  { %v6889_v6 = vmul.f32 -1.442695, %v10939_v11  ;;  %v6887_v22 = vmul.f32 -1.442695, %v10913_v36 }
 0xbcb   :  { %11328 = vpow2.f32 %v6886_v41 }
 0xbcc   :  { %11330 = vpow2.f32 %v6888_v63 }
 0xbcd   :  { %11332 = vpow2.f32 %v6889_v6 }
 0xbd5   :  { %v11329_v13 = vpop.eup %11328 }
 0xbd6   :  { %v11331_v3 = vpop.eup %11330  ;;  %v4404_v63 = vadd.f32 1.0, %v11329_v13 }
 0xbd7   :  { %v4406_v11 = vadd.f32 1.0, %v11331_v3 }
 0xc06   :  { %v4304_v59 = vpop.f32.mrb[38].mxu0  ;;  %v4375_v15 = vpop.f32.mrb[54].mxu1 }
 0xc07   :  { %v10960_v27 = vadd.f32 %v4304_v59, %v15719_v50  ;;  %v4306_v26 = vpop.f32.mrb[39].mxu0  ;;  %v4377_v46 = vpop.f32.mrb[55].mxu1  ;;  %v10982_v41 = vadd.f32 %v4375_v15, %v12406_v48 }
 0xc08   :  { %v10961_v16 = vadd.f32 %v4306_v26, %v15434_v47  ;;  %v10983_v34 = vadd.f32 %v4377_v46, %v15720_v17  ;;  %v11333_v59 = vpop.eup %11332 }
 0xc09   :  { %v6890_v62 = vmul.f32 -1.442695, %v10960_v27  ;;  %v6892_v4 = vmul.f32 -1.442695, %v10982_v41 }
 0xc0a   :  { %v6891_v42 = vmul.f32 -1.442695, %v10961_v16  ;;  %v6893_v6 = vmul.f32 -1.442695, %v10983_v34 }
 0xc0b   :  { %11334 = vpow2.f32 %v6890_v62  ;;  %v4407_v62 = vadd.f32 1.0, %v11333_v59 }
 0xc0c   :  { %11336 = vpow2.f32 %v6887_v22 }
 0xc0d   :  { %11338 = vpow2.f32 %v6891_v42 }
 0xc0e   :  { %11340 = vrcp.f32 %v4404_v63 }
 0xc0f   :  { %11342 = vrcp.f32 %v4406_v11 }
 0xc15   :  { %v11335_v50 = vpop.eup %11334 }
 0xc16   :  { %v11337_v36 = vpop.eup %11336  ;;  %v4408_v26 = vadd.f32 1.0, %v11335_v50 }
 0xc17   :  { %v11339_v27 = vpop.eup %11338  ;;  %v4405_v16 = vadd.f32 1.0, %v11337_v36 }
 0xc18   :  { %11344 = vrcp.f32 %v4408_v26  ;;  %v4409_v22 = vadd.f32 1.0, %v11339_v27  ;;  %v11341_v15 = vpop.eup %11340 }
 0xc19   :  { %11346 = vpow2.f32 %v6892_v4  ;;  %v11343_v46 = vpop.eup %11342 }
 0xc1a   :  { %11348 = vrcp.f32 %v4409_v22  ;;  %v4432_v59 = vmul.f32 %v11343_v46, %v13505_v1 }
 0xc1b   :  { %11350 = vpow2.f32 %v6893_v6  ;;  %v15721_v6 = vld [vmem:[#allocation146_spill] sm:$0xff] }
 0xc1c   :  { %11352 = vrcp.f32 %v4407_v62  ;;  %vm4442_vm7 = vcmp.ge.s32.totalorder %v15721_v6, 32  ;;  %vm4806_vm8 = vcmp.ge.s32.totalorder %v15721_v6, 64  ;;  %vm5168_vm9 = vcmp.ge.s32.totalorder %v15721_v6, 96  ;;  %v15913_v6 = vld [vmem:[#allocation96_spill] sm:$0xff] }
 0xc1d   :  { %11354 = vrcp.f32 %v4405_v16 }
 0xc22   :  { %v11345_v42 = vpop.eup %11344 }
 0xc23   :  { %v11347_v13 = vpop.eup %11346  ;;  %v4428_v3 = vmul.f32 2.0, %v11345_v42 }
 0xc24   :  { %v11349_v41 = vpop.eup %11348  ;;  %v4410_v34 = vadd.f32 1.0, %v11347_v13 }
 0xc25   :  { %v11351_v63 = vpop.eup %11350  ;;  %v6894_v50 = vadd.f32 -1.0, %v4428_v3  ;;  %v4429_v17 = vmul.f32 2.0, %v11349_v41 }
 0xc26   :  { %v11353_v11 = vpop.eup %11352  ;;  %v4411_v27 = vadd.f32 1.0, %v11351_v63  ;;  %11356 = vrcp.f32 %v4410_v34  ;;  %v15726_v34 = vld [vmem:[#allocation127_spill] sm:$0xff] }
 0xc27   :  { %v4434_v26 = vmul.f32 %v11341_v15, %v6894_v50  ;;  %v6895_v4 = vadd.f32 -1.0, %v4429_v17  ;;  %v11355_v36 = vpop.eup %11354  ;;  %v4433_v22 = vmul.f32 %v11353_v11, %v13507_v60  ;;  %v15724_v50 = vld [vmem:[#allocation126_spill] sm:$0xff]  ;;  %v15725_v11 = vld [vmem:[#allocation100_spill] sm:$0xff] }
 0xc29   :  { %v4436_v62 = vadd.f32 %v4434_v26, %v4432_v59  ;;  %v4435_v16 = vmul.f32 %v11355_v36, %v6895_v4  ;;  %v15727_v59 = vld [vmem:[#allocation102_spill] sm:$0xff]  ;;  %v15728_v26 = vld [vmem:[#allocation128_spill] sm:$0xff]  ;;  %v15730_v36 = vld [vmem:[#allocation129_spill] sm:$0xff] }
 0xc2a   :  { %v15729_v4 = vld [vmem:[#allocation104_spill] sm:$0xff] }
 0xc2b   :  { %11358 = vtanh.f32 %v4436_v62  ;;  %v13656_v42 = vadd.f32 %v4435_v16, %v4433_v22  ;;  %v13661_v13 = vsel %vm4442_vm7, %v4436_v62, %v13505_v1  ;;  %v15722_v1 = vld [vmem:[#allocation125_spill] sm:$0xff]  ;;  %v15732_v62 = vld [vmem:[#allocation130_spill] sm:$0xff]  ;;  %v15733_v22 = vld [vmem:[#allocation108_spill] sm:$0xff] }
 0xc2c   :  { %11360 = vrcp.f32 %v4411_v27  ;;  %v15731_v27 = vld [vmem:[#allocation106_spill] sm:$0xff]  ;;  %v15734_v16 = vld [vmem:[#allocation131_spill] sm:$0xff] }
 0xc2d   :  { %11362 = vtanh.f32 %v13656_v42 }
 0xc30   :  { %v11357_v17 = vpop.eup %11356 }
 0xc35   :  { %v11359_v15 = vpop.eup %11358 }
 0xc36   :  { %v11361_v46 = vpop.eup %11360  ;;  %v4440_v3 = vmul.f32 %v11359_v15, %v11357_v17  ;;  %v15735_v17 = vld [vmem:[#allocation110_spill] sm:$0xff]  ;;  %v15736_v15 = vld [vmem:[#allocation132_spill] sm:$0xff] }
 0xc37   :  { %v11363_v41 = vpop.eup %11362 }
 0xc38   :  { %v4441_v63 = vmul.f32 %v11363_v41, %v11361_v46  ;;  %v13667_v60 = vsel %vm4442_vm7, %v4440_v3, %v13511_v2  ;;  %v15723_v2 = vld [vmem:[#allocation98_spill] sm:$0xff]  ;;  %v15737_v46 = vld [vmem:[#allocation112_spill] sm:$0xff]  ;;  %v15738_v3 = vld [vmem:[#allocation133_spill] sm:$0xff] }
 0xc39   :  { %v15739_v41 = vld [vmem:[#allocation114_spill] sm:$0xff] }
 0xc3a   :  { %4524 = vmatprep.mubr.f32.mxu0 %v4441_v63  ;;  %4595 = vmatprep.mubr.f32.mxu1 %v4441_v63 }
 0xc3b   :  { %4525 = vmatmul.mubr.f32.vlgmr.msra.gmra.mrb[18].mxu0 %v13667_v60  ;;  %4596 = vmatmul.mubr.f32.vlgmr.msra.gmra.mrb[26].mxu1 %v13667_v60 }
 0xc3c   :  { %9459 = vmatpush1.bf16.msra.mxu0 %v14982_v43  ;;  %9523 = vmatpush1.bf16.msra.mxu1 %v14983_v61 }
 0xc3d   :  { %4666 = vmatprep.mubr.f32.mxu0 %v4441_v63  ;;  %4737 = vmatprep.mubr.f32.mxu1 %v4441_v63  ;;  %v15740_v63 = vld [vmem:[#allocation134_spill] sm:$0xff] }
 0xc3e   :  { %9461 = vmatprep.subr.bf16.mxu0 %v14984_v14  ;;  %9525 = vmatprep.subr.bf16.mxu1 %v14985_v7 }
 0xc40   :  { %9463 = vmatpush1.bf16.msra.mxu0 %v14986_v10  ;;  %9527 = vmatpush1.bf16.msra.mxu1 %v15070_v58 }
 0xc41   :  { %9465 = vmatprep.subr.bf16.mxu0 %v15071_v49  ;;  %9529 = vmatprep.subr.bf16.mxu1 %v15072_v24 }
 0xc44   :  { %9467 = vmatpush1.bf16.msra.mxu0 %v14990_v39  ;;  %9531 = vmatpush1.bf16.msra.mxu1 %v15073_v38 }
 0xc45   :  { %9469 = vmatprep.subr.bf16.mxu0 %v14992_v57  ;;  %9533 = vmatprep.subr.bf16.mxu1 %v15074_v12 }
 0xc48   :  { %9471 = vmatpush1.bf16.msra.mxu0 %v14994_v0  ;;  %9535 = vmatpush1.bf16.msra.mxu1 %v15075_v19 }
 0xc49   :  { %9473 = vmatprep.subr.bf16.mxu0 %v14996_v31  ;;  %9537 = vmatprep.subr.bf16.mxu1 %v15076_v44 }
 0xc4c   :  { %9475 = vmatpush1.bf16.msra.mxu0 %v14998_v23  ;;  %9539 = vmatpush1.bf16.msra.mxu1 %v15077_v25 }
 0xc4d   :  { %9477 = vmatprep.subr.bf16.mxu0 %v15000_v55  ;;  %9541 = vmatprep.subr.bf16.mxu1 %v15078_v40 }
 0xc50   :  { %9479 = vmatpush1.bf16.msra.mxu0 %v15001_v28  ;;  %9543 = vmatpush1.bf16.msra.mxu1 %v15079_v53 }
 0xc51   :  { %9481 = vmatprep.subr.bf16.mxu0 %v15002_v35  ;;  %9545 = vmatprep.subr.bf16.mxu1 %v15080_v32 }
 0xc54   :  { %9483 = vmatpush1.bf16.msra.mxu0 %v15003_v29  ;;  %9547 = vmatpush1.bf16.msra.mxu1 %v15081_v9 }
 0xc55   :  { %9485 = vmatprep.subr.bf16.mxu0 %v15159_v56  ;;  %9549 = vmatprep.subr.bf16.mxu1 %v15082_v20 }
 0xc58   :  { %9487 = vmatpush1.bf16.msra.mxu0 %v15160_v54  ;;  %9551 = vmatpush1.bf16.msra.mxu1 %v15083_v30 }
 0xc59   :  { %9489 = vmatprep.subr.bf16.mxu0 %v15161_v33  ;;  %9553 = vmatprep.subr.bf16.mxu1 %v15084_v51 }
 0xc5c   :  { %9491 = vmatpush1.bf16.msra.mxu0 %v15007_v21  ;;  %9555 = vmatpush1.bf16.msra.mxu1 %v15085_v45 }
 0xc5d   :  { %9493 = vmatprep.subr.bf16.mxu0 %v15531_v8  ;;  %9557 = vmatprep.subr.bf16.mxu1 %v15532_v37 }
 0xc60   :  { %9495 = vmatpush1.bf16.msra.mxu0 %v15533_v52  ;;  %9559 = vmatpush1.bf16.msra.mxu1 %v15722_v1 }
 0xc61   :  { %9497 = vmatprep.subr.bf16.mxu0 %v15723_v2  ;;  %9561 = vmatprep.subr.bf16.mxu1 %v15724_v50 }
 0xc64   :  { %9499 = vmatpush1.bf16.msra.mxu0 %v15725_v11  ;;  %9563 = vmatpush1.bf16.msra.mxu1 %v15726_v34  ;;  %v15814_v34 = vld [vmem:[#allocation93_spill] sm:$0xff] }
 0xc65   :  { %9501 = vmatprep.subr.bf16.mxu0 %v15727_v59  ;;  %9565 = vmatprep.subr.bf16.mxu1 %v15728_v26  ;;  %v15813_v26 = vld [vmem:[#allocation144_spill] sm:$0xff] }
 0xc68   :  { %9503 = vmatpush1.bf16.msra.mxu0 %v15729_v4  ;;  %9567 = vmatpush1.bf16.msra.mxu1 %v15730_v36  ;;  %v15741_v36 = vld [vmem:[#allocation116_spill] sm:$0xff] }
 0xc69   :  { %9505 = vmatprep.subr.bf16.mxu0 %v15731_v27  ;;  %9569 = vmatprep.subr.bf16.mxu1 %v15732_v62  ;;  %v15742_v27 = vld [vmem:[#allocation135_spill] sm:$0xff]  ;;  %v15743_v62 = vld [vmem:[#allocation118_spill] sm:$0xff] }
 0xc6c   :  { %9507 = vmatpush1.bf16.msra.mxu0 %v15733_v22  ;;  %9571 = vmatpush1.bf16.msra.mxu1 %v15734_v16  ;;  %v15744_v22 = vld [vmem:[#allocation136_spill] sm:$0xff] }
 0xc6d   :  { %9509 = vmatprep.subr.bf16.mxu0 %v15735_v17  ;;  %9573 = vmatprep.subr.bf16.mxu1 %v15736_v15  ;;  %v15745_v16 = vld [vmem:[#allocation120_spill] sm:$0xff]  ;;  %v15746_v17 = vld [vmem:[#allocation137_spill] sm:$0xff]  ;;  %v15747_v15 = vld [vmem:[#allocation10_spill] sm:$0xff] }
 0xc70   :  { %9511 = vmatpush1.bf16.msra.mxu0 %v15737_v46  ;;  %9575 = vmatpush1.bf16.msra.mxu1 %v15738_v3  ;;  %v15748_v46 = vld [vmem:[#allocation11_spill] sm:$0xff]  ;;  %v15759_v3 = vld [vmem:[#allocation17_spill] sm:$0xff] }
 0xc71   :  { %9513 = vmatprep.subr.bf16.mxu0 %v15739_v41  ;;  %9577 = vmatprep.subr.bf16.mxu1 %v15740_v63  ;;  %v15749_v63 = vld [vmem:[#allocation12_spill] sm:$0xff]  ;;  %v15758_v41 = vld [vmem:[#allocation37_spill] sm:$0xff] }
 0xc74   :  { %9515 = vmatpush1.bf16.msra.mxu0 %v15741_v36  ;;  %9579 = vmatpush1.bf16.msra.mxu1 %v15742_v27  ;;  %v15750_v36 = vld [vmem:[#allocation29_spill] sm:$0xff] }
 0xc75   :  { %9517 = vmatprep.subr.bf16.mxu0 %v15743_v62  ;;  %9581 = vmatprep.subr.bf16.mxu1 %v15744_v22  ;;  %v15751_v27 = vld [vmem:[#allocation13_spill] sm:$0xff]  ;;  %v15752_v62 = vld [vmem:[#allocation31_spill] sm:$0xff]  ;;  %v15753_v22 = vld [vmem:[#allocation14_spill] sm:$0xff] }
 0xc78   :  { %9519 = vmatpush1.bf16.msra.mxu0 %v15745_v16  ;;  %9583 = vmatpush1.bf16.msra.mxu1 %v15746_v17  ;;  %v15754_v16 = vld [vmem:[#allocation33_spill] sm:$0xff]  ;;  %v15755_v17 = vld [vmem:[#allocation15_spill] sm:$0xff] }
 0xc79   :  { %9585 = vmatprep.subr.bf16.mxu0 %v15747_v15  ;;  %9649 = vmatprep.subr.bf16.mxu1 %v15748_v46  ;;  %v15756_v15 = vld [vmem:[#allocation35_spill] sm:$0xff]  ;;  %v15757_v46 = vld [vmem:[#allocation16_spill] sm:$0xff] }
 0xc7b   :  { %4667 = vmatmul.mubr.f32.vlgmr.msra.gmra.mrb[40].mxu0 %v13667_v60  ;;  %4738 = vmatmul.mubr.f32.vlgmr.msra.gmra.mrb[56].mxu1 %v13667_v60 }
 0xc7c   :  { %9587 = vmatpush1.bf16.msra.mxu0 %v15749_v63  ;;  %9651 = vmatpush1.bf16.msra.mxu1 %v15750_v36  ;;  %v15760_v63 = vld [vmem:[#allocation39_spill] sm:$0xff]  ;;  %v15761_v36 = vld [vmem:[#allocation18_spill] sm:$0xff] }
 0xc7d   :  { %9589 = vmatprep.subr.bf16.mxu0 %v15751_v27  ;;  %9653 = vmatprep.subr.bf16.mxu1 %v15752_v62  ;;  %v15762_v27 = vld [vmem:[#allocation41_spill] sm:$0xff]  ;;  %v15763_v62 = vld [vmem:[#allocation19_spill] sm:$0xff] }
 0xc80   :  { %9591 = vmatpush1.bf16.msra.mxu0 %v15753_v22  ;;  %9655 = vmatpush1.bf16.msra.mxu1 %v15754_v16  ;;  %v15764_v22 = vld [vmem:[#allocation43_spill] sm:$0xff]  ;;  %v15765_v16 = vld [vmem:[#allocation20_spill] sm:$0xff] }
 0xc81   :  { %9593 = vmatprep.subr.bf16.mxu0 %v15755_v17  ;;  %9657 = vmatprep.subr.bf16.mxu1 %v15756_v15  ;;  %v15766_v17 = vld [vmem:[#allocation45_spill] sm:$0xff] }
 0xc82   :  { %v15767_v15 = vld [vmem:[#allocation21_spill] sm:$0xff] }
 0xc84   :  { %9595 = vmatpush1.bf16.msra.mxu0 %v15757_v46  ;;  %9659 = vmatpush1.bf16.msra.mxu1 %v15758_v41  ;;  %v15768_v46 = vld [vmem:[#allocation47_spill] sm:$0xff]  ;;  %v15769_v41 = vld [vmem:[#allocation22_spill] sm:$0xff] }
 0xc85   :  { %9597 = vmatprep.subr.bf16.mxu0 %v15759_v3  ;;  %9661 = vmatprep.subr.bf16.mxu1 %v15760_v63  ;;  %v15770_v3 = vld [vmem:[#allocation49_spill] sm:$0xff]  ;;  %v15771_v63 = vld [vmem:[#allocation23_spill] sm:$0xff] }
 0xc88   :  { %9599 = vmatpush1.bf16.msra.mxu0 %v15761_v36  ;;  %9663 = vmatpush1.bf16.msra.mxu1 %v15762_v27  ;;  %v15772_v36 = vld [vmem:[#allocation51_spill] sm:$0xff]  ;;  %v15773_v27 = vld [vmem:[#allocation24_spill] sm:$0xff] }
 0xc89   :  { %9601 = vmatprep.subr.bf16.mxu0 %v15763_v62  ;;  %9665 = vmatprep.subr.bf16.mxu1 %v15764_v22  ;;  %v15774_v62 = vld [vmem:[#allocation53_spill] sm:$0xff] }
 0xc8a   :  { %v15775_v22 = vld [vmem:[#allocation25_spill] sm:$0xff] }
 0xc8c   :  { %9603 = vmatpush1.bf16.msra.mxu0 %v15765_v16  ;;  %9667 = vmatpush1.bf16.msra.mxu1 %v15766_v17  ;;  %v15776_v16 = vld [vmem:[#allocation55_spill] sm:$0xff]  ;;  %v15777_v17 = vld [vmem:[#allocation26_spill] sm:$0xff] }
 0xc8d   :  { %9605 = vmatprep.subr.bf16.mxu0 %v15767_v15  ;;  %9669 = vmatprep.subr.bf16.mxu1 %v15768_v46  ;;  %v15778_v15 = vld [vmem:[#allocation57_spill] sm:$0xff]  ;;  %v15779_v46 = vld [vmem:[#allocation27_spill] sm:$0xff] }
 0xc90   :  { %9607 = vmatpush1.bf16.msra.mxu0 %v15769_v41  ;;  %9671 = vmatpush1.bf16.msra.mxu1 %v15770_v3  ;;  %v15780_v41 = vld [vmem:[#allocation58_spill] sm:$0xff]  ;;  %v15781_v3 = vld [vmem:[#allocation28_spill] sm:$0xff] }
 0xc91   :  { %9609 = vmatprep.subr.bf16.mxu0 %v15771_v63  ;;  %9673 = vmatprep.subr.bf16.mxu1 %v15772_v36  ;;  %v15782_v63 = vld [vmem:[#allocation60_spill] sm:$0xff]  ;;  %v15783_v36 = vld [vmem:[#allocation30_spill] sm:$0xff] }
 0xc94   :  { %9611 = vmatpush1.bf16.msra.mxu0 %v15773_v27  ;;  %9675 = vmatpush1.bf16.msra.mxu1 %v15774_v62  ;;  %v15784_v27 = vld [vmem:[#allocation62_spill] sm:$0xff]  ;;  %v15785_v62 = vld [vmem:[#allocation32_spill] sm:$0xff] }
 0xc95   :  { %9613 = vmatprep.subr.bf16.mxu0 %v15775_v22  ;;  %9677 = vmatprep.subr.bf16.mxu1 %v15776_v16  ;;  %v15786_v22 = vld [vmem:[#allocation64_spill] sm:$0xff]  ;;  %v15787_v16 = vld [vmem:[#allocation34_spill] sm:$0xff] }
 0xc98   :  { %9615 = vmatpush1.bf16.msra.mxu0 %v15777_v17  ;;  %9679 = vmatpush1.bf16.msra.mxu1 %v15778_v15  ;;  %v15788_v17 = vld [vmem:[#allocation66_spill] sm:$0xff]  ;;  %v15789_v15 = vld [vmem:[#allocation36_spill] sm:$0xff] }
 0xc99   :  { %9617 = vmatprep.subr.bf16.mxu0 %v15779_v46  ;;  %9681 = vmatprep.subr.bf16.mxu1 %v15780_v41  ;;  %v15790_v46 = vld [vmem:[#allocation68_spill] sm:$0xff]  ;;  %v15791_v41 = vld [vmem:[#allocation38_spill] sm:$0xff] }
 0xc9c   :  { %9619 = vmatpush1.bf16.msra.mxu0 %v15781_v3  ;;  %9683 = vmatpush1.bf16.msra.mxu1 %v15782_v63  ;;  %v15792_v3 = vld [vmem:[#allocation70_spill] sm:$0xff]  ;;  %v15793_v63 = vld [vmem:[#allocation40_spill] sm:$0xff] }
 0xc9d   :  { %9621 = vmatprep.subr.bf16.mxu0 %v15783_v36  ;;  %9685 = vmatprep.subr.bf16.mxu1 %v15784_v27  ;;  %v15794_v36 = vld [vmem:[#allocation72_spill] sm:$0xff]  ;;  %v15795_v27 = vld [vmem:[#allocation42_spill] sm:$0xff] }
 0xca0   :  { %9623 = vmatpush1.bf16.msra.mxu0 %v15785_v62  ;;  %9687 = vmatpush1.bf16.msra.mxu1 %v15786_v22  ;;  %v15796_v62 = vld [vmem:[#allocation74_spill] sm:$0xff]  ;;  %v15797_v22 = vld [vmem:[#allocation44_spill] sm:$0xff] }
 0xca1   :  { %9625 = vmatprep.subr.bf16.mxu0 %v15787_v16  ;;  %9689 = vmatprep.subr.bf16.mxu1 %v15788_v17  ;;  %v15798_v16 = vld [vmem:[#allocation76_spill] sm:$0xff]  ;;  %v15799_v17 = vld [vmem:[#allocation46_spill] sm:$0xff] }
 0xca4   :  { %9627 = vmatpush1.bf16.msra.mxu0 %v15789_v15  ;;  %9691 = vmatpush1.bf16.msra.mxu1 %v15790_v46  ;;  %v15800_v15 = vld [vmem:[#allocation78_spill] sm:$0xff]  ;;  %v15801_v46 = vld [vmem:[#allocation48_spill] sm:$0xff] }
 0xca5   :  { %9629 = vmatprep.subr.bf16.mxu0 %v15791_v41  ;;  %9693 = vmatprep.subr.bf16.mxu1 %v15792_v3  ;;  %v15802_v41 = vld [vmem:[#allocation80_spill] sm:$0xff]  ;;  %v15803_v3 = vld [vmem:[#allocation50_spill] sm:$0xff] }
 0xca8   :  { %9631 = vmatpush1.bf16.msra.mxu0 %v15793_v63  ;;  %9695 = vmatpush1.bf16.msra.mxu1 %v15794_v36  ;;  %v15804_v63 = vld [vmem:[#allocation82_spill] sm:$0xff]  ;;  %v15805_v36 = vld [vmem:[#allocation52_spill] sm:$0xff] }
 0xca9   :  { %9633 = vmatprep.subr.bf16.mxu0 %v15795_v27  ;;  %9697 = vmatprep.subr.bf16.mxu1 %v15796_v62  ;;  %v15806_v27 = vld [vmem:[#allocation84_spill] sm:$0xff]  ;;  %v15807_v62 = vld [vmem:[#allocation54_spill] sm:$0xff] }
 0xcac   :  { %9635 = vmatpush1.bf16.msra.mxu0 %v15797_v22  ;;  %9699 = vmatpush1.bf16.msra.mxu1 %v15798_v16  ;;  %v15808_v22 = vld [vmem:[#allocation86_spill] sm:$0xff]  ;;  %v15809_v16 = vld [vmem:[#allocation56_spill] sm:$0xff] }
 0xcad   :  { %9637 = vmatprep.subr.bf16.mxu0 %v15799_v17  ;;  %9701 = vmatprep.subr.bf16.mxu1 %v15800_v15  ;;  %v15810_v17 = vld [vmem:[#allocation88_spill] sm:$0xff]  ;;  %v15811_v15 = vld [vmem:[#allocation59_spill] sm:$0xff] }
 0xcb0   :  { %9639 = vmatpush1.bf16.msra.mxu0 %v15801_v46  ;;  %9703 = vmatpush1.bf16.msra.mxu1 %v15802_v41  ;;  %v15812_v46 = vld [vmem:[#allocation91_spill] sm:$0xff] }
 0xcb1   :  { %9641 = vmatprep.subr.bf16.mxu0 %v15803_v3  ;;  %9705 = vmatprep.subr.bf16.mxu1 %v15804_v63 }
 0xcb4   :  { %9643 = vmatpush1.bf16.msra.mxu0 %v15805_v36  ;;  %9707 = vmatpush1.bf16.msra.mxu1 %v15806_v27 }
 0xcb5   :  { %9645 = vmatprep.subr.bf16.mxu0 %v15807_v62  ;;  %9709 = vmatprep.subr.bf16.mxu1 %v15808_v22 }
 0xcb8   :  { %9647 = vmatpush1.bf16.msra.mxu0 %v15809_v16  ;;  %9711 = vmatpush1.bf16.msra.mxu1 %v15810_v17 }
 0xcb9   :  { %9713 = vmatprep.subr.bf16.mxu0 %v15811_v15  ;;  %9777 = vmatprep.subr.bf16.mxu1 %v15812_v46  ;;  %v15815_v46 = vld [vmem:[#allocation145_spill] sm:$0xff] }
 0xd0e   :  { %v4526_v41 = vpop.f32.mrb[18].mxu0  ;;  %v4597_v3 = vpop.f32.mrb[26].mxu1 }
 0xd0f   :  { %v4528_v4 = vpop.f32.mrb[19].mxu0  ;;  %v4599_v63 = vpop.f32.mrb[27].mxu1  ;;  %v10914_v36 = vadd.f32 %v4526_v41, %v15813_v26  ;;  %v10940_v27 = vadd.f32 %v4597_v3, %v15433_v5  ;;  %v15816_v3 = vld [vmem:[#allocation95_spill] sm:$0xff] }
 0xd10   :  { %v10941_v22 = vadd.f32 %v4599_v63, %v15718_v18  ;;  %v10915_v16 = vadd.f32 %v4528_v4, %v15814_v34 }
 0xd11   :  { %v6896_v59 = vmul.f32 -1.442695, %v10914_v36  ;;  %v6898_v62 = vmul.f32 -1.442695, %v10940_v27 }
 0xd12   :  { %v6899_v17 = vmul.f32 -1.442695, %v10941_v22  ;;  %v6897_v52 = vmul.f32 -1.442695, %v10915_v16 }
 0xd13   :  { %11364 = vpow2.f32 %v6896_v59 }
 0xd14   :  { %11366 = vpow2.f32 %v6898_v62 }
 0xd15   :  { %11368 = vpow2.f32 %v6899_v17 }
 0xd1d   :  { %v11365_v27 = vpop.eup %11364 }
 0xd1e   :  { %v11367_v4 = vpop.eup %11366  ;;  %v4768_v62 = vadd.f32 1.0, %v11365_v27 }
 0xd1f   :  { %v4770_v22 = vadd.f32 1.0, %v11367_v4 }
 0xd4e   :  { %v4668_v15 = vpop.f32.mrb[40].mxu0  ;;  %v4739_v11 = vpop.f32.mrb[56].mxu1 }
 0xd4f   :  { %v10962_v50 = vadd.f32 %v4668_v15, %v15815_v46  ;;  %v4670_v2 = vpop.f32.mrb[41].mxu0  ;;  %v4741_v1 = vpop.f32.mrb[57].mxu1  ;;  %v10984_v59 = vadd.f32 %v4739_v11, %v12406_v48 }
 0xd50   :  { %v10963_v41 = vadd.f32 %v4670_v2, %v15434_v47  ;;  %v10985_v63 = vadd.f32 %v4741_v1, %v15816_v3  ;;  %v11369_v15 = vpop.eup %11368 }
 0xd51   :  { %v6900_v26 = vmul.f32 -1.442695, %v10962_v50  ;;  %v6902_v34 = vmul.f32 -1.442695, %v10984_v59 }
 0xd52   :  { %v6901_v36 = vmul.f32 -1.442695, %v10963_v41  ;;  %v6903_v17 = vmul.f32 -1.442695, %v10985_v63 }
 0xd53   :  { %11370 = vpow2.f32 %v6900_v26  ;;  %v4771_v26 = vadd.f32 1.0, %v11369_v15 }
 0xd54   :  { %11372 = vpow2.f32 %v6897_v52 }
 0xd55   :  { %11374 = vpow2.f32 %v6901_v36 }
 0xd56   :  { %11376 = vrcp.f32 %v4768_v62 }
 0xd57   :  { %11378 = vrcp.f32 %v4770_v22 }
 0xd5d   :  { %v11371_v46 = vpop.eup %11370 }
 0xd5e   :  { %v11373_v16 = vpop.eup %11372  ;;  %v4772_v2 = vadd.f32 1.0, %v11371_v46 }
 0xd5f   :  { %v11375_v50 = vpop.eup %11374  ;;  %v4769_v41 = vadd.f32 1.0, %v11373_v16 }
 0xd60   :  { %11380 = vrcp.f32 %v4772_v2  ;;  %v4773_v52 = vadd.f32 1.0, %v11375_v50  ;;  %v11377_v11 = vpop.eup %11376 }
 0xd61   :  { %11382 = vpow2.f32 %v6902_v34  ;;  %v11379_v1 = vpop.eup %11378 }
 0xd62   :  { %11384 = vrcp.f32 %v4773_v52  ;;  %v4796_v15 = vmul.f32 %v11379_v1, %v13661_v13 }
 0xd63   :  { %11386 = vpow2.f32 %v6903_v17 }
 0xd64   :  { %11388 = vrcp.f32 %v4771_v26 }
 0xd65   :  { %11390 = vrcp.f32 %v4769_v41 }
 0xd6a   :  { %v11381_v36 = vpop.eup %11380 }
 0xd6b   :  { %v11383_v27 = vpop.eup %11382  ;;  %v4792_v4 = vmul.f32 2.0, %v11381_v36 }
 0xd6c   :  { %v11385_v59 = vpop.eup %11384  ;;  %v4774_v63 = vadd.f32 1.0, %v11383_v27 }
 0xd6d   :  { %v11387_v62 = vpop.eup %11386  ;;  %v6904_v46 = vadd.f32 -1.0, %v4792_v4  ;;  %v4793_v3 = vmul.f32 2.0, %v11385_v59 }
 0xd6e   :  { %v11389_v22 = vpop.eup %11388  ;;  %v4775_v50 = vadd.f32 1.0, %v11387_v62  ;;  %11392 = vrcp.f32 %v4774_v63  ;;  %v15819_v62 = vld [vmem:[#allocation98_spill] sm:$0xff]  ;;  %v15822_v63 = vld [vmem:[#allocation127_spill] sm:$0xff] }
 0xd6f   :  { %v4798_v2 = vmul.f32 %v11377_v11, %v6904_v46  ;;  %v6905_v34 = vadd.f32 -1.0, %v4793_v3  ;;  %v11391_v16 = vpop.eup %11390  ;;  %v4797_v26 = vmul.f32 %v11389_v22, %v13656_v42  ;;  %v15820_v46 = vld [vmem:[#allocation126_spill] sm:$0xff]  ;;  %v15821_v22 = vld [vmem:[#allocation100_spill] sm:$0xff] }
 0xd71   :  { %v4800_v17 = vadd.f32 %v4798_v2, %v4796_v15  ;;  %v4799_v52 = vmul.f32 %v11391_v16, %v6905_v34  ;;  %v15823_v15 = vld [vmem:[#allocation102_spill] sm:$0xff]  ;;  %v15824_v2 = vld [vmem:[#allocation128_spill] sm:$0xff]  ;;  %v15826_v16 = vld [vmem:[#allocation129_spill] sm:$0xff] }
 0xd72   :  { %v15825_v34 = vld [vmem:[#allocation104_spill] sm:$0xff] }
 0xd73   :  { %11394 = vtanh.f32 %v4800_v17  ;;  %v13812_v41 = vadd.f32 %v4799_v52, %v4797_v26  ;;  %v13817_v36 = vsel %vm4806_vm8, %v4800_v17, %v13661_v13  ;;  %v15817_v13 = vld [vmem:[#allocation96_spill] sm:$0xff]  ;;  %v15828_v17 = vld [vmem:[#allocation130_spill] sm:$0xff]  ;;  %v15830_v52 = vld [vmem:[#allocation131_spill] sm:$0xff] }
 0xd74   :  { %11396 = vrcp.f32 %v4775_v50  ;;  %v15827_v50 = vld [vmem:[#allocation106_spill] sm:$0xff]  ;;  %v15829_v26 = vld [vmem:[#allocation108_spill] sm:$0xff] }
 0xd75   :  { %11398 = vtanh.f32 %v13812_v41 }
 0xd78   :  { %v11393_v3 = vpop.eup %11392 }
 0xd7d   :  { %v11395_v11 = vpop.eup %11394 }
 0xd7e   :  { %v11397_v1 = vpop.eup %11396  ;;  %v4804_v27 = vmul.f32 %v11395_v11, %v11393_v3  ;;  %v15831_v3 = vld [vmem:[#allocation110_spill] sm:$0xff]  ;;  %v15832_v11 = vld [vmem:[#allocation132_spill] sm:$0xff] }
 0xd7f   :  { %v11399_v4 = vpop.eup %11398 }
 0xd80   :  { %v4805_v59 = vmul.f32 %v11399_v4, %v11397_v1  ;;  %v13823_v42 = vsel %vm4806_vm8, %v4804_v27, %v13667_v60  ;;  %v15818_v60 = vld [vmem:[#allocation125_spill] sm:$0xff]  ;;  %v15833_v1 = vld [vmem:[#allocation112_spill] sm:$0xff]  ;;  %v15835_v4 = vld [vmem:[#allocation114_spill] sm:$0xff] }
 0xd81   :  { %v15834_v27 = vld [vmem:[#allocation133_spill] sm:$0xff] }
 0xd82   :  { %4886 = vmatprep.mubr.f32.mxu0 %v4805_v59  ;;  %4957 = vmatprep.mubr.f32.mxu1 %v4805_v59 }
 0xd83   :  { %4887 = vmatmul.mubr.f32.vlgmr.msra.gmra.mrb[20].mxu0 %v13823_v42  ;;  %4958 = vmatmul.mubr.f32.vlgmr.msra.gmra.mrb[28].mxu1 %v13823_v42 }
 0xd84   :  { %9715 = vmatpush1.bf16.msra.mxu0 %v14982_v43  ;;  %9779 = vmatpush1.bf16.msra.mxu1 %v14983_v61 }
 0xd85   :  { %5028 = vmatprep.mubr.f32.mxu0 %v4805_v59  ;;  %5099 = vmatprep.mubr.f32.mxu1 %v4805_v59  ;;  %v15836_v59 = vld [vmem:[#allocation134_spill] sm:$0xff] }
 0xd86   :  { %9717 = vmatprep.subr.bf16.mxu0 %v14984_v14  ;;  %9781 = vmatprep.subr.bf16.mxu1 %v14985_v7 }
 0xd88   :  { %9719 = vmatpush1.bf16.msra.mxu0 %v14986_v10  ;;  %9783 = vmatpush1.bf16.msra.mxu1 %v15070_v58 }
 0xd89   :  { %9721 = vmatprep.subr.bf16.mxu0 %v15071_v49  ;;  %9785 = vmatprep.subr.bf16.mxu1 %v15072_v24 }
 0xd8c   :  { %9723 = vmatpush1.bf16.msra.mxu0 %v14990_v39  ;;  %9787 = vmatpush1.bf16.msra.mxu1 %v15073_v38 }
 0xd8d   :  { %9725 = vmatprep.subr.bf16.mxu0 %v14992_v57  ;;  %9789 = vmatprep.subr.bf16.mxu1 %v15074_v12 }
 0xd90   :  { %9727 = vmatpush1.bf16.msra.mxu0 %v14994_v0  ;;  %9791 = vmatpush1.bf16.msra.mxu1 %v15075_v19 }
 0xd91   :  { %9729 = vmatprep.subr.bf16.mxu0 %v14996_v31  ;;  %9793 = vmatprep.subr.bf16.mxu1 %v15076_v44 }
 0xd94   :  { %9731 = vmatpush1.bf16.msra.mxu0 %v14998_v23  ;;  %9795 = vmatpush1.bf16.msra.mxu1 %v15077_v25 }
 0xd95   :  { %9733 = vmatprep.subr.bf16.mxu0 %v15000_v55  ;;  %9797 = vmatprep.subr.bf16.mxu1 %v15078_v40 }
 0xd98   :  { %9735 = vmatpush1.bf16.msra.mxu0 %v15001_v28  ;;  %9799 = vmatpush1.bf16.msra.mxu1 %v15079_v53 }
 0xd99   :  { %9737 = vmatprep.subr.bf16.mxu0 %v15002_v35  ;;  %9801 = vmatprep.subr.bf16.mxu1 %v15080_v32 }
 0xd9c   :  { %9739 = vmatpush1.bf16.msra.mxu0 %v15003_v29  ;;  %9803 = vmatpush1.bf16.msra.mxu1 %v15081_v9 }
 0xd9d   :  { %9741 = vmatprep.subr.bf16.mxu0 %v15159_v56  ;;  %9805 = vmatprep.subr.bf16.mxu1 %v15082_v20 }
 0xda0   :  { %9743 = vmatpush1.bf16.msra.mxu0 %v15160_v54  ;;  %9807 = vmatpush1.bf16.msra.mxu1 %v15083_v30 }
 0xda1   :  { %9745 = vmatprep.subr.bf16.mxu0 %v15161_v33  ;;  %9809 = vmatprep.subr.bf16.mxu1 %v15084_v51 }
 0xda4   :  { %9747 = vmatpush1.bf16.msra.mxu0 %v15007_v21  ;;  %9811 = vmatpush1.bf16.msra.mxu1 %v15085_v45 }
 0xda5   :  { %9749 = vmatprep.subr.bf16.mxu0 %v15531_v8  ;;  %9813 = vmatprep.subr.bf16.mxu1 %v15532_v37 }
 0xda8   :  { %9751 = vmatpush1.bf16.msra.mxu0 %v15817_v13  ;;  %9815 = vmatpush1.bf16.msra.mxu1 %v15818_v60 }
 0xda9   :  { %9753 = vmatprep.subr.bf16.mxu0 %v15819_v62  ;;  %9817 = vmatprep.subr.bf16.mxu1 %v15820_v46  ;;  %v15911_v62 = vld [vmem:[#allocation145_spill] sm:$0xff] }
 0xdac   :  { %9755 = vmatpush1.bf16.msra.mxu0 %v15821_v22  ;;  %9819 = vmatpush1.bf16.msra.mxu1 %v15822_v63 }
 0xdad   :  { %9757 = vmatprep.subr.bf16.mxu0 %v15823_v15  ;;  %9821 = vmatprep.subr.bf16.mxu1 %v15824_v2  ;;  %v15909_v15 = vld [vmem:[#allocation144_spill] sm:$0xff] }
 0xdb0   :  { %9759 = vmatpush1.bf16.msra.mxu0 %v15825_v34  ;;  %9823 = vmatpush1.bf16.msra.mxu1 %v15826_v16  ;;  %v15837_v16 = vld [vmem:[#allocation116_spill] sm:$0xff] }
 0xdb1   :  { %9761 = vmatprep.subr.bf16.mxu0 %v15827_v50  ;;  %9825 = vmatprep.subr.bf16.mxu1 %v15828_v17  ;;  %v15838_v50 = vld [vmem:[#allocation135_spill] sm:$0xff]  ;;  %v15839_v17 = vld [vmem:[#allocation118_spill] sm:$0xff] }
 0xdb4   :  { %9763 = vmatpush1.bf16.msra.mxu0 %v15829_v26  ;;  %9827 = vmatpush1.bf16.msra.mxu1 %v15830_v52  ;;  %v15840_v26 = vld [vmem:[#allocation136_spill] sm:$0xff] }
 0xdb5   :  { %9765 = vmatprep.subr.bf16.mxu0 %v15831_v3  ;;  %9829 = vmatprep.subr.bf16.mxu1 %v15832_v11  ;;  %v15841_v52 = vld [vmem:[#allocation120_spill] sm:$0xff]  ;;  %v15842_v3 = vld [vmem:[#allocation137_spill] sm:$0xff]  ;;  %v15843_v11 = vld [vmem:[#allocation10_spill] sm:$0xff] }
 0xdb8   :  { %9767 = vmatpush1.bf16.msra.mxu0 %v15833_v1  ;;  %9831 = vmatpush1.bf16.msra.mxu1 %v15834_v27  ;;  %v15844_v1 = vld [vmem:[#allocation11_spill] sm:$0xff]  ;;  %v15855_v27 = vld [vmem:[#allocation17_spill] sm:$0xff] }
 0xdb9   :  { %9769 = vmatprep.subr.bf16.mxu0 %v15835_v4  ;;  %9833 = vmatprep.subr.bf16.mxu1 %v15836_v59  ;;  %v15845_v59 = vld [vmem:[#allocation12_spill] sm:$0xff]  ;;  %v15854_v4 = vld [vmem:[#allocation37_spill] sm:$0xff] }
 0xdbc   :  { %9771 = vmatpush1.bf16.msra.mxu0 %v15837_v16  ;;  %9835 = vmatpush1.bf16.msra.mxu1 %v15838_v50  ;;  %v15846_v16 = vld [vmem:[#allocation29_spill] sm:$0xff] }
 0xdbd   :  { %9773 = vmatprep.subr.bf16.mxu0 %v15839_v17  ;;  %9837 = vmatprep.subr.bf16.mxu1 %v15840_v26  ;;  %v15847_v50 = vld [vmem:[#allocation13_spill] sm:$0xff]  ;;  %v15848_v17 = vld [vmem:[#allocation31_spill] sm:$0xff]  ;;  %v15849_v26 = vld [vmem:[#allocation14_spill] sm:$0xff] }
 0xdc0   :  { %9775 = vmatpush1.bf16.msra.mxu0 %v15841_v52  ;;  %9839 = vmatpush1.bf16.msra.mxu1 %v15842_v3  ;;  %v15850_v52 = vld [vmem:[#allocation33_spill] sm:$0xff]  ;;  %v15851_v3 = vld [vmem:[#allocation15_spill] sm:$0xff] }
 0xdc1   :  { %9841 = vmatprep.subr.bf16.mxu0 %v15843_v11  ;;  %9905 = vmatprep.subr.bf16.mxu1 %v15844_v1  ;;  %v15852_v11 = vld [vmem:[#allocation35_spill] sm:$0xff]  ;;  %v15853_v1 = vld [vmem:[#allocation16_spill] sm:$0xff] }
 0xdc3   :  { %5029 = vmatmul.mubr.f32.vlgmr.msra.gmra.mrb[42].mxu0 %v13823_v42  ;;  %5100 = vmatmul.mubr.f32.vlgmr.msra.gmra.mrb[58].mxu1 %v13823_v42 }
 0xdc4   :  { %9843 = vmatpush1.bf16.msra.mxu0 %v15845_v59  ;;  %9907 = vmatpush1.bf16.msra.mxu1 %v15846_v16  ;;  %v15856_v59 = vld [vmem:[#allocation39_spill] sm:$0xff]  ;;  %v15857_v16 = vld [vmem:[#allocation18_spill] sm:$0xff] }
 0xdc5   :  { %9845 = vmatprep.subr.bf16.mxu0 %v15847_v50  ;;  %9909 = vmatprep.subr.bf16.mxu1 %v15848_v17  ;;  %v15858_v50 = vld [vmem:[#allocation41_spill] sm:$0xff]  ;;  %v15859_v17 = vld [vmem:[#allocation19_spill] sm:$0xff] }
 0xdc8   :  { %9847 = vmatpush1.bf16.msra.mxu0 %v15849_v26  ;;  %9911 = vmatpush1.bf16.msra.mxu1 %v15850_v52  ;;  %v15860_v26 = vld [vmem:[#allocation43_spill] sm:$0xff]  ;;  %v15861_v52 = vld [vmem:[#allocation20_spill] sm:$0xff] }
 0xdc9   :  { %9849 = vmatprep.subr.bf16.mxu0 %v15851_v3  ;;  %9913 = vmatprep.subr.bf16.mxu1 %v15852_v11  ;;  %v15862_v3 = vld [vmem:[#allocation45_spill] sm:$0xff] }
 0xdca   :  { %v15863_v11 = vld [vmem:[#allocation21_spill] sm:$0xff] }
 0xdcc   :  { %9851 = vmatpush1.bf16.msra.mxu0 %v15853_v1  ;;  %9915 = vmatpush1.bf16.msra.mxu1 %v15854_v4  ;;  %v15864_v1 = vld [vmem:[#allocation47_spill] sm:$0xff]  ;;  %v15865_v4 = vld [vmem:[#allocation22_spill] sm:$0xff] }
 0xdcd   :  { %9853 = vmatprep.subr.bf16.mxu0 %v15855_v27  ;;  %9917 = vmatprep.subr.bf16.mxu1 %v15856_v59  ;;  %v15866_v27 = vld [vmem:[#allocation49_spill] sm:$0xff]  ;;  %v15867_v59 = vld [vmem:[#allocation23_spill] sm:$0xff] }
 0xdd0   :  { %9855 = vmatpush1.bf16.msra.mxu0 %v15857_v16  ;;  %9919 = vmatpush1.bf16.msra.mxu1 %v15858_v50  ;;  %v15868_v16 = vld [vmem:[#allocation51_spill] sm:$0xff]  ;;  %v15869_v50 = vld [vmem:[#allocation24_spill] sm:$0xff] }
 0xdd1   :  { %9857 = vmatprep.subr.bf16.mxu0 %v15859_v17  ;;  %9921 = vmatprep.subr.bf16.mxu1 %v15860_v26  ;;  %v15870_v17 = vld [vmem:[#allocation53_spill] sm:$0xff] }
 0xdd2   :  { %v15871_v26 = vld [vmem:[#allocation25_spill] sm:$0xff] }
 0xdd4   :  { %9859 = vmatpush1.bf16.msra.mxu0 %v15861_v52  ;;  %9923 = vmatpush1.bf16.msra.mxu1 %v15862_v3  ;;  %v15872_v52 = vld [vmem:[#allocation55_spill] sm:$0xff]  ;;  %v15873_v3 = vld [vmem:[#allocation26_spill] sm:$0xff] }
 0xdd5   :  { %9861 = vmatprep.subr.bf16.mxu0 %v15863_v11  ;;  %9925 = vmatprep.subr.bf16.mxu1 %v15864_v1  ;;  %v15874_v11 = vld [vmem:[#allocation57_spill] sm:$0xff]  ;;  %v15875_v1 = vld [vmem:[#allocation27_spill] sm:$0xff] }
 0xdd8   :  { %9863 = vmatpush1.bf16.msra.mxu0 %v15865_v4  ;;  %9927 = vmatpush1.bf16.msra.mxu1 %v15866_v27  ;;  %v15876_v4 = vld [vmem:[#allocation58_spill] sm:$0xff]  ;;  %v15877_v27 = vld [vmem:[#allocation28_spill] sm:$0xff] }
 0xdd9   :  { %9865 = vmatprep.subr.bf16.mxu0 %v15867_v59  ;;  %9929 = vmatprep.subr.bf16.mxu1 %v15868_v16  ;;  %v15878_v59 = vld [vmem:[#allocation60_spill] sm:$0xff]  ;;  %v15879_v16 = vld [vmem:[#allocation30_spill] sm:$0xff] }
 0xddc   :  { %9867 = vmatpush1.bf16.msra.mxu0 %v15869_v50  ;;  %9931 = vmatpush1.bf16.msra.mxu1 %v15870_v17  ;;  %v15880_v50 = vld [vmem:[#allocation62_spill] sm:$0xff]  ;;  %v15881_v17 = vld [vmem:[#allocation32_spill] sm:$0xff] }
 0xddd   :  { %9869 = vmatprep.subr.bf16.mxu0 %v15871_v26  ;;  %9933 = vmatprep.subr.bf16.mxu1 %v15872_v52  ;;  %v15882_v26 = vld [vmem:[#allocation64_spill] sm:$0xff]  ;;  %v15883_v52 = vld [vmem:[#allocation34_spill] sm:$0xff] }
 0xde0   :  { %9871 = vmatpush1.bf16.msra.mxu0 %v15873_v3  ;;  %9935 = vmatpush1.bf16.msra.mxu1 %v15874_v11  ;;  %v15884_v3 = vld [vmem:[#allocation66_spill] sm:$0xff]  ;;  %v15885_v11 = vld [vmem:[#allocation36_spill] sm:$0xff] }
 0xde1   :  { %9873 = vmatprep.subr.bf16.mxu0 %v15875_v1  ;;  %9937 = vmatprep.subr.bf16.mxu1 %v15876_v4  ;;  %v15886_v1 = vld [vmem:[#allocation68_spill] sm:$0xff]  ;;  %v15887_v4 = vld [vmem:[#allocation38_spill] sm:$0xff] }
 0xde4   :  { %9875 = vmatpush1.bf16.msra.mxu0 %v15877_v27  ;;  %9939 = vmatpush1.bf16.msra.mxu1 %v15878_v59  ;;  %v15888_v27 = vld [vmem:[#allocation70_spill] sm:$0xff]  ;;  %v15889_v59 = vld [vmem:[#allocation40_spill] sm:$0xff] }
 0xde5   :  { %9877 = vmatprep.subr.bf16.mxu0 %v15879_v16  ;;  %9941 = vmatprep.subr.bf16.mxu1 %v15880_v50  ;;  %v15890_v16 = vld [vmem:[#allocation72_spill] sm:$0xff]  ;;  %v15891_v50 = vld [vmem:[#allocation42_spill] sm:$0xff] }
 0xde8   :  { %9879 = vmatpush1.bf16.msra.mxu0 %v15881_v17  ;;  %9943 = vmatpush1.bf16.msra.mxu1 %v15882_v26  ;;  %v15892_v17 = vld [vmem:[#allocation74_spill] sm:$0xff]  ;;  %v15893_v26 = vld [vmem:[#allocation44_spill] sm:$0xff] }
 0xde9   :  { %9881 = vmatprep.subr.bf16.mxu0 %v15883_v52  ;;  %9945 = vmatprep.subr.bf16.mxu1 %v15884_v3  ;;  %v15894_v52 = vld [vmem:[#allocation76_spill] sm:$0xff]  ;;  %v15895_v3 = vld [vmem:[#allocation46_spill] sm:$0xff] }
 0xdec   :  { %9883 = vmatpush1.bf16.msra.mxu0 %v15885_v11  ;;  %9947 = vmatpush1.bf16.msra.mxu1 %v15886_v1  ;;  %v15896_v11 = vld [vmem:[#allocation78_spill] sm:$0xff]  ;;  %v15897_v1 = vld [vmem:[#allocation48_spill] sm:$0xff] }
 0xded   :  { %9885 = vmatprep.subr.bf16.mxu0 %v15887_v4  ;;  %9949 = vmatprep.subr.bf16.mxu1 %v15888_v27  ;;  %v15898_v4 = vld [vmem:[#allocation80_spill] sm:$0xff]  ;;  %v15899_v27 = vld [vmem:[#allocation50_spill] sm:$0xff] }
 0xdf0   :  { %9887 = vmatpush1.bf16.msra.mxu0 %v15889_v59  ;;  %9951 = vmatpush1.bf16.msra.mxu1 %v15890_v16  ;;  %v15900_v59 = vld [vmem:[#allocation82_spill] sm:$0xff]  ;;  %v15901_v16 = vld [vmem:[#allocation52_spill] sm:$0xff] }
 0xdf1   :  { %9889 = vmatprep.subr.bf16.mxu0 %v15891_v50  ;;  %9953 = vmatprep.subr.bf16.mxu1 %v15892_v17  ;;  %v15902_v50 = vld [vmem:[#allocation84_spill] sm:$0xff]  ;;  %v15903_v17 = vld [vmem:[#allocation54_spill] sm:$0xff] }
 0xdf4   :  { %9891 = vmatpush1.bf16.msra.mxu0 %v15893_v26  ;;  %9955 = vmatpush1.bf16.msra.mxu1 %v15894_v52  ;;  %v15904_v26 = vld [vmem:[#allocation86_spill] sm:$0xff]  ;;  %v15905_v52 = vld [vmem:[#allocation56_spill] sm:$0xff] }
 0xdf5   :  { %9893 = vmatprep.subr.bf16.mxu0 %v15895_v3  ;;  %9957 = vmatprep.subr.bf16.mxu1 %v15896_v11  ;;  %v15906_v3 = vld [vmem:[#allocation88_spill] sm:$0xff]  ;;  %v15907_v11 = vld [vmem:[#allocation59_spill] sm:$0xff] }
 0xdf8   :  { %9895 = vmatpush1.bf16.msra.mxu0 %v15897_v1  ;;  %9959 = vmatpush1.bf16.msra.mxu1 %v15898_v4  ;;  %v15908_v1 = vld [vmem:[#allocation91_spill] sm:$0xff] }
 0xdf9   :  { %9897 = vmatprep.subr.bf16.mxu0 %v15899_v27  ;;  %9961 = vmatprep.subr.bf16.mxu1 %v15900_v59 }
 0xdfc   :  { %9899 = vmatpush1.bf16.msra.mxu0 %v15901_v16  ;;  %9963 = vmatpush1.bf16.msra.mxu1 %v15902_v50 }
 0xdfd   :  { %9901 = vmatprep.subr.bf16.mxu0 %v15903_v17  ;;  %9965 = vmatprep.subr.bf16.mxu1 %v15904_v26 }
 0xe00   :  { %9903 = vmatpush1.bf16.msra.mxu0 %v15905_v52  ;;  %9967 = vmatpush1.bf16.msra.mxu1 %v15906_v3 }
 0xe01   :  { %9969 = vmatprep.subr.bf16.mxu0 %v15907_v11  ;;  %10033 = vmatprep.subr.bf16.mxu1 %v15908_v1  ;;  %v15910_v1 = vld [vmem:[#allocation93_spill] sm:$0xff] }
 0xe56   :  { %v4888_v4 = vpop.f32.mrb[20].mxu0  ;;  %v4959_v27 = vpop.f32.mrb[28].mxu1 }
 0xe57   :  { %v10942_v59 = vadd.f32 %v4959_v27, %v15433_v5  ;;  %v4890_v34 = vpop.f32.mrb[21].mxu0  ;;  %v4961_v16 = vpop.f32.mrb[29].mxu1  ;;  %v10916_v3 = vadd.f32 %v4888_v4, %v15909_v15 }
 0xe58   :  { %v10943_v11 = vadd.f32 %v4961_v16, %v15718_v18  ;;  %v10917_v22 = vadd.f32 %v4890_v34, %v15910_v1  ;;  %v15912_v16 = vld [vmem:[#allocation95_spill] sm:$0xff] }
 0xe59   :  { %v6908_v2 = vmul.f32 -1.442695, %v10942_v59  ;;  %v6906_v63 = vmul.f32 -1.442695, %v10916_v3 }
 0xe5a   :  { %v6909_v46 = vmul.f32 -1.442695, %v10943_v11 }
 0xe5b   :  { %11400 = vpow2.f32 %v6908_v2 }
 0xe65   :  { %v11401_v50 = vpop.eup %11400 }
 0xe66   :  { %v5132_v17 = vadd.f32 1.0, %v11401_v50  ;;  %v6907_v50 = vmul.f32 -1.442695, %v10917_v22 }
 0xe68   :  { %11402 = vrcp.f32 %v5132_v17 }
 0xe69   :  { %11404 = vpow2.f32 %v6906_v63 }
 0xe6a   :  { %11406 = vpow2.f32 %v6909_v46 }
 0xe72   :  { %v11403_v26 = vpop.eup %11402 }
 0xe73   :  { %v5158_v52 = vmul.f32 %v11403_v26, %v13817_v36  ;;  %v11405_v15 = vpop.eup %11404 }
 0xe74   :  { %v5130_v63 = vadd.f32 1.0, %v11405_v15  ;;  %v11407_v3 = vpop.eup %11406 }
 0xe96   :  { %v5030_v5 = vpop.f32.mrb[42].mxu0  ;;  %v5101_v27 = vpop.f32.mrb[58].mxu1 }
 0xe97   :  { %v10964_v59 = vadd.f32 %v5030_v5, %v15911_v62  ;;  %v5032_v2 = vpop.f32.mrb[43].mxu0  ;;  %v5103_v60 = vpop.f32.mrb[59].mxu1  ;;  %v10986_v34 = vadd.f32 %v5101_v27, %v12406_v48 }
 0xe98   :  { %v10965_v17 = vadd.f32 %v5032_v2, %v15434_v47  ;;  %v10987_v26 = vadd.f32 %v5103_v60, %v15912_v16 }
 0xe99   :  { %v6910_v13 = vmul.f32 -1.442695, %v10964_v59  ;;  %v6912_v62 = vmul.f32 -1.442695, %v10986_v34  ;;  %v5133_v59 = vadd.f32 1.0, %v11407_v3 }
 0xe9a   :  { %v6911_v36 = vmul.f32 -1.442695, %v10965_v17  ;;  %v6913_v2 = vmul.f32 -1.442695, %v10987_v26 }
 0xe9b   :  { %11408 = vpow2.f32 %v6910_v13 }
 0xe9c   :  { %11410 = vpow2.f32 %v6907_v50 }
 0xe9d   :  { %11412 = vpow2.f32 %v6911_v36 }
 0xe9e   :  { %11414 = vrcp.f32 %v5130_v63 }
 0xea5   :  { %v11409_v11 = vpop.eup %11408 }
 0xea6   :  { %v11411_v4 = vpop.eup %11410  ;;  %v5134_v5 = vadd.f32 1.0, %v11409_v11 }
 0xea7   :  { %v11413_v22 = vpop.eup %11412  ;;  %v5131_v13 = vadd.f32 1.0, %v11411_v4 }
 0xea8   :  { %11416 = vrcp.f32 %v5134_v5  ;;  %v5135_v46 = vadd.f32 1.0, %v11413_v22  ;;  %v11415_v48 = vpop.eup %11414 }
 0xea9   :  { %11418 = vpow2.f32 %v6912_v62 }
 0xeaa   :  { %11420 = vrcp.f32 %v5135_v46 }
 0xeab   :  { %11422 = vpow2.f32 %v6913_v2 }
 0xeac   :  { %11424 = vrcp.f32 %v5133_v59 }
 0xead   :  { %11426 = vrcp.f32 %v5131_v13 }
 0xeb2   :  { %v11417_v27 = vpop.eup %11416 }
 0xeb3   :  { %v11419_v60 = vpop.eup %11418  ;;  %v5154_v50 = vmul.f32 2.0, %v11417_v27 }
 0xeb4   :  { %v11421_v17 = vpop.eup %11420  ;;  %v5136_v63 = vadd.f32 1.0, %v11419_v60 }
 0xeb5   :  { %v11423_v36 = vpop.eup %11422  ;;  %v6914_v15 = vadd.f32 -1.0, %v5154_v50  ;;  %v5155_v34 = vmul.f32 2.0, %v11421_v17  ;;  %v15916_v17 = vld [vmem:[#allocation126_spill] sm:$0xff] }
 0xeb6   :  { %v11425_v11 = vpop.eup %11424  ;;  %v5137_v22 = vadd.f32 1.0, %v11423_v36  ;;  %11428 = vrcp.f32 %v5136_v63  ;;  %v15917_v36 = vld [vmem:[#allocation100_spill] sm:$0xff] }
 0xeb7   :  { %v5160_v26 = vmul.f32 %v11415_v48, %v6914_v15  ;;  %v6915_v3 = vadd.f32 -1.0, %v5155_v34  ;;  %v11427_v5 = vpop.eup %11426  ;;  %v5159_v4 = vmul.f32 %v11425_v11, %v13812_v41  ;;  %v15914_v41 = vld [vmem:[#allocation125_spill] sm:$0xff]  ;;  %v15918_v15 = vld [vmem:[#allocation127_spill] sm:$0xff]  ;;  %v15919_v34 = vld [vmem:[#allocation102_spill] sm:$0xff] }
 0xeb8   :  { %v15920_v11 = vld [vmem:[#allocation128_spill] sm:$0xff] }
 0xeb9   :  { %v5162_v62 = vadd.f32 %v5160_v26, %v5158_v52  ;;  %v5161_v2 = vmul.f32 %v11427_v5, %v6915_v3  ;;  %v15921_v63 = vld [vmem:[#allocation104_spill] sm:$0xff]  ;;  %v15922_v26 = vld [vmem:[#allocation129_spill] sm:$0xff]  ;;  %v15923_v3 = vld [vmem:[#allocation106_spill] sm:$0xff] }
 0xeba   :  { %v15924_v5 = vld [vmem:[#allocation130_spill] sm:$0xff] }
 0xebb   :  { %11430 = vtanh.f32 %v5162_v62  ;;  %v13967_v59 = vadd.f32 %v5161_v2, %v5159_v4  ;;  %v15926_v62 = vld [vmem:[#allocation131_spill] sm:$0xff]  ;;  %v15927_v4 = vld [vmem:[#allocation110_spill] sm:$0xff]  ;;  %v15928_v2 = vld [vmem:[#allocation132_spill] sm:$0xff] }
 0xebc   :  { %11432 = vrcp.f32 %v5137_v22  ;;  %v15925_v22 = vld [vmem:[#allocation108_spill] sm:$0xff] }
 0xebd   :  { %11434 = vtanh.f32 %v13967_v59 }
 0xec0   :  { %v11429_v46 = vpop.eup %11428 }
 0xec5   :  { %v11431_v13 = vpop.eup %11430 }
 0xec6   :  { %v11433_v27 = vpop.eup %11432  ;;  %v5166_v48 = vmul.f32 %v11431_v13, %v11429_v46  ;;  %v15929_v46 = vld [vmem:[#allocation112_spill] sm:$0xff]  ;;  %v15930_v13 = vld [vmem:[#allocation133_spill] sm:$0xff] }
 0xec7   :  { %v11435_v60 = vpop.eup %11434 }
 0xec8   :  { %v13972_v50 = vsel %vm5168_vm9, %v5166_v48, %v13823_v42  ;;  %v5167_v52 = vmul.f32 %v11435_v60, %v11433_v27  ;;  %v15915_v42 = vld [vmem:[#allocation98_spill] sm:$0xff]  ;;  %v15933_v60 = vld [vmem:[#allocation116_spill] sm:$0xff] }
 0xec9   :  { %v15931_v27 = vld [vmem:[#allocation114_spill] sm:$0xff] }
 0xeca   :  { %5248 = vmatprep.mubr.f32.mxu0 %v5167_v52  ;;  %5319 = vmatprep.mubr.f32.mxu1 %v5167_v52  ;;  %v15932_v48 = vld [vmem:[#allocation134_spill] sm:$0xff] }
 0xecb   :  { %5249 = vmatmul.mubr.f32.vlgmr.msra.gmra.mrb[52].mxu0 %v13972_v50  ;;  %5320 = vmatmul.mubr.f32.vlgmr.msra.gmra.mrb[30].mxu1 %v13972_v50 }
 0xecc   :  { %9971 = vmatpush1.bf16.msra.mxu0 %v14982_v43  ;;  %10035 = vmatpush1.bf16.msra.mxu1 %v14983_v61 }
 0xecd   :  { %5390 = vmatprep.mubr.f32.mxu0 %v5167_v52  ;;  %5461 = vmatprep.mubr.f32.mxu1 %v5167_v52  ;;  %v15934_v52 = vld [vmem:[#allocation135_spill] sm:$0xff] }
 0xece   :  { %9973 = vmatprep.subr.bf16.mxu0 %v14984_v14  ;;  %10037 = vmatprep.subr.bf16.mxu1 %v14985_v7 }
 0xed0   :  { %9975 = vmatpush1.bf16.msra.mxu0 %v14986_v10  ;;  %10039 = vmatpush1.bf16.msra.mxu1 %v15070_v58 }
 0xed1   :  { %9977 = vmatprep.subr.bf16.mxu0 %v15071_v49  ;;  %10041 = vmatprep.subr.bf16.mxu1 %v15072_v24 }
 0xed4   :  { %9979 = vmatpush1.bf16.msra.mxu0 %v14990_v39  ;;  %10043 = vmatpush1.bf16.msra.mxu1 %v15073_v38 }
 0xed5   :  { %9981 = vmatprep.subr.bf16.mxu0 %v14992_v57  ;;  %10045 = vmatprep.subr.bf16.mxu1 %v15074_v12 }
 0xed8   :  { %9983 = vmatpush1.bf16.msra.mxu0 %v14994_v0  ;;  %10047 = vmatpush1.bf16.msra.mxu1 %v15075_v19 }
 0xed9   :  { %9985 = vmatprep.subr.bf16.mxu0 %v14996_v31  ;;  %10049 = vmatprep.subr.bf16.mxu1 %v15076_v44 }
 0xedc   :  { %9987 = vmatpush1.bf16.msra.mxu0 %v14998_v23  ;;  %10051 = vmatpush1.bf16.msra.mxu1 %v15077_v25 }
 0xedd   :  { %9989 = vmatprep.subr.bf16.mxu0 %v15000_v55  ;;  %10053 = vmatprep.subr.bf16.mxu1 %v15078_v40 }
 0xee0   :  { %9991 = vmatpush1.bf16.msra.mxu0 %v15001_v28  ;;  %10055 = vmatpush1.bf16.msra.mxu1 %v15079_v53 }
 0xee1   :  { %9993 = vmatprep.subr.bf16.mxu0 %v15002_v35  ;;  %10057 = vmatprep.subr.bf16.mxu1 %v15080_v32 }
 0xee4   :  { %9995 = vmatpush1.bf16.msra.mxu0 %v15003_v29  ;;  %10059 = vmatpush1.bf16.msra.mxu1 %v15081_v9 }
 0xee5   :  { %9997 = vmatprep.subr.bf16.mxu0 %v15159_v56  ;;  %10061 = vmatprep.subr.bf16.mxu1 %v15082_v20 }
 0xee8   :  { %9999 = vmatpush1.bf16.msra.mxu0 %v15160_v54  ;;  %10063 = vmatpush1.bf16.msra.mxu1 %v15083_v30 }
 0xee9   :  { %10001 = vmatprep.subr.bf16.mxu0 %v15161_v33  ;;  %10065 = vmatprep.subr.bf16.mxu1 %v15084_v51 }
 0xeec   :  { %10003 = vmatpush1.bf16.msra.mxu0 %v15007_v21  ;;  %10067 = vmatpush1.bf16.msra.mxu1 %v15085_v45 }
 0xeed   :  { %10005 = vmatprep.subr.bf16.mxu0 %v15531_v8  ;;  %10069 = vmatprep.subr.bf16.mxu1 %v15532_v37 }
 0xef0   :  { %10007 = vmatpush1.bf16.msra.mxu0 %v15913_v6  ;;  %10071 = vmatpush1.bf16.msra.mxu1 %v15914_v41 }
 0xef1   :  { %10009 = vmatprep.subr.bf16.mxu0 %v15915_v42  ;;  %10073 = vmatprep.subr.bf16.mxu1 %v15916_v17 }
 0xef4   :  { %10011 = vmatpush1.bf16.msra.mxu0 %v15917_v36  ;;  %10075 = vmatpush1.bf16.msra.mxu1 %v15918_v15 }
 0xef5   :  { %10013 = vmatprep.subr.bf16.mxu0 %v15919_v34  ;;  %10077 = vmatprep.subr.bf16.mxu1 %v15920_v11 }
 0xef8   :  { %10015 = vmatpush1.bf16.msra.mxu0 %v15921_v63  ;;  %10079 = vmatpush1.bf16.msra.mxu1 %v15922_v26 }
 0xef9   :  { %10017 = vmatprep.subr.bf16.mxu0 %v15923_v3  ;;  %10081 = vmatprep.subr.bf16.mxu1 %v15924_v5  ;;  %v15935_v5 = vld [vmem:[#allocation118_spill] sm:$0xff] }
 0xefc   :  { %10019 = vmatpush1.bf16.msra.mxu0 %v15925_v22  ;;  %10083 = vmatpush1.bf16.msra.mxu1 %v15926_v62  ;;  %v15936_v22 = vld [vmem:[#allocation136_spill] sm:$0xff] }
 0xefd   :  { %10021 = vmatprep.subr.bf16.mxu0 %v15927_v4  ;;  %10085 = vmatprep.subr.bf16.mxu1 %v15928_v2  ;;  %v15937_v62 = vld [vmem:[#allocation120_spill] sm:$0xff]  ;;  %v15938_v4 = vld [vmem:[#allocation137_spill] sm:$0xff]  ;;  %v15939_v2 = vld [vmem:[#allocation10_spill] sm:$0xff] }
 0xf00   :  { %10023 = vmatpush1.bf16.msra.mxu0 %v15929_v46  ;;  %10087 = vmatpush1.bf16.msra.mxu1 %v15930_v13  ;;  %v15940_v46 = vld [vmem:[#allocation11_spill] sm:$0xff]  ;;  %v15951_v13 = vld [vmem:[#allocation17_spill] sm:$0xff] }
 0xf01   :  { %10025 = vmatprep.subr.bf16.mxu0 %v15931_v27  ;;  %10089 = vmatprep.subr.bf16.mxu1 %v15932_v48  ;;  %v15941_v48 = vld [vmem:[#allocation12_spill] sm:$0xff]  ;;  %v15950_v27 = vld [vmem:[#allocation37_spill] sm:$0xff] }
 0xf04   :  { %10027 = vmatpush1.bf16.msra.mxu0 %v15933_v60  ;;  %10091 = vmatpush1.bf16.msra.mxu1 %v15934_v52  ;;  %v15942_v60 = vld [vmem:[#allocation29_spill] sm:$0xff] }
 0xf05   :  { %10029 = vmatprep.subr.bf16.mxu0 %v15935_v5  ;;  %10093 = vmatprep.subr.bf16.mxu1 %v15936_v22  ;;  %v15943_v52 = vld [vmem:[#allocation13_spill] sm:$0xff]  ;;  %v15944_v5 = vld [vmem:[#allocation31_spill] sm:$0xff]  ;;  %v15945_v22 = vld [vmem:[#allocation14_spill] sm:$0xff] }
 0xf08   :  { %10031 = vmatpush1.bf16.msra.mxu0 %v15937_v62  ;;  %10095 = vmatpush1.bf16.msra.mxu1 %v15938_v4  ;;  %v15946_v62 = vld [vmem:[#allocation33_spill] sm:$0xff]  ;;  %v15947_v4 = vld [vmem:[#allocation15_spill] sm:$0xff] }
 0xf09   :  { %10097 = vmatprep.subr.bf16.mxu0 %v15939_v2  ;;  %10161 = vmatprep.subr.bf16.mxu1 %v15940_v46  ;;  %v15948_v2 = vld [vmem:[#allocation35_spill] sm:$0xff]  ;;  %v15949_v46 = vld [vmem:[#allocation16_spill] sm:$0xff] }
 0xf0b   :  { %5391 = vmatmul.mubr.f32.vlgmr.msra.gmra.mrb[44].mxu0 %v13972_v50  ;;  %5462 = vmatmul.mubr.f32.vlgmr.msra.gmra.mrb[60].mxu1 %v13972_v50 }
 0xf0c   :  { %10099 = vmatpush1.bf16.msra.mxu0 %v15941_v48  ;;  %10163 = vmatpush1.bf16.msra.mxu1 %v15942_v60  ;;  %v15952_v48 = vld [vmem:[#allocation39_spill] sm:$0xff]  ;;  %v15953_v60 = vld [vmem:[#allocation18_spill] sm:$0xff] }
 0xf0d   :  { %10101 = vmatprep.subr.bf16.mxu0 %v15943_v52  ;;  %10165 = vmatprep.subr.bf16.mxu1 %v15944_v5  ;;  %v15954_v52 = vld [vmem:[#allocation41_spill] sm:$0xff]  ;;  %v15955_v5 = vld [vmem:[#allocation19_spill] sm:$0xff] }
 0xf10   :  { %10103 = vmatpush1.bf16.msra.mxu0 %v15945_v22  ;;  %10167 = vmatpush1.bf16.msra.mxu1 %v15946_v62  ;;  %v15956_v22 = vld [vmem:[#allocation43_spill] sm:$0xff]  ;;  %v15957_v62 = vld [vmem:[#allocation20_spill] sm:$0xff] }
 0xf11   :  { %10105 = vmatprep.subr.bf16.mxu0 %v15947_v4  ;;  %10169 = vmatprep.subr.bf16.mxu1 %v15948_v2  ;;  %v15958_v4 = vld [vmem:[#allocation45_spill] sm:$0xff] }
 0xf12   :  { %v15959_v2 = vld [vmem:[#allocation21_spill] sm:$0xff] }
 0xf14   :  { %10107 = vmatpush1.bf16.msra.mxu0 %v15949_v46  ;;  %10171 = vmatpush1.bf16.msra.mxu1 %v15950_v27  ;;  %v15960_v46 = vld [vmem:[#allocation47_spill] sm:$0xff]  ;;  %v15961_v27 = vld [vmem:[#allocation22_spill] sm:$0xff] }
 0xf15   :  { %10109 = vmatprep.subr.bf16.mxu0 %v15951_v13  ;;  %10173 = vmatprep.subr.bf16.mxu1 %v15952_v48  ;;  %v15962_v13 = vld [vmem:[#allocation49_spill] sm:$0xff]  ;;  %v15963_v48 = vld [vmem:[#allocation23_spill] sm:$0xff] }
 0xf18   :  { %10111 = vmatpush1.bf16.msra.mxu0 %v15953_v60  ;;  %10175 = vmatpush1.bf16.msra.mxu1 %v15954_v52  ;;  %v15964_v60 = vld [vmem:[#allocation51_spill] sm:$0xff]  ;;  %v15965_v52 = vld [vmem:[#allocation24_spill] sm:$0xff] }
 0xf19   :  { %10113 = vmatprep.subr.bf16.mxu0 %v15955_v5  ;;  %10177 = vmatprep.subr.bf16.mxu1 %v15956_v22  ;;  %v15966_v5 = vld [vmem:[#allocation53_spill] sm:$0xff] }
 0xf1a   :  { %v15967_v22 = vld [vmem:[#allocation25_spill] sm:$0xff] }
 0xf1c   :  { %10115 = vmatpush1.bf16.msra.mxu0 %v15957_v62  ;;  %10179 = vmatpush1.bf16.msra.mxu1 %v15958_v4  ;;  %v15968_v62 = vld [vmem:[#allocation55_spill] sm:$0xff]  ;;  %v15969_v4 = vld [vmem:[#allocation26_spill] sm:$0xff] }
 0xf1d   :  { %10117 = vmatprep.subr.bf16.mxu0 %v15959_v2  ;;  %10181 = vmatprep.subr.bf16.mxu1 %v15960_v46  ;;  %v15970_v2 = vld [vmem:[#allocation57_spill] sm:$0xff]  ;;  %v15971_v46 = vld [vmem:[#allocation27_spill] sm:$0xff] }
 0xf20   :  { %10119 = vmatpush1.bf16.msra.mxu0 %v15961_v27  ;;  %10183 = vmatpush1.bf16.msra.mxu1 %v15962_v13  ;;  %v15972_v27 = vld [vmem:[#allocation58_spill] sm:$0xff]  ;;  %v15973_v13 = vld [vmem:[#allocation28_spill] sm:$0xff] }
 0xf21   :  { %10121 = vmatprep.subr.bf16.mxu0 %v15963_v48  ;;  %10185 = vmatprep.subr.bf16.mxu1 %v15964_v60  ;;  %v15974_v48 = vld [vmem:[#allocation60_spill] sm:$0xff]  ;;  %v15975_v60 = vld [vmem:[#allocation30_spill] sm:$0xff] }
 0xf24   :  { %10123 = vmatpush1.bf16.msra.mxu0 %v15965_v52  ;;  %10187 = vmatpush1.bf16.msra.mxu1 %v15966_v5  ;;  %v15976_v52 = vld [vmem:[#allocation62_spill] sm:$0xff]  ;;  %v15977_v5 = vld [vmem:[#allocation32_spill] sm:$0xff] }
 0xf25   :  { %10125 = vmatprep.subr.bf16.mxu0 %v15967_v22  ;;  %10189 = vmatprep.subr.bf16.mxu1 %v15968_v62  ;;  %v15978_v22 = vld [vmem:[#allocation64_spill] sm:$0xff]  ;;  %v15979_v62 = vld [vmem:[#allocation34_spill] sm:$0xff] }
 0xf28   :  { %10127 = vmatpush1.bf16.msra.mxu0 %v15969_v4  ;;  %10191 = vmatpush1.bf16.msra.mxu1 %v15970_v2  ;;  %v15980_v4 = vld [vmem:[#allocation66_spill] sm:$0xff]  ;;  %v15981_v2 = vld [vmem:[#allocation36_spill] sm:$0xff] }
 0xf29   :  { %10129 = vmatprep.subr.bf16.mxu0 %v15971_v46  ;;  %10193 = vmatprep.subr.bf16.mxu1 %v15972_v27  ;;  %v15982_v46 = vld [vmem:[#allocation68_spill] sm:$0xff]  ;;  %v15983_v27 = vld [vmem:[#allocation38_spill] sm:$0xff] }
 0xf2c   :  { %10131 = vmatpush1.bf16.msra.mxu0 %v15973_v13  ;;  %10195 = vmatpush1.bf16.msra.mxu1 %v15974_v48  ;;  %v15984_v13 = vld [vmem:[#allocation70_spill] sm:$0xff]  ;;  %v15985_v48 = vld [vmem:[#allocation40_spill] sm:$0xff] }
 0xf2d   :  { %10133 = vmatprep.subr.bf16.mxu0 %v15975_v60  ;;  %10197 = vmatprep.subr.bf16.mxu1 %v15976_v52  ;;  %v15986_v60 = vld [vmem:[#allocation72_spill] sm:$0xff]  ;;  %v15987_v52 = vld [vmem:[#allocation42_spill] sm:$0xff] }
 0xf30   :  { %10135 = vmatpush1.bf16.msra.mxu0 %v15977_v5  ;;  %10199 = vmatpush1.bf16.msra.mxu1 %v15978_v22  ;;  %v15988_v5 = vld [vmem:[#allocation74_spill] sm:$0xff]  ;;  %v15989_v22 = vld [vmem:[#allocation44_spill] sm:$0xff] }
 0xf31   :  { %10137 = vmatprep.subr.bf16.mxu0 %v15979_v62  ;;  %10201 = vmatprep.subr.bf16.mxu1 %v15980_v4  ;;  %v15990_v62 = vld [vmem:[#allocation76_spill] sm:$0xff]  ;;  %v15991_v4 = vld [vmem:[#allocation46_spill] sm:$0xff] }
 0xf34   :  { %10139 = vmatpush1.bf16.msra.mxu0 %v15981_v2  ;;  %10203 = vmatpush1.bf16.msra.mxu1 %v15982_v46  ;;  %v15992_v2 = vld [vmem:[#allocation78_spill] sm:$0xff]  ;;  %v15993_v46 = vld [vmem:[#allocation48_spill] sm:$0xff] }
 0xf35   :  { %10141 = vmatprep.subr.bf16.mxu0 %v15983_v27  ;;  %10205 = vmatprep.subr.bf16.mxu1 %v15984_v13  ;;  %v15994_v27 = vld [vmem:[#allocation80_spill] sm:$0xff]  ;;  %v15995_v13 = vld [vmem:[#allocation50_spill] sm:$0xff] }
 0xf38   :  { %10143 = vmatpush1.bf16.msra.mxu0 %v15985_v48  ;;  %10207 = vmatpush1.bf16.msra.mxu1 %v15986_v60  ;;  %v15996_v48 = vld [vmem:[#allocation82_spill] sm:$0xff]  ;;  %v15997_v60 = vld [vmem:[#allocation52_spill] sm:$0xff] }
 0xf39   :  { %10145 = vmatprep.subr.bf16.mxu0 %v15987_v52  ;;  %10209 = vmatprep.subr.bf16.mxu1 %v15988_v5  ;;  %v15998_v52 = vld [vmem:[#allocation84_spill] sm:$0xff]  ;;  %v15999_v5 = vld [vmem:[#allocation54_spill] sm:$0xff] }
 0xf3c   :  { %10147 = vmatpush1.bf16.msra.mxu0 %v15989_v22  ;;  %10211 = vmatpush1.bf16.msra.mxu1 %v15990_v62  ;;  %v16000_v22 = vld [vmem:[#allocation86_spill] sm:$0xff]  ;;  %v16001_v62 = vld [vmem:[#allocation56_spill] sm:$0xff] }
 0xf3d   :  { %10149 = vmatprep.subr.bf16.mxu0 %v15991_v4  ;;  %10213 = vmatprep.subr.bf16.mxu1 %v15992_v2  ;;  %v16002_v4 = vld [vmem:[#allocation88_spill] sm:$0xff]  ;;  %v16003_v2 = vld [vmem:[#allocation59_spill] sm:$0xff] }
 0xf40   :  { %10151 = vmatpush1.bf16.msra.mxu0 %v15993_v46  ;;  %10215 = vmatpush1.bf16.msra.mxu1 %v15994_v27  ;;  %v16004_v46 = vld [vmem:[#allocation91_spill] sm:$0xff] }
 0xf41   :  { %10153 = vmatprep.subr.bf16.mxu0 %v15995_v13  ;;  %10217 = vmatprep.subr.bf16.mxu1 %v15996_v48  ;;  %v16005_v13 = vld [vmem:[#allocation138_spill] sm:$0xff] }
 0xf42   :  { %v334_v27 = vadd.f32 %v16005_v13, %v15910_v1 }
 0xf44   :  { %10155 = vmatpush1.bf16.msra.mxu0 %v15997_v60  ;;  %10219 = vmatpush1.bf16.msra.mxu1 %v15998_v52 }
 0xf45   :  { %10157 = vmatprep.subr.bf16.mxu0 %v15999_v5  ;;  %10221 = vmatprep.subr.bf16.mxu1 %v16000_v22 }
 0xf48   :  { %10159 = vmatpush1.bf16.msra.mxu0 %v16001_v62  ;;  %10223 = vmatpush1.bf16.msra.mxu1 %v16002_v4 }
 0xf49   :  { %10225 = vmatprep.subr.bf16.mxu0 %v16003_v2  ;;  %10289 = vmatprep.subr.bf16.mxu1 %v16004_v46 }
 0xf9e   :  { %v5250_v48 = vpop.f32.mrb[52].mxu0  ;;  %v5321_v3 = vpop.f32.mrb[30].mxu1 }
 0xf9f   :  { %v5252_v60 = vpop.f32.mrb[53].mxu0  ;;  %v5323_v26 = vpop.f32.mrb[31].mxu1 }
 0xfa0   :  { %v5253_v52 = vadd.f32 %v5252_v60, %v334_v27  ;;  %v10944_v5 = vadd.f32 %v5323_v26, %v15718_v18 }
 0xfa2   :  { %v6919_v63 = vmul.f32 -1.442695, %v10944_v5  ;;  %v6917_v62 = vmul.f32 -1.442695, %v5253_v52 }
 0xfa4   :  { %11436 = vpow2.f32 %v6919_v63 }
 0xfa5   :  { %11438 = vpow2.f32 %v6917_v62 }
 0xfae   :  { %v11437_v3 = vpop.eup %11436 }
 0xfaf   :  { %v11439_v48 = vpop.eup %11438  ;;  %v5495_v60 = vadd.f32 1.0, %v11437_v3 }
 0xfb0   :  { %v5493_v5 = vadd.f32 1.0, %v11439_v48  ;;  %v16007_v48 = vld [vmem:[#allocation128_spill] sm:$0xff] }
 0xfde   :  { %v5392_v22 = vpop.f32.mrb[44].mxu0  ;;  %v5463_v11 = vpop.f32.mrb[60].mxu1 }
 0xfdf   :  { %v5394_v34 = vpop.f32.mrb[45].mxu0  ;;  %v5465_v4 = vpop.f32.mrb[61].mxu1 }
 0xfe0   :  { %v10966_v2 = vadd.f32 %v5394_v34, %v15434_v47  ;;  %v10988_v13 = vadd.f32 %v5465_v4, %v15912_v16 }
 0xfe2   :  { %v6921_v46 = vmul.f32 -1.442695, %v10966_v2  ;;  %v6923_v27 = vmul.f32 -1.442695, %v10988_v13 }
 0xfe4   :  { %11440 = vpow2.f32 %v6921_v46 }
 0xfee   :  { %v11441_v1 = vpop.eup %11440 }
 0xfef   :  { %v5497_v26 = vadd.f32 1.0, %v11441_v1 }
 0xff1   :  { %11442 = vrcp.f32 %v5497_v26  ;;  %v16010_v26 = vld [vmem:[#allocation106_spill] sm:$0xff] }
 0xff2   :  { %11444 = vpow2.f32 %v6923_v27  ;;  %v16008_v27 = vld [vmem:[#allocation104_spill] sm:$0xff] }
 0xff3   :  { %11446 = vrcp.f32 %v5495_v60  ;;  %v16009_v60 = vld [vmem:[#allocation129_spill] sm:$0xff] }
 0xff4   :  { %11448 = vrcp.f32 %v5493_v5  ;;  %v16011_v5 = vld [vmem:[#allocation130_spill] sm:$0xff] }
 0xffb   :  { %v11443_v11 = vpop.eup %11442 }
 0xffc   :  { %v11445_v22 = vpop.eup %11444  ;;  %v5517_v34 = vmul.f32 2.0, %v11443_v11  ;;  %v16012_v11 = vld [vmem:[#allocation108_spill] sm:$0xff] }
 0xffd   :  { %v11447_v63 = vpop.eup %11446  ;;  %v5499_v46 = vadd.f32 1.0, %v11445_v22  ;;  %v16013_v22 = vld [vmem:[#allocation131_spill] sm:$0xff] }
 0xffe   :  { %v6925_v2 = vadd.f32 -1.0, %v5517_v34  ;;  %v11449_v62 = vpop.eup %11448  ;;  %v5521_v4 = vmul.f32 %v11447_v63, %v13967_v59  ;;  %v16006_v59 = vld [vmem:[#allocation102_spill] sm:$0xff]  ;;  %v16015_v63 = vld [vmem:[#allocation132_spill] sm:$0xff] }
 0xfff   :  { %11450 = vrcp.f32 %v5499_v46  ;;  %v16014_v34 = vld [vmem:[#allocation110_spill] sm:$0xff] }
0x1000   :  { %v5523_v52 = vmul.f32 %v11449_v62, %v6925_v2  ;;  %v16016_v2 = vld [vmem:[#allocation112_spill] sm:$0xff]  ;;  %v16017_v62 = vld [vmem:[#allocation133_spill] sm:$0xff]  ;;  %v16018_v46 = vld [vmem:[#allocation114_spill] sm:$0xff] }
0x1002   :  { %v14112_v16 = vadd.f32 %v5523_v52, %v5521_v4  ;;  %v16019_v4 = vld [vmem:[#allocation134_spill] sm:$0xff]  ;;  %v16020_v52 = vld [vmem:[#allocation116_spill] sm:$0xff] }
0x1004   :  { %11452 = vtanh.f32 %v14112_v16 }
0x1009   :  { %v11451_v1 = vpop.eup %11450 }
0x100e   :  { %v11453_v13 = vpop.eup %11452 }
0x100f   :  { %v14115_v3 = vmul.f32 %v11453_v13, %v11451_v1  ;;  %v16021_v1 = vld [vmem:[#allocation135_spill] sm:$0xff]  ;;  %v16022_v13 = vld [vmem:[#allocation118_spill] sm:$0xff] }
0x1011   :  { %5610 = vmatprep.mubr.f32.mxu0 %v14115_v3  ;;  %5681 = vmatprep.mubr.f32.mxu1 %v14115_v3 }
0x1012   :  { %5611 = vmatmul.mubr.f32.vlgmr.msra.gmra.mrb[54].mxu0 %v13972_v50  ;;  %5682 = vmatmul.mubr.f32.vlgmr.msra.gmra.mrb[32].mxu1 %v13972_v50 }
0x1013   :  { %10227 = vmatpush1.bf16.msra.mxu0 %v14982_v43  ;;  %10291 = vmatpush1.bf16.msra.mxu1 %v14983_v61 }
0x1014   :  { %5752 = vmatprep.mubr.f32.mxu0 %v14115_v3  ;;  %5823 = vmatprep.mubr.f32.mxu1 %v14115_v3 }
0x1015   :  { %10229 = vmatprep.subr.bf16.mxu0 %v14984_v14  ;;  %10293 = vmatprep.subr.bf16.mxu1 %v14985_v7 }
0x1017   :  { %10231 = vmatpush1.bf16.msra.mxu0 %v14986_v10  ;;  %10295 = vmatpush1.bf16.msra.mxu1 %v15070_v58 }
0x1018   :  { %10233 = vmatprep.subr.bf16.mxu0 %v15071_v49  ;;  %10297 = vmatprep.subr.bf16.mxu1 %v15072_v24 }
0x101b   :  { %10235 = vmatpush1.bf16.msra.mxu0 %v14990_v39  ;;  %10299 = vmatpush1.bf16.msra.mxu1 %v15073_v38 }
0x101c   :  { %10237 = vmatprep.subr.bf16.mxu0 %v14992_v57  ;;  %10301 = vmatprep.subr.bf16.mxu1 %v15074_v12 }
0x101f   :  { %10239 = vmatpush1.bf16.msra.mxu0 %v14994_v0  ;;  %10303 = vmatpush1.bf16.msra.mxu1 %v15075_v19 }
0x1020   :  { %10241 = vmatprep.subr.bf16.mxu0 %v14996_v31  ;;  %10305 = vmatprep.subr.bf16.mxu1 %v15076_v44 }
0x1023   :  { %10243 = vmatpush1.bf16.msra.mxu0 %v14998_v23  ;;  %10307 = vmatpush1.bf16.msra.mxu1 %v15077_v25 }
0x1024   :  { %10245 = vmatprep.subr.bf16.mxu0 %v15000_v55  ;;  %10309 = vmatprep.subr.bf16.mxu1 %v15078_v40 }
0x1027   :  { %10247 = vmatpush1.bf16.msra.mxu0 %v15001_v28  ;;  %10311 = vmatpush1.bf16.msra.mxu1 %v15079_v53 }
0x1028   :  { %10249 = vmatprep.subr.bf16.mxu0 %v15002_v35  ;;  %10313 = vmatprep.subr.bf16.mxu1 %v15080_v32 }
0x102b   :  { %10251 = vmatpush1.bf16.msra.mxu0 %v15003_v29  ;;  %10315 = vmatpush1.bf16.msra.mxu1 %v15081_v9 }
0x102c   :  { %10253 = vmatprep.subr.bf16.mxu0 %v15159_v56  ;;  %10317 = vmatprep.subr.bf16.mxu1 %v15082_v20 }
0x102f   :  { %10255 = vmatpush1.bf16.msra.mxu0 %v15160_v54  ;;  %10319 = vmatpush1.bf16.msra.mxu1 %v15083_v30 }
0x1030   :  { %10257 = vmatprep.subr.bf16.mxu0 %v15161_v33  ;;  %10321 = vmatprep.subr.bf16.mxu1 %v15084_v51 }
0x1033   :  { %10259 = vmatpush1.bf16.msra.mxu0 %v15007_v21  ;;  %10323 = vmatpush1.bf16.msra.mxu1 %v15085_v45 }
0x1034   :  { %10261 = vmatprep.subr.bf16.mxu0 %v15531_v8  ;;  %10325 = vmatprep.subr.bf16.mxu1 %v15532_v37 }
0x1037   :  { %10263 = vmatpush1.bf16.msra.mxu0 %v15913_v6  ;;  %10327 = vmatpush1.bf16.msra.mxu1 %v15914_v41 }
0x1038   :  { %10265 = vmatprep.subr.bf16.mxu0 %v15915_v42  ;;  %10329 = vmatprep.subr.bf16.mxu1 %v15916_v17 }
0x103b   :  { %10267 = vmatpush1.bf16.msra.mxu0 %v15917_v36  ;;  %10331 = vmatpush1.bf16.msra.mxu1 %v15918_v15 }
0x103c   :  { %10269 = vmatprep.subr.bf16.mxu0 %v16006_v59  ;;  %10333 = vmatprep.subr.bf16.mxu1 %v16007_v48 }
0x103f   :  { %10271 = vmatpush1.bf16.msra.mxu0 %v16008_v27  ;;  %10335 = vmatpush1.bf16.msra.mxu1 %v16009_v60 }
0x1040   :  { %10273 = vmatprep.subr.bf16.mxu0 %v16010_v26  ;;  %10337 = vmatprep.subr.bf16.mxu1 %v16011_v5 }
0x1043   :  { %10275 = vmatpush1.bf16.msra.mxu0 %v16012_v11  ;;  %10339 = vmatpush1.bf16.msra.mxu1 %v16013_v22  ;;  %v16023_v11 = vld [vmem:[#allocation136_spill] sm:$0xff] }
0x1044   :  { %10277 = vmatprep.subr.bf16.mxu0 %v16014_v34  ;;  %10341 = vmatprep.subr.bf16.mxu1 %v16015_v63  ;;  %v16024_v22 = vld [vmem:[#allocation120_spill] sm:$0xff]  ;;  %v16025_v34 = vld [vmem:[#allocation137_spill] sm:$0xff]  ;;  %v16026_v63 = vld [vmem:[#allocation10_spill] sm:$0xff] }
0x1047   :  { %10279 = vmatpush1.bf16.msra.mxu0 %v16016_v2  ;;  %10343 = vmatpush1.bf16.msra.mxu1 %v16017_v62  ;;  %v16027_v2 = vld [vmem:[#allocation11_spill] sm:$0xff]  ;;  %v16038_v62 = vld [vmem:[#allocation17_spill] sm:$0xff] }
0x1048   :  { %10281 = vmatprep.subr.bf16.mxu0 %v16018_v46  ;;  %10345 = vmatprep.subr.bf16.mxu1 %v16019_v4  ;;  %v16028_v4 = vld [vmem:[#allocation12_spill] sm:$0xff]  ;;  %v16037_v46 = vld [vmem:[#allocation37_spill] sm:$0xff] }
0x104b   :  { %10283 = vmatpush1.bf16.msra.mxu0 %v16020_v52  ;;  %10347 = vmatpush1.bf16.msra.mxu1 %v16021_v1  ;;  %v16029_v52 = vld [vmem:[#allocation29_spill] sm:$0xff] }
0x104c   :  { %10285 = vmatprep.subr.bf16.mxu0 %v16022_v13  ;;  %10349 = vmatprep.subr.bf16.mxu1 %v16023_v11  ;;  %v16030_v1 = vld [vmem:[#allocation13_spill] sm:$0xff]  ;;  %v16031_v13 = vld [vmem:[#allocation31_spill] sm:$0xff]  ;;  %v16032_v11 = vld [vmem:[#allocation14_spill] sm:$0xff] }
0x104f   :  { %10287 = vmatpush1.bf16.msra.mxu0 %v16024_v22  ;;  %10351 = vmatpush1.bf16.msra.mxu1 %v16025_v34  ;;  %v16033_v22 = vld [vmem:[#allocation33_spill] sm:$0xff]  ;;  %v16034_v34 = vld [vmem:[#allocation15_spill] sm:$0xff] }
0x1050   :  { %10353 = vmatprep.subr.bf16.mxu0 %v16026_v63  ;;  %10417 = vmatprep.subr.bf16.mxu1 %v16027_v2  ;;  %v16035_v63 = vld [vmem:[#allocation35_spill] sm:$0xff]  ;;  %v16036_v2 = vld [vmem:[#allocation16_spill] sm:$0xff] }
0x1052   :  { %5753 = vmatmul.mubr.f32.vlgmr.msra.gmra.mrb[46].mxu0 %v13972_v50  ;;  %5824 = vmatmul.mubr.f32.vlgmr.msra.gmra.mrb[62].mxu1 %v13972_v50 }
0x1053   :  { %10355 = vmatpush1.bf16.msra.mxu0 %v16028_v4  ;;  %10419 = vmatpush1.bf16.msra.mxu1 %v16029_v52  ;;  %v16039_v4 = vld [vmem:[#allocation39_spill] sm:$0xff]  ;;  %v16040_v52 = vld [vmem:[#allocation18_spill] sm:$0xff] }
0x1054   :  { %10357 = vmatprep.subr.bf16.mxu0 %v16030_v1  ;;  %10421 = vmatprep.subr.bf16.mxu1 %v16031_v13  ;;  %v16041_v1 = vld [vmem:[#allocation41_spill] sm:$0xff]  ;;  %v16042_v13 = vld [vmem:[#allocation19_spill] sm:$0xff] }
0x1057   :  { %10359 = vmatpush1.bf16.msra.mxu0 %v16032_v11  ;;  %10423 = vmatpush1.bf16.msra.mxu1 %v16033_v22  ;;  %v16043_v11 = vld [vmem:[#allocation43_spill] sm:$0xff]  ;;  %v16044_v22 = vld [vmem:[#allocation20_spill] sm:$0xff] }
0x1058   :  { %10361 = vmatprep.subr.bf16.mxu0 %v16034_v34  ;;  %10425 = vmatprep.subr.bf16.mxu1 %v16035_v63  ;;  %v16045_v34 = vld [vmem:[#allocation45_spill] sm:$0xff] }
0x1059   :  { %v16046_v63 = vld [vmem:[#allocation21_spill] sm:$0xff] }
0x105b   :  { %10363 = vmatpush1.bf16.msra.mxu0 %v16036_v2  ;;  %10427 = vmatpush1.bf16.msra.mxu1 %v16037_v46  ;;  %v16047_v2 = vld [vmem:[#allocation47_spill] sm:$0xff]  ;;  %v16048_v46 = vld [vmem:[#allocation22_spill] sm:$0xff] }
0x105c   :  { %10365 = vmatprep.subr.bf16.mxu0 %v16038_v62  ;;  %10429 = vmatprep.subr.bf16.mxu1 %v16039_v4  ;;  %v16049_v62 = vld [vmem:[#allocation49_spill] sm:$0xff]  ;;  %v16050_v4 = vld [vmem:[#allocation23_spill] sm:$0xff] }
0x105f   :  { %10367 = vmatpush1.bf16.msra.mxu0 %v16040_v52  ;;  %10431 = vmatpush1.bf16.msra.mxu1 %v16041_v1  ;;  %v16051_v52 = vld [vmem:[#allocation51_spill] sm:$0xff]  ;;  %v16052_v1 = vld [vmem:[#allocation24_spill] sm:$0xff] }
0x1060   :  { %10369 = vmatprep.subr.bf16.mxu0 %v16042_v13  ;;  %10433 = vmatprep.subr.bf16.mxu1 %v16043_v11  ;;  %v16053_v13 = vld [vmem:[#allocation53_spill] sm:$0xff] }
0x1061   :  { %v16054_v11 = vld [vmem:[#allocation25_spill] sm:$0xff] }
0x1063   :  { %10371 = vmatpush1.bf16.msra.mxu0 %v16044_v22  ;;  %10435 = vmatpush1.bf16.msra.mxu1 %v16045_v34  ;;  %v16055_v22 = vld [vmem:[#allocation55_spill] sm:$0xff]  ;;  %v16056_v34 = vld [vmem:[#allocation26_spill] sm:$0xff] }
0x1064   :  { %10373 = vmatprep.subr.bf16.mxu0 %v16046_v63  ;;  %10437 = vmatprep.subr.bf16.mxu1 %v16047_v2  ;;  %v16057_v63 = vld [vmem:[#allocation57_spill] sm:$0xff]  ;;  %v16058_v2 = vld [vmem:[#allocation27_spill] sm:$0xff] }
0x1067   :  { %10375 = vmatpush1.bf16.msra.mxu0 %v16048_v46  ;;  %10439 = vmatpush1.bf16.msra.mxu1 %v16049_v62  ;;  %v16059_v46 = vld [vmem:[#allocation58_spill] sm:$0xff]  ;;  %v16060_v62 = vld [vmem:[#allocation28_spill] sm:$0xff] }
0x1068   :  { %10377 = vmatprep.subr.bf16.mxu0 %v16050_v4  ;;  %10441 = vmatprep.subr.bf16.mxu1 %v16051_v52  ;;  %v16061_v4 = vld [vmem:[#allocation60_spill] sm:$0xff]  ;;  %v16062_v52 = vld [vmem:[#allocation30_spill] sm:$0xff] }
0x106b   :  { %10379 = vmatpush1.bf16.msra.mxu0 %v16052_v1  ;;  %10443 = vmatpush1.bf16.msra.mxu1 %v16053_v13  ;;  %v16063_v1 = vld [vmem:[#allocation62_spill] sm:$0xff]  ;;  %v16064_v13 = vld [vmem:[#allocation32_spill] sm:$0xff] }
0x106c   :  { %10381 = vmatprep.subr.bf16.mxu0 %v16054_v11  ;;  %10445 = vmatprep.subr.bf16.mxu1 %v16055_v22  ;;  %v16065_v11 = vld [vmem:[#allocation64_spill] sm:$0xff]  ;;  %v16066_v22 = vld [vmem:[#allocation34_spill] sm:$0xff] }
0x106f   :  { %10383 = vmatpush1.bf16.msra.mxu0 %v16056_v34  ;;  %10447 = vmatpush1.bf16.msra.mxu1 %v16057_v63  ;;  %v16067_v34 = vld [vmem:[#allocation66_spill] sm:$0xff]  ;;  %v16068_v63 = vld [vmem:[#allocation36_spill] sm:$0xff] }
0x1070   :  { %10385 = vmatprep.subr.bf16.mxu0 %v16058_v2  ;;  %10449 = vmatprep.subr.bf16.mxu1 %v16059_v46  ;;  %v16069_v2 = vld [vmem:[#allocation68_spill] sm:$0xff]  ;;  %v16070_v46 = vld [vmem:[#allocation38_spill] sm:$0xff] }
0x1073   :  { %10387 = vmatpush1.bf16.msra.mxu0 %v16060_v62  ;;  %10451 = vmatpush1.bf16.msra.mxu1 %v16061_v4  ;;  %v16071_v62 = vld [vmem:[#allocation70_spill] sm:$0xff]  ;;  %v16072_v4 = vld [vmem:[#allocation40_spill] sm:$0xff] }
0x1074   :  { %10389 = vmatprep.subr.bf16.mxu0 %v16062_v52  ;;  %10453 = vmatprep.subr.bf16.mxu1 %v16063_v1  ;;  %v16073_v52 = vld [vmem:[#allocation72_spill] sm:$0xff]  ;;  %v16074_v1 = vld [vmem:[#allocation42_spill] sm:$0xff] }
0x1077   :  { %10391 = vmatpush1.bf16.msra.mxu0 %v16064_v13  ;;  %10455 = vmatpush1.bf16.msra.mxu1 %v16065_v11  ;;  %v16075_v13 = vld [vmem:[#allocation74_spill] sm:$0xff]  ;;  %v16076_v11 = vld [vmem:[#allocation44_spill] sm:$0xff] }
0x1078   :  { %10393 = vmatprep.subr.bf16.mxu0 %v16066_v22  ;;  %10457 = vmatprep.subr.bf16.mxu1 %v16067_v34  ;;  %v16077_v22 = vld [vmem:[#allocation76_spill] sm:$0xff]  ;;  %v16078_v34 = vld [vmem:[#allocation46_spill] sm:$0xff] }
0x107b   :  { %10395 = vmatpush1.bf16.msra.mxu0 %v16068_v63  ;;  %10459 = vmatpush1.bf16.msra.mxu1 %v16069_v2  ;;  %v16079_v63 = vld [vmem:[#allocation78_spill] sm:$0xff]  ;;  %v16080_v2 = vld [vmem:[#allocation48_spill] sm:$0xff] }
0x107c   :  { %10397 = vmatprep.subr.bf16.mxu0 %v16070_v46  ;;  %10461 = vmatprep.subr.bf16.mxu1 %v16071_v62  ;;  %v16081_v46 = vld [vmem:[#allocation80_spill] sm:$0xff]  ;;  %v16082_v62 = vld [vmem:[#allocation50_spill] sm:$0xff] }
0x107f   :  { %10399 = vmatpush1.bf16.msra.mxu0 %v16072_v4  ;;  %10463 = vmatpush1.bf16.msra.mxu1 %v16073_v52  ;;  %v16083_v4 = vld [vmem:[#allocation82_spill] sm:$0xff]  ;;  %v16084_v52 = vld [vmem:[#allocation52_spill] sm:$0xff] }
0x1080   :  { %10401 = vmatprep.subr.bf16.mxu0 %v16074_v1  ;;  %10465 = vmatprep.subr.bf16.mxu1 %v16075_v13  ;;  %v16085_v1 = vld [vmem:[#allocation84_spill] sm:$0xff]  ;;  %v16086_v13 = vld [vmem:[#allocation54_spill] sm:$0xff] }
0x1083   :  { %10403 = vmatpush1.bf16.msra.mxu0 %v16076_v11  ;;  %10467 = vmatpush1.bf16.msra.mxu1 %v16077_v22  ;;  %v16087_v11 = vld [vmem:[#allocation86_spill] sm:$0xff]  ;;  %v16088_v22 = vld [vmem:[#allocation56_spill] sm:$0xff] }
0x1084   :  { %10405 = vmatprep.subr.bf16.mxu0 %v16078_v34  ;;  %10469 = vmatprep.subr.bf16.mxu1 %v16079_v63  ;;  %v16089_v34 = vld [vmem:[#allocation88_spill] sm:$0xff]  ;;  %v16090_v63 = vld [vmem:[#allocation59_spill] sm:$0xff] }
0x1087   :  { %10407 = vmatpush1.bf16.msra.mxu0 %v16080_v2  ;;  %10471 = vmatpush1.bf16.msra.mxu1 %v16081_v46  ;;  %v16091_v2 = vld [vmem:[#allocation91_spill] sm:$0xff]  ;;  %v16092_v46 = vld [vmem:[#allocation93_spill] sm:$0xff] }
0x1088   :  { %10409 = vmatprep.subr.bf16.mxu0 %v16082_v62  ;;  %10473 = vmatprep.subr.bf16.mxu1 %v16083_v4  ;;  %v16093_v62 = vld [vmem:[#allocation139_spill] sm:$0xff] }
0x1089   :  { %v340_v5 = vadd.f32 %v16093_v62, %v16092_v46  ;;  %v16094_v62 = vld [vmem:[#allocation95_spill] sm:$0xff] }
0x108b   :  { %10411 = vmatpush1.bf16.msra.mxu0 %v16084_v52  ;;  %10475 = vmatpush1.bf16.msra.mxu1 %v16085_v1 }
0x108c   :  { %10413 = vmatprep.subr.bf16.mxu0 %v16086_v13  ;;  %10477 = vmatprep.subr.bf16.mxu1 %v16087_v11 }
0x108f   :  { %10415 = vmatpush1.bf16.msra.mxu0 %v16088_v22  ;;  %10479 = vmatpush1.bf16.msra.mxu1 %v16089_v34 }
0x1090   :  { %10481 = vmatprep.subr.bf16.mxu0 %v16090_v63  ;;  %10545 = vmatprep.subr.bf16.mxu1 %v16091_v2 }
0x10e5   :  { %v5612_v4 = vpop.f32.mrb[54].mxu0  ;;  %v5683_v26 = vpop.f32.mrb[32].mxu1 }
0x10e6   :  { %v5614_v52 = vpop.f32.mrb[55].mxu0  ;;  %v5685_v60 = vpop.f32.mrb[33].mxu1 }
0x10e7   :  { %v5615_v1 = vadd.f32 %v5614_v52, %v340_v5  ;;  %v10945_v13 = vadd.f32 %v5685_v60, %v15718_v18 }
0x10e9   :  { %v6929_v27 = vmul.f32 -1.442695, %v10945_v13  ;;  %v6927_v22 = vmul.f32 -1.442695, %v5615_v1 }
0x10eb   :  { %11454 = vpow2.f32 %v6929_v27 }
0x10ec   :  { %11456 = vpow2.f32 %v6927_v22 }
0x10f5   :  { %v11455_v26 = vpop.eup %11454 }
0x10f6   :  { %v11457_v46 = vpop.eup %11456  ;;  %v5857_v52 = vadd.f32 1.0, %v11455_v26 }
0x10f7   :  { %v5855_v13 = vadd.f32 1.0, %v11457_v46 }
0x1125   :  { %v5754_v11 = vpop.f32.mrb[46].mxu0  ;;  %v5825_v48 = vpop.f32.mrb[62].mxu1 }
0x1126   :  { %v5756_v59 = vpop.f32.mrb[47].mxu0  ;;  %v5827_v34 = vpop.f32.mrb[63].mxu1 }
0x1127   :  { %v10967_v63 = vadd.f32 %v5756_v59, %v15434_v47  ;;  %v10989_v4 = vadd.f32 %v5827_v34, %v16094_v62  ;;  %v16095_v62 = vld [vmem:[#allocation65_spill] sm:$0xff] }
0x1128   :  { %vm5893_vm10 = vcmp.ge.s32.totalorder %v16095_v62, 160  ;;  %vm6255_vm11 = vcmp.ge.s32.totalorder %v16095_v62, 192  ;;  %vm6617_vm12 = vcmp.ge.s32.totalorder %v16095_v62, 224 }
0x1129   :  { %v6931_v2 = vmul.f32 -1.442695, %v10967_v63  ;;  %v6933_v5 = vmul.f32 -1.442695, %v10989_v4 }
0x112b   :  { %11458 = vpow2.f32 %v6931_v2 }
0x1135   :  { %v11459_v15 = vpop.eup %11458 }
0x1136   :  { %v5859_v60 = vadd.f32 1.0, %v11459_v15 }
0x1138   :  { %11460 = vrcp.f32 %v5859_v60  ;;  %v16098_v60 = vld [vmem:[#allocation128_spill] sm:$0xff] }
0x1139   :  { %11462 = vpow2.f32 %v6933_v5 }
0x113a   :  { %11464 = vrcp.f32 %v5857_v52 }
0x113b   :  { %11466 = vrcp.f32 %v5855_v13  ;;  %v16099_v13 = vld [vmem:[#allocation104_spill] sm:$0xff] }
0x1142   :  { %v11461_v48 = vpop.eup %11460 }
0x1143   :  { %v11463_v11 = vpop.eup %11462  ;;  %v5879_v59 = vmul.f32 2.0, %v11461_v48  ;;  %v16100_v48 = vld [vmem:[#allocation129_spill] sm:$0xff] }
0x1144   :  { %v11465_v27 = vpop.eup %11464  ;;  %v5861_v2 = vadd.f32 1.0, %v11463_v11  ;;  %v16101_v11 = vld [vmem:[#allocation106_spill] sm:$0xff] }
0x1145   :  { %v6935_v63 = vadd.f32 -1.0, %v5879_v59  ;;  %v11467_v22 = vpop.eup %11466  ;;  %v5883_v34 = vmul.f32 %v11465_v27, %v14112_v16  ;;  %v16102_v59 = vld [vmem:[#allocation130_spill] sm:$0xff]  ;;  %v16103_v27 = vld [vmem:[#allocation108_spill] sm:$0xff] }
0x1146   :  { %11468 = vrcp.f32 %v5861_v2  ;;  %v16106_v2 = vld [vmem:[#allocation132_spill] sm:$0xff] }
0x1147   :  { %v5885_v1 = vmul.f32 %v11467_v22, %v6935_v63  ;;  %v16104_v63 = vld [vmem:[#allocation131_spill] sm:$0xff]  ;;  %v16105_v22 = vld [vmem:[#allocation110_spill] sm:$0xff] }
0x1149   :  { %v5887_v4 = vadd.f32 %v5885_v1, %v5883_v34  ;;  %v16107_v34 = vld [vmem:[#allocation112_spill] sm:$0xff]  ;;  %v16108_v1 = vld [vmem:[#allocation133_spill] sm:$0xff] }
0x114b   :  { %11470 = vtanh.f32 %v5887_v4  ;;  %v14261_v15 = vsel %vm5893_vm10, %v5887_v4, %v14112_v16  ;;  %v16096_v16 = vld [vmem:[#allocation127_spill] sm:$0xff]  ;;  %v16109_v4 = vld [vmem:[#allocation114_spill] sm:$0xff] }
0x1150   :  { %v11469_v46 = vpop.eup %11468 }
0x1155   :  { %v11471_v26 = vpop.eup %11470 }
0x1156   :  { %v5891_v5 = vmul.f32 %v11471_v26, %v11469_v46  ;;  %v16110_v46 = vld [vmem:[#allocation134_spill] sm:$0xff]  ;;  %v16111_v26 = vld [vmem:[#allocation116_spill] sm:$0xff] }
0x1158   :  { %v14264_v52 = vsel %vm5893_vm10, %v5891_v5, %v14115_v3  ;;  %v16097_v3 = vld [vmem:[#allocation102_spill] sm:$0xff]  ;;  %v16112_v5 = vld [vmem:[#allocation135_spill] sm:$0xff] }
0x1159   :  { %5972 = vmatprep.mubr.f32.mxu0 %v14264_v52  ;;  %6043 = vmatprep.mubr.f32.mxu1 %v14264_v52 }
0x115a   :  { %5973 = vmatmul.mubr.f32.vlgmr.msra.gmra.mrb[56].mxu0 %v13972_v50  ;;  %6044 = vmatmul.mubr.f32.vlgmr.msra.gmra.mrb[34].mxu1 %v13972_v50 }
0x115b   :  { %10483 = vmatpush1.bf16.msra.mxu0 %v14982_v43  ;;  %10547 = vmatpush1.bf16.msra.mxu1 %v14983_v61 }
0x115c   :  { %6114 = vmatprep.mubr.f32.mxu0 %v14264_v52  ;;  %6185 = vmatprep.mubr.f32.mxu1 %v14264_v52 }
0x115d   :  { %10485 = vmatprep.subr.bf16.mxu0 %v14984_v14  ;;  %10549 = vmatprep.subr.bf16.mxu1 %v14985_v7 }
0x115f   :  { %10487 = vmatpush1.bf16.msra.mxu0 %v14986_v10  ;;  %10551 = vmatpush1.bf16.msra.mxu1 %v15070_v58 }
0x1160   :  { %10489 = vmatprep.subr.bf16.mxu0 %v15071_v49  ;;  %10553 = vmatprep.subr.bf16.mxu1 %v15072_v24 }
0x1163   :  { %10491 = vmatpush1.bf16.msra.mxu0 %v14990_v39  ;;  %10555 = vmatpush1.bf16.msra.mxu1 %v15073_v38 }
0x1164   :  { %10493 = vmatprep.subr.bf16.mxu0 %v14992_v57  ;;  %10557 = vmatprep.subr.bf16.mxu1 %v15074_v12 }
0x1167   :  { %10495 = vmatpush1.bf16.msra.mxu0 %v14994_v0  ;;  %10559 = vmatpush1.bf16.msra.mxu1 %v15075_v19 }
0x1168   :  { %10497 = vmatprep.subr.bf16.mxu0 %v14996_v31  ;;  %10561 = vmatprep.subr.bf16.mxu1 %v15076_v44 }
0x116b   :  { %10499 = vmatpush1.bf16.msra.mxu0 %v14998_v23  ;;  %10563 = vmatpush1.bf16.msra.mxu1 %v15077_v25 }
0x116c   :  { %10501 = vmatprep.subr.bf16.mxu0 %v15000_v55  ;;  %10565 = vmatprep.subr.bf16.mxu1 %v15078_v40 }
0x116f   :  { %10503 = vmatpush1.bf16.msra.mxu0 %v15001_v28  ;;  %10567 = vmatpush1.bf16.msra.mxu1 %v15079_v53 }
0x1170   :  { %10505 = vmatprep.subr.bf16.mxu0 %v15002_v35  ;;  %10569 = vmatprep.subr.bf16.mxu1 %v15080_v32 }
0x1173   :  { %10507 = vmatpush1.bf16.msra.mxu0 %v15003_v29  ;;  %10571 = vmatpush1.bf16.msra.mxu1 %v15081_v9 }
0x1174   :  { %10509 = vmatprep.subr.bf16.mxu0 %v15159_v56  ;;  %10573 = vmatprep.subr.bf16.mxu1 %v15082_v20 }
0x1177   :  { %10511 = vmatpush1.bf16.msra.mxu0 %v15160_v54  ;;  %10575 = vmatpush1.bf16.msra.mxu1 %v15083_v30 }
0x1178   :  { %10513 = vmatprep.subr.bf16.mxu0 %v15161_v33  ;;  %10577 = vmatprep.subr.bf16.mxu1 %v15084_v51 }
0x117b   :  { %10515 = vmatpush1.bf16.msra.mxu0 %v15007_v21  ;;  %10579 = vmatpush1.bf16.msra.mxu1 %v15085_v45 }
0x117c   :  { %10517 = vmatprep.subr.bf16.mxu0 %v15531_v8  ;;  %10581 = vmatprep.subr.bf16.mxu1 %v15532_v37 }
0x117f   :  { %10519 = vmatpush1.bf16.msra.mxu0 %v15913_v6  ;;  %10583 = vmatpush1.bf16.msra.mxu1 %v15914_v41 }
0x1180   :  { %10521 = vmatprep.subr.bf16.mxu0 %v15915_v42  ;;  %10585 = vmatprep.subr.bf16.mxu1 %v15916_v17 }
0x1183   :  { %10523 = vmatpush1.bf16.msra.mxu0 %v15917_v36  ;;  %10587 = vmatpush1.bf16.msra.mxu1 %v16096_v16 }
0x1184   :  { %10525 = vmatprep.subr.bf16.mxu0 %v16097_v3  ;;  %10589 = vmatprep.subr.bf16.mxu1 %v16098_v60 }
0x1187   :  { %10527 = vmatpush1.bf16.msra.mxu0 %v16099_v13  ;;  %10591 = vmatpush1.bf16.msra.mxu1 %v16100_v48 }
0x1188   :  { %10529 = vmatprep.subr.bf16.mxu0 %v16101_v11  ;;  %10593 = vmatprep.subr.bf16.mxu1 %v16102_v59  ;;  %v16113_v59 = vld [vmem:[#allocation118_spill] sm:$0xff] }
0x118b   :  { %10531 = vmatpush1.bf16.msra.mxu0 %v16103_v27  ;;  %10595 = vmatpush1.bf16.msra.mxu1 %v16104_v63  ;;  %v16114_v27 = vld [vmem:[#allocation136_spill] sm:$0xff] }
0x118c   :  { %10533 = vmatprep.subr.bf16.mxu0 %v16105_v22  ;;  %10597 = vmatprep.subr.bf16.mxu1 %v16106_v2  ;;  %v16115_v63 = vld [vmem:[#allocation120_spill] sm:$0xff]  ;;  %v16116_v22 = vld [vmem:[#allocation137_spill] sm:$0xff]  ;;  %v16117_v2 = vld [vmem:[#allocation10_spill] sm:$0xff] }
0x118f   :  { %10535 = vmatpush1.bf16.msra.mxu0 %v16107_v34  ;;  %10599 = vmatpush1.bf16.msra.mxu1 %v16108_v1  ;;  %v16118_v34 = vld [vmem:[#allocation11_spill] sm:$0xff]  ;;  %v16129_v1 = vld [vmem:[#allocation17_spill] sm:$0xff] }
0x1190   :  { %10537 = vmatprep.subr.bf16.mxu0 %v16109_v4  ;;  %10601 = vmatprep.subr.bf16.mxu1 %v16110_v46  ;;  %v16119_v46 = vld [vmem:[#allocation12_spill] sm:$0xff]  ;;  %v16128_v4 = vld [vmem:[#allocation37_spill] sm:$0xff] }
0x1193   :  { %10539 = vmatpush1.bf16.msra.mxu0 %v16111_v26  ;;  %10603 = vmatpush1.bf16.msra.mxu1 %v16112_v5  ;;  %v16120_v26 = vld [vmem:[#allocation29_spill] sm:$0xff] }
0x1194   :  { %10541 = vmatprep.subr.bf16.mxu0 %v16113_v59  ;;  %10605 = vmatprep.subr.bf16.mxu1 %v16114_v27  ;;  %v16121_v5 = vld [vmem:[#allocation13_spill] sm:$0xff]  ;;  %v16122_v59 = vld [vmem:[#allocation31_spill] sm:$0xff]  ;;  %v16123_v27 = vld [vmem:[#allocation14_spill] sm:$0xff] }
0x1197   :  { %10543 = vmatpush1.bf16.msra.mxu0 %v16115_v63  ;;  %10607 = vmatpush1.bf16.msra.mxu1 %v16116_v22  ;;  %v16124_v63 = vld [vmem:[#allocation33_spill] sm:$0xff]  ;;  %v16125_v22 = vld [vmem:[#allocation15_spill] sm:$0xff] }
0x1198   :  { %10609 = vmatprep.subr.bf16.mxu0 %v16117_v2  ;;  %10673 = vmatprep.subr.bf16.mxu1 %v16118_v34  ;;  %v16126_v2 = vld [vmem:[#allocation35_spill] sm:$0xff]  ;;  %v16127_v34 = vld [vmem:[#allocation16_spill] sm:$0xff] }
0x119a   :  { %6115 = vmatmul.mubr.f32.vlgmr.msra.gmra.mrb[48].mxu0 %v13972_v50  ;;  %6186 = vmatmul.mubr.f32.vlgmr.msra.gmra.mrb[64].mxu1 %v13972_v50 }
0x119b   :  { %10611 = vmatpush1.bf16.msra.mxu0 %v16119_v46  ;;  %10675 = vmatpush1.bf16.msra.mxu1 %v16120_v26  ;;  %v16130_v46 = vld [vmem:[#allocation39_spill] sm:$0xff]  ;;  %v16131_v26 = vld [vmem:[#allocation18_spill] sm:$0xff] }
0x119c   :  { %10613 = vmatprep.subr.bf16.mxu0 %v16121_v5  ;;  %10677 = vmatprep.subr.bf16.mxu1 %v16122_v59  ;;  %v16132_v5 = vld [vmem:[#allocation41_spill] sm:$0xff]  ;;  %v16133_v59 = vld [vmem:[#allocation19_spill] sm:$0xff] }
0x119f   :  { %10615 = vmatpush1.bf16.msra.mxu0 %v16123_v27  ;;  %10679 = vmatpush1.bf16.msra.mxu1 %v16124_v63  ;;  %v16134_v27 = vld [vmem:[#allocation43_spill] sm:$0xff]  ;;  %v16135_v63 = vld [vmem:[#allocation20_spill] sm:$0xff] }
0x11a0   :  { %10617 = vmatprep.subr.bf16.mxu0 %v16125_v22  ;;  %10681 = vmatprep.subr.bf16.mxu1 %v16126_v2  ;;  %v16136_v22 = vld [vmem:[#allocation45_spill] sm:$0xff] }
0x11a1   :  { %v16137_v2 = vld [vmem:[#allocation21_spill] sm:$0xff] }
0x11a3   :  { %10619 = vmatpush1.bf16.msra.mxu0 %v16127_v34  ;;  %10683 = vmatpush1.bf16.msra.mxu1 %v16128_v4  ;;  %v16138_v34 = vld [vmem:[#allocation47_spill] sm:$0xff]  ;;  %v16139_v4 = vld [vmem:[#allocation22_spill] sm:$0xff] }
0x11a4   :  { %10621 = vmatprep.subr.bf16.mxu0 %v16129_v1  ;;  %10685 = vmatprep.subr.bf16.mxu1 %v16130_v46  ;;  %v16140_v1 = vld [vmem:[#allocation49_spill] sm:$0xff]  ;;  %v16141_v46 = vld [vmem:[#allocation23_spill] sm:$0xff] }
0x11a7   :  { %10623 = vmatpush1.bf16.msra.mxu0 %v16131_v26  ;;  %10687 = vmatpush1.bf16.msra.mxu1 %v16132_v5  ;;  %v16142_v26 = vld [vmem:[#allocation51_spill] sm:$0xff]  ;;  %v16143_v5 = vld [vmem:[#allocation24_spill] sm:$0xff] }
0x11a8   :  { %10625 = vmatprep.subr.bf16.mxu0 %v16133_v59  ;;  %10689 = vmatprep.subr.bf16.mxu1 %v16134_v27  ;;  %v16144_v59 = vld [vmem:[#allocation53_spill] sm:$0xff] }
0x11a9   :  { %v16145_v27 = vld [vmem:[#allocation25_spill] sm:$0xff] }
0x11ab   :  { %10627 = vmatpush1.bf16.msra.mxu0 %v16135_v63  ;;  %10691 = vmatpush1.bf16.msra.mxu1 %v16136_v22  ;;  %v16146_v63 = vld [vmem:[#allocation55_spill] sm:$0xff]  ;;  %v16147_v22 = vld [vmem:[#allocation26_spill] sm:$0xff] }
0x11ac   :  { %10629 = vmatprep.subr.bf16.mxu0 %v16137_v2  ;;  %10693 = vmatprep.subr.bf16.mxu1 %v16138_v34  ;;  %v16148_v2 = vld [vmem:[#allocation57_spill] sm:$0xff]  ;;  %v16149_v34 = vld [vmem:[#allocation27_spill] sm:$0xff] }
0x11af   :  { %10631 = vmatpush1.bf16.msra.mxu0 %v16139_v4  ;;  %10695 = vmatpush1.bf16.msra.mxu1 %v16140_v1  ;;  %v16150_v4 = vld [vmem:[#allocation58_spill] sm:$0xff]  ;;  %v16151_v1 = vld [vmem:[#allocation28_spill] sm:$0xff] }
0x11b0   :  { %10633 = vmatprep.subr.bf16.mxu0 %v16141_v46  ;;  %10697 = vmatprep.subr.bf16.mxu1 %v16142_v26  ;;  %v16152_v46 = vld [vmem:[#allocation60_spill] sm:$0xff]  ;;  %v16153_v26 = vld [vmem:[#allocation30_spill] sm:$0xff] }
0x11b3   :  { %10635 = vmatpush1.bf16.msra.mxu0 %v16143_v5  ;;  %10699 = vmatpush1.bf16.msra.mxu1 %v16144_v59  ;;  %v16154_v5 = vld [vmem:[#allocation62_spill] sm:$0xff]  ;;  %v16155_v59 = vld [vmem:[#allocation32_spill] sm:$0xff] }
0x11b4   :  { %10637 = vmatprep.subr.bf16.mxu0 %v16145_v27  ;;  %10701 = vmatprep.subr.bf16.mxu1 %v16146_v63  ;;  %v16156_v27 = vld [vmem:[#allocation64_spill] sm:$0xff]  ;;  %v16157_v63 = vld [vmem:[#allocation34_spill] sm:$0xff] }
0x11b7   :  { %10639 = vmatpush1.bf16.msra.mxu0 %v16147_v22  ;;  %10703 = vmatpush1.bf16.msra.mxu1 %v16148_v2  ;;  %v16158_v22 = vld [vmem:[#allocation66_spill] sm:$0xff]  ;;  %v16159_v2 = vld [vmem:[#allocation36_spill] sm:$0xff] }
0x11b8   :  { %10641 = vmatprep.subr.bf16.mxu0 %v16149_v34  ;;  %10705 = vmatprep.subr.bf16.mxu1 %v16150_v4  ;;  %v16160_v34 = vld [vmem:[#allocation68_spill] sm:$0xff]  ;;  %v16161_v4 = vld [vmem:[#allocation38_spill] sm:$0xff] }
0x11bb   :  { %10643 = vmatpush1.bf16.msra.mxu0 %v16151_v1  ;;  %10707 = vmatpush1.bf16.msra.mxu1 %v16152_v46  ;;  %v16162_v1 = vld [vmem:[#allocation70_spill] sm:$0xff]  ;;  %v16163_v46 = vld [vmem:[#allocation40_spill] sm:$0xff] }
0x11bc   :  { %10645 = vmatprep.subr.bf16.mxu0 %v16153_v26  ;;  %10709 = vmatprep.subr.bf16.mxu1 %v16154_v5  ;;  %v16164_v26 = vld [vmem:[#allocation72_spill] sm:$0xff]  ;;  %v16165_v5 = vld [vmem:[#allocation42_spill] sm:$0xff] }
0x11bf   :  { %10647 = vmatpush1.bf16.msra.mxu0 %v16155_v59  ;;  %10711 = vmatpush1.bf16.msra.mxu1 %v16156_v27  ;;  %v16166_v59 = vld [vmem:[#allocation74_spill] sm:$0xff]  ;;  %v16167_v27 = vld [vmem:[#allocation44_spill] sm:$0xff] }
0x11c0   :  { %10649 = vmatprep.subr.bf16.mxu0 %v16157_v63  ;;  %10713 = vmatprep.subr.bf16.mxu1 %v16158_v22  ;;  %v16168_v63 = vld [vmem:[#allocation76_spill] sm:$0xff]  ;;  %v16169_v22 = vld [vmem:[#allocation46_spill] sm:$0xff] }
0x11c3   :  { %10651 = vmatpush1.bf16.msra.mxu0 %v16159_v2  ;;  %10715 = vmatpush1.bf16.msra.mxu1 %v16160_v34  ;;  %v16170_v2 = vld [vmem:[#allocation78_spill] sm:$0xff]  ;;  %v16171_v34 = vld [vmem:[#allocation48_spill] sm:$0xff] }
0x11c4   :  { %10653 = vmatprep.subr.bf16.mxu0 %v16161_v4  ;;  %10717 = vmatprep.subr.bf16.mxu1 %v16162_v1  ;;  %v16172_v4 = vld [vmem:[#allocation80_spill] sm:$0xff]  ;;  %v16173_v1 = vld [vmem:[#allocation50_spill] sm:$0xff] }
0x11c7   :  { %10655 = vmatpush1.bf16.msra.mxu0 %v16163_v46  ;;  %10719 = vmatpush1.bf16.msra.mxu1 %v16164_v26  ;;  %v16174_v46 = vld [vmem:[#allocation82_spill] sm:$0xff]  ;;  %v16175_v26 = vld [vmem:[#allocation52_spill] sm:$0xff] }
0x11c8   :  { %10657 = vmatprep.subr.bf16.mxu0 %v16165_v5  ;;  %10721 = vmatprep.subr.bf16.mxu1 %v16166_v59  ;;  %v16176_v5 = vld [vmem:[#allocation84_spill] sm:$0xff]  ;;  %v16177_v59 = vld [vmem:[#allocation54_spill] sm:$0xff] }
0x11cb   :  { %10659 = vmatpush1.bf16.msra.mxu0 %v16167_v27  ;;  %10723 = vmatpush1.bf16.msra.mxu1 %v16168_v63  ;;  %v16178_v27 = vld [vmem:[#allocation86_spill] sm:$0xff]  ;;  %v16179_v63 = vld [vmem:[#allocation56_spill] sm:$0xff] }
0x11cc   :  { %10661 = vmatprep.subr.bf16.mxu0 %v16169_v22  ;;  %10725 = vmatprep.subr.bf16.mxu1 %v16170_v2  ;;  %v16180_v22 = vld [vmem:[#allocation88_spill] sm:$0xff]  ;;  %v16181_v2 = vld [vmem:[#allocation59_spill] sm:$0xff] }
0x11cf   :  { %10663 = vmatpush1.bf16.msra.mxu0 %v16171_v34  ;;  %10727 = vmatpush1.bf16.msra.mxu1 %v16172_v4  ;;  %v16182_v34 = vld [vmem:[#allocation91_spill] sm:$0xff]  ;;  %v16183_v4 = vld [vmem:[#allocation93_spill] sm:$0xff] }
0x11d0   :  { %10665 = vmatprep.subr.bf16.mxu0 %v16173_v1  ;;  %10729 = vmatprep.subr.bf16.mxu1 %v16174_v46  ;;  %v16184_v1 = vld [vmem:[#allocation140_spill] sm:$0xff] }
0x11d1   :  { %v346_v11 = vadd.f32 %v16184_v1, %v16183_v4  ;;  %v16185_v1 = vld [vmem:[#allocation95_spill] sm:$0xff] }
0x11d3   :  { %10667 = vmatpush1.bf16.msra.mxu0 %v16175_v26  ;;  %10731 = vmatpush1.bf16.msra.mxu1 %v16176_v5 }
0x11d4   :  { %10669 = vmatprep.subr.bf16.mxu0 %v16177_v59  ;;  %10733 = vmatprep.subr.bf16.mxu1 %v16178_v27 }
0x11d7   :  { %10671 = vmatpush1.bf16.msra.mxu0 %v16179_v63  ;;  %10735 = vmatpush1.bf16.msra.mxu1 %v16180_v22 }
0x11d8   :  { %10737 = vmatprep.subr.bf16.mxu0 %v16181_v2  ;;  %10801 = vmatprep.subr.bf16.mxu1 %v16182_v34 }
0x122d   :  { %v5974_v46 = vpop.f32.mrb[56].mxu0  ;;  %v6045_v48 = vpop.f32.mrb[34].mxu1 }
0x122e   :  { %v5976_v26 = vpop.f32.mrb[57].mxu0  ;;  %v6047_v13 = vpop.f32.mrb[35].mxu1 }
0x122f   :  { %v5977_v5 = vadd.f32 %v5976_v26, %v346_v11  ;;  %v10946_v59 = vadd.f32 %v6047_v13, %v15718_v18 }
0x1231   :  { %v6939_v60 = vmul.f32 -1.442695, %v10946_v59  ;;  %v6937_v63 = vmul.f32 -1.442695, %v5977_v5 }
0x1233   :  { %11472 = vpow2.f32 %v6939_v60 }
0x1234   :  { %11474 = vpow2.f32 %v6937_v63 }
0x123d   :  { %v11473_v48 = vpop.eup %11472 }
0x123e   :  { %v11475_v4 = vpop.eup %11474  ;;  %v6219_v26 = vadd.f32 1.0, %v11473_v48 }
0x123f   :  { %v6217_v59 = vadd.f32 1.0, %v11475_v4 }
0x126d   :  { %v6116_v27 = vpop.f32.mrb[48].mxu0  ;;  %v6187_v3 = vpop.f32.mrb[64].mxu1 }
0x126e   :  { %v6118_v16 = vpop.f32.mrb[49].mxu0  ;;  %v6189_v22 = vpop.f32.mrb[65].mxu1 }
0x126f   :  { %v10968_v2 = vadd.f32 %v6118_v16, %v15434_v47  ;;  %v10990_v46 = vadd.f32 %v6189_v22, %v16185_v1 }
0x1271   :  { %v6941_v34 = vmul.f32 -1.442695, %v10968_v2  ;;  %v6943_v11 = vmul.f32 -1.442695, %v10990_v46 }
0x1273   :  { %11476 = vpow2.f32 %v6941_v34 }
0x127d   :  { %v11477_v36 = vpop.eup %11476 }
0x127e   :  { %v6221_v13 = vadd.f32 1.0, %v11477_v36 }
0x1280   :  { %11478 = vrcp.f32 %v6221_v13 }
0x1281   :  { %11480 = vpow2.f32 %v6943_v11 }
0x1282   :  { %11482 = vrcp.f32 %v6219_v26 }
0x1283   :  { %11484 = vrcp.f32 %v6217_v59  ;;  %v6628_v59 = vld [vmem:[#allocation7 + $0x30] sm:$0xff] }
0x128a   :  { %v11479_v3 = vpop.eup %11478 }
0x128b   :  { %v11481_v5 = vpop.eup %11480  ;;  %v6241_v16 = vmul.f32 2.0, %v11479_v3  ;;  %v6629_v3 = vld [vmem:[#allocation7 + $0x38] sm:$0xff] }
0x128c   :  { %v11483_v60 = vpop.eup %11482  ;;  %v6223_v2 = vadd.f32 1.0, %v11481_v5  ;;  %v10878_v5 = vpack.c.bf16 %v6629_v3, %v6628_v59 }
0x128d   :  { %v6945_v27 = vadd.f32 -1.0, %v6241_v16  ;;  %v11485_v63 = vpop.eup %11484  ;;  %v6245_v22 = vmul.f32 %v11483_v60, %v14261_v15  ;;  %v6646_v16 = vld [vmem:[#allocation7 + $0xc0] sm:$0xff]  ;;  %v6647_v60 = vld [vmem:[#allocation7 + $0xc8] sm:$0xff] }
0x128e   :  { %11486 = vrcp.f32 %v6223_v2  ;;  %v6631_v2 = vld [vmem:[#allocation7 + $0x48] sm:$0xff] }
0x128f   :  { %v6247_v34 = vmul.f32 %v11485_v63, %v6945_v27  ;;  %v10880_v27 = vpack.c.bf16 %v6647_v60, %v6646_v16  ;;  %v6630_v63 = vld [vmem:[#allocation7 + $0x40] sm:$0xff] }
0x1291   :  { %v6249_v46 = vadd.f32 %v6247_v34, %v6245_v22  ;;  %v10882_v22 = vpack.c.bf16 %v6631_v2, %v6630_v63  ;;  %v6648_v34 = vld [vmem:[#allocation7 + $0xd0] sm:$0xff]  ;;  %v6956_v63 = vld [vmem:[%s14505_s5] ss:$0 sm:$0xff] }
0x1293   :  { %11488 = vtanh.f32 %v6249_v46  ;;  %v14410_v36 = vsel %vm6255_vm11, %v6249_v46, %v14261_v15  ;;  %v6644_v15 = vld [vmem:[#allocation7 + $0xb0] sm:$0xff]  ;;  %v6649_v46 = vld [vmem:[#allocation7 + $0xd8] sm:$0xff] }
0x1298   :  { %v11487_v4 = vpop.eup %11486 }
0x129d   :  { %v11489_v48 = vpop.eup %11488 }
0x129e   :  { %v6253_v11 = vmul.f32 %v11489_v48, %v11487_v4  ;;  %v6632_v4 = vld [vmem:[#allocation7 + $0x50] sm:$0xff]  ;;  %v10884_v48 = vpack.c.bf16 %v6649_v46, %v6648_v34 }
0x12a0   :  { %v14413_v26 = vsel %vm6255_vm11, %v6253_v11, %v14264_v52  ;;  %v6645_v52 = vld [vmem:[#allocation7 + $0xb8] sm:$0xff] }
0x12a1   :  { %6334 = vmatprep.mubr.f32.mxu0 %v14413_v26  ;;  %6405 = vmatprep.mubr.f32.mxu1 %v14413_v26  ;;  %v10876_v13 = vpack.c.bf16 %v6645_v52, %v6644_v15  ;;  %v6633_v11 = vld [vmem:[#allocation7 + $0x58] sm:$0xff] }
0x12a2   :  { %6335 = vmatmul.mubr.f32.vlgmr.msra.gmra.mrb[58].mxu0 %v13972_v50  ;;  %6406 = vmatmul.mubr.f32.vlgmr.msra.gmra.mrb[36].mxu1 %v13972_v50 }
0x12a3   :  { %10739 = vmatpush1.bf16.msra.mxu0 %v14982_v43  ;;  %10803 = vmatpush1.bf16.msra.mxu1 %v14983_v61  ;;  %v16186_v43 = vld [vmem:[#allocation100_spill] sm:$0xff]  ;;  %v16187_v61 = vld [vmem:[#allocation127_spill] sm:$0xff] }
0x12a4   :  { %6476 = vmatprep.mubr.f32.mxu0 %v14413_v26  ;;  %6547 = vmatprep.mubr.f32.mxu1 %v14413_v26 }
0x12a5   :  { %10741 = vmatprep.subr.bf16.mxu0 %v14984_v14  ;;  %10805 = vmatprep.subr.bf16.mxu1 %v14985_v7  ;;  %v16188_v14 = vld [vmem:[#allocation102_spill] sm:$0xff]  ;;  %v16190_v7 = vld [vmem:[#allocation104_spill] sm:$0xff] }
0x12a7   :  { %10743 = vmatpush1.bf16.msra.mxu0 %v14986_v10  ;;  %10807 = vmatpush1.bf16.msra.mxu1 %v15070_v58  ;;  %v16191_v10 = vld [vmem:[#allocation129_spill] sm:$0xff]  ;;  %v16201_v58 = vld [vmem:[#allocation134_spill] sm:$0xff] }
0x12a8   :  { %10745 = vmatprep.subr.bf16.mxu0 %v15071_v49  ;;  %10809 = vmatprep.subr.bf16.mxu1 %v15072_v24  ;;  %v16202_v49 = vld [vmem:[#allocation116_spill] sm:$0xff]  ;;  %v16203_v24 = vld [vmem:[#allocation135_spill] sm:$0xff] }
0x12ab   :  { %10747 = vmatpush1.bf16.msra.mxu0 %v14990_v39  ;;  %10811 = vmatpush1.bf16.msra.mxu1 %v15073_v38  ;;  %v16194_v39 = vld [vmem:[#allocation108_spill] sm:$0xff]  ;;  %v16204_v38 = vld [vmem:[#allocation118_spill] sm:$0xff] }
0x12ac   :  { %10749 = vmatprep.subr.bf16.mxu0 %v14992_v57  ;;  %10813 = vmatprep.subr.bf16.mxu1 %v15074_v12  ;;  %v16196_v57 = vld [vmem:[#allocation110_spill] sm:$0xff]  ;;  %v16205_v12 = vld [vmem:[#allocation136_spill] sm:$0xff] }
0x12af   :  { %10751 = vmatpush1.bf16.msra.mxu0 %v14994_v0  ;;  %10815 = vmatpush1.bf16.msra.mxu1 %v15075_v19  ;;  %v16198_v0 = vld [vmem:[#allocation112_spill] sm:$0xff] }
0x12b0   :  { %10753 = vmatprep.subr.bf16.mxu0 %v14996_v31  ;;  %10817 = vmatprep.subr.bf16.mxu1 %v15076_v44  ;;  %v16200_v31 = vld [vmem:[#allocation114_spill] sm:$0xff]  ;;  %v16206_v19 = vld [vmem:[#allocation120_spill] sm:$0xff]  ;;  %v16207_v44 = vld [vmem:[#allocation137_spill] sm:$0xff] }
0x12b3   :  { %10755 = vmatpush1.bf16.msra.mxu0 %v14998_v23  ;;  %10819 = vmatpush1.bf16.msra.mxu1 %v15077_v25  ;;  %v16192_v23 = vld [vmem:[#allocation106_spill] sm:$0xff] }
0x12b4   :  { %10757 = vmatprep.subr.bf16.mxu0 %v15000_v55  ;;  %10821 = vmatprep.subr.bf16.mxu1 %v15078_v40  ;;  %v16193_v55 = vld [vmem:[#allocation130_spill] sm:$0xff]  ;;  %v6639_v40 = vld [vmem:[#allocation7 + $0x88] sm:$0xff] }
0x12b5   :  { %v6638_v25 = vld [vmem:[#allocation7 + $0x80] sm:$0xff] }
0x12b7   :  { %10759 = vmatpush1.bf16.msra.mxu0 %v15001_v28  ;;  %10823 = vmatpush1.bf16.msra.mxu1 %v15079_v53  ;;  %v16195_v28 = vld [vmem:[#allocation131_spill] sm:$0xff]  ;;  %v10864_v53 = vpack.c.bf16 %v6639_v40, %v6638_v25 }
0x12b8   :  { %10761 = vmatprep.subr.bf16.mxu0 %v15002_v35  ;;  %10825 = vmatprep.subr.bf16.mxu1 %v15080_v32  ;;  %v16197_v35 = vld [vmem:[#allocation132_spill] sm:$0xff]  ;;  %v6622_v32 = vld [vmem:[#allocation7] sm:$0xff] }
0x12bb   :  { %10763 = vmatpush1.bf16.msra.mxu0 %v15003_v29  ;;  %10827 = vmatpush1.bf16.msra.mxu1 %v15081_v9  ;;  %v16199_v29 = vld [vmem:[#allocation133_spill] sm:$0xff]  ;;  %v6623_v9 = vld [vmem:[#allocation7 + $0x8] sm:$0xff] }
0x12bc   :  { %10765 = vmatprep.subr.bf16.mxu0 %v15159_v56  ;;  %10829 = vmatprep.subr.bf16.mxu1 %v15082_v20  ;;  %v10866_v20 = vpack.c.bf16 %v6623_v9, %v6622_v32  ;;  %v6624_v56 = vld [vmem:[#allocation7 + $0x10] sm:$0xff] }
0x12bf   :  { %10767 = vmatpush1.bf16.msra.mxu0 %v15160_v54  ;;  %10831 = vmatpush1.bf16.msra.mxu1 %v15083_v30  ;;  %v6640_v30 = vld [vmem:[#allocation7 + $0x90] sm:$0xff]  ;;  %v6625_v54 = vld [vmem:[#allocation7 + $0x18] sm:$0xff] }
0x12c0   :  { %10769 = vmatprep.subr.bf16.mxu0 %v15161_v33  ;;  %10833 = vmatprep.subr.bf16.mxu1 %v15084_v51  ;;  %v6641_v51 = vld [vmem:[#allocation7 + $0x98] sm:$0xff]  ;;  %v10870_v33 = vpack.c.bf16 %v6625_v54, %v6624_v56 }
0x12c3   :  { %10771 = vmatpush1.bf16.msra.mxu0 %v15007_v21  ;;  %10835 = vmatpush1.bf16.msra.mxu1 %v15085_v45  ;;  %v16189_v21 = vld [vmem:[#allocation128_spill] sm:$0xff]  ;;  %v10868_v45 = vpack.c.bf16 %v6641_v51, %v6640_v30 }
0x12c4   :  { %10773 = vmatprep.subr.bf16.mxu0 %v15531_v8  ;;  %10837 = vmatprep.subr.bf16.mxu1 %v15532_v37  ;;  %v6642_v8 = vld [vmem:[#allocation7 + $0xa0] sm:$0xff]  ;;  %v6643_v37 = vld [vmem:[#allocation7 + $0xa8] sm:$0xff] }
0x12c7   :  { %10775 = vmatpush1.bf16.msra.mxu0 %v15913_v6  ;;  %10839 = vmatpush1.bf16.msra.mxu1 %v15914_v41  ;;  %v10872_v6 = vpack.c.bf16 %v6643_v37, %v6642_v8  ;;  %v6626_v41 = vld [vmem:[#allocation7 + $0x20] sm:$0xff] }
0x12c8   :  { %10777 = vmatprep.subr.bf16.mxu0 %v15915_v42  ;;  %10841 = vmatprep.subr.bf16.mxu1 %v15916_v17  ;;  %v6627_v42 = vld [vmem:[#allocation7 + $0x28] sm:$0xff] }
0x12c9   :  { %v10874_v17 = vpack.c.bf16 %v6627_v42, %v6626_v41 }
0x12cb   :  { %10779 = vmatpush1.bf16.msra.mxu0 %v16186_v43  ;;  %10843 = vmatpush1.bf16.msra.mxu1 %v16187_v61  ;;  %v6650_v43 = vld [vmem:[#allocation7 + $0xe0] sm:$0xff]  ;;  %v6651_v61 = vld [vmem:[#allocation7 + $0xe8] sm:$0xff] }
0x12cc   :  { %10781 = vmatprep.subr.bf16.mxu0 %v16188_v14  ;;  %10845 = vmatprep.subr.bf16.mxu1 %v16189_v21  ;;  %v10886_v14 = vpack.c.bf16 %v6633_v11, %v6632_v4  ;;  %v10888_v21 = vpack.c.bf16 %v6651_v61, %v6650_v43 }
0x12cf   :  { %10783 = vmatpush1.bf16.msra.mxu0 %v16190_v7  ;;  %10847 = vmatpush1.bf16.msra.mxu1 %v16191_v10  ;;  %v6634_v7 = vld [vmem:[#allocation7 + $0x60] sm:$0xff]  ;;  %v6635_v10 = vld [vmem:[#allocation7 + $0x68] sm:$0xff] }
0x12d0   :  { %10785 = vmatprep.subr.bf16.mxu0 %v16192_v23  ;;  %10849 = vmatprep.subr.bf16.mxu1 %v16193_v55  ;;  %v6652_v23 = vld [vmem:[#allocation7 + $0xf0] sm:$0xff]  ;;  %v6653_v55 = vld [vmem:[#allocation7 + $0xf8] sm:$0xff] }
0x12d3   :  { %10787 = vmatpush1.bf16.msra.mxu0 %v16194_v39  ;;  %10851 = vmatpush1.bf16.msra.mxu1 %v16195_v28  ;;  %v10890_v39 = vpack.c.bf16 %v6635_v10, %v6634_v7  ;;  %v10892_v28 = vpack.c.bf16 %v6653_v55, %v6652_v23 }
0x12d4   :  { %10789 = vmatprep.subr.bf16.mxu0 %v16196_v57  ;;  %10853 = vmatprep.subr.bf16.mxu1 %v16197_v35  ;;  %v6636_v57 = vld [vmem:[#allocation7 + $0x70] sm:$0xff]  ;;  %v6637_v35 = vld [vmem:[#allocation7 + $0x78] sm:$0xff] }
0x12d7   :  { %10791 = vmatpush1.bf16.msra.mxu0 %v16198_v0  ;;  %10855 = vmatpush1.bf16.msra.mxu1 %v16199_v29  ;;  %v10894_v0 = vpack.c.bf16 %v6637_v35, %v6636_v57  ;;  %v16208_v29 = vld [vmem:[#allocation93_spill] sm:$0xff] }
0x12d8   :  { %10793 = vmatprep.subr.bf16.mxu0 %v16200_v31  ;;  %10857 = vmatprep.subr.bf16.mxu1 %v16201_v58  ;;  %v16209_v31 = vld [vmem:[#allocation141_spill] sm:$0xff] }
0x12d9   :  { %v352_v58 = vadd.f32 %v16209_v31, %v16208_v29 }
0x12db   :  { %10795 = vmatpush1.bf16.msra.mxu0 %v16202_v49  ;;  %10859 = vmatpush1.bf16.msra.mxu1 %v16203_v24 }
0x12dc   :  { %10797 = vmatprep.subr.bf16.mxu0 %v16204_v38  ;;  %10861 = vmatprep.subr.bf16.mxu1 %v16205_v12 }
0x12df   :  { %10799 = vmatpush1.bf16.msra.mxu0 %v16206_v19  ;;  %10863 = vmatpush1.bf16.msra.mxu1 %v16207_v44 }
0x12e0   :  { %10865 = vmatprep.subr.bf16.mxu0 %v10864_v53 }
0x12e2   :  { %6477 = vmatmul.mubr.f32.vlgmr.msra.gmra.mrb[50].mxu0 %v13972_v50  ;;  %6548 = vmatmul.mubr.f32.vlgmr.msra.gmra.mrb[66].mxu1 %v13972_v50 }
0x12e3   :  { %10867 = vmatpush3.bf16.msra.mxu0 %v10866_v20 }
0x12e4   :  { %10869 = vmatprep.subr.bf16.mxu0 %v10868_v45 }
0x12e7   :  { %10871 = vmatpush3.bf16.msra.mxu0 %v10870_v33 }
0x12e8   :  { %10873 = vmatprep.subr.bf16.mxu0 %v10872_v6 }
0x12eb   :  { %10875 = vmatpush3.bf16.msra.mxu0 %v10874_v17 }
0x12ec   :  { %10877 = vmatprep.subr.bf16.mxu0 %v10876_v13 }
0x12ef   :  { %10879 = vmatpush3.bf16.msra.mxu0 %v10878_v5 }
0x12f0   :  { %10881 = vmatprep.subr.bf16.mxu0 %v10880_v27 }
0x12f3   :  { %10883 = vmatpush3.bf16.msra.mxu0 %v10882_v22 }
0x12f4   :  { %10885 = vmatprep.subr.bf16.mxu0 %v10884_v48 }
0x12f7   :  { %10887 = vmatpush3.bf16.msra.mxu0 %v10886_v14 }
0x12f8   :  { %10889 = vmatprep.subr.bf16.mxu0 %v10888_v21 }
0x12fb   :  { %10891 = vmatpush3.bf16.msra.mxu0 %v10890_v39 }
0x12fc   :  { %10893 = vmatprep.subr.bf16.mxu0 %v10892_v28 }
0x12ff   :  { %10895 = vmatpush3.bf16.msra.mxu0 %v10894_v0 }
0x1375   :  { %v6336_v49 = vpop.f32.mrb[58].mxu0  ;;  %v6407_v24 = vpop.f32.mrb[36].mxu1 }
0x1376   :  { %v6338_v38 = vpop.f32.mrb[59].mxu0  ;;  %v6409_v12 = vpop.f32.mrb[37].mxu1 }
0x1377   :  { %v6339_v19 = vadd.f32 %v6338_v38, %v352_v58  ;;  %v10947_v44 = vadd.f32 %v6409_v12, %v15718_v18 }
0x1379   :  { %v6949_v25 = vmul.f32 -1.442695, %v10947_v44  ;;  %v6947_v51 = vmul.f32 -1.442695, %v6339_v19 }
0x137b   :  { %11490 = vpow2.f32 %v6949_v25 }
0x1385   :  { %v11491_v40 = vpop.eup %11490 }
0x1386   :  { %v6581_v53 = vadd.f32 1.0, %v11491_v40 }
0x1388   :  { %11492 = vrcp.f32 %v6581_v53 }
0x1389   :  { %11494 = vpow2.f32 %v6947_v51 }
0x1392   :  { %v11493_v32 = vpop.eup %11492 }
0x1393   :  { %v6607_v9 = vmul.f32 %v11493_v32, %v14410_v36  ;;  %v11495_v8 = vpop.eup %11494 }
0x1394   :  { %v6579_v42 = vadd.f32 1.0, %v11495_v8 }
0x13b5   :  { %v6478_v20 = vpop.f32.mrb[50].mxu0  ;;  %v6549_v30 = vpop.f32.mrb[66].mxu1 }
0x13b6   :  { %v6480_v45 = vpop.f32.mrb[51].mxu0  ;;  %v6551_v56 = vpop.f32.mrb[67].mxu1 }
0x13b7   :  { %v10969_v54 = vadd.f32 %v6480_v45, %v15434_v47  ;;  %v10991_v18 = vadd.f32 %v6551_v56, %v16185_v1 }
0x13b9   :  { %v6951_v33 = vmul.f32 -1.442695, %v10969_v54  ;;  %v6953_v6 = vmul.f32 -1.442695, %v10991_v18 }
0x13bb   :  { %11496 = vpow2.f32 %v6951_v33 }
0x13c5   :  { %v11497_v37 = vpop.eup %11496 }
0x13c6   :  { %v6583_v41 = vadd.f32 1.0, %v11497_v37 }
0x13c8   :  { %11498 = vrcp.f32 %v6583_v41 }
0x13c9   :  { %11500 = vpow2.f32 %v6953_v6 }
0x13ca   :  { %11502 = vrcp.f32 %v6579_v42 }
0x13d2   :  { %v11499_v36 = vpop.eup %11498 }
0x13d3   :  { %v11501_v17 = vpop.eup %11500  ;;  %v6603_v15 = vmul.f32 2.0, %v11499_v36 }
0x13d4   :  { %v11503_v13 = vpop.eup %11502  ;;  %v6585_v59 = vadd.f32 1.0, %v11501_v17 }
0x13d5   :  { %v6955_v52 = vadd.f32 -1.0, %v6603_v15 }
0x13d6   :  { %11504 = vrcp.f32 %v6585_v59 }
0x13d7   :  { %v6609_v47 = vmul.f32 %v11503_v13, %v6955_v52 }
0x13d9   :  { %v6611_v3 = vadd.f32 %v6609_v47, %v6607_v9 }
0x13db   :  { %11506 = vtanh.f32 %v6611_v3 }
0x13e0   :  { %v11505_v5 = vpop.eup %11504 }
0x13e5   :  { %v11507_v1 = vpop.eup %11506 }
0x13e6   :  { %v6615_v16 = vmul.f32 %v11507_v1, %v11505_v5 }
0x13e8   :  { %v6621_v60 = vsel %vm6617_vm12, %v6615_v16, %v14413_v26 }
0x13e9   :  { %6725 = vmatprep.mubr.f32.mxu0 %v6621_v60 }
0x13ea   :  { %6726 = vmatmul.mubr.f32.vlgmr.msra.gmra.mrb[60].mxu0 %v13972_v50 }
0x14bd   :  { %v6989_v27 = vpop.f32.mrb[60].mxu0 }
0x14be   :  { %v6990_v2 = vpop.f32.mrb[61].mxu0 }
0x14bf   :  { %v6991_v22 = vadd.f32 %v6990_v2, %v6989_v27 }
0x14c1   :  { %v6728_v34 = vadd.f32 %v6991_v22, %v6956_v63 }
0x14c3   :  { %6731 = vst [vmem:[%s14506_s6] sm:$0xff] %v6728_v34 }
0x14c4   :  { %6736 = vsyncpa [#allocation4], 1 }
0x14c5   :  { %6737 = vsyncpa [#allocation6], 1 }

</bundles_post_ra>
